<compile_context>
chip_gen: v7x
topology: tpu7x:2x2x1
jax: 0.10.0
libtpu: 0.0.40
codegen_flags: <defaults>
</compile_context>

<pallas_src>
import functools

import numpy as np
import jax
import jax.numpy as jnp
from jax.experimental import pallas as pl
from jax.experimental.pallas import tpu as pltpu

CLASS_NUM = 11
FEAT_DIM = 2048              # xception final feature width
HEAD_PAD = 128               # 4 * 11 = 44 logits padded to a lane-dense 128
IMG = 32                     # synthetic test input spatial size
S1 = (IMG - 3) // 2 + 1      # 15 : spatial after the 3x3 stride-2 stem conv
S2 = (S1 + 1) // 2           # 8  : spatial after the stride-2 separable block
P1 = S1 * S1                 # 225
P2 = S2 * S2                 # 64
C1 = 32                      # stem conv1 channels
C2 = 128                     # stem conv2 / block channels
FEAT_CHUNK = 512             # feat-matmul column chunk (caps f32 intermediate)

_VMEM_LIMIT = 32 * 1024 * 1024


# --------------------------------------------------------------------------
# Launch 1: fused stem  (conv1 3x3 s2 + ReLU + conv2 3x3 s1 p1 + ReLU)
# --------------------------------------------------------------------------
def _stem_kernel(cols1_ref, mask_ref, w1_ref, b1_ref, w2_ref, b2_ref, o_ref):
    # conv1 as one small matmul on the pre-im2col'd input patches
    h1 = jnp.dot(cols1_ref[0], w1_ref[...], preferred_element_type=jnp.float32)
    h1 = jnp.maximum(h1 + b1_ref[...], 0.0).astype(jnp.bfloat16)      # (225, 32)

    # conv2: 9 shifted K=32 tap matmuls on the flattened (225, 32) conv1
    # output.  A spatial shift (dy-1, dx-1) is a row shift by (dy-1)*15+(dx-1)
    # plus a precomputed border mask (kills row-wrap / out-of-image taps).
    zpad = jnp.zeros((S1 + 1, C1), jnp.bfloat16)
    h1e = jnp.concatenate([zpad, h1, zpad], axis=0)                   # (257, 32)

    acc = jnp.zeros((P1, C2), jnp.float32)
    for t in range(9):
        dy, dx = t // 3, t % 3
        start = (S1 + 1) + (dy - 1) * S1 + (dx - 1)
        tap = h1e[start:start + P1, :] * mask_ref[t]                  # (225, 32)
        acc = acc + jnp.dot(tap, w2_ref[t],
                            preferred_element_type=jnp.float32)
    h2 = jnp.maximum(acc + b2_ref[...], 0.0)
    o_ref[0] = h2.astype(o_ref.dtype)                                 # (225, 128)


def stem(cols1, p):
    B, _, kcols = cols1.shape
    return pl.pallas_call(
        _stem_kernel,
        out_shape=jax.ShapeDtypeStruct((B, P1, C2), jnp.bfloat16),
        grid=(B,),
        in_specs=[
            pl.BlockSpec((1, P1, kcols), lambda b: (b, 0, 0)),
            pl.BlockSpec((9, P1, 1), lambda b: (0, 0, 0)),
            pl.BlockSpec((kcols, C1), lambda b: (0, 0)),
            pl.BlockSpec((1, C1), lambda b: (0, 0)),
            pl.BlockSpec((9, C1, C2), lambda b: (0, 0, 0)),
            pl.BlockSpec((1, C2), lambda b: (0, 0)),
        ],
        out_specs=pl.BlockSpec((1, P1, C2), lambda b: (b, 0, 0)),
        compiler_params=pltpu.CompilerParams(
            dimension_semantics=("parallel",),
            vmem_limit_bytes=_VMEM_LIMIT),
    )(cols1, p["mask2"], p["w1"], p["b1"], p["w2"], p["b2"])


# --------------------------------------------------------------------------
# Launch 2: fused back-half
#   depthwise 3x3 s2 (VPU taps) + residual block (single K=256 matmul)
#   + 1x1 -> 2048 + ReLU + GAP (column-chunked) + 4 fused linear heads
# --------------------------------------------------------------------------
def _block_head_kernel(cols_ref, wdw_ref, bdw_ref, wblk_ref, bblk_ref,
                       wf_ref, bf_ref, wh_ref, bh_ref, o_ref):
    # depthwise: 9 per-channel scaled adds on the VPU (MXU stays free)
    dw = cols_ref[0, 0].astype(jnp.float32) * wdw_ref[0]
    for t in range(1, 9):
        dw = dw + cols_ref[0, t].astype(jnp.float32) * wdw_ref[t]
    dw = jnp.maximum(dw + bdw_ref[...], 0.0)                          # (64, 128)

    # residual block: relu([skip || relu(dw)] @ [Wskip ; Wpw] + (bskip + bpw))
    # -> one K=256 contraction (MXU-depth-friendly on v6e/v7x).
    skip = cols_ref[0, 4]              # centre tap == 1x1 stride-2 skip input
    cat = jnp.concatenate([skip, dw.astype(jnp.bfloat16)], axis=1)    # (64, 256)
    h = jnp.dot(cat, wblk_ref[...], preferred_element_type=jnp.float32)
    h = jnp.maximum(h + bblk_ref[...], 0.0).astype(jnp.bfloat16)      # (64, 128)

    # 1x1 conv -> 2048 + ReLU + global average pool, chunked over output
    # columns so the f32 intermediate never exceeds (64, FEAT_CHUNK).
    pooled = []
    for c in range(0, FEAT_DIM, FEAT_CHUNK):
        part = jnp.dot(h, wf_ref[:, c:c + FEAT_CHUNK],
                       preferred_element_type=jnp.float32)
        part = jnp.maximum(part + bf_ref[:, c:c + FEAT_CHUNK], 0.0)
        pooled.append(jnp.sum(part, axis=0, keepdims=True))           # (1, chunk)
    feat = (jnp.concatenate(pooled, axis=1) * (1.0 / P2)).astype(jnp.bfloat16)

    # four fused Linear(2048, 11) heads (padded to 128 lanes, f32 logits)
    logits = jnp.dot(feat, wh_ref[...],
                     preferred_element_type=jnp.float32) + bh_ref[...]
    o_ref[0] = logits                                                 # (1, 128)


def block_head(dwcols, p):
    B = dwcols.shape[0]
    return pl.pallas_call(
        _block_head_kernel,
        out_shape=jax.ShapeDtypeStruct((B, 1, HEAD_PAD), jnp.float32),
        grid=(B,),
        in_specs=[
            pl.BlockSpec((1, 9, P2, C2), lambda b: (b, 0, 0, 0)),
            pl.BlockSpec((9, 1, C2), lambda b: (0, 0, 0)),
            pl.BlockSpec((1, C2), lambda b: (0, 0)),
            pl.BlockSpec((2 * C2, C2), lambda b: (0, 0)),
            pl.BlockSpec((1, C2), lambda b: (0, 0)),
            pl.BlockSpec((C2, FEAT_DIM), lambda b: (0, 0)),
            pl.BlockSpec((1, FEAT_DIM), lambda b: (0, 0)),
            pl.BlockSpec((FEAT_DIM, HEAD_PAD), lambda b: (0, 0)),
            pl.BlockSpec((1, HEAD_PAD), lambda b: (0, 0)),
        ],
        out_specs=pl.BlockSpec((1, 1, HEAD_PAD), lambda b: (b, 0, 0)),
        compiler_params=pltpu.CompilerParams(
            dimension_semantics=("parallel",),
            vmem_limit_bytes=_VMEM_LIMIT),
    )(dwcols, p["wdw"], p["bdw"], p["wblk"], p["bblk"],
      p["wf"], p["bf"], p["wh"], p["bh"])


# --------------------------------------------------------------------------
# Deterministic parameter construction — all layout work done once at init
# --------------------------------------------------------------------------
def init_params(key):
    ks = jax.random.split(key, 14)

    def nrm(i, shape):
        return 0.05 * jax.random.normal(ks[i], shape, jnp.float32)

    p = {}
    # stem conv1: 3x3 stride 2, 3 -> 32 ; rows ordered (tap, cin) to match the
    # wrapper's im2col column order.
    p["w1"] = nrm(0, (9 * 3, C1)).astype(jnp.bfloat16)
    p["b1"] = nrm(1, (1, C1))
    # stem conv2: 3x3 stride 1 pad 1, 32 -> 128 ; one (32, 128) matrix per tap.
    p["w2"] = nrm(2, (9, C1, C2)).astype(jnp.bfloat16)
    p["b2"] = nrm(3, (1, C2))
    # conv2 border mask: mask[t, oh*15+ow] = 1 iff tap t of output (oh,ow) is
    # inside the image (compile-time constant, streamed as a tiny input).
    mask = np.zeros((9, P1, 1), np.float32)
    for t in range(9):
        dy, dx = t // 3, t % 3
        for oh in range(S1):
            for ow in range(S1):
                if 0 <= oh + dy - 1 < S1 and 0 <= ow + dx - 1 < S1:
                    mask[t, oh * S1 + ow, 0] = 1.0
    p["mask2"] = jnp.asarray(mask, jnp.bfloat16)

    # separable block: depthwise 3x3 stride-2 per-tap per-channel scales ...
    p["wdw"] = nrm(4, (9, 1, C2))
    p["bdw"] = nrm(5, (1, C2))
    # ... and the fused residual-block matmul: [Wskip ; Wpw] concatenated along
    # K (single 256-deep contraction), biases pre-summed.
    wskip = nrm(6, (C2, C2))
    wpw = nrm(7, (C2, C2))
    p["wblk"] = jnp.concatenate([wskip, wpw], axis=0).astype(jnp.bfloat16)
    p["bblk"] = nrm(8, (1, C2)) + nrm(9, (1, C2))

    # final 1x1 conv -> 2048 features
    p["wf"] = nrm(10, (C2, FEAT_DIM)).astype(jnp.bfloat16)
    p["bf"] = nrm(11, (1, FEAT_DIM))

    # four nn.Linear(2048, 11) heads fused and padded 44 -> 128 lanes
    wh = nrm(12, (FEAT_DIM, 4 * CLASS_NUM))
    bh = nrm(13, (1, 4 * CLASS_NUM))
    npad = HEAD_PAD - 4 * CLASS_NUM
    p["wh"] = jnp.pad(wh, ((0, 0), (0, npad))).astype(jnp.bfloat16)
    p["bh"] = jnp.pad(bh, ((0, 0), (0, npad)))
    return p


# --------------------------------------------------------------------------
# Forward pass (mirrors DigitsXception.forward) — 2 pallas_call launches
# --------------------------------------------------------------------------
def forward(params, img_nchw):
    B = img_nchw.shape[0]
    # NCHW (PyTorch) -> NHWC bf16 + conv1 im2col: boundary prep only, fused by
    # XLA ahead of the first launch (no inter-launch glue here).
    x = jnp.transpose(img_nchw, (0, 2, 3, 1)).astype(jnp.bfloat16)   # (B,32,32,3)
    p1 = [x[:, dy:dy + 2 * S1 - 1:2, dx:dx + 2 * S1 - 1:2, :]
          for dy in range(3) for dx in range(3)]
    cols1 = jnp.concatenate(p1, axis=-1).reshape(B, P1, 9 * 3)       # (B,225,27)

    y = stem(cols1, params)                                          # launch 1

    # The only inter-launch glue: gather the 9 stride-2 depthwise taps.
    # Tap 4 (centre) doubles as the 1x1 stride-2 skip input, so no separate
    # strided skip slice is materialised.
    xs = y.reshape(B, S1, S1, C2)
    xp = jnp.pad(xs, ((0, 0), (1, 1), (1, 1), (0, 0)))               # (B,17,17,128)
    taps = [xp[:, dy:dy + 2 * S2:2, dx:dx + 2 * S2:2, :]
            for dy in range(3) for dx in range(3)]
    dwcols = jnp.stack(taps, axis=1).reshape(B, 9, P2, C2)           # (B,9,64,128)

    logits = block_head(dwcols, params)                              # launch 2
    logits = logits.reshape(B, HEAD_PAD)[:, :4 * CLASS_NUM]          # drop pad
    c1, c2, c3, c4 = jnp.split(logits, 4, axis=1)
    return c1, c2, c3, c4


# --------------------------------------------------------------------------
if __name__ == "__main__":
    key = jax.random.PRNGKey(0)
    pkey, xkey = jax.random.split(key)
    params = init_params(pkey)

    # small-but-consistent input: batch=2, RGB image 32x32 (NCHW like PyTorch)
    img = jax.random.normal(xkey, (2, 3, IMG, IMG), dtype=jnp.float32)

    fwd = jax.jit(functools.partial(forward, params))
    c1, c2, c3, c4 = fwd(img)
    jax.block_until_ready((c1, c2, c3, c4))

    for c in (c1, c2, c3, c4):
        assert c.shape == (2, CLASS_NUM), c.shape
        assert bool(jnp.all(jnp.isfinite(c)))
    print("KERNEL_OK")
</pallas_src>

<mosaic_0001>
module attributes {stable_mosaic.version = 11 : i64} {
  func.func @_stem_kernel(%arg0: i32, %arg1: memref<1x225x27xbf16, #tpu.memory_space<vmem>>, %arg2: memref<9x225x1xbf16, #tpu.memory_space<vmem>>, %arg3: memref<27x32xbf16, #tpu.memory_space<vmem>>, %arg4: memref<1x32xf32, #tpu.memory_space<vmem>>, %arg5: memref<9x32x128xbf16, #tpu.memory_space<vmem>>, %arg6: memref<1x128xf32, #tpu.memory_space<vmem>>, %arg7: memref<1x225x128xbf16, #tpu.memory_space<vmem>>) attributes {dimension_semantics = [#tpu.dimension_semantics<parallel>], iteration_bounds = array<i64: 2>, scalar_prefetch = 0 : i64, scratch_operands = 0 : i64, tpu.core_type = #tpu.core_type<tc>, window_params = [{transform_indices = @transform_0, window_bounds = array<i64: 1, 225, 27>}, {pipeline_mode = #tpu.pipeline_mode<synchronous>, transform_indices = @transform_1, window_bounds = array<i64: 9, 225, 1>}, {pipeline_mode = #tpu.pipeline_mode<synchronous>, transform_indices = @transform_2, window_bounds = array<i64: 27, 32>}, {pipeline_mode = #tpu.pipeline_mode<synchronous>, transform_indices = @transform_3, window_bounds = array<i64: 1, 32>}, {pipeline_mode = #tpu.pipeline_mode<synchronous>, transform_indices = @transform_4, window_bounds = array<i64: 9, 32, 128>}, {pipeline_mode = #tpu.pipeline_mode<synchronous>, transform_indices = @transform_5, window_bounds = array<i64: 1, 128>}, {transform_indices = @transform_6, window_bounds = array<i64: 1, 225, 128>}]} {
    %c0 = arith.constant 0 : index
    %c0_0 = arith.constant 0 : index
    %c0_1 = arith.constant 0 : index
    %0 = vector.load %arg1[%c0, %c0_0, %c0_1] : memref<1x225x27xbf16, #tpu.memory_space<vmem>>, vector<1x225x27xbf16>
    %1 = vector.shape_cast %0 : vector<1x225x27xbf16> to vector<225x27xbf16>
    %c0_2 = arith.constant 0 : index
    %c0_3 = arith.constant 0 : index
    %2 = vector.load %arg3[%c0_2, %c0_3] : memref<27x32xbf16, #tpu.memory_space<vmem>>, vector<27x32xbf16>
    %cst = arith.constant dense<0.000000e+00> : vector<225x32xf32>
    %3 = tpu.matmul %1, %2, %cst {dimension_numbers = #tpu.dot_dimension_numbers<[1], [0], [0], [1], [0, 0, 1, 1], [], []>} : vector<225x27xbf16>, vector<27x32xbf16>, vector<225x32xf32> -> vector<225x32xf32>
    %c0_4 = arith.constant 0 : index
    %c0_5 = arith.constant 0 : index
    %4 = vector.load %arg4[%c0_4, %c0_5] : memref<1x32xf32, #tpu.memory_space<vmem>>, vector<1x32xf32>
    %5 = vector.broadcast %4 : vector<1x32xf32> to vector<225x32xf32>
    %6 = arith.addf %3, %5 : vector<225x32xf32>
    %cst_6 = arith.constant 0.000000e+00 : f32
    %7 = vector.broadcast %cst_6 : f32 to vector<225x32xf32>
    %8 = arith.maximumf %6, %7 : vector<225x32xf32>
    %9 = arith.truncf %8 : vector<225x32xf32> to vector<225x32xbf16>
    %cst_7 = arith.constant 0.000000e+00 : bf16
    %10 = vector.broadcast %cst_7 : bf16 to vector<16x32xbf16>
    %11 = tpu.concatenate %10, %9, %10 in 0 : vector<16x32xbf16>, vector<225x32xbf16>, vector<16x32xbf16> -> vector<257x32xbf16>
    %cst_8 = arith.constant 0.000000e+00 : f32
    %12 = vector.broadcast %cst_8 : f32 to vector<225x128xf32>
    %13 = vector.extract_strided_slice %11 {offsets = [0, 0], sizes = [225, 32], strides = [1, 1]} : vector<257x32xbf16> to vector<225x32xbf16>
    %c0_9 = arith.constant 0 : index
    %c0_10 = arith.constant 0 : index
    %c0_11 = arith.constant 0 : index
    %14 = vector.load %arg2[%c0_9, %c0_10, %c0_11] : memref<9x225x1xbf16, #tpu.memory_space<vmem>>, vector<1x225x1xbf16>
    %15 = vector.shape_cast %14 : vector<1x225x1xbf16> to vector<225x1xbf16>
    %16 = vector.broadcast %15 : vector<225x1xbf16> to vector<225x32xbf16>
    %17 = arith.mulf %13, %16 : vector<225x32xbf16>
    %c0_12 = arith.constant 0 : index
    %c0_13 = arith.constant 0 : index
    %c0_14 = arith.constant 0 : index
    %18 = vector.load %arg5[%c0_12, %c0_13, %c0_14] : memref<9x32x128xbf16, #tpu.memory_space<vmem>>, vector<1x32x128xbf16>
    %19 = vector.shape_cast %18 : vector<1x32x128xbf16> to vector<32x128xbf16>
    %cst_15 = arith.constant dense<0.000000e+00> : vector<225x128xf32>
    %20 = tpu.matmul %17, %19, %cst_15 {dimension_numbers = #tpu.dot_dimension_numbers<[1], [0], [0], [1], [0, 0, 1, 1], [], []>} : vector<225x32xbf16>, vector<32x128xbf16>, vector<225x128xf32> -> vector<225x128xf32>
    %21 = arith.addf %12, %20 : vector<225x128xf32>
    %22 = vector.extract_strided_slice %11 {offsets = [1, 0], sizes = [225, 32], strides = [1, 1]} : vector<257x32xbf16> to vector<225x32xbf16>
    %c1 = arith.constant 1 : index
    %c0_16 = arith.constant 0 : index
    %c0_17 = arith.constant 0 : index
    %23 = vector.load %arg2[%c1, %c0_16, %c0_17] : memref<9x225x1xbf16, #tpu.memory_space<vmem>>, vector<1x225x1xbf16>
    %24 = vector.shape_cast %23 : vector<1x225x1xbf16> to vector<225x1xbf16>
    %25 = vector.broadcast %24 : vector<225x1xbf16> to vector<225x32xbf16>
    %26 = arith.mulf %22, %25 : vector<225x32xbf16>
    %c1_18 = arith.constant 1 : index
    %c0_19 = arith.constant 0 : index
    %c0_20 = arith.constant 0 : index
    %27 = vector.load %arg5[%c1_18, %c0_19, %c0_20] : memref<9x32x128xbf16, #tpu.memory_space<vmem>>, vector<1x32x128xbf16>
    %28 = vector.shape_cast %27 : vector<1x32x128xbf16> to vector<32x128xbf16>
    %cst_21 = arith.constant dense<0.000000e+00> : vector<225x128xf32>
    %29 = tpu.matmul %26, %28, %cst_21 {dimension_numbers = #tpu.dot_dimension_numbers<[1], [0], [0], [1], [0, 0, 1, 1], [], []>} : vector<225x32xbf16>, vector<32x128xbf16>, vector<225x128xf32> -> vector<225x128xf32>
    %30 = arith.addf %21, %29 : vector<225x128xf32>
    %31 = vector.extract_strided_slice %11 {offsets = [2, 0], sizes = [225, 32], strides = [1, 1]} : vector<257x32xbf16> to vector<225x32xbf16>
    %c2 = arith.constant 2 : index
    %c0_22 = arith.constant 0 : index
    %c0_23 = arith.constant 0 : index
    %32 = vector.load %arg2[%c2, %c0_22, %c0_23] : memref<9x225x1xbf16, #tpu.memory_space<vmem>>, vector<1x225x1xbf16>
    %33 = vector.shape_cast %32 : vector<1x225x1xbf16> to vector<225x1xbf16>
    %34 = vector.broadcast %33 : vector<225x1xbf16> to vector<225x32xbf16>
    %35 = arith.mulf %31, %34 : vector<225x32xbf16>
    %c2_24 = arith.constant 2 : index
    %c0_25 = arith.constant 0 : index
    %c0_26 = arith.constant 0 : index
    %36 = vector.load %arg5[%c2_24, %c0_25, %c0_26] : memref<9x32x128xbf16, #tpu.memory_space<vmem>>, vector<1x32x128xbf16>
    %37 = vector.shape_cast %36 : vector<1x32x128xbf16> to vector<32x128xbf16>
    %cst_27 = arith.constant dense<0.000000e+00> : vector<225x128xf32>
    %38 = tpu.matmul %35, %37, %cst_27 {dimension_numbers = #tpu.dot_dimension_numbers<[1], [0], [0], [1], [0, 0, 1, 1], [], []>} : vector<225x32xbf16>, vector<32x128xbf16>, vector<225x128xf32> -> vector<225x128xf32>
    %39 = arith.addf %30, %38 : vector<225x128xf32>
    %40 = vector.extract_strided_slice %11 {offsets = [15, 0], sizes = [225, 32], strides = [1, 1]} : vector<257x32xbf16> to vector<225x32xbf16>
    %c3 = arith.constant 3 : index
    %c0_28 = arith.constant 0 : index
    %c0_29 = arith.constant 0 : index
    %41 = vector.load %arg2[%c3, %c0_28, %c0_29] : memref<9x225x1xbf16, #tpu.memory_space<vmem>>, vector<1x225x1xbf16>
    %42 = vector.shape_cast %41 : vector<1x225x1xbf16> to vector<225x1xbf16>
    %43 = vector.broadcast %42 : vector<225x1xbf16> to vector<225x32xbf16>
    %44 = arith.mulf %40, %43 : vector<225x32xbf16>
    %c3_30 = arith.constant 3 : index
    %c0_31 = arith.constant 0 : index
    %c0_32 = arith.constant 0 : index
    %45 = vector.load %arg5[%c3_30, %c0_31, %c0_32] : memref<9x32x128xbf16, #tpu.memory_space<vmem>>, vector<1x32x128xbf16>
    %46 = vector.shape_cast %45 : vector<1x32x128xbf16> to vector<32x128xbf16>
    %cst_33 = arith.constant dense<0.000000e+00> : vector<225x128xf32>
    %47 = tpu.matmul %44, %46, %cst_33 {dimension_numbers = #tpu.dot_dimension_numbers<[1], [0], [0], [1], [0, 0, 1, 1], [], []>} : vector<225x32xbf16>, vector<32x128xbf16>, vector<225x128xf32> -> vector<225x128xf32>
    %48 = arith.addf %39, %47 : vector<225x128xf32>
    %49 = vector.extract_strided_slice %11 {offsets = [16, 0], sizes = [225, 32], strides = [1, 1]} : vector<257x32xbf16> to vector<225x32xbf16>
    %c4 = arith.constant 4 : index
    %c0_34 = arith.constant 0 : index
    %c0_35 = arith.constant 0 : index
    %50 = vector.load %arg2[%c4, %c0_34, %c0_35] : memref<9x225x1xbf16, #tpu.memory_space<vmem>>, vector<1x225x1xbf16>
    %51 = vector.shape_cast %50 : vector<1x225x1xbf16> to vector<225x1xbf16>
    %52 = vector.broadcast %51 : vector<225x1xbf16> to vector<225x32xbf16>
    %53 = arith.mulf %49, %52 : vector<225x32xbf16>
    %c4_36 = arith.constant 4 : index
    %c0_37 = arith.constant 0 : index
    %c0_38 = arith.constant 0 : index
    %54 = vector.load %arg5[%c4_36, %c0_37, %c0_38] : memref<9x32x128xbf16, #tpu.memory_space<vmem>>, vector<1x32x128xbf16>
    %55 = vector.shape_cast %54 : vector<1x32x128xbf16> to vector<32x128xbf16>
    %cst_39 = arith.constant dense<0.000000e+00> : vector<225x128xf32>
    %56 = tpu.matmul %53, %55, %cst_39 {dimension_numbers = #tpu.dot_dimension_numbers<[1], [0], [0], [1], [0, 0, 1, 1], [], []>} : vector<225x32xbf16>, vector<32x128xbf16>, vector<225x128xf32> -> vector<225x128xf32>
    %57 = arith.addf %48, %56 : vector<225x128xf32>
    %58 = vector.extract_strided_slice %11 {offsets = [17, 0], sizes = [225, 32], strides = [1, 1]} : vector<257x32xbf16> to vector<225x32xbf16>
    %c5 = arith.constant 5 : index
    %c0_40 = arith.constant 0 : index
    %c0_41 = arith.constant 0 : index
    %59 = vector.load %arg2[%c5, %c0_40, %c0_41] : memref<9x225x1xbf16, #tpu.memory_space<vmem>>, vector<1x225x1xbf16>
    %60 = vector.shape_cast %59 : vector<1x225x1xbf16> to vector<225x1xbf16>
    %61 = vector.broadcast %60 : vector<225x1xbf16> to vector<225x32xbf16>
    %62 = arith.mulf %58, %61 : vector<225x32xbf16>
    %c5_42 = arith.constant 5 : index
    %c0_43 = arith.constant 0 : index
    %c0_44 = arith.constant 0 : index
    %63 = vector.load %arg5[%c5_42, %c0_43, %c0_44] : memref<9x32x128xbf16, #tpu.memory_space<vmem>>, vector<1x32x128xbf16>
    %64 = vector.shape_cast %63 : vector<1x32x128xbf16> to vector<32x128xbf16>
    %cst_45 = arith.constant dense<0.000000e+00> : vector<225x128xf32>
    %65 = tpu.matmul %62, %64, %cst_45 {dimension_numbers = #tpu.dot_dimension_numbers<[1], [0], [0], [1], [0, 0, 1, 1], [], []>} : vector<225x32xbf16>, vector<32x128xbf16>, vector<225x128xf32> -> vector<225x128xf32>
    %66 = arith.addf %57, %65 : vector<225x128xf32>
    %67 = vector.extract_strided_slice %11 {offsets = [30, 0], sizes = [225, 32], strides = [1, 1]} : vector<257x32xbf16> to vector<225x32xbf16>
    %c6 = arith.constant 6 : index
    %c0_46 = arith.constant 0 : index
    %c0_47 = arith.constant 0 : index
    %68 = vector.load %arg2[%c6, %c0_46, %c0_47] : memref<9x225x1xbf16, #tpu.memory_space<vmem>>, vector<1x225x1xbf16>
    %69 = vector.shape_cast %68 : vector<1x225x1xbf16> to vector<225x1xbf16>
    %70 = vector.broadcast %69 : vector<225x1xbf16> to vector<225x32xbf16>
    %71 = arith.mulf %67, %70 : vector<225x32xbf16>
    %c6_48 = arith.constant 6 : index
    %c0_49 = arith.constant 0 : index
    %c0_50 = arith.constant 0 : index
    %72 = vector.load %arg5[%c6_48, %c0_49, %c0_50] : memref<9x32x128xbf16, #tpu.memory_space<vmem>>, vector<1x32x128xbf16>
    %73 = vector.shape_cast %72 : vector<1x32x128xbf16> to vector<32x128xbf16>
    %cst_51 = arith.constant dense<0.000000e+00> : vector<225x128xf32>
    %74 = tpu.matmul %71, %73, %cst_51 {dimension_numbers = #tpu.dot_dimension_numbers<[1], [0], [0], [1], [0, 0, 1, 1], [], []>} : vector<225x32xbf16>, vector<32x128xbf16>, vector<225x128xf32> -> vector<225x128xf32>
    %75 = arith.addf %66, %74 : vector<225x128xf32>
    %76 = vector.extract_strided_slice %11 {offsets = [31, 0], sizes = [225, 32], strides = [1, 1]} : vector<257x32xbf16> to vector<225x32xbf16>
    %c7 = arith.constant 7 : index
    %c0_52 = arith.constant 0 : index
    %c0_53 = arith.constant 0 : index
    %77 = vector.load %arg2[%c7, %c0_52, %c0_53] : memref<9x225x1xbf16, #tpu.memory_space<vmem>>, vector<1x225x1xbf16>
    %78 = vector.shape_cast %77 : vector<1x225x1xbf16> to vector<225x1xbf16>
    %79 = vector.broadcast %78 : vector<225x1xbf16> to vector<225x32xbf16>
    %80 = arith.mulf %76, %79 : vector<225x32xbf16>
    %c7_54 = arith.constant 7 : index
    %c0_55 = arith.constant 0 : index
    %c0_56 = arith.constant 0 : index
    %81 = vector.load %arg5[%c7_54, %c0_55, %c0_56] : memref<9x32x128xbf16, #tpu.memory_space<vmem>>, vector<1x32x128xbf16>
    %82 = vector.shape_cast %81 : vector<1x32x128xbf16> to vector<32x128xbf16>
    %cst_57 = arith.constant dense<0.000000e+00> : vector<225x128xf32>
    %83 = tpu.matmul %80, %82, %cst_57 {dimension_numbers = #tpu.dot_dimension_numbers<[1], [0], [0], [1], [0, 0, 1, 1], [], []>} : vector<225x32xbf16>, vector<32x128xbf16>, vector<225x128xf32> -> vector<225x128xf32>
    %84 = arith.addf %75, %83 : vector<225x128xf32>
    %85 = vector.extract_strided_slice %11 {offsets = [32, 0], sizes = [225, 32], strides = [1, 1]} : vector<257x32xbf16> to vector<225x32xbf16>
    %c8 = arith.constant 8 : index
    %c0_58 = arith.constant 0 : index
    %c0_59 = arith.constant 0 : index
    %86 = vector.load %arg2[%c8, %c0_58, %c0_59] : memref<9x225x1xbf16, #tpu.memory_space<vmem>>, vector<1x225x1xbf16>
    %87 = vector.shape_cast %86 : vector<1x225x1xbf16> to vector<225x1xbf16>
    %88 = vector.broadcast %87 : vector<225x1xbf16> to vector<225x32xbf16>
    %89 = arith.mulf %85, %88 : vector<225x32xbf16>
    %c8_60 = arith.constant 8 : index
    %c0_61 = arith.constant 0 : index
    %c0_62 = arith.constant 0 : index
    %90 = vector.load %arg5[%c8_60, %c0_61, %c0_62] : memref<9x32x128xbf16, #tpu.memory_space<vmem>>, vector<1x32x128xbf16>
    %91 = vector.shape_cast %90 : vector<1x32x128xbf16> to vector<32x128xbf16>
    %cst_63 = arith.constant dense<0.000000e+00> : vector<225x128xf32>
    %92 = tpu.matmul %89, %91, %cst_63 {dimension_numbers = #tpu.dot_dimension_numbers<[1], [0], [0], [1], [0, 0, 1, 1], [], []>} : vector<225x32xbf16>, vector<32x128xbf16>, vector<225x128xf32> -> vector<225x128xf32>
    %93 = arith.addf %84, %92 : vector<225x128xf32>
    %c0_64 = arith.constant 0 : index
    %c0_65 = arith.constant 0 : index
    %94 = vector.load %arg6[%c0_64, %c0_65] : memref<1x128xf32, #tpu.memory_space<vmem>>, vector<1x128xf32>
    %95 = vector.broadcast %94 : vector<1x128xf32> to vector<225x128xf32>
    %96 = arith.addf %93, %95 : vector<225x128xf32>
    %cst_66 = arith.constant 0.000000e+00 : f32
    %97 = vector.broadcast %cst_66 : f32 to vector<225x128xf32>
    %98 = arith.maximumf %96, %97 : vector<225x128xf32>
    %99 = arith.truncf %98 : vector<225x128xf32> to vector<225x128xbf16>
    %c0_67 = arith.constant 0 : index
    %c0_68 = arith.constant 0 : index
    %c0_69 = arith.constant 0 : index
    %100 = vector.load %arg7[%c0_67, %c0_68, %c0_69] : memref<1x225x128xbf16, #tpu.memory_space<vmem>>, vector<1x225x128xbf16>
    %101 = vector.shape_cast %100 : vector<1x225x128xbf16> to vector<225x128xbf16>
    %102 = vector.shape_cast %99 : vector<225x128xbf16> to vector<1x225x128xbf16>
    tpu.vector_store %arg7[%c0_67, %c0_68, %c0_69], %102 {strides = array<i32>} : memref<1x225x128xbf16, #tpu.memory_space<vmem>>, vector<1x225x128xbf16>,
    return
  }
  func.func @transform_0(%arg0: i32) -> (i32, i32, i32) {
    %c0_i32 = arith.constant 0 : i32
    %c0_i32_0 = arith.constant 0 : i32
    %c0_i32_1 = arith.constant 0 : i32
    return %arg0, %c0_i32, %c0_i32_0 : i32, i32, i32
  }
  func.func @transform_1(%arg0: i32) -> (i32, i32, i32) {
    %c0_i32 = arith.constant 0 : i32
    %c0_i32_0 = arith.constant 0 : i32
    %c0_i32_1 = arith.constant 0 : i32
    %c0_i32_2 = arith.constant 0 : i32
    return %c0_i32, %c0_i32_0, %c0_i32_1 : i32, i32, i32
  }
  func.func @transform_2(%arg0: i32) -> (i32, i32) {
    %c0_i32 = arith.constant 0 : i32
    %c0_i32_0 = arith.constant 0 : i32
    %c0_i32_1 = arith.constant 0 : i32
    return %c0_i32, %c0_i32_0 : i32, i32
  }
  func.func @transform_3(%arg0: i32) -> (i32, i32) {
    %c0_i32 = arith.constant 0 : i32
    %c0_i32_0 = arith.constant 0 : i32
    %c0_i32_1 = arith.constant 0 : i32
    return %c0_i32, %c0_i32_0 : i32, i32
  }
  func.func @transform_4(%arg0: i32) -> (i32, i32, i32) {
    %c0_i32 = arith.constant 0 : i32
    %c0_i32_0 = arith.constant 0 : i32
    %c0_i32_1 = arith.constant 0 : i32
    %c0_i32_2 = arith.constant 0 : i32
    return %c0_i32, %c0_i32_0, %c0_i32_1 : i32, i32, i32
  }
  func.func @transform_5(%arg0: i32) -> (i32, i32) {
    %c0_i32 = arith.constant 0 : i32
    %c0_i32_0 = arith.constant 0 : i32
    %c0_i32_1 = arith.constant 0 : i32
    return %c0_i32, %c0_i32_0 : i32, i32
  }
  func.func @transform_6(%arg0: i32) -> (i32, i32, i32) {
    %c0_i32 = arith.constant 0 : i32
    %c0_i32_0 = arith.constant 0 : i32
    %c0_i32_1 = arith.constant 0 : i32
    return %arg0, %c0_i32, %c0_i32_0 : i32, i32, i32
  }
}

module attributes {stable_mosaic.version = 11 : i64} {
  func.func @_block_head_kernel(%arg0: i32, %arg1: memref<1x9x64x128xbf16, #tpu.memory_space<vmem>>, %arg2: memref<9x1x128xf32, #tpu.memory_space<vmem>>, %arg3: memref<1x128xf32, #tpu.memory_space<vmem>>, %arg4: memref<256x128xbf16, #tpu.memory_space<vmem>>, %arg5: memref<1x128xf32, #tpu.memory_space<vmem>>, %arg6: memref<128x2048xbf16, #tpu.memory_space<vmem>>, %arg7: memref<1x2048xf32, #tpu.memory_space<vmem>>, %arg8: memref<2048x128xbf16, #tpu.memory_space<vmem>>, %arg9: memref<1x128xf32, #tpu.memory_space<vmem>>, %arg10: memref<1x1x128xf32, #tpu.memory_space<vmem>>) attributes {dimension_semantics = [#tpu.dimension_semantics<parallel>], iteration_bounds = array<i64: 2>, scalar_prefetch = 0 : i64, scratch_operands = 0 : i64, tpu.core_type = #tpu.core_type<tc>, window_params = [{transform_indices = @transform_0, window_bounds = array<i64: 1, 9, 64, 128>}, {pipeline_mode = #tpu.pipeline_mode<synchronous>, transform_indices = @transform_1, window_bounds = array<i64: 9, 1, 128>}, {pipeline_mode = #tpu.pipeline_mode<synchronous>, transform_indices = @transform_2, window_bounds = array<i64: 1, 128>}, {pipeline_mode = #tpu.pipeline_mode<synchronous>, transform_indices = @transform_3, window_bounds = array<i64: 256, 128>}, {pipeline_mode = #tpu.pipeline_mode<synchronous>, transform_indices = @transform_4, window_bounds = array<i64: 1, 128>}, {pipeline_mode = #tpu.pipeline_mode<synchronous>, transform_indices = @transform_5, window_bounds = array<i64: 128, 2048>}, {pipeline_mode = #tpu.pipeline_mode<synchronous>, transform_indices = @transform_6, window_bounds = array<i64: 1, 2048>}, {pipeline_mode = #tpu.pipeline_mode<synchronous>, transform_indices = @transform_7, window_bounds = array<i64: 2048, 128>}, {pipeline_mode = #tpu.pipeline_mode<synchronous>, transform_indices = @transform_8, window_bounds = array<i64: 1, 128>}, {transform_indices = @transform_9, window_bounds = array<i64: 1, 1, 128>}]} {
    %c0 = arith.constant 0 : index
    %c0_0 = arith.constant 0 : index
    %c0_1 = arith.constant 0 : index
    %c0_2 = arith.constant 0 : index
    %0 = vector.load %arg1[%c0, %c0_0, %c0_1, %c0_2] : memref<1x9x64x128xbf16, #tpu.memory_space<vmem>>, vector<1x1x64x128xbf16>
    %1 = vector.shape_cast %0 : vector<1x1x64x128xbf16> to vector<64x128xbf16>
    %2 = arith.extf %1 : vector<64x128xbf16> to vector<64x128xf32>
    %c0_3 = arith.constant 0 : index
    %c0_4 = arith.constant 0 : index
    %c0_5 = arith.constant 0 : index
    %3 = vector.load %arg2[%c0_3, %c0_4, %c0_5] : memref<9x1x128xf32, #tpu.memory_space<vmem>>, vector<1x1x128xf32>
    %4 = vector.shape_cast %3 : vector<1x1x128xf32> to vector<1x128xf32>
    %5 = vector.broadcast %4 : vector<1x128xf32> to vector<64x128xf32>
    %6 = arith.mulf %2, %5 : vector<64x128xf32>
    %c0_6 = arith.constant 0 : index
    %c1 = arith.constant 1 : index
    %c0_7 = arith.constant 0 : index
    %c0_8 = arith.constant 0 : index
    %7 = vector.load %arg1[%c0_6, %c1, %c0_7, %c0_8] : memref<1x9x64x128xbf16, #tpu.memory_space<vmem>>, vector<1x1x64x128xbf16>
    %8 = vector.shape_cast %7 : vector<1x1x64x128xbf16> to vector<64x128xbf16>
    %9 = arith.extf %8 : vector<64x128xbf16> to vector<64x128xf32>
    %c1_9 = arith.constant 1 : index
    %c0_10 = arith.constant 0 : index
    %c0_11 = arith.constant 0 : index
    %10 = vector.load %arg2[%c1_9, %c0_10, %c0_11] : memref<9x1x128xf32, #tpu.memory_space<vmem>>, vector<1x1x128xf32>
    %11 = vector.shape_cast %10 : vector<1x1x128xf32> to vector<1x128xf32>
    %12 = vector.broadcast %11 : vector<1x128xf32> to vector<64x128xf32>
    %13 = arith.mulf %9, %12 : vector<64x128xf32>
    %14 = arith.addf %6, %13 : vector<64x128xf32>
    %c0_12 = arith.constant 0 : index
    %c2 = arith.constant 2 : index
    %c0_13 = arith.constant 0 : index
    %c0_14 = arith.constant 0 : index
    %15 = vector.load %arg1[%c0_12, %c2, %c0_13, %c0_14] : memref<1x9x64x128xbf16, #tpu.memory_space<vmem>>, vector<1x1x64x128xbf16>
    %16 = vector.shape_cast %15 : vector<1x1x64x128xbf16> to vector<64x128xbf16>
    %17 = arith.extf %16 : vector<64x128xbf16> to vector<64x128xf32>
    %c2_15 = arith.constant 2 : index
    %c0_16 = arith.constant 0 : index
    %c0_17 = arith.constant 0 : index
    %18 = vector.load %arg2[%c2_15, %c0_16, %c0_17] : memref<9x1x128xf32, #tpu.memory_space<vmem>>, vector<1x1x128xf32>
    %19 = vector.shape_cast %18 : vector<1x1x128xf32> to vector<1x128xf32>
    %20 = vector.broadcast %19 : vector<1x128xf32> to vector<64x128xf32>
    %21 = arith.mulf %17, %20 : vector<64x128xf32>
    %22 = arith.addf %14, %21 : vector<64x128xf32>
    %c0_18 = arith.constant 0 : index
    %c3 = arith.constant 3 : index
    %c0_19 = arith.constant 0 : index
    %c0_20 = arith.constant 0 : index
    %23 = vector.load %arg1[%c0_18, %c3, %c0_19, %c0_20] : memref<1x9x64x128xbf16, #tpu.memory_space<vmem>>, vector<1x1x64x128xbf16>
    %24 = vector.shape_cast %23 : vector<1x1x64x128xbf16> to vector<64x128xbf16>
    %25 = arith.extf %24 : vector<64x128xbf16> to vector<64x128xf32>
    %c3_21 = arith.constant 3 : index
    %c0_22 = arith.constant 0 : index
    %c0_23 = arith.constant 0 : index
    %26 = vector.load %arg2[%c3_21, %c0_22, %c0_23] : memref<9x1x128xf32, #tpu.memory_space<vmem>>, vector<1x1x128xf32>
    %27 = vector.shape_cast %26 : vector<1x1x128xf32> to vector<1x128xf32>
    %28 = vector.broadcast %27 : vector<1x128xf32> to vector<64x128xf32>
    %29 = arith.mulf %25, %28 : vector<64x128xf32>
    %30 = arith.addf %22, %29 : vector<64x128xf32>
    %c0_24 = arith.constant 0 : index
    %c4 = arith.constant 4 : index
    %c0_25 = arith.constant 0 : index
    %c0_26 = arith.constant 0 : index
    %31 = vector.load %arg1[%c0_24, %c4, %c0_25, %c0_26] : memref<1x9x64x128xbf16, #tpu.memory_space<vmem>>, vector<1x1x64x128xbf16>
    %32 = vector.shape_cast %31 : vector<1x1x64x128xbf16> to vector<64x128xbf16>
    %33 = arith.extf %32 : vector<64x128xbf16> to vector<64x128xf32>
    %c4_27 = arith.constant 4 : index
    %c0_28 = arith.constant 0 : index
    %c0_29 = arith.constant 0 : index
    %34 = vector.load %arg2[%c4_27, %c0_28, %c0_29] : memref<9x1x128xf32, #tpu.memory_space<vmem>>, vector<1x1x128xf32>
    %35 = vector.shape_cast %34 : vector<1x1x128xf32> to vector<1x128xf32>
    %36 = vector.broadcast %35 : vector<1x128xf32> to vector<64x128xf32>
    %37 = arith.mulf %33, %36 : vector<64x128xf32>
    %38 = arith.addf %30, %37 : vector<64x128xf32>
    %c0_30 = arith.constant 0 : index
    %c5 = arith.constant 5 : index
    %c0_31 = arith.constant 0 : index
    %c0_32 = arith.constant 0 : index
    %39 = vector.load %arg1[%c0_30, %c5, %c0_31, %c0_32] : memref<1x9x64x128xbf16, #tpu.memory_space<vmem>>, vector<1x1x64x128xbf16>
    %40 = vector.shape_cast %39 : vector<1x1x64x128xbf16> to vector<64x128xbf16>
    %41 = arith.extf %40 : vector<64x128xbf16> to vector<64x128xf32>
    %c5_33 = arith.constant 5 : index
    %c0_34 = arith.constant 0 : index
    %c0_35 = arith.constant 0 : index
    %42 = vector.load %arg2[%c5_33, %c0_34, %c0_35] : memref<9x1x128xf32, #tpu.memory_space<vmem>>, vector<1x1x128xf32>
    %43 = vector.shape_cast %42 : vector<1x1x128xf32> to vector<1x128xf32>
    %44 = vector.broadcast %43 : vector<1x128xf32> to vector<64x128xf32>
    %45 = arith.mulf %41, %44 : vector<64x128xf32>
    %46 = arith.addf %38, %45 : vector<64x128xf32>
    %c0_36 = arith.constant 0 : index
    %c6 = arith.constant 6 : index
    %c0_37 = arith.constant 0 : index
    %c0_38 = arith.constant 0 : index
    %47 = vector.load %arg1[%c0_36, %c6, %c0_37, %c0_38] : memref<1x9x64x128xbf16, #tpu.memory_space<vmem>>, vector<1x1x64x128xbf16>
    %48 = vector.shape_cast %47 : vector<1x1x64x128xbf16> to vector<64x128xbf16>
    %49 = arith.extf %48 : vector<64x128xbf16> to vector<64x128xf32>
    %c6_39 = arith.constant 6 : index
    %c0_40 = arith.constant 0 : index
    %c0_41 = arith.constant 0 : index
    %50 = vector.load %arg2[%c6_39, %c0_40, %c0_41] : memref<9x1x128xf32, #tpu.memory_space<vmem>>, vector<1x1x128xf32>
    %51 = vector.shape_cast %50 : vector<1x1x128xf32> to vector<1x128xf32>
    %52 = vector.broadcast %51 : vector<1x128xf32> to vector<64x128xf32>
    %53 = arith.mulf %49, %52 : vector<64x128xf32>
    %54 = arith.addf %46, %53 : vector<64x128xf32>
    %c0_42 = arith.constant 0 : index
    %c7 = arith.constant 7 : index
    %c0_43 = arith.constant 0 : index
    %c0_44 = arith.constant 0 : index
    %55 = vector.load %arg1[%c0_42, %c7, %c0_43, %c0_44] : memref<1x9x64x128xbf16, #tpu.memory_space<vmem>>, vector<1x1x64x128xbf16>
    %56 = vector.shape_cast %55 : vector<1x1x64x128xbf16> to vector<64x128xbf16>
    %57 = arith.extf %56 : vector<64x128xbf16> to vector<64x128xf32>
    %c7_45 = arith.constant 7 : index
    %c0_46 = arith.constant 0 : index
    %c0_47 = arith.constant 0 : index
    %58 = vector.load %arg2[%c7_45, %c0_46, %c0_47] : memref<9x1x128xf32, #tpu.memory_space<vmem>>, vector<1x1x128xf32>
    %59 = vector.shape_cast %58 : vector<1x1x128xf32> to vector<1x128xf32>
    %60 = vector.broadcast %59 : vector<1x128xf32> to vector<64x128xf32>
    %61 = arith.mulf %57, %60 : vector<64x128xf32>
    %62 = arith.addf %54, %61 : vector<64x128xf32>
    %c0_48 = arith.constant 0 : index
    %c8 = arith.constant 8 : index
    %c0_49 = arith.constant 0 : index
    %c0_50 = arith.constant 0 : index
    %63 = vector.load %arg1[%c0_48, %c8, %c0_49, %c0_50] : memref<1x9x64x128xbf16, #tpu.memory_space<vmem>>, vector<1x1x64x128xbf16>
    %64 = vector.shape_cast %63 : vector<1x1x64x128xbf16> to vector<64x128xbf16>
    %65 = arith.extf %64 : vector<64x128xbf16> to vector<64x128xf32>
    %c8_51 = arith.constant 8 : index
    %c0_52 = arith.constant 0 : index
    %c0_53 = arith.constant 0 : index
    %66 = vector.load %arg2[%c8_51, %c0_52, %c0_53] : memref<9x1x128xf32, #tpu.memory_space<vmem>>, vector<1x1x128xf32>
    %67 = vector.shape_cast %66 : vector<1x1x128xf32> to vector<1x128xf32>
    %68 = vector.broadcast %67 : vector<1x128xf32> to vector<64x128xf32>
    %69 = arith.mulf %65, %68 : vector<64x128xf32>
    %70 = arith.addf %62, %69 : vector<64x128xf32>
    %c0_54 = arith.constant 0 : index
    %c0_55 = arith.constant 0 : index
    %71 = vector.load %arg3[%c0_54, %c0_55] : memref<1x128xf32, #tpu.memory_space<vmem>>, vector<1x128xf32>
    %72 = vector.broadcast %71 : vector<1x128xf32> to vector<64x128xf32>
    %73 = arith.addf %70, %72 : vector<64x128xf32>
    %cst = arith.constant 0.000000e+00 : f32
    %74 = vector.broadcast %cst : f32 to vector<64x128xf32>
    %75 = arith.maximumf %73, %74 : vector<64x128xf32>
    %c0_56 = arith.constant 0 : index
    %c4_57 = arith.constant 4 : index
    %c0_58 = arith.constant 0 : index
    %c0_59 = arith.constant 0 : index
    %76 = vector.load %arg1[%c0_56, %c4_57, %c0_58, %c0_59] : memref<1x9x64x128xbf16, #tpu.memory_space<vmem>>, vector<1x1x64x128xbf16>
    %77 = vector.shape_cast %76 : vector<1x1x64x128xbf16> to vector<64x128xbf16>
    %78 = arith.truncf %75 : vector<64x128xf32> to vector<64x128xbf16>
    %79 = tpu.concatenate %77, %78 in 1 : vector<64x128xbf16>, vector<64x128xbf16> -> vector<64x256xbf16>
    %c0_60 = arith.constant 0 : index
    %c0_61 = arith.constant 0 : index
    %80 = vector.load %arg4[%c0_60, %c0_61] : memref<256x128xbf16, #tpu.memory_space<vmem>>, vector<256x128xbf16>
    %cst_62 = arith.constant dense<0.000000e+00> : vector<64x128xf32>
    %81 = tpu.matmul %79, %80, %cst_62 {dimension_numbers = #tpu.dot_dimension_numbers<[1], [0], [0], [1], [0, 0, 1, 1], [], []>} : vector<64x256xbf16>, vector<256x128xbf16>, vector<64x128xf32> -> vector<64x128xf32>
    %c0_63 = arith.constant 0 : index
    %c0_64 = arith.constant 0 : index
    %82 = vector.load %arg5[%c0_63, %c0_64] : memref<1x128xf32, #tpu.memory_space<vmem>>, vector<1x128xf32>
    %83 = vector.broadcast %82 : vector<1x128xf32> to vector<64x128xf32>
    %84 = arith.addf %81, %83 : vector<64x128xf32>
    %cst_65 = arith.constant 0.000000e+00 : f32
    %85 = vector.broadcast %cst_65 : f32 to vector<64x128xf32>
    %86 = arith.maximumf %84, %85 : vector<64x128xf32>
    %87 = arith.truncf %86 : vector<64x128xf32> to vector<64x128xbf16>
    %c0_66 = arith.constant 0 : index
    %c0_67 = arith.constant 0 : index
    %88 = vector.load %arg6[%c0_66, %c0_67] : memref<128x2048xbf16, #tpu.memory_space<vmem>>, vector<128x512xbf16>
    %cst_68 = arith.constant dense<0.000000e+00> : vector<64x512xf32>
    %89 = tpu.matmul %87, %88, %cst_68 {dimension_numbers = #tpu.dot_dimension_numbers<[1], [0], [0], [1], [0, 0, 1, 1], [], []>} : vector<64x128xbf16>, vector<128x512xbf16>, vector<64x512xf32> -> vector<64x512xf32>
    %c0_69 = arith.constant 0 : index
    %c0_70 = arith.constant 0 : index
    %90 = vector.load %arg7[%c0_69, %c0_70] : memref<1x2048xf32, #tpu.memory_space<vmem>>, vector<1x512xf32>
    %91 = vector.broadcast %90 : vector<1x512xf32> to vector<64x512xf32>
    %92 = arith.addf %89, %91 : vector<64x512xf32>
    %cst_71 = arith.constant 0.000000e+00 : f32
    %93 = vector.broadcast %cst_71 : f32 to vector<64x512xf32>
    %94 = arith.maximumf %92, %93 : vector<64x512xf32>
    %cst_72 = arith.constant dense<0.000000e+00> : vector<512xf32>
    %95 = vector.multi_reduction <add>, %94, %cst_72 [0] : vector<64x512xf32> to vector<512xf32>
    %96 = vector.shape_cast %95 : vector<512xf32> to vector<1x512xf32>
    %c0_73 = arith.constant 0 : index
    %c512 = arith.constant 512 : index
    %97 = vector.load %arg6[%c0_73, %c512] : memref<128x2048xbf16, #tpu.memory_space<vmem>>, vector<128x512xbf16>
    %cst_74 = arith.constant dense<0.000000e+00> : vector<64x512xf32>
    %98 = tpu.matmul %87, %97, %cst_74 {dimension_numbers = #tpu.dot_dimension_numbers<[1], [0], [0], [1], [0, 0, 1, 1], [], []>} : vector<64x128xbf16>, vector<128x512xbf16>, vector<64x512xf32> -> vector<64x512xf32>
    %c0_75 = arith.constant 0 : index
    %c512_76 = arith.constant 512 : index
    %99 = vector.load %arg7[%c0_75, %c512_76] : memref<1x2048xf32, #tpu.memory_space<vmem>>, vector<1x512xf32>
    %100 = vector.broadcast %99 : vector<1x512xf32> to vector<64x512xf32>
    %101 = arith.addf %98, %100 : vector<64x512xf32>
    %cst_77 = arith.constant 0.000000e+00 : f32
    %102 = vector.broadcast %cst_77 : f32 to vector<64x512xf32>
    %103 = arith.maximumf %101, %102 : vector<64x512xf32>
    %cst_78 = arith.constant dense<0.000000e+00> : vector<512xf32>
    %104 = vector.multi_reduction <add>, %103, %cst_78 [0] : vector<64x512xf32> to vector<512xf32>
    %105 = vector.shape_cast %104 : vector<512xf32> to vector<1x512xf32>
    %c0_79 = arith.constant 0 : index
    %c1024 = arith.constant 1024 : index
    %106 = vector.load %arg6[%c0_79, %c1024] : memref<128x2048xbf16, #tpu.memory_space<vmem>>, vector<128x512xbf16>
    %cst_80 = arith.constant dense<0.000000e+00> : vector<64x512xf32>
    %107 = tpu.matmul %87, %106, %cst_80 {dimension_numbers = #tpu.dot_dimension_numbers<[1], [0], [0], [1], [0, 0, 1, 1], [], []>} : vector<64x128xbf16>, vector<128x512xbf16>, vector<64x512xf32> -> vector<64x512xf32>
    %c0_81 = arith.constant 0 : index
    %c1024_82 = arith.constant 1024 : index
    %108 = vector.load %arg7[%c0_81, %c1024_82] : memref<1x2048xf32, #tpu.memory_space<vmem>>, vector<1x512xf32>
    %109 = vector.broadcast %108 : vector<1x512xf32> to vector<64x512xf32>
    %110 = arith.addf %107, %109 : vector<64x512xf32>
    %cst_83 = arith.constant 0.000000e+00 : f32
    %111 = vector.broadcast %cst_83 : f32 to vector<64x512xf32>
    %112 = arith.maximumf %110, %111 : vector<64x512xf32>
    %cst_84 = arith.constant dense<0.000000e+00> : vector<512xf32>
    %113 = vector.multi_reduction <add>, %112, %cst_84 [0] : vector<64x512xf32> to vector<512xf32>
    %114 = vector.shape_cast %113 : vector<512xf32> to vector<1x512xf32>
    %c0_85 = arith.constant 0 : index
    %c1536 = arith.constant 1536 : index
    %115 = vector.load %arg6[%c0_85, %c1536] : memref<128x2048xbf16, #tpu.memory_space<vmem>>, vector<128x512xbf16>
    %cst_86 = arith.constant dense<0.000000e+00> : vector<64x512xf32>
    %116 = tpu.matmul %87, %115, %cst_86 {dimension_numbers = #tpu.dot_dimension_numbers<[1], [0], [0], [1], [0, 0, 1, 1], [], []>} : vector<64x128xbf16>, vector<128x512xbf16>, vector<64x512xf32> -> vector<64x512xf32>
    %c0_87 = arith.constant 0 : index
    %c1536_88 = arith.constant 1536 : index
    %117 = vector.load %arg7[%c0_87, %c1536_88] : memref<1x2048xf32, #tpu.memory_space<vmem>>, vector<1x512xf32>
    %118 = vector.broadcast %117 : vector<1x512xf32> to vector<64x512xf32>
    %119 = arith.addf %116, %118 : vector<64x512xf32>
    %cst_89 = arith.constant 0.000000e+00 : f32
    %120 = vector.broadcast %cst_89 : f32 to vector<64x512xf32>
    %121 = arith.maximumf %119, %120 : vector<64x512xf32>
    %cst_90 = arith.constant dense<0.000000e+00> : vector<512xf32>
    %122 = vector.multi_reduction <add>, %121, %cst_90 [0] : vector<64x512xf32> to vector<512xf32>
    %123 = vector.shape_cast %122 : vector<512xf32> to vector<1x512xf32>
    %124 = tpu.concatenate %96, %105, %114, %123 in 1 : vector<1x512xf32>, vector<1x512xf32>, vector<1x512xf32>, vector<1x512xf32> -> vector<1x2048xf32>
    %cst_91 = arith.constant 1.562500e-02 : f32
    %125 = vector.broadcast %cst_91 : f32 to vector<1x2048xf32>
    %126 = arith.mulf %124, %125 : vector<1x2048xf32>
    %127 = arith.truncf %126 : vector<1x2048xf32> to vector<1x2048xbf16>
    %c0_92 = arith.constant 0 : index
    %c0_93 = arith.constant 0 : index
    %128 = vector.load %arg8[%c0_92, %c0_93] : memref<2048x128xbf16, #tpu.memory_space<vmem>>, vector<2048x128xbf16>
    %cst_94 = arith.constant dense<0.000000e+00> : vector<1x128xf32>
    %129 = tpu.matmul %127, %128, %cst_94 {dimension_numbers = #tpu.dot_dimension_numbers<[1], [0], [0], [1], [0, 0, 1, 1], [], []>} : vector<1x2048xbf16>, vector<2048x128xbf16>, vector<1x128xf32> -> vector<1x128xf32>
    %c0_95 = arith.constant 0 : index
    %c0_96 = arith.constant 0 : index
    %130 = vector.load %arg9[%c0_95, %c0_96] : memref<1x128xf32, #tpu.memory_space<vmem>>, vector<1x128xf32>
    %131 = arith.addf %129, %130 : vector<1x128xf32>
    %c0_97 = arith.constant 0 : index
    %c0_98 = arith.constant 0 : index
    %c0_99 = arith.constant 0 : index
    %132 = vector.load %arg10[%c0_97, %c0_98, %c0_99] : memref<1x1x128xf32, #tpu.memory_space<vmem>>, vector<1x1x128xf32>
    %133 = vector.shape_cast %132 : vector<1x1x128xf32> to vector<1x128xf32>
    %134 = vector.shape_cast %131 : vector<1x128xf32> to vector<1x1x128xf32>
    tpu.vector_store %arg10[%c0_97, %c0_98, %c0_99], %134 {strides = array<i32>} : memref<1x1x128xf32, #tpu.memory_space<vmem>>, vector<1x1x128xf32>,
    return
  }
  func.func @transform_0(%arg0: i32) -> (i32, i32, i32, i32) {
    %c0_i32 = arith.constant 0 : i32
    %c0_i32_0 = arith.constant 0 : i32
    %c0_i32_1 = arith.constant 0 : i32
    %c0_i32_2 = arith.constant 0 : i32
    return %arg0, %c0_i32, %c0_i32_0, %c0_i32_1 : i32, i32, i32, i32
  }
  func.func @transform_1(%arg0: i32) -> (i32, i32, i32) {
    %c0_i32 = arith.constant 0 : i32
    %c0_i32_0 = arith.constant 0 : i32
    %c0_i32_1 = arith.constant 0 : i32
    %c0_i32_2 = arith.constant 0 : i32
    return %c0_i32, %c0_i32_0, %c0_i32_1 : i32, i32, i32
  }
  func.func @transform_2(%arg0: i32) -> (i32, i32) {
    %c0_i32 = arith.constant 0 : i32
    %c0_i32_0 = arith.constant 0 : i32
    %c0_i32_1 = arith.constant 0 : i32
    return %c0_i32, %c0_i32_0 : i32, i32
  }
  func.func @transform_3(%arg0: i32) -> (i32, i32) {
    %c0_i32 = arith.constant 0 : i32
    %c0_i32_0 = arith.constant 0 : i32
    %c0_i32_1 = arith.constant 0 : i32
    return %c0_i32, %c0_i32_0 : i32, i32
  }
  func.func @transform_4(%arg0: i32) -> (i32, i32) {
    %c0_i32 = arith.constant 0 : i32
    %c0_i32_0 = arith.constant 0 : i32
    %c0_i32_1 = arith.constant 0 : i32
    return %c0_i32, %c0_i32_0 : i32, i32
  }
  func.func @transform_5(%arg0: i32) -> (i32, i32) {
    %c0_i32 = arith.constant 0 : i32
    %c0_i32_0 = arith.constant 0 : i32
    %c0_i32_1 = arith.constant 0 : i32
    return %c0_i32, %c0_i32_0 : i32, i32
  }
  func.func @transform_6(%arg0: i32) -> (i32, i32) {
    %c0_i32 = arith.constant 0 : i32
    %c0_i32_0 = arith.constant 0 : i32
    %c0_i32_1 = arith.constant 0 : i32
    return %c0_i32, %c0_i32_0 : i32, i32
  }
  func.func @transform_7(%arg0: i32) -> (i32, i32) {
    %c0_i32 = arith.constant 0 : i32
    %c0_i32_0 = arith.constant 0 : i32
    %c0_i32_1 = arith.constant 0 : i32
    return %c0_i32, %c0_i32_0 : i32, i32
  }
  func.func @transform_8(%arg0: i32) -> (i32, i32) {
    %c0_i32 = arith.constant 0 : i32
    %c0_i32_0 = arith.constant 0 : i32
    %c0_i32_1 = arith.constant 0 : i32
    return %c0_i32, %c0_i32_0 : i32, i32
  }
  func.func @transform_9(%arg0: i32) -> (i32, i32, i32) {
    %c0_i32 = arith.constant 0 : i32
    %c0_i32_0 = arith.constant 0 : i32
    %c0_i32_1 = arith.constant 0 : i32
    return %arg0, %c0_i32, %c0_i32_0 : i32, i32, i32
  }
}

</mosaic_0001>

<bundles_post_ra>
// kernel: forward.2
= control target key start
LH: loop header
LB: loop body
LE: loop exit
PB: predicated region body
PF: predicated region fallthrough
CT: control target
= control target key end

     0   :  { %s10080_s21 = smov 0   ;;  %s14023_s0 = inlined_call_operand.vmem [shape: bf16[2,225,27], index: 0, kind: input, shape index: {}]   ;;  %s14024_s1 = inlined_call_operand.vmem [shape: bf16[9,225,1], index: 1, kind: input, shape index: {}]   ;;  %s14025_s2 = inlined_call_operand.vmem [shape: bf16[27,32], index: 2, kind: input, shape index: {}]   ;;  %s14026_s3 = inlined_call_operand.vmem [shape: f32[1,32], index: 3, kind: input, shape index: {}]   ;;  %s14027_s4 = inlined_call_operand.vmem [shape: bf16[9,32,128], index: 4, kind: input, shape index: {}]   ;;  %s14028_s5 = inlined_call_operand.vmem [shape: f32[1,128], index: 5, kind: input, shape index: {}]   ;;  %s14029_s6 = inlined_call_operand.vmem [shape: bf16[2,225,128], index: 6, kind: output, shape index: {}]  }
   0x1 LB: > { %s8433_s22 = sadd.s32 4294967295, %s10038_s21   ;;  %p8437_p0 = scmp.ge.s32.totalorder %s10038_s21, 1  ;;  %s10038_s21 = sphi %s10080_s21, %s16_s21  }
   0x2   : > { %p212_p1 = scmp.lt.s32.totalorder %s10038_s21, 3 }
   0x4   : > { %p213_p2 = pnand %p8437_p0, %p212_p1 }
   0x6   : > { %216 = sbr.rel (%p213_p2) target bundleno = 1070 (0x42e), region = 44 }
   0xd   : > { %v632_v0 = vld [vmem:[%s14024_s1 + $0x8] sm:$0xf]  ;;  %v630_v1 = vld [vmem:[%s14024_s1] sm:$0xf]  ;;  %v10040_v2 = vmov 0   ;;  %vm423_vm0 = vcmask 1044480  }
   0xe   : > { %9994 = vset.pattern.permute.xlu1 %v10040_v2  ;;  %9993 = vset.pattern.permute.xlu0 %v10040_v2  ;;  %v9995_v3 = vld [vmem:[%s14025_s2] sm:$0xff]   ;;  %v633_v4 = vld [vmem:[%s14024_s1 + $0xc] sm:$0xf]  ;;  %v14030_v6 = vmov 0.0   ;;  %vm424_vm1 = vcmask 1045504   ;;  %v10042_v8 = vmov 65535  }
   0xf   : > { %685 = vperm.xlu1 %9994, %v632_v0   ;;  %661 = vperm.xlu0 %9993, %v630_v1   ;;  %v631_v5 = vld [vmem:[%s14024_s1 + $0x4] sm:$0xf]  ;;  %v9996_v7 = vld [vmem:[%s14025_s2 + $0x8] sm:$0x3f]   ;;  %v425_v9 = vsel %vm423_vm0, 4294967295, %v10042_v8  ;;  %vm10043_vm2 = vmmov 0  }
  0x10   : > { %9339 = vmatprep.subr.bf16.mxu0 %v14030_v6  ;;  %9403 = vmatprep.subr.bf16.mxu1 %v14030_v6  ;;  %v426_v10 = vsel %vm424_vm1, %v425_v9, 0  ;;  %p242_p3 = scmp.lt.s32.totalorder %s8433_s22, 1  ;;  %v635_v12 = vld [vmem:[%s14024_s1 + $0x14] sm:$0xf]  ;;  %v634_v13 = vld [vmem:[%s14024_s1 + $0x10] sm:$0xf] }
  0x11   : > { %9340 = vmatpush3.bf16.msra.mxu0 %v9995_v3  ;;  %9343 = vmatprep.mubr.msk.bf16.mxu0 %vm10043_vm2, %v14030_v6  ;;  %v428_v11 = vand.u32 %v9996_v7, %v426_v10  ;;  %vm377_vm3 = vcmask 220160   ;;  %v637_v14 = vld [vmem:[%s14024_s1 + $0x1c] sm:$0xf]  ;;  %v636_v15 = vld [vmem:[%s14024_s1 + $0x18] sm:$0xf]  ;;  %v10012_v37 = vld [vmem:[%s14027_s4] sm:$0xff]  }
  0x12   : > { %9341 = vmatprep.subr.bf16.mxu0 %v14030_v6  ;;  %s14281_s22 = smov (!%p242_p3, %s8433_s22), 1  ;;  %9407 = vmatprep.mubr.msk.bf16.mxu1 %vm10043_vm2, %v14030_v6  ;;  %v639_v17 = vld [vmem:[%s14024_s1 + $0x24] sm:$0xf]  ;;  %v638_v18 = vld [vmem:[%s14024_s1 + $0x20] sm:$0xf]  ;;  %v10013_v40 = vld [vmem:[%s14027_s4 + $0x8] sm:$0xff]  }
  0x13   : > { %697 = vperm.xlu1 %9994, %v633_v4   ;;  %673 = vperm.xlu0 %9993, %v631_v5   ;;  %s9979_s15 = smul.u32 116, %s14281_s22  ;;  %v641_v20 = vld [vmem:[%s14024_s1 + $0x2c] sm:$0xf]  ;;  %v640_v21 = vld [vmem:[%s14024_s1 + $0x28] sm:$0xf]  ;;  %vm1846_vm4 = vcmask 261120  }
  0x14   : > { %v643_v22 = vld [vmem:[%s14024_s1 + $0x34] sm:$0xf]  ;;  %v642_v23 = vld [vmem:[%s14024_s1 + $0x30] sm:$0xf]  ;;  %v645_v25 = vld [vmem:[%s14024_s1 + $0x3c] sm:$0xf] }
  0x15   : > { %9342 = vmatpush3.bf16.msra.mxu0 %v428_v11  ;;  %s10132_s18 = scalar_lea.vmem %s14023_s0, %s9979_s15  ;;  %v644_v26 = vld [vmem:[%s14024_s1 + $0x38] sm:$0xf]  ;;  %v647_v27 = vld [vmem:[%s14024_s1 + $0x44] sm:$0xf]  ;;  %v646_v28 = vld [vmem:[%s14024_s1 + $0x40] sm:$0xf]  ;;  %s13946_s12 = scalar_lea.vmem %s14029_s6, %s9979_s15 }
  0x16   : > { %9467 = vmatprep.subr.bf16.mxu0 %v14030_v6  ;;  %v9997_v16 = vld [vmem:[%s10132_s18] sm:$0xff]   ;;  %v9998_v19 = vld [vmem:[%s10132_s18 + $0x8] sm:$0xff]   ;;  %v9999_v24 = vld [vmem:[%s10132_s18 + $0x10] sm:$0xff]   ;;  %vm627_vm5 = vsmask.f32 256  ;;  %vm626_vm7 = vcmask 1040384  }
  0x17   : > { %721 = vperm.xlu1 %9994, %v635_v12   ;;  %709 = vperm.xlu0 %9993, %v634_v13   ;;  %v10000_v29 = vld [vmem:[%s10132_s18 + $0x18] sm:$0xff]   ;;  %v649_v30 = vld [vmem:[%s14024_s1 + $0x4c] sm:$0xf]  ;;  %v648_v31 = vld [vmem:[%s14024_s1 + $0x48] sm:$0xf]  ;;  %vm2783_vm8 = vcmask 1046528  }
  0x18   : > { %9344 = vmatmul.mubr.msk.bf16.vlgmr.msra.gmra.mrb[0].mxu0 %vm377_vm3, %v9997_v16  ;;  %v651_v32 = vld [vmem:[%s14024_s1 + $0x54] sm:$0xf]  ;;  %v650_v33 = vld [vmem:[%s14024_s1 + $0x50] sm:$0xf]  ;;  %v10001_v34 = vld [vmem:[%s10132_s18 + $0x20] sm:$0xff]  }
  0x19   : > { %9347 = vmatprep.mubr.msk.bf16.mxu0 %vm10043_vm2, %v14030_v6  ;;  %v653_v35 = vld [vmem:[%s14024_s1 + $0x5c] sm:$0xf]  ;;  %v652_v36 = vld [vmem:[%s14024_s1 + $0x58] sm:$0xf]  ;;  %v655_v38 = vld [vmem:[%s14024_s1 + $0x64] sm:$0xf]  ;;  %9468 = vmatpush3.bf16.msra.mxu0 %v10012_v37 }
  0x1a   : > { %v654_v39 = vld [vmem:[%s14024_s1 + $0x60] sm:$0xf]  ;;  %v10002_v41 = vld [vmem:[%s10132_s18 + $0x28] sm:$0xff]   ;;  %9469 = vmatprep.subr.bf16.mxu0 %v14030_v6  ;;  %v8488_v44 = vld [vmem:[%s14024_s1 + $0x74] sm:$0xf] }
  0x1b   : > { %745 = vperm.xlu1 %9994, %v637_v14   ;;  %733 = vperm.xlu0 %9993, %v636_v15   ;;  %v657_v42 = vld [vmem:[%s14024_s1 + $0x6c] sm:$0xf]  ;;  %v656_v43 = vld [vmem:[%s14024_s1 + $0x68] sm:$0xf]  ;;  %v658_v45 = vld [vmem:[%s14024_s1 + $0x70] sm:$0x1] }
  0x1c   : > { %v10003_v46 = vld [vmem:[%s10132_s18 + $0x30] sm:$0xff]   ;;  %v8490_v47 = vld [vmem:[%s14024_s1 + $0x7c] sm:$0xf]  ;;  %v8489_v48 = vld [vmem:[%s14024_s1 + $0x78] sm:$0xf] }
  0x1d   : > { %9470 = vmatpush3.bf16.msra.mxu0 %v10013_v40  ;;  %v8492_v49 = vld [vmem:[%s14024_s1 + $0x84] sm:$0xf]  ;;  %v8491_v50 = vld [vmem:[%s14024_s1 + $0x80] sm:$0xf]  ;;  %v10004_v51 = vld [vmem:[%s10132_s18 + $0x38] sm:$0xff]  }
  0x1e   : > { %9595 = vmatprep.subr.bf16.mxu0 %v14030_v6  ;;  %v8494_v52 = vld [vmem:[%s14024_s1 + $0x8c] sm:$0xf]  ;;  %v8493_v53 = vld [vmem:[%s14024_s1 + $0x88] sm:$0xf]  ;;  %v8496_v54 = vld [vmem:[%s14024_s1 + $0x94] sm:$0xf] }
  0x1f   : > { %769 = vperm.xlu1 %9994, %v639_v17   ;;  %757 = vperm.xlu0 %9993, %v638_v18   ;;  %v8495_v55 = vld [vmem:[%s14024_s1 + $0x90] sm:$0xf]  ;;  %v10005_v56 = vld [vmem:[%s10132_s18 + $0x40] sm:$0xff]   ;;  %v8498_v57 = vld [vmem:[%s14024_s1 + $0x9c] sm:$0xf] }
  0x20   : > { %9348 = vmatmul.mubr.msk.bf16.gmra.mrb[4].mxu0 %vm377_vm3, %v9998_v19  ;;  %v8497_v58 = vld [vmem:[%s14024_s1 + $0x98] sm:$0xf]  ;;  %v8500_v59 = vld [vmem:[%s14024_s1 + $0xa4] sm:$0xf]  ;;  %v8499_v60 = vld [vmem:[%s14024_s1 + $0xa0] sm:$0xf] }
  0x21   : > { %9351 = vmatprep.mubr.msk.bf16.mxu0 %vm10043_vm2, %v14030_v6  ;;  %v10006_v61 = vld [vmem:[%s10132_s18 + $0x48] sm:$0xff]   ;;  %v8504_v0 = vld [vmem:[%s14024_s1 + $0xb4] sm:$0xf]  ;;  %v8503_v1 = vld [vmem:[%s14024_s1 + $0xb0] sm:$0xf] }
  0x22   : > { %v8502_v62 = vld [vmem:[%s14024_s1 + $0xac] sm:$0xf]  ;;  %v8501_v63 = vld [vmem:[%s14024_s1 + $0xa8] sm:$0xf]  ;;  %v10007_v2 = vld [vmem:[%s10132_s18 + $0x50] sm:$0xff]  }
  0x23   : > { %793 = vperm.xlu1 %9994, %v641_v20   ;;  %781 = vperm.xlu0 %9993, %v640_v21   ;;  %v8506_v3 = vld [vmem:[%s14024_s1 + $0xbc] sm:$0xf]  ;;  %v8505_v4 = vld [vmem:[%s14024_s1 + $0xb8] sm:$0xf]  ;;  %v8508_v5 = vld [vmem:[%s14024_s1 + $0xc4] sm:$0xf] }
  0x24   : > { %v8507_v7 = vld [vmem:[%s14024_s1 + $0xc0] sm:$0xf]  ;;  %v10008_v8 = vld [vmem:[%s10132_s18 + $0x58] sm:$0xff]   ;;  %v8510_v9 = vld [vmem:[%s14024_s1 + $0xcc] sm:$0xf] }
  0x25   : > { %v8509_v10 = vld [vmem:[%s14024_s1 + $0xc8] sm:$0xf]  ;;  %v8512_v11 = vld [vmem:[%s14024_s1 + $0xd4] sm:$0xf]  ;;  %v8511_v12 = vld [vmem:[%s14024_s1 + $0xd0] sm:$0xf] }
  0x26   : > { %v10014_v13 = vld [vmem:[%s14027_s4 + $0x10] sm:$0xff]   ;;  %v10009_v14 = vld [vmem:[%s10132_s18 + $0x60] sm:$0xff]   ;;  %v8514_v15 = vld [vmem:[%s14024_s1 + $0xdc] sm:$0xf]  ;;  %vm1715_vm6 = vsmask.f32 7424 }
  0x27   : > { %817 = vperm.xlu1 %9994, %v643_v22   ;;  %805 = vperm.xlu0 %9993, %v642_v23   ;;  %v8513_v16 = vld [vmem:[%s14024_s1 + $0xd8] sm:$0xf]  ;;  %v8516_v18 = vld [vmem:[%s14024_s1 + $0xe4] sm:$0x1]  ;;  %v8515_v19 = vld [vmem:[%s14024_s1 + $0xe0] sm:$0xf] }
  0x28   : > { %9352 = vmatmul.mubr.msk.bf16.gmra.mrb[8].mxu0 %vm377_vm3, %v9999_v24  ;;  %9404 = vmatpush3.bf16.msra.mxu1 %v10014_v13  ;;  %v10015_v17 = vld [vmem:[%s14027_s4 + $0x18] sm:$0xff]   ;;  %v10010_v20 = vld [vmem:[%s10132_s18 + $0x68] sm:$0xff]   ;;  %v8573_v23 = vld [vmem:[%s14024_s1 + $0xf4] sm:$0xf] }
  0x29   : > { %9355 = vmatprep.mubr.msk.bf16.mxu0 %vm10043_vm2, %v14030_v6  ;;  %9405 = vmatprep.subr.bf16.mxu1 %v14030_v6  ;;  %v8571_v21 = vld [vmem:[%s14024_s1 + $0xec] sm:$0xf]  ;;  %v8570_v22 = vld [vmem:[%s14024_s1 + $0xe8] sm:$0xf]  ;;  %v8572_v24 = vld [vmem:[%s14024_s1 + $0xf0] sm:$0xf] }
  0x2a   : > { %v8578_v40 = vld [vmem:[%s14024_s1 + $0x108] sm:$0xf]  ;;  %vm12919_vm9 = vmand %vm626_vm7, %vm627_vm5 }
  0x2b   : > { %841 = vperm.xlu1 %9994, %v645_v25   ;;  %829 = vperm.xlu0 %9993, %v644_v26   ;;  %v10044_v25 = vmov 839922192  }
  0x2c   : > { %9406 = vmatpush3.bf16.msra.mxu1 %v10015_v17  ;;  %v665_v26 = vunpack.c.l.s4 %v10044_v25 }
  0x2d   : > { %9531 = vmatprep.subr.bf16.mxu1 %v14030_v6 }
  0x2f   : > { %865 = vperm.xlu1 %9994, %v647_v27   ;;  %853 = vperm.xlu0 %9993, %v646_v28   ;;  %v667_v27 = vlaneseq  ;;  %v10011_v28 = vld [vmem:[%s10132_s18 + $0x70] ss:$0 sps:$4 sm:$0x11]  }
  0x30   : > { %9356 = vmatmul.mubr.msk.bf16.gmra.mrb[12].mxu0 %vm377_vm3, %v10000_v29  ;;  %v8575_v29 = vld [vmem:[%s14024_s1 + $0xfc] sm:$0xf] }
  0x31   : > { %9359 = vmatprep.mubr.msk.bf16.mxu0 %vm10043_vm2, %v14030_v6 }
  0x33   : > { %889 = vperm.xlu1 %9994, %v649_v30   ;;  %877 = vperm.xlu0 %9993, %v648_v31   ;;  %v8574_v30 = vld [vmem:[%s14024_s1 + $0xf8] sm:$0xf]  ;;  %v666_v31 = vunpack.c.0.s8 %v665_v26 }
  0x37   : > { %913 = vperm.xlu1 %9994, %v651_v32   ;;  %901 = vperm.xlu0 %9993, %v650_v33   ;;  %v668_v32 = vshrl.u32 %v667_v27, 7  ;;  %v8577_v33 = vld [vmem:[%s14024_s1 + $0x104] sm:$0xf]  ;;  %v8639_v27 = vld [vmem:[%s14024_s1 + $0x16c] sm:$0xf] }
  0x38   : > { %9360 = vmatmul.mubr.msk.bf16.gmra.mrb[16].mxu0 %vm377_vm3, %v10001_v34 }
  0x39   : > { %9363 = vmatprep.mubr.msk.bf16.mxu0 %vm10043_vm2, %v14030_v6  ;;  %v10387_v34 = vsub.s32 %v666_v31, %v668_v32  ;;  %v8641_v31 = vld [vmem:[%s14024_s1 + $0x174] sm:$0xf]  ;;  %v8640_v32 = vld [vmem:[%s14024_s1 + $0x170] sm:$0xf] }
  0x3b   : > { %937 = vperm.xlu1 %9994, %v653_v35   ;;  %925 = vperm.xlu0 %9993, %v652_v36   ;;  %14062 = vst [vmem:[#allocation2_spill] sm:$0xff] %v10387_v34  ;;  %v8576_v35 = vld [vmem:[%s14024_s1 + $0x100] sm:$0xf] }
  0x3f   : > { %961 = vperm.xlu1 %9994, %v655_v38   ;;  %949 = vperm.xlu0 %9993, %v654_v39   ;;  %v8579_v38 = vld [vmem:[%s14024_s1 + $0x10c] sm:$0xf] }
  0x40   : > { %9364 = vmatmul.mubr.msk.bf16.gmra.mrb[20].mxu0 %vm377_vm3, %v10002_v41 }
  0x41   : > { %9367 = vmatprep.mubr.msk.bf16.mxu0 %vm10043_vm2, %v14030_v6 }
  0x43   : > { %985 = vperm.xlu1 %9994, %v657_v42   ;;  %973 = vperm.xlu0 %9993, %v656_v43  }
  0x47   : > { %1146 = vperm.xlu1 %9994, %v8488_v44   ;;  %997 = vperm.xlu0 %9993, %v658_v45   ;;  %v8581_v44 = vld [vmem:[%s14024_s1 + $0x114] sm:$0xf] }
  0x48   : > { %9368 = vmatmul.mubr.msk.bf16.gmra.mrb[24].mxu0 %vm377_vm3, %v10003_v46  ;;  %v8580_v46 = vld [vmem:[%s14024_s1 + $0x110] sm:$0xf] }
  0x49   : > { %9371 = vmatprep.mubr.msk.bf16.mxu0 %vm10043_vm2, %v14030_v6 }
  0x4b   : > { %1170 = vperm.xlu1 %9994, %v8490_v47   ;;  %1158 = vperm.xlu0 %9993, %v8489_v48  }
  0x4f   : > { %1194 = vperm.xlu1 %9994, %v8492_v49   ;;  %1182 = vperm.xlu0 %9993, %v8491_v50   ;;  %v8583_v50 = vld [vmem:[%s14024_s1 + $0x11c] sm:$0xf] }
  0x50   : > { %9372 = vmatmul.mubr.msk.bf16.gmra.mrb[28].mxu0 %vm377_vm3, %v10004_v51  ;;  %v8582_v51 = vld [vmem:[%s14024_s1 + $0x118] sm:$0xf] }
  0x51   : > { %9375 = vmatprep.mubr.msk.bf16.mxu0 %vm10043_vm2, %v14030_v6 }
  0x53   : > { %1218 = vperm.xlu1 %9994, %v8494_v52   ;;  %1206 = vperm.xlu0 %9993, %v8493_v53  }
  0x57   : > { %1242 = vperm.xlu1 %9994, %v8496_v54   ;;  %1230 = vperm.xlu0 %9993, %v8495_v55   ;;  %v8585_v54 = vld [vmem:[%s14024_s1 + $0x124] sm:$0xf]  ;;  %v8584_v55 = vld [vmem:[%s14024_s1 + $0x120] sm:$0xf] }
  0x58   : > { %9376 = vmatmul.mubr.msk.bf16.gmra.mrb[32].mxu0 %vm377_vm3, %v10005_v56 }
  0x59   : > { %9379 = vmatprep.mubr.msk.bf16.mxu0 %vm10043_vm2, %v14030_v6 }
  0x5b   : > { %1266 = vperm.xlu1 %9994, %v8498_v57   ;;  %1254 = vperm.xlu0 %9993, %v8497_v58   ;;  %v8587_v58 = vld [vmem:[%s14024_s1 + $0x12c] sm:$0xf] }
  0x5f   : > { %1290 = vperm.xlu1 %9994, %v8500_v59   ;;  %1278 = vperm.xlu0 %9993, %v8499_v60   ;;  %v8586_v59 = vld [vmem:[%s14024_s1 + $0x128] sm:$0xf] }
  0x60   : > { %9380 = vmatmul.mubr.msk.bf16.gmra.mrb[36].mxu0 %vm377_vm3, %v10006_v61 }
  0x61   : > { %9383 = vmatprep.mubr.msk.bf16.mxu0 %vm10043_vm2, %v14030_v6 }
  0x63   : > { %1314 = vperm.xlu1 %9994, %v8502_v62   ;;  %1302 = vperm.xlu0 %9993, %v8501_v63   ;;  %v8589_v62 = vld [vmem:[%s14024_s1 + $0x134] sm:$0xf]  ;;  %v8588_v63 = vld [vmem:[%s14024_s1 + $0x130] sm:$0xf] }
  0x67   : > { %1338 = vperm.xlu1 %9994, %v8504_v0   ;;  %1326 = vperm.xlu0 %9993, %v8503_v1  }
  0x68   : > { %9384 = vmatmul.mubr.msk.bf16.gmra.mrb[40].mxu0 %vm377_vm3, %v10007_v2  ;;  %v8591_v2 = vld [vmem:[%s14024_s1 + $0x13c] sm:$0xf] }
  0x69   : > { %9387 = vmatprep.mubr.msk.bf16.mxu0 %vm10043_vm2, %v14030_v6 }
  0x6b   : > { %1362 = vperm.xlu1 %9994, %v8506_v3   ;;  %1350 = vperm.xlu0 %9993, %v8505_v4   ;;  %v8590_v3 = vld [vmem:[%s14024_s1 + $0x138] sm:$0xf] }
  0x6f   : > { %1386 = vperm.xlu1 %9994, %v8508_v5   ;;  %1374 = vperm.xlu0 %9993, %v8507_v7   ;;  %v8593_v7 = vld [vmem:[%s14024_s1 + $0x144] sm:$0xf] }
  0x70   : > { %9388 = vmatmul.mubr.msk.bf16.gmra.mrb[44].mxu0 %vm377_vm3, %v10008_v8  ;;  %v8592_v8 = vld [vmem:[%s14024_s1 + $0x140] sm:$0xf] }
  0x71   : > { %9391 = vmatprep.mubr.msk.bf16.mxu0 %vm10043_vm2, %v14030_v6 }
  0x73   : > { %1410 = vperm.xlu1 %9994, %v8510_v9   ;;  %1398 = vperm.xlu0 %9993, %v8509_v10  }
  0x77   : > { %1434 = vperm.xlu1 %9994, %v8512_v11   ;;  %1422 = vperm.xlu0 %9993, %v8511_v12   ;;  %v8595_v11 = vld [vmem:[%s14024_s1 + $0x14c] sm:$0xf]  ;;  %v8594_v12 = vld [vmem:[%s14024_s1 + $0x148] sm:$0xf] }
  0x78   : > { %9392 = vmatmul.mubr.msk.bf16.gmra.mrb[48].mxu0 %vm377_vm3, %v10009_v14 }
  0x79   : > { %9395 = vmatprep.mubr.msk.bf16.mxu0 %vm10043_vm2, %v14030_v6 }
  0x7b   : > { %1458 = vperm.xlu1 %9994, %v8514_v15   ;;  %1446 = vperm.xlu0 %9993, %v8513_v16   ;;  %v8597_v15 = vld [vmem:[%s14024_s1 + $0x154] sm:$0xf]  ;;  %v8596_v16 = vld [vmem:[%s14024_s1 + $0x150] sm:$0xf] }
  0x7f   : > { %1482 = vperm.xlu1 %9994, %v8516_v18   ;;  %1470 = vperm.xlu0 %9993, %v8515_v19   ;;  %v8635_v19 = vld [vmem:[%s14024_s1 + $0x15c] sm:$0xf] }
  0x80   : > { %9396 = vmatmul.mubr.msk.bf16.gmra.mrb[52].mxu0 %vm377_vm3, %v10010_v20  ;;  %v8598_v20 = vld [vmem:[%s14024_s1 + $0x158] sm:$0x1] }
  0x81   : > { %9399 = vmatprep.mubr.msk.bf16.mxu0 %vm10043_vm2, %v14030_v6 }
  0x83   : > { %2297 = vperm.xlu1 %9994, %v8571_v21   ;;  %2285 = vperm.xlu0 %9993, %v8570_v22  }
  0x87   : > { %2321 = vperm.xlu1 %9994, %v8573_v23   ;;  %2309 = vperm.xlu0 %9993, %v8572_v24   ;;  %v8637_v23 = vld [vmem:[%s14024_s1 + $0x164] sm:$0xf]  ;;  %v8636_v24 = vld [vmem:[%s14024_s1 + $0x160] sm:$0xf] }
  0x88   : > { %9400 = vmatmul.mubr.msk.bf16.gmra.mrb[56].mxu0 %vm377_vm3, %v10011_v28  ;;  %v8638_v28 = vld [vmem:[%s14024_s1 + $0x168] sm:$0xf] }
  0x89   : > { %9471 = vmatprep.mubr.msk.bf16.mxu0 %vm10043_vm2, %v14030_v6 }
  0x8b   : > { %2345 = vperm.xlu1 %9994, %v8575_v29   ;;  %2333 = vperm.xlu0 %9993, %v8574_v30  }
  0x8e   : > { %v10392_v36 = vpop.permute.xlu1 %685  ;;  %v662_v37 = vpop.permute.xlu0 %661 }
  0x8f   : > { %2369 = vperm.xlu1 %9994, %v8577_v33   ;;  %2357 = vperm.xlu0 %9993, %v8576_v35   ;;  %v670_v39 = vrot.slane %v662_v37, %v10387_v34  ;;  %v8643_v37 = vld [vmem:[%s14024_s1 + $0x17c] sm:$0xf] }
  0x92   : > { %v10401_v41 = vpop.permute.xlu1 %697  ;;  %v674_v42 = vpop.permute.xlu0 %673 }
  0x93   : > { %v682_v43 = vrot.slane %v674_v42, %v10387_v34  ;;  %2393 = vperm.xlu1 %9994, %v8579_v38   ;;  %2381 = vperm.xlu0 %9993, %v8578_v40   ;;  %v8642_v38 = vld [vmem:[%s14024_s1 + $0x178] sm:$0xf]  ;;  %v8645_v42 = vld [vmem:[%s14024_s1 + $0x184] sm:$0xf] }
  0x95   : > { %v8473_v45 = vcombine.low %v670_v39, %v682_v43  ;;  %v8644_v43 = vld [vmem:[%s14024_s1 + $0x180] sm:$0xf] }
  0x96   : > { %v10410_v47 = vpop.permute.xlu1 %721  ;;  %v10412_v48 = vpop.permute.xlu0 %709 }
  0x97   : > { %v1095_v49 = vmul.bf16 0, %v8473_v45  ;;  %2417 = vperm.xlu1 %9994, %v8581_v44   ;;  %2405 = vperm.xlu0 %9993, %v8580_v46   ;;  %v8647_v46 = vld [vmem:[%s14024_s1 + $0x18c] sm:$0xf] }
  0x99   : > { %9472 = vmatmul.mubr.msk.bf16.vlgmr.msra.gmra.mrb[60].mxu0 %vm1846_vm4, %v1095_v49  ;;  %v8646_v49 = vld [vmem:[%s14024_s1 + $0x188] sm:$0xf] }
  0x9a   : > { %v10421_v52 = vpop.permute.xlu1 %745  ;;  %9475 = vmatprep.mubr.msk.bf16.mxu0 %vm10043_vm2, %v14030_v6  ;;  %v10425_v53 = vpop.permute.xlu0 %733 }
  0x9b   : > { %2441 = vperm.xlu1 %9994, %v8583_v50   ;;  %2429 = vperm.xlu0 %9993, %v8582_v51  }
  0x9e   : > { %v10433_v56 = vpop.permute.xlu1 %769  ;;  %v10435_v57 = vpop.permute.xlu0 %757 }
  0x9f   : > { %2465 = vperm.xlu1 %9994, %v8585_v54   ;;  %2453 = vperm.xlu0 %9993, %v8584_v55   ;;  %v8701_v54 = vld [vmem:[%s14024_s1 + $0x1d4] sm:$0xf]  ;;  %v8700_v55 = vld [vmem:[%s14024_s1 + $0x1d0] sm:$0xf] }
  0xa2   : > { %v10443_v60 = vpop.permute.xlu1 %793  ;;  %v10445_v61 = vpop.permute.xlu0 %781 }
  0xa3   : > { %2489 = vperm.xlu1 %9994, %v8587_v58   ;;  %2477 = vperm.xlu0 %9993, %v8586_v59  }
  0xa6   : > { %v10453_v0 = vpop.permute.xlu1 %817  ;;  %v10455_v1 = vpop.permute.xlu0 %805 }
  0xa7   : > { %2513 = vperm.xlu1 %9994, %v8589_v62   ;;  %2501 = vperm.xlu0 %9993, %v8588_v63   ;;  %v8703_v62 = vld [vmem:[%s14024_s1 + $0x1dc] sm:$0xf]  ;;  %v8702_v63 = vld [vmem:[%s14024_s1 + $0x1d8] sm:$0xf] }
  0xaa   : > { %v10463_v4 = vpop.permute.xlu1 %841  ;;  %v10465_v5 = vpop.permute.xlu0 %829 }
  0xab   : > { %2537 = vperm.xlu1 %9994, %v8591_v2   ;;  %2525 = vperm.xlu0 %9993, %v8590_v3  }
  0xae   : > { %v10473_v9 = vpop.permute.xlu1 %865  ;;  %v10475_v10 = vpop.permute.xlu0 %853 }
  0xaf   : > { %2561 = vperm.xlu1 %9994, %v8593_v7   ;;  %2549 = vperm.xlu0 %9993, %v8592_v8   ;;  %v8705_v8 = vld [vmem:[%s14024_s1 + $0x1e4] sm:$0xf] }
  0xb2   : > { %v10483_v13 = vpop.permute.xlu1 %889  ;;  %v10485_v14 = vpop.permute.xlu0 %877 }
  0xb3   : > { %2585 = vperm.xlu1 %9994, %v8595_v11   ;;  %2573 = vperm.xlu0 %9993, %v8594_v12   ;;  %v8704_v12 = vld [vmem:[%s14024_s1 + $0x1e0] sm:$0xf] }
  0xb6   : > { %v10493_v17 = vpop.permute.xlu1 %913  ;;  %v10495_v18 = vpop.permute.xlu0 %901 }
  0xb7   : > { %2609 = vperm.xlu1 %9994, %v8597_v15   ;;  %2597 = vperm.xlu0 %9993, %v8596_v16  }
  0xba   : > { %v10503_v21 = vpop.permute.xlu1 %937  ;;  %v10505_v22 = vpop.permute.xlu0 %925 }
  0xbb   : > { %3083 = vperm.xlu1 %9994, %v8635_v19   ;;  %2621 = vperm.xlu0 %9993, %v8598_v20   ;;  %v8707_v20 = vld [vmem:[%s14024_s1 + $0x1ec] sm:$0xf] }
  0xbe   : > { %v10513_v25 = vpop.permute.xlu1 %961  ;;  %v10515_v26 = vpop.permute.xlu0 %949 }
  0xbf   : > { %14063 = vst [vmem:[#allocation3_spill] sm:$0xff] %v10515_v26  ;;  %3107 = vperm.xlu1 %9994, %v8637_v23   ;;  %3095 = vperm.xlu0 %9993, %v8636_v24   ;;  %v8706_v23 = vld [vmem:[%s14024_s1 + $0x1e8] sm:$0xf] }
  0xc2   : > { %v10523_v29 = vpop.permute.xlu1 %985  ;;  %v10525_v30 = vpop.permute.xlu0 %973 }
  0xc3   : > { %14064 = vst [vmem:[#allocation4_spill] sm:$0xff] %v10523_v29  ;;  %14065 = vst [vmem:[#allocation5_spill] sm:$0xff] %v10525_v30  ;;  %3131 = vperm.xlu1 %9994, %v8639_v27   ;;  %3119 = vperm.xlu0 %9993, %v8638_v28  }
  0xc6   : > { %v1147_v33 = vpop.permute.xlu1 %1146  ;;  %v10533_v35 = vpop.permute.xlu0 %997 }
  0xc7   : > { %14066 = vst [vmem:[#allocation6_spill] sm:$0xff] %v10533_v35  ;;  %3155 = vperm.xlu1 %9994, %v8641_v31   ;;  %3143 = vperm.xlu0 %9993, %v8640_v32   ;;  %v1155_v11 = vrot.slane %v1147_v33, %v10387_v34  ;;  %v8708_v33 = vld [vmem:[%s14024_s1 + $0x1f0] sm:$0xf] }
  0xca   : > { %v1171_v39 = vpop.permute.xlu1 %1170  ;;  %v1159_v40 = vpop.permute.xlu0 %1158 }
  0xcb   : > { %3179 = vperm.xlu1 %9994, %v8643_v37   ;;  %3167 = vperm.xlu0 %9993, %v8642_v38   ;;  %v1167_v3 = vrot.slane %v1159_v40, %v10387_v34  ;;  %v1179_v32 = vrot.slane %v1171_v39, %v10387_v34  ;;  %v10018_v37 = vld [vmem:[%s14027_s4 + $0x30] sm:$0xff]  }
  0xcc   : > { %v8648_v38 = vld [vmem:[%s14024_s1 + $0x190] sm:$0xf]  ;;  %9596 = vmatpush3.bf16.msra.mxu0 %v10018_v37  ;;  %v8649_v39 = vld [vmem:[%s14024_s1 + $0x194] sm:$0xf] }
  0xcd   : > { %v8517_v16 = vcombine.low %v1155_v11, %v1167_v3  ;;  %9597 = vmatprep.subr.bf16.mxu0 %v14030_v6  ;;  %v10637_v11 = vld [vmem:[%s14026_s3] ss:$0 sm:$0xff] }
  0xce   : > { %v10547_v44 = vpop.permute.xlu1 %1194  ;;  %v1183_v45 = vpop.permute.xlu0 %1182 }
  0xcf   : > { %3203 = vperm.xlu1 %9994, %v8645_v42   ;;  %3191 = vperm.xlu0 %9993, %v8644_v43   ;;  %v1191_v24 = vrot.slane %v1183_v45, %v10387_v34  ;;  %v1566_v28 = vshrl.u32 %v8517_v16, 16 }
  0xd1   : > { %v8518_v40 = vcombine.low %v1179_v32, %v1191_v24  ;;  %v1568_v43 = vrot.slane %v1566_v28, 7 }
  0xd2   : > { %v10555_v50 = vpop.permute.xlu1 %1218  ;;  %v10557_v51 = vpop.permute.xlu0 %1206 }
  0xd3   : > { %3227 = vperm.xlu1 %9994, %v8647_v46   ;;  %3215 = vperm.xlu0 %9993, %v8646_v49   ;;  %v1569_v46 = vshll.u32 %v8517_v16, 16  ;;  %v8709_v49 = vld [vmem:[%s14024_s1 + $0x1f4] sm:$0xf]  ;;  %v8650_v16 = vld [vmem:[%s14024_s1 + $0x198] sm:$0xf] }
  0xd6   : > { %v10565_v58 = vpop.permute.xlu1 %1242  ;;  %v10567_v59 = vpop.permute.xlu0 %1230 }
  0xd7   : > { %4051 = vperm.xlu1 %9994, %v8701_v54   ;;  %4039 = vperm.xlu0 %9993, %v8700_v55   ;;  %v1573_v54 = vshrl.u32 %v8518_v40, 16 }
  0xda   : > { %v10575_v2 = vpop.permute.xlu1 %1266  ;;  %v10578_v7 = vpop.permute.xlu0 %1254 }
  0xdb   : > { %4075 = vperm.xlu1 %9994, %v8703_v62   ;;  %4063 = vperm.xlu0 %9993, %v8702_v63   ;;  %v10019_v62 = vld [vmem:[%s14027_s4 + $0x38] sm:$0xff]   ;;  %v10628_v63 = vor.u32 %v1569_v46, %v1568_v43 }
  0xdc   : > { %9598 = vmatpush3.bf16.msra.mxu0 %v10019_v62 }
  0xdd   : > { %9723 = vmatprep.subr.bf16.mxu0 %v14030_v6  ;;  %v1695_v28 = vmul.bf16 0, %v10628_v63 }
  0xde   : > { %v10587_v15 = vpop.permute.xlu1 %1290  ;;  %v10589_v19 = vpop.permute.xlu0 %1278 }
  0xdf   : > { %4099 = vperm.xlu1 %9994, %v8705_v8   ;;  %4087 = vperm.xlu0 %9993, %v8704_v12   ;;  %v1215_v8 = vrot.slane %v10557_v51, %v10387_v34  ;;  %v8710_v12 = vld [vmem:[%s14024_s1 + $0x1f8] sm:$0xf]  ;;  %v1203_v51 = vrot.slane %v10547_v44, %v10387_v34  ;;  %v8651_v44 = vld [vmem:[%s14024_s1 + $0x19c] sm:$0xf] }
  0xe2   : > { %v10598_v27 = vpop.permute.xlu1 %1314  ;;  %v10600_v31 = vpop.permute.xlu0 %1302 }
  0xe3   : > { %4123 = vperm.xlu1 %9994, %v8707_v20   ;;  %4111 = vperm.xlu0 %9993, %v8706_v23   ;;  %v10648_v20 = vrot.slane %v1573_v54, 7  ;;  %v706_v54 = vrot.slane %v10401_v41, %v10387_v34  ;;  %v1239_v41 = vrot.slane %v10567_v59, %v10387_v34 }
  0xe6   : > { %v10612_v42 = vpop.permute.xlu1 %1338  ;;  %v10614_v45 = vpop.permute.xlu0 %1326 }
  0xe7   : > { %4135 = vperm.xlu1 %9994, %v8708_v33   ;;  %3239 = vperm.xlu0 %9993, %v8648_v38   ;;  %v1576_v38 = vshll.u32 %v8518_v40, 16  ;;  %v8711_v40 = vld [vmem:[%s14024_s1 + $0x1fc] sm:$0xf] }
  0xea   : > { %v10623_v55 = vpop.permute.xlu1 %1362  ;;  %v10630_v3 = vpop.permute.xlu0 %1350 }
  0xeb   : > { %3251 = vperm.xlu1 %9994, %v8649_v39   ;;  %4147 = vperm.xlu0 %9993, %v8709_v49   ;;  %v464_v23 = vpop.f32.mrb[0].mxu0  ;;  %v8519_v39 = vcombine.low %v1203_v51, %v1215_v8  ;;  %v694_v49 = vrot.slane %v10392_v36, %v10387_v34  ;;  %v1578_v8 = vor.u32 %v1576_v38, %v10648_v20 }
  0xec   : > { %v465_v32 = vadd.f32 %v10637_v11, %v464_v23  ;;  %v9345_v33 = vpop.f32.mrb[1].mxu0 }
  0xed   : > { %v467_v46 = vpop.f32.mrb[2].mxu0  ;;  %v1581_v36 = vshrl.u32 %v8519_v39, 16  ;;  %v1579_v59 = vsel %vm627_vm5, %v1568_v43, %v1578_v8  ;;  %v718_v8 = vrot.slane %v10412_v48, %v10387_v34  ;;  %v14068_v48 = vmov 0.0  }
  0xee   : > { %v10650_v24 = vpop.permute.xlu1 %1386  ;;  %v10654_v37 = vpop.permute.xlu0 %1374  ;;  %v468_v62 = vadd.f32 %v10637_v11, %v467_v46  ;;  %v582_v51 = vmax.f32 %v465_v32, 0.0  ;;  %v8712_v46 = vld [vmem:[%s14024_s1 + $0x200] sm:$0xf] }
  0xef   : > { %4159 = vperm.xlu1 %9994, %v8710_v12   ;;  %3263 = vperm.xlu0 %9993, %v8650_v16   ;;  %v9346_v63 = vpop.f32.mrb[3].mxu0  ;;  %v1719_v16 = vshll.u32 %v1695_v28, 16  ;;  %v8652_v32 = vld [vmem:[%s14024_s1 + $0x1a0] sm:$0xf] }
  0xf0   : > { %v583_v23 = vmax.f32 %v468_v62, 0.0  ;;  %v8474_v63 = vcombine.low %v694_v49, %v706_v54 }
  0xf2   : > { %v10668_v12 = vpop.permute.xlu1 %1410  ;;  %v10670_v33 = vpop.permute.xlu0 %1398  ;;  %v10677_v38 = vpack.c.bf16 %v583_v23, %v582_v51  ;;  %v1721_v51 = vrot.slane %v1719_v16, 1  ;;  %v10696_v23 = vrot.slane %v1581_v36, 7  ;;  %v1717_v16 = vshrl.u32 %v1695_v28, 16  ;;  %v8713_v36 = vld [vmem:[%s14024_s1 + $0x204] sm:$0xf] }
  0xf3   : > { %3275 = vperm.xlu1 %9994, %v8651_v44   ;;  %4171 = vperm.xlu0 %9993, %v8711_v40   ;;  %v1227_v44 = vrot.slane %v10555_v50, %v10387_v34  ;;  %v472_v62 = vpop.f32.mrb[4].mxu0  ;;  %v730_v50 = vrot.slane %v10410_v47, %v10387_v34 }
  0xf4   : > { %14067 = vst [vmem:[#allocation7_spill] sm:$0xff] %v10677_v38  ;;  %v473_v40 = vadd.f32 %v10637_v11, %v472_v62  ;;  %v9349_v35 = vpop.f32.mrb[5].mxu0  ;;  %v1096_v30 = vmul.bf16 %v8474_v63, %v10677_v38  ;;  %v10692_v54 = vmul.bf16 %v1579_v59, %v10677_v38  ;;  %v1722_v28 = vor.u32 %v1721_v51, %v1717_v16 }
  0xf5   : > { %v10698_v29 = vcombine.low %v1227_v44, %v1239_v41  ;;  %v475_v43 = vpop.f32.mrb[6].mxu0  ;;  %v8653_v35 = vld [vmem:[%s14024_s1 + $0x1a4] sm:$0xf]  ;;  %v1584_v41 = vshll.u32 %v8519_v39, 16 }
  0xf6   : > { %v10684_v6 = vpop.permute.xlu1 %1434  ;;  %v10689_v49 = vpop.permute.xlu0 %1422  ;;  %9476 = vmatmul.mubr.msk.bf16.gmra.mrb[64].mxu0 %vm1846_vm4, %v1096_v30  ;;  %v1724_v47 = vshll.u32 %v10692_v54, 16  ;;  %v584_v62 = vmax.f32 %v473_v40, 0.0  ;;  %v8714_v40 = vld [vmem:[%s14024_s1 + $0x208] sm:$0xf] }
  0xf7   : > { %4183 = vperm.xlu1 %9994, %v8712_v46   ;;  %3287 = vperm.xlu0 %9993, %v8652_v32   ;;  %v476_v46 = vadd.f32 %v10637_v11, %v475_v43  ;;  %v9350_v63 = vpop.f32.mrb[7].mxu0  ;;  %v1263_v32 = vrot.slane %v10578_v7, %v10387_v34  ;;  %v1586_v39 = vor.u32 %v1584_v41, %v10696_v23  ;;  %v1589_v38 = vshrl.u32 %v10698_v29, 16 }
  0xf8   : > { %9479 = vmatprep.mubr.msk.bf16.mxu0 %vm10043_vm2, %v14068_v48  ;;  %v1726_v43 = vrot.slane %v1724_v47, 1  ;;  %v10016_v63 = vld [vmem:[%s14027_s4 + $0x20] sm:$0xff]   ;;  %v1251_v7 = vrot.slane %v10565_v58, %v10387_v34 }
  0xf9   : > { %v585_v59 = vmax.f32 %v476_v46, 0.0  ;;  %v8475_v46 = vcombine.low %v718_v8, %v730_v50 }
  0xfa   : > { %v10713_v44 = vpop.permute.xlu1 %1458  ;;  %v10717_v30 = vpop.permute.xlu0 %1446  ;;  %v1727_v16 = vsel %vm1715_vm6, %v1722_v28, %v1726_v43  ;;  %v10735_v47 = vcombine.low %v1251_v7, %v1263_v32  ;;  %v754_v32 = vrot.slane %v10421_v52, %v10387_v34  ;;  %v10751_v28 = vrot.slane %v1589_v38, 7 }
  0xfb   : > { %3299 = vperm.xlu1 %9994, %v8653_v35   ;;  %4195 = vperm.xlu0 %9993, %v8713_v36   ;;  %v10729_v51 = vpack.c.bf16 %v585_v59, %v584_v62  ;;  %v8654_v35 = vld [vmem:[%s14024_s1 + $0x1a8] sm:$0xf]  ;;  %v480_v41 = vpop.f32.mrb[8].mxu0  ;;  %v742_v59 = vrot.slane %v10425_v53, %v10387_v34  ;;  %v1287_v52 = vrot.slane %v10589_v19, %v10387_v34 }
  0xfc   : > { %9408 = vmatmul.mubr.msk.bf16.vlgmr.msra.gmra.mrb[0].mxu1 %vm1846_vm4, %v1727_v16  ;;  %v481_v36 = vadd.f32 %v10637_v11, %v480_v41  ;;  %v9353_v26 = vpop.f32.mrb[9].mxu0  ;;  %v10017_v62 = vld [vmem:[%s14027_s4 + $0x28] sm:$0xff]   ;;  %v1597_v19 = vshrl.u32 %v10735_v47, 16 }
  0xfd   : > { %14069 = vst [vmem:[#allocation8_spill] sm:$0xff] %v10729_v51  ;;  %9532 = vmatpush3.bf16.msra.mxu1 %v10016_v63  ;;  %v1097_v50 = vmul.bf16 %v8475_v46, %v10729_v51  ;;  %v483_v7 = vpop.f32.mrb[10].mxu0  ;;  %9411 = vmatprep.mubr.msk.bf16.mxu1 %vm10043_vm2, %v14068_v48  ;;  %v1587_v26 = vsel %vm627_vm5, %v10648_v20, %v1586_v39  ;;  %v8655_v63 = vld [vmem:[%s14024_s1 + $0x1ac] sm:$0xf]  ;;  %v1592_v20 = vshll.u32 %v10698_v29, 16 }
  0xfe   : > { %v10738_v58 = vpop.permute.xlu1 %1482  ;;  %v10742_v8 = vpop.permute.xlu0 %1470  ;;  %v10765_v38 = vmul.bf16 %v1587_v26, %v10729_v51  ;;  %v8715_v46 = vld [vmem:[%s14024_s1 + $0x20c] sm:$0xf]  ;;  %9533 = vmatprep.subr.bf16.mxu1 %v14068_v48  ;;  %v1275_v39 = vrot.slane %v10575_v2, %v10387_v34  ;;  %v8476_v29 = vcombine.low %v742_v59, %v754_v32  ;;  %v10795_v32 = vrot.slane %v1597_v19, 7 }
  0xff   : > { %4207 = vperm.xlu1 %9994, %v8714_v40   ;;  %3311 = vperm.xlu0 %9993, %v8654_v35   ;;  %v484_v40 = vadd.f32 %v10637_v11, %v483_v7  ;;  %v9354_v53 = vpop.f32.mrb[11].mxu0  ;;  %v586_v35 = vmax.f32 %v481_v36, 0.0  ;;  %v1728_v7 = vshrl.u32 %v10692_v54, 16  ;;  %v1594_v2 = vor.u32 %v1592_v20, %v10751_v28 }
 0x100   : > { %9480 = vmatmul.mubr.msk.bf16.gmra.mrb[68].mxu0 %vm1846_vm4, %v1097_v50  ;;  %v1732_v26 = vshll.u32 %v10765_v38, 16  ;;  %v8716_v53 = vld [vmem:[%s14024_s1 + $0x210] sm:$0xf]  ;;  %v10788_v36 = vcombine.low %v1275_v39, %v1287_v52  ;;  %v766_v19 = vrot.slane %v10435_v57, %v10387_v34 }
 0x101   : > { %9483 = vmatprep.mubr.msk.bf16.mxu0 %vm10043_vm2, %v14068_v48  ;;  %v587_v41 = vmax.f32 %v484_v40, 0.0  ;;  %9534 = vmatpush3.bf16.msra.mxu1 %v10017_v62  ;;  %v8656_v62 = vld [vmem:[%s14024_s1 + $0x1b0] sm:$0xf] }
 0x102   : > { %v10775_v16 = vpop.permute.xlu1 %2297  ;;  %v10779_v50 = vpop.permute.xlu0 %2285  ;;  %9659 = vmatprep.subr.bf16.mxu1 %v14068_v48  ;;  %v1734_v54 = vrot.slane %v1732_v26, 1 }
 0x103   : > { %14070 = vst [vmem:[#allocation9_spill] sm:$0xff] %v10779_v50  ;;  %3323 = vperm.xlu1 %9994, %v8655_v63   ;;  %4219 = vperm.xlu0 %9993, %v8715_v46   ;;  %v10790_v40 = vpack.c.bf16 %v587_v41, %v586_v35  ;;  %v1730_v50 = vor.u32 %v1728_v7, %v1726_v43  ;;  %v488_v59 = vpop.f32.mrb[12].mxu0  ;;  %v1600_v35 = vshll.u32 %v10735_v47, 16  ;;  %v1605_v7 = vshrl.u32 %v10788_v36, 16 }
 0x104   : > { %v489_v46 = vadd.f32 %v10637_v11, %v488_v59  ;;  %v9357_v51 = vpop.f32.mrb[13].mxu0  ;;  %v778_v43 = vrot.slane %v10433_v56, %v10387_v34 }
 0x105   : > { %14071 = vst [vmem:[#allocation10_spill] sm:$0xff] %v10790_v40  ;;  %v1735_v20 = vsel %vm1715_vm6, %v1730_v50, %v1734_v54  ;;  %v1098_v52 = vmul.bf16 %v8476_v29, %v10790_v40  ;;  %v491_v41 = vpop.f32.mrb[14].mxu0  ;;  %v1595_v51 = vsel %vm627_vm5, %v10696_v23, %v1594_v2  ;;  %v8657_v50 = vld [vmem:[%s14024_s1 + $0x1b4] sm:$0xf]  ;;  %v1602_v47 = vor.u32 %v1600_v35, %v10795_v32 }
 0x106   : > { %v10797_v63 = vpop.permute.xlu1 %2321  ;;  %v10802_v39 = vpop.permute.xlu0 %2309  ;;  %9412 = vmatmul.mubr.msk.bf16.gmra.mrb[4].mxu1 %vm1846_vm4, %v1735_v20  ;;  %v492_v56 = vadd.f32 %v10637_v11, %v491_v41  ;;  %v1698_v57 = vmul.bf16 %v1595_v51, %v10790_v40  ;;  %v8717_v23 = vld [vmem:[%s14024_s1 + $0x214] sm:$0xf]  ;;  %v1311_v29 = vrot.slane %v10600_v31, %v10387_v34  ;;  %v1736_v20 = vshrl.u32 %v10765_v38, 16  ;;  %v8718_v31 = vld [vmem:[%s14024_s1 + $0x218] sm:$0xf] }
 0x107   : > { %4231 = vperm.xlu1 %9994, %v8716_v53   ;;  %3335 = vperm.xlu0 %9993, %v8656_v62   ;;  %v9358_v26 = vpop.f32.mrb[15].mxu0  ;;  %v588_v53 = vmax.f32 %v489_v46, 0.0  ;;  %v8477_v41 = vcombine.low %v766_v19, %v778_v43  ;;  %v1299_v35 = vrot.slane %v10587_v15, %v10387_v34  ;;  %v10839_v51 = vrot.slane %v1605_v7, 7  ;;  %v8658_v38 = vld [vmem:[%s14024_s1 + $0x1b8] sm:$0xf] }
 0x108   : > { %9484 = vmatmul.mubr.msk.bf16.gmra.mrb[72].mxu0 %vm1846_vm4, %v1098_v52  ;;  %9415 = vmatprep.mubr.msk.bf16.mxu1 %vm10043_vm2, %v14068_v48  ;;  %v589_v62 = vmax.f32 %v492_v56, 0.0  ;;  %v1740_v52 = vshll.u32 %v1698_v57, 16  ;;  %v1738_v46 = vor.u32 %v1736_v20, %v1734_v54  ;;  %v1608_v43 = vshll.u32 %v10788_v36, 16 }
 0x109   : > { %9487 = vmatprep.mubr.msk.bf16.mxu0 %vm10043_vm2, %v14068_v48  ;;  %v10847_v19 = vcombine.low %v1299_v35, %v1311_v29  ;;  %v802_v36 = vrot.slane %v10443_v60, %v10387_v34  ;;  %v8719_v60 = vld [vmem:[%s14024_s1 + $0x21c] sm:$0xf] }
 0x10a   : > { %v10827_v2 = vpop.permute.xlu1 %2345  ;;  %v10831_v59 = vpop.permute.xlu0 %2333  ;;  %v10841_v26 = vpack.c.bf16 %v589_v62, %v588_v53  ;;  %v1742_v56 = vrot.slane %v1740_v52, 1  ;;  %v1603_v62 = vsel %vm627_vm5, %v10751_v28, %v1602_v47  ;;  %v790_v52 = vrot.slane %v10445_v61, %v10387_v34 }
 0x10b   : > { %3347 = vperm.xlu1 %9994, %v8657_v50   ;;  %4243 = vperm.xlu0 %9993, %v8717_v23   ;;  %v496_v15 = vpop.f32.mrb[16].mxu0  ;;  %v1613_v35 = vshrl.u32 %v10847_v19, 16 }
 0x10c   : > { %v497_v23 = vadd.f32 %v10637_v11, %v496_v15  ;;  %v1743_v7 = vsel %vm1715_vm6, %v1738_v46, %v1742_v56  ;;  %v9361_v40 = vpop.f32.mrb[17].mxu0  ;;  %v1099_v53 = vmul.bf16 %v8477_v41, %v10841_v26  ;;  %v1699_v20 = vmul.bf16 %v1603_v62, %v10841_v26 }
 0x10d   : > { %v499_v29 = vpop.f32.mrb[18].mxu0  ;;  %v8659_v40 = vld [vmem:[%s14024_s1 + $0x1bc] sm:$0xf]  ;;  %v1610_v41 = vor.u32 %v1608_v43, %v10839_v51  ;;  %v1744_v46 = vshrl.u32 %v1698_v57, 16  ;;  %v8478_v57 = vcombine.low %v790_v52, %v802_v36 }
 0x10e   : > { %v10849_v50 = vpop.permute.xlu1 %2369  ;;  %v10854_v54 = vpop.permute.xlu0 %2357  ;;  %9416 = vmatmul.mubr.msk.bf16.gmra.mrb[8].mxu1 %vm1846_vm4, %v1743_v7  ;;  %v500_v28 = vadd.f32 %v10637_v11, %v499_v29  ;;  %v590_v43 = vmax.f32 %v497_v23, 0.0  ;;  %v8660_v23 = vld [vmem:[%s14024_s1 + $0x1c0] sm:$0xf] }
 0x10f   : > { %4255 = vperm.xlu1 %9994, %v8718_v31   ;;  %3359 = vperm.xlu0 %9993, %v8658_v38   ;;  %v9362_v47 = vpop.f32.mrb[19].mxu0  ;;  %v1335_v31 = vrot.slane %v10614_v45, %v10387_v34  ;;  %v1748_v38 = vshll.u32 %v1699_v20, 16  ;;  %v1746_v62 = vor.u32 %v1744_v46, %v1742_v56  ;;  %v8720_v45 = vld [vmem:[%s14024_s1 + $0x220] sm:$0xf] }
 0x110   : > { %9488 = vmatmul.mubr.msk.bf16.gmra.mrb[76].mxu0 %vm1846_vm4, %v1099_v53  ;;  %9419 = vmatprep.mubr.msk.bf16.mxu1 %vm10043_vm2, %v14068_v48  ;;  %v591_v15 = vmax.f32 %v500_v28, 0.0  ;;  %v1323_v53 = vrot.slane %v10598_v27, %v10387_v34  ;;  %v10894_v28 = vrot.slane %v1613_v35, 7 }
 0x111   : > { %9491 = vmatprep.mubr.msk.bf16.mxu0 %vm10043_vm2, %v14068_v48  ;;  %v1750_v29 = vrot.slane %v1748_v38, 1 }
 0x112   : > { %v10878_v61 = vpop.permute.xlu1 %2393  ;;  %v10882_v7 = vpop.permute.xlu0 %2381  ;;  %v10889_v47 = vpack.c.bf16 %v591_v15, %v590_v43  ;;  %v1616_v43 = vshll.u32 %v10847_v19, 16 }
 0x113   : > { %14072 = vst [vmem:[#allocation11_spill] sm:$0xff] %v10882_v7  ;;  %3371 = vperm.xlu1 %9994, %v8659_v40   ;;  %4267 = vperm.xlu0 %9993, %v8719_v60   ;;  %v10896_v40 = vcombine.low %v1323_v53, %v1335_v31  ;;  %v504_v7 = vpop.f32.mrb[20].mxu0  ;;  %v1751_v27 = vsel %vm1715_vm6, %v1746_v62, %v1750_v29  ;;  %v8721_v62 = vld [vmem:[%s14024_s1 + $0x224] sm:$0xf] }
 0x114   : > { %v1611_v60 = vsel %vm627_vm5, %v10795_v32, %v1610_v41  ;;  %v505_v36 = vadd.f32 %v10637_v11, %v504_v7  ;;  %v9365_v52 = vpop.f32.mrb[21].mxu0  ;;  %v1100_v46 = vmul.bf16 %v8478_v57, %v10889_v47  ;;  %v826_v31 = vrot.slane %v10453_v0, %v10387_v34  ;;  %v8661_v32 = vld [vmem:[%s14024_s1 + $0x1c4] sm:$0xf] }
 0x115   : > { %v10908_v35 = vmul.bf16 %v1611_v60, %v10889_v47  ;;  %v507_v15 = vpop.f32.mrb[22].mxu0  ;;  %v814_v41 = vrot.slane %v10455_v1, %v10387_v34  ;;  %v1752_v0 = vshrl.u32 %v1699_v20, 16  ;;  %v1621_v57 = vshrl.u32 %v10896_v40, 16 }
 0x116   : > { %v10899_v56 = vpop.permute.xlu1 %2417  ;;  %v10905_v38 = vpop.permute.xlu0 %2405  ;;  %9420 = vmatmul.mubr.msk.bf16.gmra.mrb[12].mxu1 %vm1846_vm4, %v1751_v27  ;;  %v508_v7 = vadd.f32 %v10637_v11, %v507_v15  ;;  %v1359_v1 = vrot.slane %v10630_v3, %v10387_v34  ;;  %v592_v27 = vmax.f32 %v505_v36, 0.0  ;;  %v8722_v3 = vld [vmem:[%s14024_s1 + $0x228] sm:$0xf] }
 0x117   : > { %4279 = vperm.xlu1 %9994, %v8720_v45   ;;  %3383 = vperm.xlu0 %9993, %v8660_v23   ;;  %v9366_v53 = vpop.f32.mrb[23].mxu0  ;;  %v1756_v19 = vshll.u32 %v10908_v35, 16  ;;  %v1618_v45 = vor.u32 %v1616_v43, %v10894_v28  ;;  %v1754_v52 = vor.u32 %v1752_v0, %v1750_v29  ;;  %v1347_v43 = vrot.slane %v10612_v42, %v10387_v34  ;;  %v8662_v36 = vld [vmem:[%s14024_s1 + $0x1c8] sm:$0xf] }
 0x118   : > { %9492 = vmatmul.mubr.msk.bf16.gmra.mrb[80].mxu0 %vm1846_vm4, %v1100_v46  ;;  %9423 = vmatprep.mubr.msk.bf16.mxu1 %vm10043_vm2, %v14068_v48  ;;  %v593_v20 = vmax.f32 %v508_v7, 0.0  ;;  %v8479_v15 = vcombine.low %v814_v41, %v826_v31  ;;  %v10948_v29 = vrot.slane %v1621_v57, 7  ;;  %v850_v57 = vrot.slane %v10463_v4, %v10387_v34 }
 0x119   : > { %9495 = vmatprep.mubr.msk.bf16.mxu0 %vm10043_vm2, %v14068_v48  ;;  %v1758_v46 = vrot.slane %v1756_v19, 1  ;;  %v1619_v0 = vsel %vm627_vm5, %v10839_v51, %v1618_v45  ;;  %v8663_v51 = vld [vmem:[%s14024_s1 + $0x1cc] sm:$0x1]  ;;  %v838_v45 = vrot.slane %v10465_v5, %v10387_v34  ;;  %v1760_v4 = vshrl.u32 %v10908_v35, 16 }
 0x11a   : > { %v10931_v23 = vpop.permute.xlu1 %2441  ;;  %v10935_v60 = vpop.permute.xlu0 %2429  ;;  %v10942_v53 = vpack.c.bf16 %v593_v20, %v592_v27 }
 0x11b   : > { %14073 = vst [vmem:[#allocation12_spill] sm:$0xff] %v10931_v23  ;;  %3395 = vperm.xlu1 %9994, %v8661_v32   ;;  %4291 = vperm.xlu0 %9993, %v8721_v62   ;;  %v1759_v23 = vsel %vm1715_vm6, %v1754_v52, %v1758_v46  ;;  %v10950_v32 = vcombine.low %v1347_v43, %v1359_v1  ;;  %v512_v7 = vpop.f32.mrb[24].mxu0  ;;  %v1624_v1 = vshll.u32 %v10896_v40, 16 }
 0x11c   : > { %14074 = vst [vmem:[#allocation13_spill] sm:$0xff] %v10942_v53  ;;  %v513_v31 = vadd.f32 %v10637_v11, %v512_v7  ;;  %v9369_v41 = vpop.f32.mrb[25].mxu0  ;;  %v1101_v19 = vmul.bf16 %v8479_v15, %v10942_v53  ;;  %v10961_v27 = vmul.bf16 %v1619_v0, %v10942_v53  ;;  %v1383_v15 = vrot.slane %v10654_v37, %v10387_v34  ;;  %v8725_v37 = vld [vmem:[%s14024_s1 + $0x234] sm:$0xf] }
 0x11d   : > { %v515_v20 = vpop.f32.mrb[26].mxu0  ;;  %v1629_v5 = vshrl.u32 %v10950_v32, 16  ;;  %v1762_v41 = vor.u32 %v1760_v4, %v1758_v46 }
 0x11e   : > { %v10952_v42 = vpop.permute.xlu1 %2465  ;;  %v10958_v62 = vpop.permute.xlu0 %2453  ;;  %9424 = vmatmul.mubr.msk.bf16.gmra.mrb[16].mxu1 %vm1846_vm4, %v1759_v23  ;;  %v516_v52 = vadd.f32 %v10637_v11, %v515_v20  ;;  %v1764_v40 = vshll.u32 %v10961_v27, 16  ;;  %v8723_v23 = vld [vmem:[%s14024_s1 + $0x22c] sm:$0xf]  ;;  %v594_v7 = vmax.f32 %v513_v31, 0.0  ;;  %v8480_v20 = vcombine.low %v838_v45, %v850_v57  ;;  %v8724_v31 = vld [vmem:[%s14024_s1 + $0x230] sm:$0xf] }
 0x11f   : > { %4303 = vperm.xlu1 %9994, %v8722_v3   ;;  %3407 = vperm.xlu0 %9993, %v8662_v36   ;;  %v9370_v43 = vpop.f32.mrb[27].mxu0  ;;  %v1626_v3 = vor.u32 %v1624_v1, %v10948_v29  ;;  %v1371_v1 = vrot.slane %v10623_v55, %v10387_v34  ;;  %v11002_v46 = vrot.slane %v1629_v5, 7  ;;  %v874_v5 = vrot.slane %v10473_v9, %v10387_v34 }
 0x120   : > { %9496 = vmatmul.mubr.msk.bf16.gmra.mrb[84].mxu0 %vm1846_vm4, %v1101_v19  ;;  %9427 = vmatprep.mubr.msk.bf16.mxu1 %vm10043_vm2, %v14068_v48  ;;  %v595_v35 = vmax.f32 %v516_v52, 0.0  ;;  %v1766_v19 = vrot.slane %v1764_v40, 1  ;;  %v1768_v9 = vshrl.u32 %v10961_v27, 16 }
 0x121   : > { %9499 = vmatprep.mubr.msk.bf16.mxu0 %vm10043_vm2, %v14068_v48  ;;  %v1627_v4 = vsel %vm627_vm5, %v10894_v28, %v1626_v3  ;;  %v8727_v28 = vld [vmem:[%s14024_s1 + $0x23c] sm:$0xf]  ;;  %v862_v3 = vrot.slane %v10475_v10, %v10387_v34 }
 0x122   : > { %v10985_v36 = vpop.permute.xlu1 %2489  ;;  %v10989_v0 = vpop.permute.xlu0 %2477  ;;  %v10996_v43 = vpack.c.bf16 %v595_v35, %v594_v7 }
 0x123   : > { %14075 = vst [vmem:[#allocation14_spill] sm:$0xff] %v10985_v36  ;;  %3419 = vperm.xlu1 %9994, %v8663_v51   ;;  %4315 = vperm.xlu0 %9993, %v8723_v23   ;;  %v1767_v36 = vsel %vm1715_vm6, %v1762_v41, %v1766_v19  ;;  %v11004_v51 = vcombine.low %v1371_v1, %v1383_v15  ;;  %v520_v52 = vpop.f32.mrb[28].mxu0  ;;  %v1632_v15 = vshll.u32 %v10950_v32, 16 }
 0x124   : > { %v521_v57 = vadd.f32 %v10637_v11, %v520_v52  ;;  %v9373_v45 = vpop.f32.mrb[29].mxu0  ;;  %v1102_v40 = vmul.bf16 %v8480_v20, %v10996_v43  ;;  %v11015_v7 = vmul.bf16 %v1627_v4, %v10996_v43  ;;  %v1407_v20 = vrot.slane %v10670_v33, %v10387_v34  ;;  %v8766_v33 = vld [vmem:[%s14024_s1 + $0x248] sm:$0xf] }
 0x125   : > { %v523_v35 = vpop.f32.mrb[30].mxu0  ;;  %v1637_v10 = vshrl.u32 %v11004_v51, 16  ;;  %v1770_v45 = vor.u32 %v1768_v9, %v1766_v19 }
 0x126   : > { %v11006_v55 = vpop.permute.xlu1 %2513  ;;  %v11012_v23 = vpop.permute.xlu0 %2501  ;;  %9428 = vmatmul.mubr.msk.bf16.gmra.mrb[20].mxu1 %vm1846_vm4, %v1767_v36  ;;  %v524_v41 = vadd.f32 %v10637_v11, %v523_v35  ;;  %v1772_v32 = vshll.u32 %v11015_v7, 16  ;;  %v8726_v36 = vld [vmem:[%s14024_s1 + $0x238] sm:$0xf]  ;;  %v596_v52 = vmax.f32 %v521_v57, 0.0  ;;  %v8481_v35 = vcombine.low %v862_v3, %v874_v5  ;;  %v8765_v57 = vld [vmem:[%s14024_s1 + $0x244] sm:$0xf] }
 0x127   : > { %4339 = vperm.xlu1 %9994, %v8725_v37   ;;  %4327 = vperm.xlu0 %9993, %v8724_v31   ;;  %v9374_v1 = vpop.f32.mrb[31].mxu0  ;;  %v1634_v37 = vor.u32 %v1632_v15, %v11002_v46  ;;  %v1395_v15 = vrot.slane %v10650_v24, %v10387_v34  ;;  %v11056_v19 = vrot.slane %v1637_v10, 7  ;;  %v898_v10 = vrot.slane %v10483_v13, %v10387_v34 }
 0x128   : > { %9500 = vmatmul.mubr.msk.bf16.gmra.mrb[88].mxu0 %vm1846_vm4, %v1102_v40  ;;  %9431 = vmatprep.mubr.msk.bf16.mxu1 %vm10043_vm2, %v14068_v48  ;;  %v597_v27 = vmax.f32 %v524_v41, 0.0  ;;  %v1774_v40 = vrot.slane %v1772_v32, 1  ;;  %v1776_v13 = vshrl.u32 %v11015_v7, 16 }
 0x129   : > { %9503 = vmatprep.mubr.msk.bf16.mxu0 %vm10043_vm2, %v14068_v48  ;;  %v1635_v9 = vsel %vm627_vm5, %v10948_v29, %v1634_v37  ;;  %v8768_v29 = vld [vmem:[%s14024_s1 + $0x250] sm:$0xf]  ;;  %v886_v37 = vrot.slane %v10485_v14, %v10387_v34 }
 0x12a   : > { %v11039_v31 = vpop.permute.xlu1 %2537  ;;  %v11043_v4 = vpop.permute.xlu0 %2525  ;;  %v11050_v1 = vpack.c.bf16 %v597_v27, %v596_v52 }
 0x12b   : > { %14076 = vst [vmem:[#allocation15_spill] sm:$0xff] %v11039_v31  ;;  %14077 = vst [vmem:[#allocation16_spill] sm:$0xff] %v11043_v4  ;;  %4363 = vperm.xlu1 %9994, %v8727_v28   ;;  %4351 = vperm.xlu0 %9993, %v8726_v36   ;;  %v1775_v31 = vsel %vm1715_vm6, %v1770_v45, %v1774_v40  ;;  %v11058_v28 = vcombine.low %v1395_v15, %v1407_v20  ;;  %v528_v41 = vpop.f32.mrb[32].mxu0  ;;  %v1640_v20 = vshll.u32 %v11004_v51, 16 }
 0x12c   : > { %v529_v5 = vadd.f32 %v10637_v11, %v528_v41  ;;  %v9377_v3 = vpop.f32.mrb[33].mxu0  ;;  %v1103_v32 = vmul.bf16 %v8481_v35, %v11050_v1  ;;  %v11069_v52 = vmul.bf16 %v1635_v9, %v11050_v1  ;;  %v1431_v35 = vrot.slane %v10689_v49, %v10387_v34  ;;  %v8769_v49 = vld [vmem:[%s14024_s1 + $0x254] sm:$0xf] }
 0x12d   : > { %v531_v27 = vpop.f32.mrb[34].mxu0  ;;  %v1645_v14 = vshrl.u32 %v11058_v28, 16  ;;  %v1778_v3 = vor.u32 %v1776_v13, %v1774_v40 }
 0x12e   : > { %v11060_v24 = vpop.permute.xlu1 %2561  ;;  %v11066_v36 = vpop.permute.xlu0 %2549  ;;  %9432 = vmatmul.mubr.msk.bf16.gmra.mrb[24].mxu1 %vm1846_vm4, %v1775_v31  ;;  %v532_v45 = vadd.f32 %v10637_v11, %v531_v27  ;;  %v1780_v51 = vshll.u32 %v11069_v52, 16  ;;  %v8767_v31 = vld [vmem:[%s14024_s1 + $0x24c] sm:$0xf]  ;;  %v598_v41 = vmax.f32 %v529_v5, 0.0  ;;  %v8482_v27 = vcombine.low %v886_v37, %v898_v10  ;;  %v8728_v5 = vld [vmem:[%s14024_s1 + $0x240] sm:$0x1] }
 0x12f   : > { %14078 = vst [vmem:[#allocation17_spill] sm:$0xff] %v11060_v24  ;;  %14079 = vst [vmem:[#allocation18_spill] sm:$0xff] %v11066_v36  ;;  %4775 = vperm.xlu1 %9994, %v8766_v33   ;;  %4763 = vperm.xlu0 %9993, %v8765_v57   ;;  %v9378_v15 = vpop.f32.mrb[35].mxu0  ;;  %v1642_v33 = vor.u32 %v1640_v20, %v11056_v19  ;;  %v1419_v20 = vrot.slane %v10668_v12, %v10387_v34  ;;  %v11110_v40 = vrot.slane %v1645_v14, 7 }
 0x130   : > { %9504 = vmatmul.mubr.msk.bf16.gmra.mrb[92].mxu0 %vm1846_vm4, %v1103_v32  ;;  %9435 = vmatprep.mubr.msk.bf16.mxu1 %vm10043_vm2, %v14068_v48  ;;  %v599_v7 = vmax.f32 %v532_v45, 0.0  ;;  %v1782_v32 = vrot.slane %v1780_v51, 1  ;;  %v922_v14 = vrot.slane %v10493_v17, %v10387_v34  ;;  %v1784_v17 = vshrl.u32 %v11069_v52, 16 }
 0x131   : > { %9507 = vmatprep.mubr.msk.bf16.mxu0 %vm10043_vm2, %v14068_v48  ;;  %v1643_v13 = vsel %vm627_vm5, %v11002_v46, %v1642_v33  ;;  %v8830_v46 = vld [vmem:[%s14024_s1 + $0x2b8] sm:$0xf]  ;;  %v910_v33 = vrot.slane %v10495_v18, %v10387_v34 }
 0x132   : > { %v11093_v57 = vpop.permute.xlu1 %2585  ;;  %v11097_v9 = vpop.permute.xlu0 %2573  ;;  %v11104_v15 = vpack.c.bf16 %v599_v7, %v598_v41  ;;  %v1786_v52 = vor.u32 %v1784_v17, %v1782_v32 }
 0x133   : > { %14080 = vst [vmem:[#allocation19_spill] sm:$0xff] %v11093_v57  ;;  %14081 = vst [vmem:[#allocation20_spill] sm:$0xff] %v11097_v9  ;;  %4799 = vperm.xlu1 %9994, %v8768_v29   ;;  %4787 = vperm.xlu0 %9993, %v8767_v31   ;;  %v1783_v57 = vsel %vm1715_vm6, %v1778_v3, %v1782_v32  ;;  %v11112_v29 = vcombine.low %v1419_v20, %v1431_v35  ;;  %v536_v45 = vpop.f32.mrb[36].mxu0  ;;  %v1648_v35 = vshll.u32 %v11058_v28, 16 }
 0x134   : > { %v537_v10 = vadd.f32 %v10637_v11, %v536_v45  ;;  %v9381_v37 = vpop.f32.mrb[37].mxu0  ;;  %v1104_v51 = vmul.bf16 %v8482_v27, %v11104_v15  ;;  %v11123_v41 = vmul.bf16 %v1643_v13, %v11104_v15 }
 0x135   : > { %v539_v7 = vpop.f32.mrb[38].mxu0  ;;  %v1653_v18 = vshrl.u32 %v11112_v29, 16 }
 0x136   : > { %v11114_v12 = vpop.permute.xlu1 %2609  ;;  %v11120_v31 = vpop.permute.xlu0 %2597  ;;  %9436 = vmatmul.mubr.msk.bf16.gmra.mrb[28].mxu1 %vm1846_vm4, %v1783_v57  ;;  %v540_v3 = vadd.f32 %v10637_v11, %v539_v7  ;;  %v1788_v28 = vshll.u32 %v11123_v41, 16  ;;  %v8770_v57 = vld [vmem:[%s14024_s1 + $0x258] sm:$0xf]  ;;  %v1455_v7 = vrot.slane %v10717_v30, %v10387_v34 }
 0x137   : > { %14082 = vst [vmem:[#allocation21_spill] sm:$0xff] %v11114_v12  ;;  %14083 = vst [vmem:[#allocation22_spill] sm:$0xff] %v11120_v31  ;;  %4811 = vperm.xlu1 %9994, %v8769_v49   ;;  %4375 = vperm.xlu0 %9993, %v8728_v5   ;;  %v9382_v20 = vpop.f32.mrb[39].mxu0  ;;  %v1650_v49 = vor.u32 %v1648_v35, %v11110_v40  ;;  %v600_v5 = vmax.f32 %v537_v10, 0.0  ;;  %v8483_v35 = vcombine.low %v910_v33, %v922_v14  ;;  %v8831_v10 = vld [vmem:[%s14024_s1 + $0x2bc] sm:$0xf] }
 0x138   : > { %9508 = vmatmul.mubr.msk.bf16.gmra.mrb[96].mxu0 %vm1846_vm4, %v1104_v51  ;;  %9439 = vmatprep.mubr.msk.bf16.mxu1 %vm10043_vm2, %v14068_v48  ;;  %v601_v45 = vmax.f32 %v540_v3, 0.0  ;;  %v1790_v37 = vrot.slane %v1788_v28, 1  ;;  %v8832_v51 = vld [vmem:[%s14024_s1 + $0x2c0] sm:$0xf]  ;;  %v11162_v32 = vrot.slane %v1653_v18, 7  ;;  %v1443_v14 = vrot.slane %v10684_v6, %v10387_v34 }
 0x139   : > { %9511 = vmatprep.mubr.msk.bf16.mxu0 %vm10043_vm2, %v14068_v48  ;;  %v1651_v17 = vsel %vm627_vm5, %v11056_v19, %v1650_v49  ;;  %v946_v18 = vrot.slane %v10503_v21, %v10387_v34  ;;  %v1656_v19 = vshll.u32 %v11112_v29, 16  ;;  %v8771_v49 = vld [vmem:[%s14024_s1 + $0x25c] sm:$0xf]  ;;  %v1792_v21 = vshrl.u32 %v11123_v41, 16  ;;  %v8833_v29 = vld [vmem:[%s14024_s1 + $0x2c4] sm:$0xf] }
 0x13a   : > { %v11145_v27 = vpop.permute.xlu1 %3083  ;;  %v11149_v13 = vpop.permute.xlu0 %2621  ;;  %v11156_v20 = vpack.c.bf16 %v601_v45, %v600_v5  ;;  %v1791_v31 = vsel %vm1715_vm6, %v1786_v52, %v1790_v37  ;;  %v934_v45 = vrot.slane %v10505_v22, %v10387_v34  ;;  %v11184_v52 = vcombine.low %v1443_v14, %v1455_v7 }
 0x13b   : > { %14084 = vst [vmem:[#allocation23_spill] sm:$0xff] %v11149_v13  ;;  %5720 = vperm.xlu1 %9994, %v8830_v46   ;;  %4823 = vperm.xlu0 %9993, %v8770_v57   ;;  %v544_v46 = vpop.f32.mrb[40].mxu0  ;;  %v1479_v7 = vrot.slane %v10742_v8, %v10387_v34  ;;  %v1794_v41 = vor.u32 %v1792_v21, %v1790_v37  ;;  %v8772_v37 = vld [vmem:[%s14024_s1 + $0x260] sm:$0xf] }
 0x13c   : > { %14085 = vst [vmem:[#allocation24_spill] sm:$0xff] %v11156_v20  ;;  %v545_v30 = vadd.f32 %v10637_v11, %v544_v46  ;;  %v9385_v33 = vpop.f32.mrb[41].mxu0  ;;  %v1105_v28 = vmul.bf16 %v8483_v35, %v11156_v20  ;;  %v11173_v5 = vmul.bf16 %v1651_v17, %v11156_v20  ;;  %v1467_v8 = vrot.slane %v10713_v44, %v10387_v34 }
 0x13d   : > { %v547_v6 = vpop.f32.mrb[42].mxu0 }
 0x13e   : > { %v11164_v3 = vpop.permute.xlu1 %3107  ;;  %v3096_v57 = vpop.permute.xlu0 %3095  ;;  %9440 = vmatmul.mubr.msk.bf16.gmra.mrb[32].mxu1 %vm1846_vm4, %v1791_v31  ;;  %v1796_v22 = vshll.u32 %v11173_v5, 16  ;;  %v1658_v31 = vor.u32 %v1656_v19, %v11162_v32  ;;  %v602_v46 = vmax.f32 %v545_v30, 0.0  ;;  %v8834_v19 = vld [vmem:[%s14024_s1 + $0x2c8] sm:$0xf] }
 0x13f   : > { %5744 = vperm.xlu1 %9994, %v8832_v51   ;;  %5732 = vperm.xlu0 %9993, %v8831_v10   ;;  %v548_v51 = vadd.f32 %v10637_v11, %v547_v6  ;;  %v9386_v35 = vpop.f32.mrb[43].mxu0  ;;  %v3104_v6 = vrot.slane %v3096_v57, %v10387_v34  ;;  %v3092_v57 = vrot.slane %v11145_v27, %v10387_v34 }
 0x140   : > { %9512 = vmatmul.mubr.msk.bf16.gmra.mrb[100].mxu0 %vm1846_vm4, %v1105_v28  ;;  %9443 = vmatprep.mubr.msk.bf16.mxu1 %vm10043_vm2, %v14068_v48  ;;  %v1798_v33 = vrot.slane %v1796_v22, 1  ;;  %v8484_v28 = vcombine.low %v934_v45, %v946_v18  ;;  %v1661_v35 = vshrl.u32 %v11184_v52, 16  ;;  %v1659_v44 = vsel %vm627_vm5, %v11110_v40, %v1658_v31  ;;  %v8773_v31 = vld [vmem:[%s14024_s1 + $0x264] sm:$0xf] }
 0x141   : > { %9515 = vmatprep.mubr.msk.bf16.mxu0 %vm10043_vm2, %v14068_v48  ;;  %v603_v17 = vmax.f32 %v548_v51, 0.0  ;;  %v11222_v51 = vcombine.low %v1467_v8, %v1479_v7  ;;  %v970_v7 = vrot.slane %v10513_v25, %v10387_v34  ;;  %v14087_v8 = vld [vmem:[#allocation3_spill] sm:$0xff]  ;;  %v1664_v25 = vshll.u32 %v11184_v52, 16 }
 0x142   : > { %v11198_v10 = vpop.permute.xlu1 %3131  ;;  %v3120_v14 = vpop.permute.xlu0 %3119  ;;  %v1799_v30 = vsel %vm1715_vm6, %v1794_v41, %v1798_v33  ;;  %v11241_v41 = vrot.slane %v1661_v35, 7 }
 0x143   : > { %4835 = vperm.xlu1 %9994, %v8771_v49   ;;  %5756 = vperm.xlu0 %9993, %v8833_v29   ;;  %v11209_v13 = vpack.c.bf16 %v603_v17, %v602_v46  ;;  %v3128_v18 = vrot.slane %v3120_v14, %v10387_v34  ;;  %v552_v45 = vpop.f32.mrb[44].mxu0  ;;  %v3116_v17 = vrot.slane %v11164_v3, %v10387_v34  ;;  %v1672_v12 = vshll.u32 %v11222_v51, 16 }
 0x144   : > { %v553_v21 = vadd.f32 %v10637_v11, %v552_v45  ;;  %v9389_v22 = vpop.f32.mrb[45].mxu0  ;;  %v11233_v14 = vcombine.low %v3092_v57, %v3104_v6  ;;  %v8835_v6 = vld [vmem:[%s14024_s1 + $0x2cc] sm:$0xf]  ;;  %v1669_v57 = vshrl.u32 %v11222_v51, 16 }
 0x145   : > { %14086 = vst [vmem:[#allocation25_spill] sm:$0xff] %v11209_v13  ;;  %v1106_v29 = vmul.bf16 %v8484_v28, %v11209_v13  ;;  %v11229_v27 = vmul.bf16 %v1659_v44, %v11209_v13  ;;  %v555_v40 = vpop.f32.mrb[46].mxu0  ;;  %v11254_v35 = vcombine.low %v3116_v17, %v3128_v18  ;;  %v1666_v17 = vor.u32 %v1664_v25, %v11241_v41 }
 0x146   : > { %v11218_v49 = vpop.permute.xlu1 %3155  ;;  %v11226_v46 = vpop.permute.xlu0 %3143  ;;  %9444 = vmatmul.mubr.msk.bf16.gmra.mrb[36].mxu1 %vm1846_vm4, %v1799_v30  ;;  %v556_v28 = vadd.f32 %v10637_v11, %v555_v40  ;;  %v958_v30 = vrot.slane %v14087_v8, %v10387_v34  ;;  %v604_v45 = vmax.f32 %v553_v21, 0.0  ;;  %v3503_v52 = vshll.u32 %v11233_v14, 16  ;;  %v8774_v21 = vld [vmem:[%s14024_s1 + $0x268] sm:$0xf] }
 0x147   : > { %5768 = vperm.xlu1 %9994, %v8834_v19   ;;  %4847 = vperm.xlu0 %9993, %v8772_v37   ;;  %v9390_v19 = vpop.f32.mrb[47].mxu0  ;;  %v1804_v3 = vshll.u32 %v11229_v27, 16  ;;  %v1800_v37 = vshrl.u32 %v11173_v5, 16  ;;  %v8836_v5 = vld [vmem:[%s14024_s1 + $0x2d0] sm:$0xf]  ;;  %v11283_v8 = vrot.slane %v1669_v57, 7 }
 0x148   : > { %9516 = vmatmul.mubr.msk.bf16.gmra.mrb[104].mxu0 %vm1846_vm4, %v1106_v29  ;;  %9447 = vmatprep.mubr.msk.bf16.mxu1 %vm10043_vm2, %v14068_v48  ;;  %v605_v44 = vmax.f32 %v556_v28, 0.0  ;;  %v8485_v28 = vcombine.low %v958_v30, %v970_v7  ;;  %v3510_v19 = vshll.u32 %v11254_v35, 16  ;;  %v3140_v7 = vrot.slane %v11198_v10, %v10387_v34 }
 0x149   : > { %9519 = vmatprep.mubr.msk.bf16.mxu0 %vm10043_vm2, %v14068_v48  ;;  %v11264_v29 = vrot.slane %v1804_v3, 1  ;;  %v1802_v18 = vor.u32 %v1800_v37, %v1798_v33  ;;  %v1674_v51 = vor.u32 %v1672_v12, %v11283_v8  ;;  %v1491_v12 = vrot.slane %v10738_v58, %v10387_v34  ;;  %v14093_v58 = vld [vmem:[#allocation6_spill] sm:$0xff] }
 0x14a   : > { %v11256_v11 = vpop.permute.xlu1 %3179  ;;  %v11262_v22 = vpop.permute.xlu0 %3167  ;;  %v11271_v40 = vpack.c.bf16 %v605_v44, %v604_v45  ;;  %v11287_v45 = vrot.slane %v3503_v52, 1  ;;  %v8775_v52 = vld [vmem:[%s14024_s1 + $0x26c] sm:$0xf] }
 0x14b   : > { %4859 = vperm.xlu1 %9994, %v8773_v31   ;;  %5780 = vperm.xlu0 %9993, %v8835_v6   ;;  %v3152_v31 = vrot.slane %v11226_v46, %v10387_v34  ;;  %v560_v33 = vpop.f32.mrb[48].mxu0  ;;  %v1807_v3 = vsel %vm1715_vm6, %v1802_v18, %v11264_v29  ;;  %v11294_v46 = vld [vmem:[%s14026_s3] ss:$0 sm:$0xff]  ;;  %v14089_v18 = vld [vmem:[#allocation4_spill] sm:$0xff] }
 0x14c   : > { %14088 = vst [vmem:[#allocation3_spill] sm:$0xff] %v11271_v40  ;;  %v9393_v25 = vpop.f32.mrb[49].mxu0  ;;  %v561_v30 = vadd.f32 %v11294_v46, %v560_v33  ;;  %v1107_v44 = vmul.bf16 %v8485_v28, %v11271_v40  ;;  %v994_v10 = vrot.slane %v14089_v18, %v10387_v34  ;;  %v1667_v28 = vsel %vm627_vm5, %v11162_v32, %v1666_v17 }
 0x14d   : > { %v563_v57 = vpop.f32.mrb[50].mxu0  ;;  %v3506_v33 = vshrl.u32 %v11233_v14, 16  ;;  %v11315_v18 = vcombine.low %v3140_v7, %v3152_v31  ;;  %v1707_v32 = vmul.bf16 %v1667_v28, %v11271_v40  ;;  %v8838_v31 = vld [vmem:[%s14024_s1 + $0x2d8] sm:$0xf] }
 0x14e   : > { %v11281_v6 = vpop.permute.xlu1 %3203  ;;  %v11285_v37 = vpop.permute.xlu0 %3191  ;;  %9448 = vmatmul.mubr.msk.bf16.gmra.mrb[40].mxu1 %vm1846_vm4, %v1807_v3  ;;  %v3512_v3 = vrot.slane %v3510_v19, 1  ;;  %v606_v17 = vmax.f32 %v561_v30, 0.0 }
 0x14f   : > { %5792 = vperm.xlu1 %9994, %v8836_v5   ;;  %4871 = vperm.xlu0 %9993, %v8774_v21   ;;  %v14090_v5 = vld [vmem:[#allocation5_spill] sm:$0xff]  ;;  %v9394_v9 = vpop.f32.mrb[51].mxu0  ;;  %v8837_v21 = vld [vmem:[%s14024_s1 + $0x2d4] sm:$0xf]  ;;  %v3508_v14 = vor.u32 %v3506_v33, %v11287_v45  ;;  %v3518_v30 = vshll.u32 %v11315_v18, 16 }
 0x150   : > { %v982_v25 = vrot.slane %v14090_v5, %v10387_v34  ;;  %9451 = vmatprep.mubr.msk.bf16.mxu1 %vm10043_vm2, %v14068_v48  ;;  %v564_v5 = vadd.f32 %v11294_v46, %v563_v57  ;;  %9520 = vmatmul.mubr.msk.bf16.gmra.mrb[108].mxu0 %vm1846_vm4, %v1107_v44  ;;  %v1808_v57 = vshrl.u32 %v11229_v27, 16  ;;  %v1812_v44 = vshll.u32 %v1707_v32, 16 }
 0x151   : > { %9523 = vmatprep.mubr.msk.bf16.mxu0 %vm10043_vm2, %v14068_v48  ;;  %v3513_v28 = vsel %vm1715_vm6, %v3508_v14, %v3512_v3  ;;  %v1006_v27 = vrot.slane %v14093_v58, %v10387_v34  ;;  %v1675_v14 = vsel %vm627_vm5, %v11241_v41, %v1674_v51  ;;  %v14094_v41 = vld [vmem:[#allocation7_spill] sm:$0xff] }
 0x152   : > { %v11319_v9 = vpop.permute.xlu1 %3227  ;;  %v11322_v36 = vpop.permute.xlu0 %3215  ;;  %v607_v19 = vmax.f32 %v564_v5, 0.0  ;;  %v8486_v7 = vcombine.low %v982_v25, %v994_v10  ;;  %v1810_v5 = vor.u32 %v1808_v57, %v11264_v29  ;;  %v1814_v24 = vrot.slane %v1812_v44, 1  ;;  %v8777_v29 = vld [vmem:[%s14024_s1 + $0x274] sm:$0xf] }
 0x153   : > { %4883 = vperm.xlu1 %9994, %v8775_v52   ;;  %5804 = vperm.xlu0 %9993, %v8837_v21   ;;  %v8776_v52 = vld [vmem:[%s14024_s1 + $0x270] sm:$0xf]  ;;  %v3176_v21 = vrot.slane %v11262_v22, %v10387_v34  ;;  %v568_v10 = vpop.f32.mrb[52].mxu0  ;;  %v3164_v22 = vrot.slane %v11218_v49, %v10387_v34  ;;  %v11364_v51 = vmul.bf16 %v3513_v28, %v14094_v41  ;;  %v3520_v44 = vrot.slane %v3518_v30, 1 }
 0x154   : > { %v11341_v33 = vpack.c.bf16 %v607_v19, %v606_v17  ;;  %v9397_v40 = vpop.f32.mrb[53].mxu0  ;;  %v569_v17 = vadd.f32 %v11294_v46, %v568_v10  ;;  %v1815_v49 = vsel %vm1715_vm6, %v1810_v5, %v1814_v24  ;;  %v1816_v5 = vshrl.u32 %v1707_v32, 16 }
 0x155   : > { %v571_v19 = vpop.f32.mrb[54].mxu0  ;;  %v8531_v40 = vcombine.low %v1491_v12, %v1491_v12 }
 0x156   : > { %14091 = vst [vmem:[#allocation4_spill] sm:$0xff] %v11341_v33  ;;  %v11343_v25 = vpop.permute.xlu1 %4051  ;;  %v11348_v4 = vpop.permute.xlu0 %4039  ;;  %v11357_v58 = vmul.bf16 %v1675_v14, %v11341_v33  ;;  %9452 = vmatmul.mubr.msk.bf16.gmra.mrb[44].mxu1 %vm1846_vm4, %v1815_v49  ;;  %v572_v10 = vadd.f32 %v11294_v46, %v571_v19  ;;  %v8840_v46 = vld [vmem:[%s14024_s1 + $0x2e0] sm:$0xf]  ;;  %v3658_v49 = vshrl.u32 %v11364_v51, 16 }
 0x157   : > { %14092 = vst [vmem:[#allocation5_spill] sm:$0xff] %v11343_v25  ;;  %5816 = vperm.xlu1 %9994, %v8838_v31   ;;  %v1108_v25 = vmul.bf16 %v8486_v7, %v11341_v33  ;;  %4895 = vperm.xlu0 %9993, %v8776_v52   ;;  %v3514_v31 = vshrl.u32 %v11254_v35, 16  ;;  %v9398_v57 = vpop.f32.mrb[55].mxu0  ;;  %v8839_v7 = vld [vmem:[%s14024_s1 + $0x2dc] sm:$0xf]  ;;  %v11370_v52 = vcombine.low %v3164_v22, %v3176_v21  ;;  %v608_v21 = vmax.f32 %v569_v17, 0.0 }
 0x158   : > { %v1820_v12 = vshll.u32 %v11357_v58, 16  ;;  %9455 = vmatprep.mubr.msk.bf16.mxu1 %vm10043_vm2, %v14068_v48  ;;  %v609_v14 = vmax.f32 %v572_v10, 0.0  ;;  %v1677_v19 = vshll.u32 %v8531_v40, 16  ;;  %v1818_v57 = vor.u32 %v1816_v5, %v1814_v24 }
 0x159   : > { %9524 = vmatmul.mubr.msk.bf16.gmra.mrb[112].mxu0 %vm1846_vm4, %v1108_v25  ;;  %v3516_v30 = vor.u32 %v3514_v31, %v3512_v3  ;;  %v8487_v25 = vcombine.low %v1006_v27, %v1006_v27  ;;  %v8778_v3 = vld [vmem:[%s14024_s1 + $0x278] sm:$0xf]  ;;  %v3526_v17 = vshll.u32 %v11370_v52, 16  ;;  %v3633_v40 = vmul.bf16 0, %v11287_v45 }
 0x15a   : > { %v11375_v35 = vpop.permute.xlu1 %4075  ;;  %v11380_v28 = vpop.permute.xlu0 %4063  ;;  %v1822_v22 = vrot.slane %v1820_v12, 1  ;;  %9527 = vmatprep.mubr.msk.bf16.mxu0 %vm10043_vm2, %v14068_v48  ;;  %v11395_v31 = vpack.c.bf16 %v609_v14, %v608_v21  ;;  %v1679_v24 = vsel %vm627_vm5, %v11283_v8, %v1677_v19  ;;  %v8779_v8 = vld [vmem:[%s14024_s1 + $0x27c] sm:$0xf]  ;;  %v11422_v19 = vrot.slane %v3658_v49, 7 }
 0x15b   : > { %4907 = vperm.xlu1 %9994, %v8777_v29   ;;  %5828 = vperm.xlu0 %9993, %v8839_v7   ;;  %v3521_v32 = vsel %vm1715_vm6, %v3516_v30, %v3520_v44  ;;  %v3200_v29 = vrot.slane %v11285_v37, %v10387_v34  ;;  %v11399_v27 = vpop.f32.mrb[56].mxu0  ;;  %v2306_v37 = vrot.slane %v10775_v16, %v10387_v34  ;;  %v14099_v49 = vld [vmem:[#allocation9_spill] sm:$0xff] }
 0x15c   : > { %14095 = vst [vmem:[#allocation6_spill] sm:$0xff] %v11395_v31  ;;  %14096 = vst [vmem:[#allocation7_spill] sm:$0xff] %v11399_v27  ;;  %v1823_v10 = vsel %vm1715_vm6, %v1818_v57, %v1822_v22  ;;  %v9401_v5 = vpop.f32.mrb[57].mxu0  ;;  %v3188_v30 = vrot.slane %v11256_v11, %v10387_v34  ;;  %v1109_v21 = vmul.bf16 %v8487_v25, %v11395_v31  ;;  %v14098_v11 = vld [vmem:[#allocation8_spill] sm:$0xff]  ;;  %v8841_v25 = vld [vmem:[%s14024_s1 + $0x2e4] sm:$0xf] }
 0x15d   : > { %v11413_v14 = vmul.bf16 %v1679_v24, %v11395_v31  ;;  %v579_v45 = vpop.f32.mrb[58].mxu0  ;;  %v2318_v16 = vrot.slane %v10802_v39, %v10387_v34  ;;  %v11425_v57 = vmul.bf16 %v3521_v32, %v14098_v11  ;;  %v3522_v24 = vshrl.u32 %v11315_v18, 16 }
 0x15e   : > { %v11397_v7 = vpop.permute.xlu1 %4099  ;;  %v11405_v12 = vpop.permute.xlu0 %4087  ;;  %v3528_v5 = vrot.slane %v3526_v17, 1  ;;  %v11431_v45 = vcombine.low %v3188_v30, %v3200_v29  ;;  %9456 = vmatmul.mubr.msk.bf16.gmra.mrb[48].mxu1 %vm1846_vm4, %v1823_v10  ;;  %v2294_v32 = vrot.slane %v14099_v49, %v10387_v34  ;;  %v3654_v27 = vshrl.u32 %v3633_v40, 16  ;;  %v8842_v40 = vld [vmem:[%s14024_s1 + $0x2e8] sm:$0xf] }
 0x15f   : > { %14097 = vst [vmem:[#allocation26_spill] sm:$0xff] %v11405_v12  ;;  %5840 = vperm.xlu1 %9994, %v8840_v46   ;;  %4919 = vperm.xlu0 %9993, %v8778_v3   ;;  %v2330_v46 = vrot.slane %v10797_v63, %v10387_v34  ;;  %v9402_v3 = vpop.f32.mrb[59].mxu0  ;;  %v1828_v39 = vshll.u32 %v11413_v14, 16  ;;  %v3661_v12 = vshll.u32 %v11364_v51, 16  ;;  %v1824_v17 = vshrl.u32 %v11357_v58, 16 }
 0x160   : > { %9459 = vmatprep.mubr.msk.bf16.mxu1 %vm10043_vm2, %v14068_v48  ;;  %v3524_v29 = vor.u32 %v3522_v24, %v3520_v44  ;;  %v8780_v58 = vld [vmem:[%s14024_s1 + $0x280] sm:$0xf]  ;;  %v3666_v44 = vshrl.u32 %v11425_v57, 16  ;;  %v3224_v3 = vrot.slane %v11322_v36, %v10387_v34  ;;  %v2342_v49 = vrot.slane %v10831_v59, %v10387_v34  ;;  %v8781_v36 = vld [vmem:[%s14024_s1 + $0x284] sm:$0xf] }
 0x161   : > { %9528 = vmatmul.mubr.msk.bf16.gmra.mrb[116].mxu0 %vm1846_vm4, %v1109_v21  ;;  %v1830_v10 = vrot.slane %v1828_v39, 1  ;;  %v11451_v30 = vcombine.low %v2318_v16, %v2330_v46  ;;  %v1826_v51 = vor.u32 %v1824_v17, %v1822_v22  ;;  %v3663_v21 = vor.u32 %v3661_v12, %v11422_v19 }
 0x162   : > { %v11435_v63 = vpop.permute.xlu1 %4123  ;;  %v11443_v18 = vpop.permute.xlu0 %4111  ;;  %9599 = vmatprep.mubr.msk.bf16.mxu0 %vm10043_vm2, %v14068_v48  ;;  %v11464_v46 = vcombine.low %v2294_v32, %v2306_v37  ;;  %v3656_v22 = vrot.slane %v3654_v27, 7  ;;  %v2354_v39 = vrot.slane %v10827_v2, %v10387_v34  ;;  %v3212_v17 = vrot.slane %v11281_v6, %v10387_v34  ;;  %v14100_v37 = vld [vmem:[#allocation10_spill] sm:$0xff]  ;;  %v8843_v2 = vld [vmem:[%s14024_s1 + $0x2ec] sm:$0xf]  ;;  %v10022_v6 = vld [vmem:[%s14027_s4 + $0x50] sm:$0xff]  }
 0x163   : > { %4931 = vperm.xlu1 %9994, %v8779_v8   ;;  %5852 = vperm.xlu0 %9993, %v8841_v25   ;;  %v3529_v8 = vsel %vm1715_vm6, %v3524_v29, %v3528_v5  ;;  %v3534_v25 = vshll.u32 %v11431_v45, 16  ;;  %v1831_v12 = vsel %vm1715_vm6, %v1826_v51, %v1830_v10  ;;  %v14040_v27 = vrot.slane %v11451_v30, 7 }
 0x164   : > { %v11480_v32 = vmul.bf16 %v3529_v8, %v14100_v37  ;;  %v3664_v29 = vsel %vm627_vm5, %v3656_v22, %v3663_v21  ;;  %v11486_v59 = vrot.slane %v3666_v44, 7  ;;  %v3530_v10 = vshrl.u32 %v11370_v52, 16 }
 0x165   : > { %v11492_v51 = vcombine.low %v3212_v17, %v3224_v3  ;;  %v3669_v8 = vshll.u32 %v11425_v57, 16  ;;  %v11504_v52 = vcombine.low %v2342_v49, %v2354_v39  ;;  %v8844_v3 = vld [vmem:[%s14024_s1 + $0x2f0] sm:$0xf]  ;;  %v8782_v57 = vld [vmem:[%s14024_s1 + $0x288] sm:$0xf]  ;;  %v10023_v49 = vld [vmem:[%s14027_s4 + $0x58] sm:$0xff]  }
 0x166   : > { %v11462_v24 = vpop.permute.xlu1 %4135  ;;  %v11467_v16 = vpop.permute.xlu0 %3239  ;;  %9460 = vmatmul.mubr.msk.bf16.gmra.mrb[52].mxu1 %vm1846_vm4, %v1831_v12 }
 0x167   : > { %5864 = vperm.xlu1 %9994, %v8842_v40   ;;  %4943 = vperm.xlu0 %9993, %v8780_v58   ;;  %v3536_v40 = vrot.slane %v3534_v25, 1  ;;  %v2704_v58 = vrot.slane %v11464_v46, 7  ;;  %v3532_v25 = vor.u32 %v3530_v10, %v3528_v5  ;;  %v3671_v12 = vor.u32 %v3669_v8, %v11486_v59 }
 0x168   : > { %9463 = vmatprep.mubr.msk.bf16.mxu1 %vm10043_vm2, %v14068_v48  ;;  %v3674_v5 = vshrl.u32 %v11480_v32, 16 }
 0x169   : > { %9600 = vmatmul.mubr.msk.bf16.vlgmr.msra.gmra.mrb[120].mxu0 %vm1846_vm4, %v3664_v29  ;;  %v2706_v22 = vsel %vm626_vm7, %v2704_v58, %v14040_v27  ;;  %v3537_v17 = vsel %vm1715_vm6, %v3532_v25, %v3536_v40  ;;  %v3248_v29 = vrot.slane %v11467_v16, %v10387_v34  ;;  %v3236_v25 = vrot.slane %v11319_v9, %v10387_v34  ;;  %v8783_v16 = vld [vmem:[%s14024_s1 + $0x28c] sm:$0xf]  ;;  %v8845_v9 = vld [vmem:[%s14024_s1 + $0x2f4] sm:$0xf] }
 0x16a   : > { %v11496_v21 = vpop.permute.xlu1 %3251  ;;  %v11501_v44 = vpop.permute.xlu0 %4147  ;;  %9603 = vmatprep.mubr.msk.bf16.mxu0 %vm10043_vm2, %v14068_v48  ;;  %9724 = vmatpush3.bf16.msra.mxu0 %v10022_v6 }
 0x16b   : > { %14101 = vst [vmem:[#allocation8_spill] sm:$0xff] %v11501_v44  ;;  %4955 = vperm.xlu1 %9994, %v8781_v36   ;;  %5876 = vperm.xlu0 %9993, %v8843_v2   ;;  %v3542_v36 = vshll.u32 %v11492_v51, 16  ;;  %v1832_v44 = vshrl.u32 %v11413_v14, 16  ;;  %v2366_v14 = vrot.slane %v10854_v54, %v10387_v34  ;;  %v3677_v54 = vshll.u32 %v11480_v32, 16  ;;  %v8784_v32 = vld [vmem:[%s14024_s1 + $0x290] sm:$0xf] }
 0x16c   : > { %v11511_v46 = vpop.f32.mrb[60].mxu0  ;;  %9725 = vmatprep.subr.bf16.mxu0 %v14068_v48 }
 0x16d   : > { %v9473_v39 = vpop.f32.mrb[61].mxu0  ;;  %v3544_v27 = vrot.slane %v3542_v36, 1 }
 0x16e   : > { %v11528_v2 = vpop.permute.xlu1 %4159  ;;  %v11530_v10 = vpop.f32.mrb[62].mxu0  ;;  %v2749_v39 = vmul.bf16 %v2706_v22, %v14094_v41  ;;  %v3672_v22 = vsel %vm627_vm5, %v11422_v19, %v3671_v12  ;;  %9726 = vmatpush3.bf16.msra.mxu0 %v10023_v49  ;;  %9464 = vmatmul.mubr.msk.bf16.gmra.mrb[56].mxu1 %vm1846_vm4, %v1832_v44  ;;  %v2748_v12 = vmul.bf16 0, %v2704_v58  ;;  %v14103_v58 = vrot.slane %v11504_v52, 7 }
 0x16f   : > { %14102 = vst [vmem:[#allocation9_spill] sm:$0xff] %v11528_v2  ;;  %v3264_v8 = vpop.permute.xlu0 %3263  ;;  %5888 = vperm.xlu1 %9994, %v8844_v3   ;;  %v9474_v6 = vpop.f32.mrb[63].mxu0  ;;  %4967 = vperm.xlu0 %9993, %v8782_v57   ;;  %v2378_v2 = vrot.slane %v10849_v50, %v10387_v34  ;;  %v11544_v3 = vmul.bf16 %v3537_v17, %v10841_v26  ;;  %v3538_v57 = vshrl.u32 %v11431_v45, 16  ;;  %v8846_v45 = vld [vmem:[%s14024_s1 + $0x2f8] sm:$0xf]  ;;  %v14104_v17 = vrot.slane %v11451_v30, 7 }
 0x170   : > { %v11551_v6 = vrot.slane %v3674_v5, 7  ;;  %v11556_v50 = vcombine.low %v3236_v25, %v3248_v29  ;;  %9535 = vmatprep.mubr.msk.bf16.mxu1 %vm10043_vm2, %v14068_v48  ;;  %v2785_v44 = vrot.slane %v2749_v39, 1  ;;  %9851 = vmatprep.subr.bf16.mxu0 %v14068_v48  ;;  %v3272_v30 = vrot.slane %v3264_v8, %v10387_v34 }
 0x171   : > { %9604 = vmatmul.mubr.msk.bf16.gmra.mrb[124].mxu0 %vm1846_vm4, %v3672_v22  ;;  %v3540_v49 = vor.u32 %v3538_v57, %v3536_v40  ;;  %v2708_v36 = vsel %vm626_vm7, %v14104_v17, %v14103_v58  ;;  %v3682_v40 = vshrl.u32 %v11544_v3, 16  ;;  %v11583_v25 = vcombine.low %v2366_v14, %v2378_v2  ;;  %v10020_v57 = vld [vmem:[%s14027_s4 + $0x40] sm:$0xff]   ;;  %v14106_v2 = vld [vmem:[#allocation11_spill] sm:$0xff] }
 0x172   : > { %v11560_v19 = vpop.permute.xlu1 %3275  ;;  %9607 = vmatprep.mubr.msk.bf16.mxu0 %vm10043_vm2, %v14068_v48  ;;  %v3679_v29 = vor.u32 %v3677_v54, %v11551_v6  ;;  %v2402_v58 = vrot.slane %v10878_v61, %v10387_v34  ;;  %v2390_v14 = vrot.slane %v14106_v2, %v10387_v34  ;;  %v2750_v8 = vmul.bf16 %v2708_v36, %v14098_v11  ;;  %v8785_v61 = vld [vmem:[%s14024_s1 + $0x294] sm:$0xf]  ;;  %v8847_v2 = vld [vmem:[%s14024_s1 + $0x2fc] sm:$0xf] }
 0x173   : > { %v11564_v5 = vpop.permute.xlu0 %4171  ;;  %4979 = vperm.xlu1 %9994, %v8783_v16   ;;  %5900 = vperm.xlu0 %9993, %v8845_v9   ;;  %v3545_v39 = vsel %vm1715_vm6, %v3540_v49, %v3544_v27  ;;  %v3550_v16 = vshll.u32 %v11556_v50, 16  ;;  %v2784_v9 = vrot.slane %v2748_v12, 1  ;;  %v3260_v49 = vrot.slane %v11496_v21, %v10387_v34 }
 0x174   : > { %v11601_v12 = vmul.bf16 %v3545_v39, %v10889_v47  ;;  %v11612_v21 = vrot.slane %v3682_v40, 7  ;;  %v2709_v36 = vrot.slane %v11583_v25, 7  ;;  %v3685_v40 = vshll.u32 %v11544_v3, 16 }
 0x175   : > { %v2786_v17 = vsel %vm2783_vm8, %v2784_v9, %v2785_v44  ;;  %v3552_v39 = vrot.slane %v3550_v16, 1  ;;  %v11630_v25 = vcombine.low %v2390_v14, %v2402_v58  ;;  %v14107_v58 = vrot.slane %v11504_v52, 7 }
 0x176   : > { %v11588_v22 = vpop.permute.xlu1 %4183  ;;  %9536 = vmatmul.mubr.msk.bf16.vlgmr.msra.gmra.mrb[60].mxu1 %vm1846_vm4, %v2786_v17  ;;  %v3687_v9 = vor.u32 %v3685_v40, %v11612_v21  ;;  %v3690_v3 = vshrl.u32 %v11601_v12, 16  ;;  %v2426_v52 = vrot.slane %v10899_v56, %v10387_v34 }
 0x177   : > { %14105 = vst [vmem:[#allocation10_spill] sm:$0xff] %v11588_v22  ;;  %v3288_v54 = vpop.permute.xlu0 %3287  ;;  %5912 = vperm.xlu1 %9994, %v8846_v45   ;;  %4991 = vperm.xlu0 %9993, %v8784_v32   ;;  %v3680_v45 = vsel %vm627_vm5, %v11486_v59, %v3679_v29  ;;  %v3546_v32 = vshrl.u32 %v11492_v51, 16  ;;  %v11616_v22 = vcombine.low %v3260_v49, %v3272_v30  ;;  %v10021_v51 = vld [vmem:[%s14027_s4 + $0x48] sm:$0xff]   ;;  %v2787_v30 = vrot.slane %v2750_v8, 1 }
 0x178   : > { %9660 = vmatpush3.bf16.msra.mxu1 %v10020_v57  ;;  %9539 = vmatprep.mubr.msk.bf16.mxu1 %vm10043_vm2, %v14068_v48  ;;  %v8848_v57 = vld [vmem:[%s14024_s1 + $0x300] sm:$0xf]  ;;  %v3296_v8 = vrot.slane %v3288_v54, %v10387_v34  ;;  %v11666_v56 = vrot.slane %v3690_v3, 7 }
 0x179   : > { %9608 = vmatmul.mubr.msk.bf16.gmra.mrb[128].mxu0 %vm1846_vm4, %v3680_v45  ;;  %v3548_v16 = vor.u32 %v3546_v32, %v3544_v27  ;;  %9661 = vmatprep.subr.bf16.mxu1 %v14068_v48  ;;  %v2710_v27 = vsel %vm626_vm7, %v14107_v58, %v2709_v36  ;;  %v3558_v49 = vshll.u32 %v11616_v22, 16  ;;  %v8786_v45 = vld [vmem:[%s14024_s1 + $0x298] sm:$0xf]  ;;  %v3284_v32 = vrot.slane %v11560_v19, %v10387_v34  ;;  %v8787_v58 = vld [vmem:[%s14024_s1 + $0x29c] sm:$0xf] }
 0x17a   : > { %v11620_v59 = vpop.permute.xlu1 %3299  ;;  %9611 = vmatprep.mubr.msk.bf16.mxu0 %vm10043_vm2, %v14068_v48  ;;  %v2788_v40 = vsel %vm2783_vm8, %v2785_v44, %v2787_v30  ;;  %v2414_v19 = vrot.slane %v10905_v38, %v10387_v34  ;;  %v3554_v44 = vshrl.u32 %v11556_v50, 16  ;;  %v3693_v38 = vshll.u32 %v11601_v12, 16 }
 0x17b   : > { %v11624_v29 = vpop.permute.xlu0 %4195  ;;  %5003 = vperm.xlu1 %9994, %v8785_v61   ;;  %5924 = vperm.xlu0 %9993, %v8847_v2   ;;  %v3553_v14 = vsel %vm1715_vm6, %v3548_v16, %v3552_v39  ;;  %v14041_v2 = vrot.slane %v11630_v25, 7  ;;  %v3688_v16 = vsel %vm627_vm5, %v11551_v6, %v3687_v9  ;;  %v8849_v9 = vld [vmem:[%s14024_s1 + $0x304] sm:$0xf] }
 0x17c   : > { %9662 = vmatpush3.bf16.msra.mxu1 %v10021_v51  ;;  %v11658_v54 = vmul.bf16 %v3553_v14, %v10942_v53  ;;  %v2751_v51 = vmul.bf16 %v2710_v27, %v14100_v37  ;;  %v11672_v14 = vcombine.low %v3284_v32, %v3296_v8  ;;  %v3556_v50 = vor.u32 %v3554_v44, %v3552_v39  ;;  %v14109_v44 = vld [vmem:[#allocation12_spill] sm:$0xff] }
 0x17d   : > { %9787 = vmatprep.subr.bf16.mxu1 %v14068_v48  ;;  %v2712_v27 = vsel %vm626_vm7, %v2709_v36, %v14041_v2  ;;  %v3695_v8 = vor.u32 %v3693_v38, %v11666_v56  ;;  %v8788_v36 = vld [vmem:[%s14024_s1 + $0x2a0] sm:$0xf] }
 0x17e   : > { %v11646_v17 = vpop.permute.xlu1 %4207  ;;  %9540 = vmatmul.mubr.msk.bf16.gmra.mrb[64].mxu1 %vm1846_vm4, %v2788_v40  ;;  %v3698_v32 = vshrl.u32 %v11658_v54, 16  ;;  %v11696_v40 = vcombine.low %v2414_v19, %v2426_v52  ;;  %v3566_v39 = vshll.u32 %v11672_v14, 16  ;;  %v2438_v52 = vrot.slane %v10935_v60, %v10387_v34 }
 0x17f   : > { %v3312_v61 = vpop.permute.xlu0 %3311  ;;  %5936 = vperm.xlu1 %9994, %v8848_v57   ;;  %5015 = vperm.xlu0 %9993, %v8786_v45   ;;  %v3560_v57 = vrot.slane %v3558_v49, 1  ;;  %v2789_v49 = vrot.slane %v2751_v51, 1  ;;  %v8850_v45 = vld [vmem:[%s14024_s1 + $0x308] sm:$0xf]  ;;  %v3308_v19 = vrot.slane %v11620_v59, %v10387_v34  ;;  %v2752_v38 = vmul.bf16 %v2712_v27, %v10841_v26 }
 0x180   : > { %9543 = vmatprep.mubr.msk.bf16.mxu1 %vm10043_vm2, %v14068_v48  ;;  %v3696_v2 = vsel %vm627_vm5, %v11612_v21, %v3695_v8  ;;  %v2713_v60 = vrot.slane %v11696_v40, 7  ;;  %v3562_v59 = vshrl.u32 %v11616_v22, 16  ;;  %v8851_v21 = vld [vmem:[%s14024_s1 + $0x30c] sm:$0xf]  ;;  %v3701_v22 = vshll.u32 %v11658_v54, 16 }
 0x181   : > { %9612 = vmatmul.mubr.msk.bf16.gmra.mrb[132].mxu0 %vm1846_vm4, %v3688_v16  ;;  %v3561_v12 = vsel %vm1715_vm6, %v3556_v50, %v3560_v57  ;;  %v3320_v16 = vrot.slane %v3312_v61, %v10387_v34  ;;  %v2790_v50 = vsel %vm2783_vm8, %v2787_v30, %v2789_v49 }
 0x182   : > { %v11676_v6 = vpop.permute.xlu1 %3323  ;;  %9615 = vmatprep.mubr.msk.bf16.mxu0 %vm10043_vm2, %v14068_v48  ;;  %v3640_v61 = vmul.bf16 %v3561_v12, %v10996_v43  ;;  %v3564_v40 = vor.u32 %v3562_v59, %v3560_v57 }
 0x183   : > { %v11683_v3 = vpop.permute.xlu0 %4219  ;;  %5027 = vperm.xlu1 %9994, %v8787_v58   ;;  %5948 = vperm.xlu0 %9993, %v8849_v9   ;;  %v2450_v9 = vrot.slane %v14109_v44, %v10387_v34  ;;  %v8789_v44 = vld [vmem:[%s14024_s1 + $0x2a4] sm:$0xf]  ;;  %v11724_v27 = vcombine.low %v3308_v19, %v3320_v16  ;;  %v3332_v59 = vrot.slane %v11676_v6, %v10387_v34  ;;  %v3570_v6 = vshrl.u32 %v11672_v14, 16 }
 0x184   : > { %v3706_v16 = vshrl.u32 %v3640_v61, 16 }
 0x185   : > { %v3574_v54 = vshll.u32 %v11724_v27, 16 }
 0x186   : > { %v11701_v58 = vpop.permute.xlu1 %4231  ;;  %9544 = vmatmul.mubr.msk.bf16.gmra.mrb[68].mxu1 %vm1846_vm4, %v2790_v50 }
 0x187   : > { %14108 = vst [vmem:[#allocation11_spill] sm:$0xff] %v11701_v58  ;;  %v3336_v51 = vpop.permute.xlu0 %3335  ;;  %5960 = vperm.xlu1 %9994, %v8850_v45   ;;  %5039 = vperm.xlu0 %9993, %v8788_v36   ;;  %v11720_v58 = vrot.slane %v3698_v32, 7  ;;  %v3568_v45 = vrot.slane %v3566_v39, 1  ;;  %v11740_v32 = vcombine.low %v2438_v52, %v2450_v9  ;;  %v8852_v39 = vld [vmem:[%s14024_s1 + $0x310] sm:$0xf]  ;;  %v14110_v36 = vrot.slane %v11630_v25, 7 }
 0x188   : > { %9547 = vmatprep.mubr.msk.bf16.mxu1 %vm10043_vm2, %v14068_v48  ;;  %v3344_v57 = vrot.slane %v3336_v51, %v10387_v34  ;;  %v8790_v52 = vld [vmem:[%s14024_s1 + $0x2a8] sm:$0xf]  ;;  %v2474_v25 = vrot.slane %v10952_v42, %v10387_v34  ;;  %v2462_v42 = vrot.slane %v10958_v62, %v10387_v34  ;;  %v3709_v62 = vshll.u32 %v3640_v61, 16 }
 0x189   : > { %9616 = vmatmul.mubr.msk.bf16.gmra.mrb[136].mxu0 %vm1846_vm4, %v3696_v2  ;;  %v2791_v2 = vrot.slane %v2752_v38, 1  ;;  %v3703_v12 = vor.u32 %v3701_v22, %v11720_v58  ;;  %v2714_v19 = vsel %vm626_vm7, %v14110_v36, %v2713_v60  ;;  %v3569_v50 = vsel %vm1715_vm6, %v3564_v40, %v3568_v45  ;;  %v8791_v36 = vld [vmem:[%s14024_s1 + $0x2ac] sm:$0xf] }
 0x18a   : > { %v11728_v30 = vpop.permute.xlu1 %3347  ;;  %9619 = vmatprep.mubr.msk.bf16.mxu0 %vm10043_vm2, %v14068_v48  ;;  %v3641_v51 = vmul.bf16 %v3569_v50, %v11050_v1  ;;  %v2753_v40 = vmul.bf16 %v2714_v19, %v10889_v47  ;;  %v3572_v14 = vor.u32 %v3570_v6, %v3568_v45  ;;  %v14113_v19 = vrot.slane %v11740_v32, 7  ;;  %v14115_v6 = vld [vmem:[#allocation14_spill] sm:$0xff] }
 0x18b   : > { %v11735_v8 = vpop.permute.xlu0 %4243  ;;  %5051 = vperm.xlu1 %9994, %v8789_v44   ;;  %5972 = vperm.xlu0 %9993, %v8851_v21   ;;  %v2792_v21 = vsel %vm2783_vm8, %v2789_v49, %v2791_v2  ;;  %v3704_v22 = vsel %vm627_vm5, %v11666_v56, %v3703_v12  ;;  %v11770_v44 = vrot.slane %v3706_v16, 7  ;;  %v3576_v49 = vrot.slane %v3574_v54, 1  ;;  %v8853_v12 = vld [vmem:[%s14024_s1 + $0x314] sm:$0xf] }
 0x18c   : > { %v2716_v50 = vsel %vm626_vm7, %v2713_v60, %v14113_v19  ;;  %v2793_v54 = vrot.slane %v2753_v40, 1  ;;  %v8792_v60 = vld [vmem:[%s14024_s1 + $0x2b0] sm:$0xf] }
 0x18e   : > { %v11752_v9 = vpop.permute.xlu1 %4255  ;;  %9548 = vmatmul.mubr.msk.bf16.gmra.mrb[72].mxu1 %vm1846_vm4, %v2792_v21  ;;  %v11797_v21 = vcombine.low %v2462_v42, %v2474_v25  ;;  %v2486_v25 = vrot.slane %v10989_v0, %v10387_v34  ;;  %v3356_v42 = vrot.slane %v11728_v30, %v10387_v34  ;;  %v3578_v30 = vshrl.u32 %v11724_v27, 16 }
 0x18f   : > { %14111 = vst [vmem:[#allocation12_spill] sm:$0xff] %v11752_v9  ;;  %v3360_v38 = vpop.permute.xlu0 %3359  ;;  %5984 = vperm.xlu1 %9994, %v8852_v39   ;;  %5063 = vperm.xlu0 %9993, %v8790_v52   ;;  %v11775_v39 = vcombine.low %v3332_v59, %v3344_v57  ;;  %v3711_v57 = vor.u32 %v3709_v62, %v11770_v44  ;;  %v8854_v52 = vld [vmem:[%s14024_s1 + $0x318] sm:$0xf]  ;;  %v3714_v59 = vshrl.u32 %v3641_v51, 16  ;;  %v3717_v27 = vshll.u32 %v3641_v51, 16 }
 0x190   : > { %9551 = vmatprep.mubr.msk.bf16.mxu1 %vm10043_vm2, %v14068_v48  ;;  %v3368_v45 = vrot.slane %v3360_v38, %v10387_v34  ;;  %v2754_v62 = vmul.bf16 %v2716_v50, %v10942_v53  ;;  %v2717_v0 = vrot.slane %v11797_v21, 7  ;;  %v3580_v21 = vor.u32 %v3578_v30, %v3576_v49 }
 0x191   : > { %9620 = vmatmul.mubr.msk.bf16.gmra.mrb[140].mxu0 %vm1846_vm4, %v3704_v22  ;;  %v3577_v22 = vsel %vm1715_vm6, %v3572_v14, %v3576_v49  ;;  %v3582_v61 = vshll.u32 %v11775_v39, 16  ;;  %v2794_v14 = vsel %vm2783_vm8, %v2791_v2, %v2793_v54  ;;  %v3712_v19 = vsel %vm627_vm5, %v11720_v58, %v3711_v57  ;;  %v8855_v58 = vld [vmem:[%s14024_s1 + $0x31c] sm:$0xf] }
 0x192   : > { %v11779_v56 = vpop.permute.xlu1 %3371  ;;  %9623 = vmatprep.mubr.msk.bf16.mxu0 %vm10043_vm2, %v14068_v48  ;;  %v3642_v38 = vmul.bf16 %v3577_v22, %v11104_v15  ;;  %v11825_v50 = vcombine.low %v3356_v42, %v3368_v45  ;;  %v2795_v22 = vrot.slane %v2754_v62, 1  ;;  %v8793_v45 = vld [vmem:[%s14024_s1 + $0x2b4] sm:$0x1]  ;;  %v14117_v42 = vrot.slane %v11740_v32, 7 }
 0x193   : > { %v11786_v16 = vpop.permute.xlu0 %4267  ;;  %5075 = vperm.xlu1 %9994, %v8791_v36   ;;  %5996 = vperm.xlu0 %9993, %v8853_v12   ;;  %v2498_v12 = vrot.slane %v14115_v6, %v10387_v34  ;;  %v8856_v6 = vld [vmem:[%s14024_s1 + $0x320] sm:$0xf]  ;;  %v3380_v32 = vrot.slane %v11779_v56, %v10387_v34 }
 0x194   : > { %14112 = vst [vmem:[#allocation27_spill] sm:$0xff] %v11786_v16  ;;  %v3590_v51 = vshll.u32 %v11825_v50, 16  ;;  %v2796_v30 = vsel %vm2783_vm8, %v2793_v54, %v2795_v22 }
 0x196   : > { %v11802_v36 = vpop.permute.xlu1 %4279  ;;  %9552 = vmatmul.mubr.msk.bf16.gmra.mrb[76].mxu1 %vm1846_vm4, %v2794_v14  ;;  %v2718_v14 = vsel %vm626_vm7, %v14117_v42, %v2717_v0  ;;  %v3592_v56 = vrot.slane %v3590_v51, 1 }
 0x197   : > { %14114 = vst [vmem:[#allocation28_spill] sm:$0xff] %v11802_v36  ;;  %v3384_v40 = vpop.permute.xlu0 %3383  ;;  %6008 = vperm.xlu1 %9994, %v8854_v52   ;;  %5087 = vperm.xlu0 %9993, %v8792_v60   ;;  %v11821_v36 = vrot.slane %v3714_v59, 7  ;;  %v3584_v52 = vrot.slane %v3582_v61, 1  ;;  %v11840_v59 = vcombine.low %v2486_v25, %v2498_v12  ;;  %v3722_v60 = vshrl.u32 %v3642_v38, 16  ;;  %v8857_v25 = vld [vmem:[%s14024_s1 + $0x324] sm:$0xf] }
 0x198   : > { %9555 = vmatprep.mubr.msk.bf16.mxu1 %vm10043_vm2, %v14068_v48  ;;  %v3392_v49 = vrot.slane %v3384_v40, %v10387_v34 }
 0x199   : > { %9624 = vmatmul.mubr.msk.bf16.gmra.mrb[144].mxu0 %vm1846_vm4, %v3712_v19  ;;  %v3719_v61 = vor.u32 %v3717_v27, %v11821_v36  ;;  %v3585_v19 = vsel %vm1715_vm6, %v3580_v21, %v3584_v52  ;;  %v2755_v27 = vmul.bf16 %v2718_v14, %v10996_v43  ;;  %v8895_v21 = vld [vmem:[%s14024_s1 + $0x32c] sm:$0xf]  ;;  %v11868_v42 = vrot.slane %v3722_v60, 7 }
 0x19a   : > { %v11829_v2 = vpop.permute.xlu1 %3395  ;;  %9627 = vmatprep.mubr.msk.bf16.mxu0 %vm10043_vm2, %v14068_v48  ;;  %v2510_v60 = vrot.slane %v11012_v23, %v10387_v34 }
 0x19b   : > { %v11836_v57 = vpop.permute.xlu0 %4291  ;;  %6032 = vperm.xlu1 %9994, %v8856_v6   ;;  %6020 = vperm.xlu0 %9993, %v8855_v58   ;;  %v3643_v58 = vmul.bf16 %v3585_v19, %v11156_v20  ;;  %v3720_v40 = vsel %vm627_vm5, %v11770_v44, %v3719_v61  ;;  %v3586_v6 = vshrl.u32 %v11775_v39, 16  ;;  %v8858_v44 = vld [vmem:[%s14024_s1 + $0x328] sm:$0x1]  ;;  %v3725_v39 = vshll.u32 %v3642_v38, 16  ;;  %v8897_v38 = vld [vmem:[%s14024_s1 + $0x334] sm:$0xf] }
 0x19c   : > { %14116 = vst [vmem:[#allocation14_spill] sm:$0xff] %v11836_v57  ;;  %v14120_v19 = vrot.slane %v11840_v59, 7 }
 0x19d   : > { %v3588_v14 = vor.u32 %v3586_v6, %v3584_v52 }
 0x19e   : > { %v11852_v12 = vpop.permute.xlu1 %4303  ;;  %9556 = vmatmul.mubr.msk.bf16.gmra.mrb[80].mxu1 %vm1846_vm4, %v2796_v30  ;;  %v2720_v51 = vsel %vm626_vm7, %v2717_v0, %v14120_v19  ;;  %v8896_v0 = vld [vmem:[%s14024_s1 + $0x330] sm:$0xf] }
 0x19f   : > { %14118 = vst [vmem:[#allocation29_spill] sm:$0xff] %v11852_v12  ;;  %v3408_v62 = vpop.permute.xlu0 %3407  ;;  %5099 = vperm.xlu1 %9994, %v8793_v45   ;;  %6044 = vperm.xlu0 %9993, %v8857_v25   ;;  %v11871_v12 = vcombine.low %v3380_v32, %v3392_v49  ;;  %v2522_v45 = vrot.slane %v11006_v55, %v10387_v34  ;;  %v2797_v49 = vrot.slane %v2755_v27, 1  ;;  %v3730_v32 = vshrl.u32 %v3643_v58, 16 }
 0x1a0   : > { %9559 = vmatprep.mubr.msk.bf16.mxu1 %vm10043_vm2, %v14068_v48  ;;  %v3727_v25 = vor.u32 %v3725_v39, %v11868_v42  ;;  %v3593_v55 = vsel %vm1715_vm6, %v3588_v14, %v3592_v56  ;;  %v3416_v23 = vrot.slane %v3408_v62, %v10387_v34  ;;  %v3404_v27 = vrot.slane %v11829_v2, %v10387_v34  ;;  %v8899_v14 = vld [vmem:[%s14024_s1 + $0x33c] sm:$0xf] }
 0x1a1   : > { %9628 = vmatmul.mubr.msk.bf16.gmra.mrb[148].mxu0 %vm1846_vm4, %v3720_v40  ;;  %v3598_v30 = vshll.u32 %v11871_v12, 16  ;;  %v11905_v40 = vcombine.low %v2510_v60, %v2522_v45  ;;  %v2798_v62 = vsel %vm2783_vm8, %v2795_v22, %v2797_v49  ;;  %v11917_v45 = vrot.slane %v3730_v32, 7 }
 0x1a2   : > { %v3420_v54 = vpop.permute.xlu1 %3419  ;;  %9631 = vmatprep.mubr.msk.bf16.mxu0 %vm10043_vm2, %v14068_v48  ;;  %v3728_v39 = vsel %vm627_vm5, %v11821_v36, %v3727_v25  ;;  %v3594_v60 = vshrl.u32 %v11825_v50, 16  ;;  %v11920_v19 = vcombine.low %v3404_v27, %v3416_v23  ;;  %v8898_v36 = vld [vmem:[%s14024_s1 + $0x338] sm:$0xf] }
 0x1a3   : > { %v11880_v61 = vpop.permute.xlu0 %4315  ;;  %6517 = vperm.xlu1 %9994, %v8895_v21   ;;  %6056 = vperm.xlu0 %9993, %v8858_v44   ;;  %v2756_v21 = vmul.bf16 %v2720_v51, %v11050_v1  ;;  %v3644_v44 = vmul.bf16 %v3593_v55, %v11209_v13  ;;  %v3600_v2 = vrot.slane %v3598_v30, 1  ;;  %v14124_v51 = vld [vmem:[#allocation15_spill] sm:$0xff]  ;;  %v3733_v55 = vshll.u32 %v3643_v58, 16 }
 0x1a4   : > { %14119 = vst [vmem:[#allocation30_spill] sm:$0xff] %v11880_v61  ;;  %v2546_v25 = vrot.slane %v14124_v51, %v10387_v34  ;;  %v2721_v30 = vrot.slane %v11905_v40, 7  ;;  %v3596_v23 = vor.u32 %v3594_v60, %v3592_v56  ;;  %v8900_v56 = vld [vmem:[%s14024_s1 + $0x340] sm:$0xf] }
 0x1a5   : > { %v3735_v27 = vor.u32 %v3733_v55, %v11917_v45  ;;  %v14128_v55 = vld [vmem:[#allocation3_spill] sm:$0xff] }
 0x1a6   : > { %v11898_v52 = vpop.permute.xlu1 %4339  ;;  %9560 = vmatmul.mubr.msk.bf16.gmra.mrb[84].mxu1 %vm1846_vm4, %v2798_v62  ;;  %v8960_v62 = vld [vmem:[%s14024_s1 + $0x3a0] sm:$0xf]  ;;  %v3601_v51 = vsel %vm1715_vm6, %v3596_v23, %v3600_v2 }
 0x1a7   : > { %14121 = vst [vmem:[#allocation31_spill] sm:$0xff] %v11898_v52  ;;  %v11903_v6 = vpop.permute.xlu0 %4327  ;;  %6541 = vperm.xlu1 %9994, %v8897_v38   ;;  %6529 = vperm.xlu0 %9993, %v8896_v0   ;;  %v14125_v38 = vld [vmem:[#allocation16_spill] sm:$0xff]  ;;  %v2799_v0 = vrot.slane %v2756_v21, 1  ;;  %v3645_v23 = vmul.bf16 %v3601_v51, %v14128_v55  ;;  %v14130_v51 = vld [vmem:[#allocation18_spill] sm:$0xff] }
 0x1a8   : > { %14122 = vst [vmem:[#allocation32_spill] sm:$0xff] %v11903_v6  ;;  %v2534_v32 = vrot.slane %v14125_v38, %v10387_v34  ;;  %9563 = vmatprep.mubr.msk.bf16.mxu1 %vm10043_vm2, %v14068_v48  ;;  %v3606_v38 = vshll.u32 %v11920_v19, 16 }
 0x1a9   : > { %9632 = vmatmul.mubr.msk.bf16.gmra.mrb[152].mxu0 %vm1846_vm4, %v3728_v39  ;;  %v3738_v39 = vshrl.u32 %v3644_v44, 16 }
 0x1aa   : > { %v11924_v22 = vpop.permute.xlu1 %4363  ;;  %9635 = vmatprep.mubr.msk.bf16.mxu0 %vm10043_vm2, %v14068_v48  ;;  %v11952_v40 = vcombine.low %v2534_v32, %v2546_v25  ;;  %v8901_v25 = vld [vmem:[%s14024_s1 + $0x344] sm:$0xf] }
 0x1ab   : > { %14123 = vst [vmem:[#allocation33_spill] sm:$0xff] %v11924_v22  ;;  %v11935_v50 = vpop.permute.xlu0 %4351  ;;  %6565 = vperm.xlu1 %9994, %v8899_v14   ;;  %6553 = vperm.xlu0 %9993, %v8898_v36   ;;  %v14127_v14 = vrot.slane %v11840_v59, 7  ;;  %v2800_v36 = vsel %vm2783_vm8, %v2797_v49, %v2799_v0  ;;  %v11967_v32 = vrot.slane %v3738_v39, 7  ;;  %v3602_v59 = vshrl.u32 %v11871_v12, 16 }
 0x1ac   : > { %14126 = vst [vmem:[#allocation15_spill] sm:$0xff] %v11935_v50  ;;  %v3428_v50 = vrot.slane %v3420_v54, %v10387_v34  ;;  %v3736_v54 = vsel %vm627_vm5, %v11868_v42, %v3735_v27  ;;  %v8961_v42 = vld [vmem:[%s14024_s1 + $0x3a4] sm:$0xf]  ;;  %v2723_v27 = vrot.slane %v11952_v40, 7  ;;  %v3741_v12 = vshll.u32 %v3644_v44, 16 }
 0x1ad   : > { %v2722_v60 = vsel %vm626_vm7, %v14127_v14, %v2721_v30  ;;  %v3608_v14 = vrot.slane %v3606_v38, 1  ;;  %v2558_v38 = vrot.slane %v14130_v51, %v10387_v34  ;;  %v8903_v51 = vld [vmem:[%s14024_s1 + $0x34c] sm:$0xf] }
 0x1ae   : > { %v11947_v58 = vpop.permute.xlu1 %4775  ;;  %v2757_v22 = vmul.bf16 %v2722_v60, %v11104_v15  ;;  %v8678_v6 = vcombine.low %v3428_v50, %v3428_v50  ;;  %9564 = vmatmul.mubr.msk.bf16.gmra.mrb[88].mxu1 %vm1846_vm4, %v2800_v36  ;;  %v14129_v50 = vld [vmem:[#allocation17_spill] sm:$0xff]  ;;  %v3743_v40 = vor.u32 %v3741_v12, %v11967_v32  ;;  %v8962_v36 = vld [vmem:[%s14024_s1 + $0x3a8] sm:$0xf] }
 0x1af   : > { %v11954_v21 = vpop.permute.xlu0 %4763  ;;  %7473 = vperm.xlu1 %9994, %v8960_v62   ;;  %6577 = vperm.xlu0 %9993, %v8900_v56   ;;  %v2570_v39 = vrot.slane %v14129_v50, %v10387_v34  ;;  %v3604_v56 = vor.u32 %v3602_v59, %v3600_v2  ;;  %v8902_v50 = vld [vmem:[%s14024_s1 + $0x348] sm:$0xf]  ;;  %v2724_v2 = vsel %vm626_vm7, %v2721_v30, %v2723_v27 }
 0x1b0   : > { %9567 = vmatprep.mubr.msk.bf16.mxu1 %vm10043_vm2, %v14068_v48  ;;  %v2801_v60 = vrot.slane %v2757_v22, 1  ;;  %v3614_v44 = vshll.u32 %v8678_v6, 16  ;;  %v2758_v59 = vmul.bf16 %v2724_v2, %v11156_v20  ;;  %v3744_v6 = vsel %vm627_vm5, %v11917_v45, %v3743_v40  ;;  %v8963_v45 = vld [vmem:[%s14024_s1 + $0x3ac] sm:$0xf] }
 0x1b1   : > { %9636 = vmatmul.mubr.msk.bf16.gmra.mrb[156].mxu0 %vm1846_vm4, %v3736_v54  ;;  %v3746_v54 = vshrl.u32 %v3645_v23, 16  ;;  %v3609_v52 = vsel %vm1715_vm6, %v3604_v56, %v3608_v14 }
 0x1b2   : > { %v11972_v49 = vpop.permute.xlu1 %4799  ;;  %9639 = vmatprep.mubr.msk.bf16.mxu0 %vm10043_vm2, %v14068_v48  ;;  %v2802_v12 = vsel %vm2783_vm8, %v2799_v0, %v2801_v60  ;;  %v14133_v0 = vld [vmem:[#allocation19_spill] sm:$0xff]  ;;  %v2803_v2 = vrot.slane %v2758_v59, 1  ;;  %v4784_v59 = vrot.slane %v11947_v58, %v10387_v34 }
 0x1b3   : > { %v11980_v62 = vpop.permute.xlu0 %4787  ;;  %6589 = vperm.xlu1 %9994, %v8901_v25   ;;  %7485 = vperm.xlu0 %9993, %v8961_v42   ;;  %v12001_v25 = vcombine.low %v2558_v38, %v2570_v39  ;;  %v3646_v42 = vmul.bf16 %v3609_v52, %v11341_v33  ;;  %v12011_v30 = vrot.slane %v3746_v54, 7  ;;  %v3610_v39 = vshrl.u32 %v11920_v19, 16  ;;  %v14134_v54 = vld [vmem:[#allocation20_spill] sm:$0xff] }
 0x1b4   : > { %v3616_v38 = vrot.slane %v3614_v44, 1  ;;  %v2594_v56 = vrot.slane %v14133_v0, %v10387_v34  ;;  %v3749_v19 = vshll.u32 %v3645_v23, 16  ;;  %v2582_v44 = vrot.slane %v14134_v54, %v10387_v34 }
 0x1b5   : > { %v3754_v0 = vshrl.u32 %v3646_v42, 16  ;;  %v4808_v23 = vrot.slane %v11972_v49, %v10387_v34 }
 0x1b6   : > { %v11993_v61 = vpop.permute.xlu1 %4811  ;;  %9568 = vmatmul.mubr.msk.bf16.gmra.mrb[92].mxu1 %vm1846_vm4, %v2802_v12  ;;  %v3751_v12 = vor.u32 %v3749_v19, %v12011_v30  ;;  %v12051_v49 = vcombine.low %v2582_v44, %v2594_v56  ;;  %v3757_v44 = vshll.u32 %v3646_v42, 16 }
 0x1b7   : > { %v11999_v22 = vpop.permute.xlu0 %4375  ;;  %7497 = vperm.xlu1 %9994, %v8962_v36   ;;  %6601 = vperm.xlu0 %9993, %v8902_v50   ;;  %v2725_v36 = vrot.slane %v12001_v25, 7  ;;  %v3612_v50 = vor.u32 %v3610_v39, %v3608_v14  ;;  %v4796_v25 = vrot.slane %v11980_v62, %v10387_v34  ;;  %v8904_v14 = vld [vmem:[%s14024_s1 + $0x350] sm:$0xf]  ;;  %v2804_v62 = vsel %vm2783_vm8, %v2801_v60, %v2803_v2 }
 0x1b8   : > { %14131 = vst [vmem:[#allocation16_spill] sm:$0xff] %v11999_v22  ;;  %9571 = vmatprep.mubr.msk.bf16.mxu1 %vm10043_vm2, %v14068_v48  ;;  %v3752_v19 = vsel %vm627_vm5, %v11967_v32, %v3751_v12  ;;  %v8965_v32 = vld [vmem:[%s14024_s1 + $0x3b4] sm:$0xf]  ;;  %v2727_v12 = vrot.slane %v12051_v49, 7 }
 0x1b9   : > { %9640 = vmatmul.mubr.msk.bf16.gmra.mrb[160].mxu0 %vm1846_vm4, %v3744_v6  ;;  %v8964_v6 = vld [vmem:[%s14024_s1 + $0x3b0] sm:$0xf] }
 0x1ba   : > { %v12016_v52 = vpop.permute.xlu1 %5720  ;;  %9643 = vmatprep.mubr.msk.bf16.mxu0 %vm10043_vm2, %v14068_v48 }
 0x1bb   : > { %14132 = vst [vmem:[#allocation17_spill] sm:$0xff] %v12016_v52  ;;  %v4824_v40 = vpop.permute.xlu0 %4823  ;;  %6613 = vperm.xlu1 %9994, %v8903_v51   ;;  %7509 = vperm.xlu0 %9993, %v8963_v45   ;;  %v3617_v52 = vsel %vm1715_vm6, %v3612_v50, %v3616_v38  ;;  %v4772_v51 = vrot.slane %v11954_v21, %v10387_v34  ;;  %v8905_v21 = vld [vmem:[%s14024_s1 + $0x354] sm:$0xf]  ;;  %v12063_v50 = vrot.slane %v3754_v0, 7 }
 0x1bc   : > { %v2726_v38 = vsel %vm626_vm7, %v2723_v27, %v2725_v36  ;;  %v12055_v45 = vmul.bf16 %v3617_v52, %v11395_v31  ;;  %v8795_v27 = vcombine.low %v4796_v25, %v4808_v23  ;;  %v14139_v23 = vld [vmem:[#allocation22_spill] sm:$0xff] }
 0x1bd   : > { %v2759_v58 = vmul.bf16 %v2726_v38, %v11209_v13  ;;  %v8794_v52 = vcombine.low %v4772_v51, %v4784_v59  ;;  %v2606_v25 = vrot.slane %v14139_v23, %v10387_v34  ;;  %v3759_v51 = vor.u32 %v3757_v44, %v12063_v50  ;;  %v8966_v38 = vld [vmem:[%s14024_s1 + $0x3b8] sm:$0xf] }
 0x1be   : > { %v12039_v54 = vpop.permute.xlu1 %5744  ;;  %9572 = vmatmul.mubr.msk.bf16.gmra.mrb[96].mxu1 %vm1846_vm4, %v2804_v62  ;;  %v3762_v42 = vshrl.u32 %v12055_v45, 16  ;;  %v5190_v49 = vshrl.u32 %v8795_v27, 16  ;;  %v4820_v62 = vrot.slane %v11993_v61, %v10387_v34 }
 0x1bf   : > { %14135 = vst [vmem:[#allocation18_spill] sm:$0xff] %v12039_v54  ;;  %v12048_v39 = vpop.permute.xlu0 %5732  ;;  %7521 = vperm.xlu1 %9994, %v8964_v6   ;;  %6625 = vperm.xlu0 %9993, %v8904_v14   ;;  %v14138_v6 = vld [vmem:[#allocation21_spill] sm:$0xff]  ;;  %v4832_v14 = vrot.slane %v4824_v40, %v10387_v34  ;;  %v2805_v59 = vrot.slane %v2759_v58, 1  ;;  %v5183_v58 = vshrl.u32 %v8794_v52, 16  ;;  %v3760_v61 = vsel %vm627_vm5, %v12011_v30, %v3759_v51 }
 0x1c0   : > { %14136 = vst [vmem:[#allocation19_spill] sm:$0xff] %v12048_v39  ;;  %9575 = vmatprep.mubr.msk.bf16.mxu1 %vm10043_vm2, %v14068_v48  ;;  %v2618_v0 = vrot.slane %v14138_v6, %v10387_v34  ;;  %v8906_v40 = vld [vmem:[%s14024_s1 + $0x358] sm:$0xf]  ;;  %v12108_v54 = vrot.slane %v3762_v42, 7  ;;  %v8967_v30 = vld [vmem:[%s14024_s1 + $0x3bc] sm:$0xf] }
 0x1c1   : > { %9644 = vmatmul.mubr.msk.bf16.gmra.mrb[164].mxu0 %vm1846_vm4, %v3752_v19  ;;  %v12099_v6 = vcombine.low %v4820_v62, %v4832_v14  ;;  %v2806_v23 = vsel %vm2783_vm8, %v2803_v2, %v2805_v59  ;;  %v5185_v14 = vrot.slane %v5183_v58, 7 }
 0x1c2   : > { %v12067_v60 = vpop.permute.xlu1 %4835  ;;  %9647 = vmatprep.mubr.msk.bf16.mxu0 %vm10043_vm2, %v14068_v48  ;;  %v12097_v44 = vcombine.low %v2606_v25, %v2618_v0  ;;  %v12112_v25 = vrot.slane %v5190_v49, 7  ;;  %v5193_v49 = vshll.u32 %v8795_v27, 16 }
 0x1c3   : > { %v12074_v56 = vpop.permute.xlu0 %5756  ;;  %6637 = vperm.xlu1 %9994, %v8905_v21   ;;  %7533 = vperm.xlu0 %9993, %v8965_v32   ;;  %v2728_v32 = vsel %vm626_vm7, %v2725_v36, %v2727_v12  ;;  %v14141_v36 = vld [vmem:[#allocation23_spill] sm:$0xff]  ;;  %v5198_v62 = vshrl.u32 %v12099_v6, 16 }
 0x1c4   : > { %14137 = vst [vmem:[#allocation20_spill] sm:$0xff] %v12074_v56  ;;  %v8907_v56 = vld [vmem:[%s14024_s1 + $0x35c] sm:$0xf]  ;;  %v2630_v0 = vrot.slane %v14141_v36, %v10387_v34  ;;  %v2729_v42 = vrot.slane %v12097_v44, 7  ;;  %v5195_v27 = vor.u32 %v5193_v49, %v12112_v25 }
 0x1c6   : > { %v12091_v19 = vpop.permute.xlu1 %5768  ;;  %9576 = vmatmul.mubr.msk.bf16.gmra.mrb[100].mxu1 %vm1846_vm4, %v2806_v23  ;;  %v8613_v44 = vcombine.low %v2630_v0, %v2630_v0 }
 0x1c7   : > { %14140 = vst [vmem:[#allocation21_spill] sm:$0xff] %v12091_v19  ;;  %v4848_v21 = vpop.permute.xlu0 %4847  ;;  %7545 = vperm.xlu1 %9994, %v8966_v38   ;;  %6649 = vperm.xlu0 %9993, %v8906_v40   ;;  %v2760_v19 = vmul.bf16 %v2728_v32, %v14128_v55  ;;  %v3765_v38 = vshll.u32 %v12055_v45, 16  ;;  %v5186_v32 = vshll.u32 %v8794_v52, 16  ;;  %v8968_v45 = vld [vmem:[%s14024_s1 + $0x3c0] sm:$0xf] }
 0x1c8   : > { %9579 = vmatprep.mubr.msk.bf16.mxu1 %vm10043_vm2, %v14068_v48  ;;  %v4856_v58 = vrot.slane %v4848_v21, %v10387_v34  ;;  %v8908_v52 = vld [vmem:[%s14024_s1 + $0x360] sm:$0xf] }
 0x1c9   : > { %9648 = vmatmul.mubr.msk.bf16.gmra.mrb[168].mxu0 %vm1846_vm4, %v3760_v61  ;;  %v12130_v40 = vpop.f32.mrb[64].mxu0  ;;  %v12133_v61 = vrot.slane %v2760_v19, 1  ;;  %v3767_v36 = vor.u32 %v3765_v38, %v12108_v54  ;;  %v4844_v19 = vrot.slane %v12067_v60, %v10387_v34  ;;  %v2730_v38 = vsel %vm626_vm7, %v2727_v12, %v2729_v42  ;;  %v8909_v60 = vld [vmem:[%s14024_s1 + $0x364] sm:$0xf] }
 0x1ca   : > { %v12116_v2 = vpop.permute.xlu1 %4859  ;;  %9651 = vmatprep.mubr.msk.bf16.mxu0 %vm10043_vm2, %v14068_v48  ;;  %v9477_v23 = vpop.f32.mrb[65].mxu0  ;;  %v2731_v12 = vrot.slane %v8613_v44, 7 }
 0x1cb   : > { %v12123_v51 = vpop.permute.xlu0 %5780  ;;  %6661 = vperm.xlu1 %9994, %v8907_v56   ;;  %7557 = vperm.xlu0 %9993, %v8967_v30   ;;  %v5188_v56 = vor.u32 %v5186_v32, %v5185_v14  ;;  %v12150_v23 = vrot.slane %v5198_v62, 7  ;;  %v12152_v0 = vcombine.low %v4844_v19, %v4856_v58  ;;  %v2808_v49 = vsel %vm2783_vm8, %v2805_v59, %v12133_v61 }
 0x1cc   : > { %14142 = vst [vmem:[#allocation22_spill] sm:$0xff] %v12123_v51  ;;  %v12140_v51 = vpop.f32.mrb[66].mxu0  ;;  %v3768_v57 = vsel %vm627_vm5, %v12063_v50, %v3767_v36  ;;  %v2761_v32 = vmul.bf16 %v2730_v38, %v11341_v33  ;;  %v5196_v62 = vsel %vm627_vm5, %v5185_v14, %v5195_v27  ;;  %v5201_v58 = vshll.u32 %v12099_v6, 16  ;;  %v8969_v50 = vld [vmem:[%s14024_s1 + $0x3c4] sm:$0xf] }
 0x1cd   : > { %v9478_v21 = vpop.f32.mrb[67].mxu0  ;;  %v12172_v36 = vmul.bf16 %v5188_v56, %v14094_v41  ;;  %v5206_v38 = vshrl.u32 %v12152_v0, 16 }
 0x1ce   : > { %v12142_v22 = vpop.permute.xlu1 %5792  ;;  %9580 = vmatmul.mubr.msk.bf16.gmra.mrb[104].mxu1 %vm1846_vm4, %v2808_v49  ;;  %v5203_v6 = vor.u32 %v5201_v58, %v12150_v23  ;;  %v12191_v21 = vmul.bf16 %v5196_v62, %v14098_v11  ;;  %v8910_v62 = vld [vmem:[%s14024_s1 + $0x368] sm:$0xf] }
 0x1cf   : > { %v4872_v30 = vpop.permute.xlu0 %4871  ;;  %7569 = vperm.xlu1 %9994, %v8968_v45   ;;  %v1926_v39 = vpop.f32.mrb[0].mxu1  ;;  %6673 = vperm.xlu0 %9993, %v8908_v52   ;;  %v5335_v58 = vshll.u32 %v12172_v36, 16 }
 0x1d0   : > { %v9409_v59 = vpop.f32.mrb[1].mxu1  ;;  %9583 = vmatprep.mubr.msk.bf16.mxu1 %vm10043_vm2, %v14068_v48  ;;  %v4880_v44 = vrot.slane %v4872_v30, %v10387_v34  ;;  %v4868_v30 = vrot.slane %v12116_v2, %v10387_v34  ;;  %v12211_v2 = vrot.slane %v5206_v38, 7 }
 0x1d1   : > { %9652 = vmatmul.mubr.msk.bf16.gmra.mrb[172].mxu0 %vm1846_vm4, %v3768_v57  ;;  %v1929_v52 = vpop.f32.mrb[2].mxu1  ;;  %v12181_v57 = vadd.f32 %v11511_v46, %v1926_v39  ;;  %v2809_v59 = vrot.slane %v2761_v32, 1  ;;  %v8970_v46 = vld [vmem:[%s14024_s1 + $0x3c8] sm:$0xf]  ;;  %v2732_v39 = vsel %vm626_vm7, %v2729_v42, %v2731_v12  ;;  %v5204_v42 = vsel %vm627_vm5, %v12112_v25, %v5203_v6  ;;  %v8971_v25 = vld [vmem:[%s14024_s1 + $0x3cc] sm:$0xf] }
 0x1d2   : > { %v12166_v45 = vpop.permute.xlu1 %4883  ;;  %9655 = vmatprep.mubr.msk.bf16.mxu0 %vm10043_vm2, %v14068_v48  ;;  %v9410_v27 = vpop.f32.mrb[3].mxu1  ;;  %v12188_v56 = vadd.f32 %v11530_v10, %v1929_v52  ;;  %v2762_v52 = vmul.bf16 %v2732_v39, %v11395_v31  ;;  %v5337_v6 = vrot.slane %v5335_v58, 1 }
 0x1d3   : > { %v12176_v14 = vpop.permute.xlu0 %5804  ;;  %14143 = vst [vmem:[#allocation23_spill] sm:$0xff] %v12181_v57  ;;  %v12185_v19 = vpop.f32.mrb[68].mxu0  ;;  %6685 = vperm.xlu1 %9994, %v8909_v60   ;;  %7581 = vperm.xlu0 %9993, %v8969_v50   ;;  %v12207_v27 = vcombine.low %v4868_v30, %v4880_v44  ;;  %v2810_v12 = vsel %vm2783_vm8, %v12133_v61, %v2809_v59  ;;  %v5209_v61 = vshll.u32 %v12152_v0, 16 }
 0x1d4   : > { %14144 = vst [vmem:[#allocation34_spill] sm:$0xff] %v12188_v56  ;;  %v9481_v49 = vpop.f32.mrb[69].mxu0  ;;  %v12230_v39 = vrot.slane %v2762_v52, 1  ;;  %v5333_v52 = vshrl.u32 %v12172_v36, 16 }
 0x1d5   : > { %v12200_v60 = vpop.f32.mrb[70].mxu0  ;;  %v8911_v49 = vld [vmem:[%s14024_s1 + $0x36c] sm:$0xf]  ;;  %v5214_v30 = vshrl.u32 %v12207_v27, 16  ;;  %v5211_v57 = vor.u32 %v5209_v61, %v12211_v2 }
 0x1d6   : > { %v5817_v10 = vpop.permute.xlu1 %5816  ;;  %v9482_v32 = vpop.f32.mrb[71].mxu0  ;;  %9584 = vmatmul.mubr.msk.bf16.gmra.mrb[108].mxu1 %vm1846_vm4, %v2810_v12 }
 0x1d7   : > { %v4896_v50 = vpop.permute.xlu0 %4895  ;;  %7593 = vperm.xlu1 %9994, %v8970_v46   ;;  %6697 = vperm.xlu0 %9993, %v8910_v62   ;;  %v5340_v32 = vshll.u32 %v12191_v21, 16  ;;  %v5825_v62 = vrot.slane %v5817_v10, %v10387_v34  ;;  %v8972_v10 = vld [vmem:[%s14024_s1 + $0x3d0] sm:$0xf] }
 0x1d8   : > { %9587 = vmatprep.mubr.msk.bf16.mxu1 %vm10043_vm2, %v14068_v48 }
 0x1d9   : > { %9656 = vmatmul.mubr.msk.bf16.gmra.mrb[176].mxu0 %vm1846_vm4, %v12108_v54  ;;  %v1934_v38 = vpop.f32.mrb[4].mxu1  ;;  %v12235_v54 = vmul.bf16 %v5204_v42, %v14100_v37  ;;  %v4904_v42 = vrot.slane %v4896_v50, %v10387_v34  ;;  %v5342_v31 = vrot.slane %v5340_v32, 1  ;;  %v5813_v50 = vrot.slane %v12176_v14, %v10387_v34  ;;  %v8913_v14 = vld [vmem:[%s14024_s1 + $0x374] sm:$0xf] }
 0x1da   : > { %v12222_v44 = vpop.permute.xlu1 %4907  ;;  %9727 = vmatprep.mubr.msk.bf16.mxu0 %vm10043_vm2, %v14068_v48  ;;  %v9413_v58 = vpop.f32.mrb[5].mxu1  ;;  %v12243_v56 = vadd.f32 %v12130_v40, %v1934_v38  ;;  %v8912_v40 = vld [vmem:[%s14024_s1 + $0x370] sm:$0xf]  ;;  %v12265_v38 = vrot.slane %v5214_v30, 7 }
 0x1db   : > { %v5829_v46 = vpop.permute.xlu0 %5828  ;;  %v12239_v12 = vpop.f32.mrb[72].mxu0  ;;  %6709 = vperm.xlu1 %9994, %v8911_v49   ;;  %7605 = vperm.xlu0 %9993, %v8971_v25   ;;  %v5338_v25 = vor.u32 %v5337_v6, %v5333_v52  ;;  %v5212_v6 = vsel %vm627_vm5, %v12150_v23, %v5211_v57  ;;  %v5344_v23 = vshrl.u32 %v12191_v21, 16 }
 0x1dc   : > { %v5837_v0 = vrot.slane %v5829_v46, %v10387_v34  ;;  %v1937_v9 = vpop.f32.mrb[6].mxu1  ;;  %v9485_v16 = vpop.f32.mrb[73].mxu0 }
 0x1dd   : > { %v9414_v58 = vpop.f32.mrb[7].mxu1  ;;  %v12253_v49 = vpop.f32.mrb[74].mxu0  ;;  %v12259_v36 = vadd.f32 %v12140_v51, %v1937_v9  ;;  %v4892_v16 = vrot.slane %v12166_v45, %v10387_v34  ;;  %v5801_v9 = vrot.slane %v12142_v22, %v10387_v34  ;;  %v5343_v45 = vsel %vm1715_vm6, %v5338_v25, %v5342_v31  ;;  %v8973_v22 = vld [vmem:[%s14024_s1 + $0x3d4] sm:$0xf] }
 0x1de   : > { %v12251_v46 = vcombine.low %v5825_v62, %v5837_v0  ;;  %v9486_v32 = vpop.f32.mrb[75].mxu0  ;;  %v5841_v61 = vpop.permute.xlu1 %5840  ;;  %v2812_v62 = vsel %vm2783_vm8, %v2809_v59, %v12230_v39  ;;  %v5348_v58 = vshll.u32 %v12235_v54, 16  ;;  %v5217_v59 = vshll.u32 %v12207_v27, 16 }
 0x1df   : > { %v4920_v0 = vpop.permute.xlu0 %4919  ;;  %7617 = vperm.xlu1 %9994, %v8972_v10   ;;  %v12272_v51 = vcombine.low %v4892_v16, %v4904_v42  ;;  %6721 = vperm.xlu0 %9993, %v8912_v40   ;;  %v12286_v30 = vcombine.low %v5801_v9, %v5813_v50  ;;  %v12301_v16 = vmul.bf16 %v5212_v6, %v10841_v26  ;;  %v10026_v50 = vld [vmem:[%s14027_s4 + $0x70] sm:$0xff]  }
 0x1e0   : > { %9588 = vmatmul.mubr.msk.bf16.gmra.mrb[112].mxu1 %vm1846_vm4, %v2812_v62  ;;  %v5219_v57 = vor.u32 %v5217_v59, %v12265_v38  ;;  %v12298_v40 = vrot.slane %v5348_v58, 1  ;;  %v6146_v25 = vrot.slane %v12251_v46, 1  ;;  %v4928_v62 = vrot.slane %v4920_v0, %v10387_v34  ;;  %v8974_v58 = vld [vmem:[%s14024_s1 + $0x3d8] sm:$0xf] }
 0x1e1   : > { %9728 = vmatmul.mubr.msk.bf16.vlgmr.msra.gmra.mrb[180].mxu0 %vm1846_vm4, %v5343_v45  ;;  %14145 = vst [vmem:[#allocation35_spill] sm:$0xff] %v12286_v30  ;;  %v1942_v52 = vpop.f32.mrb[8].mxu1  ;;  %9591 = vmatprep.mubr.msk.bf16.mxu1 %vm10043_vm2, %v14068_v48  ;;  %v5222_v21 = vshrl.u32 %v12272_v51, 16  ;;  %v8914_v46 = vld [vmem:[%s14024_s1 + $0x378] sm:$0xf] }
 0x1e2   : > { %v12290_v42 = vpop.permute.xlu1 %4931  ;;  %9731 = vmatprep.mubr.msk.bf16.mxu0 %vm10043_vm2, %v14068_v48  ;;  %v9417_v27 = vpop.f32.mrb[9].mxu1  ;;  %v12307_v32 = vadd.f32 %v12185_v19, %v1942_v52  ;;  %v4048_v19 = vrot.slane %v11348_v4, %v10387_v34  ;;  %9852 = vmatpush3.bf16.msra.mxu0 %v10026_v50  ;;  %v5356_v50 = vshll.u32 %v12301_v16, 16 }
 0x1e3   : > { %v12296_v10 = vpop.f32.mrb[76].mxu0  ;;  %6733 = vperm.xlu1 %9994, %v8913_v14   ;;  %v1945_v9 = vpop.f32.mrb[10].mxu1  ;;  %7629 = vperm.xlu0 %9993, %v8973_v22   ;;  %v14146_v14 = vld [vmem:[#allocation5_spill] sm:$0xff]  ;;  %v5346_v27 = vor.u32 %v5344_v23, %v5342_v31  ;;  %v14044_v22 = vrot.slane %v12286_v30, 1 }
 0x1e4   : > { %v9489_v45 = vpop.f32.mrb[77].mxu0  ;;  %v4060_v6 = vrot.slane %v14146_v14, %v10387_v34  ;;  %v9418_v59 = vpop.f32.mrb[11].mxu1  ;;  %v12323_v0 = vadd.f32 %v12200_v60, %v1945_v9  ;;  %v5849_v14 = vrot.slane %v5841_v61, %v10387_v34  ;;  %9853 = vmatprep.subr.bf16.mxu0 %v14068_v48  ;;  %v10027_v61 = vld [vmem:[%s14027_s4 + $0x78] sm:$0xff]   ;;  %v12343_v9 = vrot.slane %v5222_v21, 7 }
 0x1e5   : > { %v5853_v52 = vpop.permute.xlu0 %5852  ;;  %v4916_v45 = vrot.slane %v12222_v44, %v10387_v34  ;;  %v12330_v59 = vpop.f32.mrb[78].mxu0  ;;  %v5351_v60 = vsel %vm1715_vm6, %v5346_v27, %v12298_v40  ;;  %v5220_v44 = vsel %vm627_vm5, %v12211_v2, %v5219_v57  ;;  %v8975_v21 = vld [vmem:[%s14024_s1 + $0x3dc] sm:$0xf]  ;;  %v5225_v27 = vshll.u32 %v12272_v51, 16 }
 0x1e6   : > { %14147 = vst [vmem:[#allocation5_spill] sm:$0xff] %v12323_v0  ;;  %v5861_v4 = vrot.slane %v5853_v52, %v10387_v34  ;;  %v12332_v31 = vpop.permute.xlu1 %5864  ;;  %v9490_v23 = vpop.f32.mrb[79].mxu0  ;;  %v6147_v52 = vsel %vm2783_vm8, %v14044_v22, %v6146_v25  ;;  %v8729_v2 = vcombine.low %v4048_v19, %v4060_v6  ;;  %v12377_v51 = vmul.bf16 %v5220_v44, %v10889_v47 }
 0x1e7   : > { %7641 = vperm.xlu1 %9994, %v8974_v58   ;;  %v12348_v23 = vcombine.low %v4916_v45, %v4928_v62  ;;  %6745 = vperm.xlu0 %9993, %v8914_v46   ;;  %v8915_v58 = vld [vmem:[%s14024_s1 + $0x37c] sm:$0xf]  ;;  %v4084_v62 = vrot.slane %v11375_v35, %v10387_v34  ;;  %v12374_v35 = vrot.slane %v5356_v50, 1  ;;  %v5227_v22 = vor.u32 %v5225_v27, %v12343_v9 }
 0x1e8   : > { %v12350_v0 = vcombine.low %v5849_v14, %v5861_v4  ;;  %9592 = vmatmul.mubr.msk.bf16.gmra.mrb[116].mxu1 %vm1846_vm4, %v12230_v39  ;;  %v5352_v39 = vshrl.u32 %v12235_v54, 16  ;;  %9854 = vmatpush3.bf16.msra.mxu0 %v10027_v61  ;;  %v4072_v44 = vrot.slane %v11380_v28, %v10387_v34  ;;  %v5873_v28 = vrot.slane %v12332_v31, %v10387_v34 }
 0x1e9   : > { %9732 = vmatmul.mubr.msk.bf16.gmra.mrb[184].mxu0 %vm1846_vm4, %v5351_v60  ;;  %v4944_v57 = vpop.permute.xlu0 %4943  ;;  %v1950_v45 = vpop.f32.mrb[12].mxu1  ;;  %9663 = vmatprep.mubr.msk.bf16.mxu1 %vm10043_vm2, %v14068_v48  ;;  %v6187_v60 = vmul.bf16 %v6147_v52, %v10889_v47  ;;  %v5230_v46 = vshrl.u32 %v12348_v23, 16 }
 0x1ea   : > { %v12367_v6 = vpop.permute.xlu1 %4955  ;;  %9735 = vmatprep.mubr.msk.bf16.mxu0 %vm10043_vm2, %v14068_v48  ;;  %v9421_v19 = vpop.f32.mrb[13].mxu1  ;;  %v12380_v4 = vadd.f32 %v12239_v12, %v1950_v45  ;;  %v14149_v54 = vrot.slane %v12350_v0, 1  ;;  %v4952_v50 = vrot.slane %v4944_v57, %v10387_v34  ;;  %v8976_v12 = vld [vmem:[%s14024_s1 + $0x3e0] sm:$0xf]  ;;  %v5354_v27 = vor.u32 %v5352_v39, %v12298_v40 }
 0x1eb   : > { %v12372_v14 = vpop.f32.mrb[80].mxu0  ;;  %6757 = vperm.xlu1 %9994, %v8915_v58   ;;  %v1953_v58 = vpop.f32.mrb[14].mxu1  ;;  %7653 = vperm.xlu0 %9993, %v8975_v21   ;;  %v4473_v21 = vmul.bf16 %v8729_v2, %v14094_v41  ;;  %v4940_v45 = vrot.slane %v12290_v42, %v10387_v34  ;;  %v10024_v39 = vld [vmem:[%s14027_s4 + $0x60] sm:$0xff]   ;;  %v5364_v42 = vshll.u32 %v12377_v51, 16 }
 0x1ec   : > { %14148 = vst [vmem:[#allocation36_spill] sm:$0xff] %v12380_v4  ;;  %v6149_v19 = vsel %vm2783_vm8, %v6146_v25, %v14149_v54  ;;  %v9493_v30 = vpop.f32.mrb[81].mxu0  ;;  %v9422_v61 = vpop.f32.mrb[15].mxu1  ;;  %v8916_v25 = vld [vmem:[%s14024_s1 + $0x380] sm:$0xf]  ;;  %v12399_v57 = vadd.f32 %v12253_v49, %v1953_v58  ;;  %v5359_v2 = vsel %vm1715_vm6, %v5354_v27, %v12374_v35 }
 0x1ed   : > { %v5877_v52 = vpop.permute.xlu0 %5876  ;;  %v6188_v30 = vmul.bf16 %v6149_v19, %v10942_v53  ;;  %v12408_v40 = vpop.f32.mrb[82].mxu0  ;;  %v12418_v19 = vrot.slane %v6187_v60, 7  ;;  %v5228_v61 = vsel %vm627_vm5, %v12265_v38, %v5227_v22  ;;  %v8977_v38 = vld [vmem:[%s14024_s1 + $0x3e4] sm:$0xf] }
 0x1ee   : > { %14150 = vst [vmem:[#allocation37_spill] sm:$0xff] %v12399_v57  ;;  %v5885_v54 = vrot.slane %v5877_v52, %v10387_v34  ;;  %v12413_v49 = vpop.permute.xlu1 %5888  ;;  %v9494_v58 = vpop.f32.mrb[83].mxu0  ;;  %v12424_v52 = vrot.slane %v5230_v46, 7  ;;  %v12426_v57 = vcombine.low %v4940_v45, %v4952_v50  ;;  %v8730_v46 = vcombine.low %v4072_v44, %v4084_v62 }
 0x1ef   : > { %7665 = vperm.xlu1 %9994, %v8976_v12   ;;  %14151 = vst [vmem:[#allocation38_spill] sm:$0xff] %v12418_v19  ;;  %v12420_v31 = vrot.slane %v6188_v30, 7  ;;  %6769 = vperm.xlu0 %9993, %v8916_v25   ;;  %v8917_v12 = vld [vmem:[%s14024_s1 + $0x384] sm:$0xf]  ;;  %v5233_v50 = vshll.u32 %v12348_v23, 16  ;;  %v5360_v23 = vshrl.u32 %v12301_v16, 16  ;;  %v12460_v44 = vmul.bf16 %v5228_v61, %v10942_v53 }
 0x1f0   : > { %v12428_v4 = vcombine.low %v5873_v28, %v5885_v54  ;;  %9664 = vmatmul.mubr.msk.bf16.vlgmr.msra.gmra.mrb[120].mxu1 %vm1846_vm4, %v4473_v21  ;;  %v10025_v21 = vld [vmem:[%s14027_s4 + $0x68] sm:$0xff]   ;;  %v12457_v62 = vrot.slane %v5364_v42, 1  ;;  %v5238_v58 = vshrl.u32 %v12426_v57, 16  ;;  %v4108_v61 = vrot.slane %v11397_v7, %v10387_v34 }
 0x1f1   : > { %9736 = vmatmul.mubr.msk.bf16.gmra.mrb[188].mxu0 %vm1846_vm4, %v5359_v2  ;;  %v4968_v60 = vpop.permute.xlu0 %4967  ;;  %v12441_v22 = vsel %vm626_vm7, %v12418_v19, %v12420_v31  ;;  %9788 = vmatpush3.bf16.msra.mxu1 %v10024_v39  ;;  %v1958_v25 = vpop.f32.mrb[16].mxu1  ;;  %v5235_v39 = vor.u32 %v5233_v50, %v12424_v52  ;;  %v14153_v2 = vrot.slane %v12350_v0, 1  ;;  %v5362_v0 = vor.u32 %v5360_v23, %v12374_v35 }
 0x1f2   : > { %14152 = vst [vmem:[#allocation39_spill] sm:$0xff] %v12441_v22  ;;  %v14046_v27 = vrot.slane %v12428_v4, 1  ;;  %9667 = vmatprep.mubr.msk.bf16.mxu1 %vm10043_vm2, %v14068_v48  ;;  %v12447_v30 = vpop.permute.xlu1 %4979  ;;  %v9425_v45 = vpop.f32.mrb[17].mxu1  ;;  %9739 = vmatprep.mubr.msk.bf16.mxu0 %vm10043_vm2, %v14068_v48  ;;  %v12463_v54 = vadd.f32 %v12296_v10, %v1958_v25  ;;  %v4976_v16 = vrot.slane %v4968_v60, %v10387_v34  ;;  %v8978_v10 = vld [vmem:[%s14024_s1 + $0x3e8] sm:$0xf] }
 0x1f3   : > { %v12452_v28 = vpop.f32.mrb[84].mxu0  ;;  %6781 = vperm.xlu1 %9994, %v8917_v12   ;;  %v1961_v42 = vpop.f32.mrb[18].mxu1  ;;  %7677 = vperm.xlu0 %9993, %v8977_v38   ;;  %v8918_v60 = vld [vmem:[%s14024_s1 + $0x388] sm:$0xf]  ;;  %v4964_v22 = vrot.slane %v12367_v6, %v10387_v34  ;;  %v5897_v7 = vrot.slane %v12413_v49, %v10387_v34  ;;  %v5236_v49 = vsel %vm627_vm5, %v12343_v9, %v5235_v39  ;;  %v8979_v9 = vld [vmem:[%s14024_s1 + $0x3ec] sm:$0xf] }
 0x1f4   : > { %v6151_v12 = vsel %vm2783_vm8, %v14153_v2, %v14046_v27  ;;  %v9497_v45 = vpop.f32.mrb[85].mxu0  ;;  %9789 = vmatprep.subr.bf16.mxu1 %v14068_v48  ;;  %v9426_v50 = vpop.f32.mrb[19].mxu1  ;;  %v12484_v2 = vadd.f32 %v12330_v59, %v1961_v42  ;;  %v4474_v59 = vmul.bf16 %v8730_v46, %v14098_v11  ;;  %v8919_v46 = vld [vmem:[%s14024_s1 + $0x38c] sm:$0xf] }
 0x1f5   : > { %v5901_v25 = vpop.permute.xlu0 %5900  ;;  %v6189_v38 = vmul.bf16 %v6151_v12, %v10996_v43  ;;  %v14154_v45 = vld [vmem:[#allocation26_spill] sm:$0xff]  ;;  %v12494_v23 = vpop.f32.mrb[86].mxu0  ;;  %9790 = vmatpush3.bf16.msra.mxu1 %v10025_v21  ;;  %v5367_v12 = vsel %vm1715_vm6, %v5362_v0, %v12457_v62  ;;  %v12509_v19 = vcombine.low %v4964_v22, %v4976_v16 }
 0x1f6   : > { %v4096_v27 = vrot.slane %v14154_v45, %v10387_v34  ;;  %v5909_v35 = vrot.slane %v5901_v25, %v10387_v34  ;;  %v12496_v50 = vpop.permute.xlu1 %5912  ;;  %v9498_v42 = vpop.f32.mrb[87].mxu0  ;;  %v5372_v45 = vshll.u32 %v12460_v44, 16  ;;  %9915 = vmatprep.subr.bf16.mxu1 %v14068_v48  ;;  %v12507_v25 = vrot.slane %v5238_v58, 7 }
 0x1f7   : > { %7689 = vperm.xlu1 %9994, %v8978_v10   ;;  %v12503_v6 = vrot.slane %v6189_v38, 7  ;;  %6793 = vperm.xlu0 %9993, %v8918_v60   ;;  %v5241_v58 = vshll.u32 %v12426_v57, 16  ;;  %v12540_v57 = vmul.bf16 %v5236_v49, %v10996_v43  ;;  %v14156_v42 = vrot.slane %v12428_v4, 1  ;;  %v8920_v4 = vld [vmem:[%s14024_s1 + $0x390] sm:$0xf] }
 0x1f8   : > { %v12511_v21 = vcombine.low %v5897_v7, %v5909_v35  ;;  %9668 = vmatmul.mubr.msk.bf16.gmra.mrb[124].mxu1 %vm1846_vm4, %v4474_v59  ;;  %v8731_v39 = vcombine.low %v4096_v27, %v4108_v61  ;;  %v12537_v27 = vrot.slane %v5372_v45, 1  ;;  %v5246_v59 = vshrl.u32 %v12509_v19, 16 }
 0x1f9   : > { %9740 = vmatmul.mubr.msk.bf16.gmra.mrb[192].mxu0 %vm1846_vm4, %v5367_v12  ;;  %v4992_v10 = vpop.permute.xlu0 %4991  ;;  %v12524_v22 = vsel %vm626_vm7, %v12420_v31, %v12503_v6  ;;  %v1966_v0 = vpop.f32.mrb[20].mxu1  ;;  %9671 = vmatprep.mubr.msk.bf16.mxu1 %vm10043_vm2, %v14068_v48  ;;  %v5368_v31 = vshrl.u32 %v12377_v51, 16  ;;  %v5243_v35 = vor.u32 %v5241_v58, %v12507_v25  ;;  %v4132_v49 = vrot.slane %v11435_v63, %v10387_v34 }
 0x1fa   : > { %14155 = vst [vmem:[#allocation26_spill] sm:$0xff] %v12524_v22  ;;  %v14048_v16 = vrot.slane %v12511_v21, 1  ;;  %v12530_v60 = vpop.permute.xlu1 %5003  ;;  %9743 = vmatprep.mubr.msk.bf16.mxu0 %vm10043_vm2, %v14068_v48  ;;  %v9429_v38 = vpop.f32.mrb[21].mxu1  ;;  %v12543_v61 = vadd.f32 %v12372_v14, %v1966_v0  ;;  %v5000_v51 = vrot.slane %v4992_v10, %v10387_v34  ;;  %v8980_v14 = vld [vmem:[%s14024_s1 + $0x3f0] sm:$0xf]  ;;  %v5921_v63 = vrot.slane %v12496_v50, %v10387_v34 }
 0x1fb   : > { %v12534_v7 = vpop.f32.mrb[88].mxu0  ;;  %6805 = vperm.xlu1 %9994, %v8919_v46   ;;  %v1969_v45 = vpop.f32.mrb[22].mxu1  ;;  %7701 = vperm.xlu0 %9993, %v8979_v9   ;;  %v5370_v38 = vor.u32 %v5368_v31, %v12457_v62  ;;  %v12585_v50 = vrot.slane %v5246_v59, 7 }
 0x1fc   : > { %v6153_v12 = vsel %vm2783_vm8, %v14156_v42, %v14048_v16  ;;  %v9501_v46 = vpop.f32.mrb[89].mxu0  ;;  %v9430_v58 = vpop.f32.mrb[23].mxu1  ;;  %v12563_v10 = vadd.f32 %v12408_v40, %v1969_v45  ;;  %v4120_v42 = vrot.slane %v11443_v18, %v10387_v34  ;;  %v4475_v40 = vmul.bf16 %v8731_v39, %v14100_v37  ;;  %v8921_v39 = vld [vmem:[%s14024_s1 + $0x394] sm:$0xf] }
 0x1fd   : > { %v5925_v0 = vpop.permute.xlu0 %5924  ;;  %v6190_v9 = vmul.bf16 %v6153_v12, %v11050_v1  ;;  %v4988_v46 = vrot.slane %v12447_v30, %v10387_v34  ;;  %v12573_v31 = vpop.f32.mrb[90].mxu0  ;;  %v5375_v12 = vsel %vm1715_vm6, %v5370_v38, %v12537_v27  ;;  %v5380_v18 = vshll.u32 %v12540_v57, 16 }
 0x1fe   : > { %v5933_v62 = vrot.slane %v5925_v0, %v10387_v34  ;;  %v12575_v58 = vpop.permute.xlu1 %5936  ;;  %v9502_v45 = vpop.f32.mrb[91].mxu0  ;;  %v5244_v30 = vsel %vm627_vm5, %v12424_v52, %v5243_v35  ;;  %v8981_v52 = vld [vmem:[%s14024_s1 + $0x3f4] sm:$0xf]  ;;  %v8732_v59 = vcombine.low %v4120_v42, %v4132_v49 }
 0x1ff   : > { %7713 = vperm.xlu1 %9994, %v8980_v14   ;;  %v12581_v16 = vrot.slane %v6190_v9, 7  ;;  %v12587_v0 = vcombine.low %v4988_v46, %v5000_v51  ;;  %6817 = vperm.xlu0 %9993, %v8920_v4   ;;  %v5249_v51 = vshll.u32 %v12509_v19, 16  ;;  %v12615_v49 = vrot.slane %v5380_v18, 1 }
 0x200   : > { %v12589_v22 = vcombine.low %v5921_v63, %v5933_v62  ;;  %9672 = vmatmul.mubr.msk.bf16.gmra.mrb[128].mxu1 %vm1846_vm4, %v4475_v40  ;;  %v12618_v19 = vmul.bf16 %v5244_v30, %v11050_v1  ;;  %v14158_v45 = vrot.slane %v12511_v21, 1  ;;  %v4144_v30 = vrot.slane %v11462_v24, %v10387_v34  ;;  %v8922_v21 = vld [vmem:[%s14024_s1 + $0x398] sm:$0xf] }
 0x201   : > { %9744 = vmatmul.mubr.msk.bf16.gmra.mrb[196].mxu0 %vm1846_vm4, %v5375_v12  ;;  %v5016_v14 = vpop.permute.xlu0 %5015  ;;  %v12602_v35 = vsel %vm626_vm7, %v12503_v6, %v12581_v16  ;;  %v1974_v4 = vpop.f32.mrb[24].mxu1  ;;  %9675 = vmatprep.mubr.msk.bf16.mxu1 %vm10043_vm2, %v14068_v48  ;;  %v5376_v6 = vshrl.u32 %v12460_v44, 16  ;;  %v5251_v62 = vor.u32 %v5249_v51, %v12585_v50  ;;  %v5254_v40 = vshrl.u32 %v12587_v0, 16 }
 0x202   : > { %14157 = vst [vmem:[#allocation40_spill] sm:$0xff] %v12602_v35  ;;  %v14049_v38 = vrot.slane %v12589_v22, 1  ;;  %v12608_v9 = vpop.permute.xlu1 %5027  ;;  %9747 = vmatprep.mubr.msk.bf16.mxu0 %vm10043_vm2, %v14068_v48  ;;  %v9433_v46 = vpop.f32.mrb[25].mxu1  ;;  %v12621_v42 = vadd.f32 %v12452_v28, %v1974_v4  ;;  %v5024_v44 = vrot.slane %v5016_v14, %v10387_v34  ;;  %v8982_v28 = vld [vmem:[%s14024_s1 + $0x3f8] sm:$0xf]  ;;  %v5945_v24 = vrot.slane %v12575_v58, %v10387_v34 }
 0x203   : > { %v12612_v63 = vpop.f32.mrb[92].mxu0  ;;  %6829 = vperm.xlu1 %9994, %v8921_v39   ;;  %v1977_v18 = vpop.f32.mrb[26].mxu1  ;;  %7725 = vperm.xlu0 %9993, %v8981_v52   ;;  %v5378_v46 = vor.u32 %v5376_v6, %v12537_v27  ;;  %v12663_v58 = vrot.slane %v5254_v40, 7  ;;  %v5257_v40 = vshll.u32 %v12587_v0, 16 }
 0x204   : > { %v6155_v12 = vsel %vm2783_vm8, %v14158_v45, %v14049_v38  ;;  %v9505_v39 = vpop.f32.mrb[93].mxu0  ;;  %v9434_v51 = vpop.f32.mrb[27].mxu1  ;;  %v12641_v14 = vadd.f32 %v12494_v23, %v1977_v18  ;;  %v14160_v45 = vld [vmem:[#allocation8_spill] sm:$0xff]  ;;  %v5012_v38 = vrot.slane %v12530_v60, %v10387_v34  ;;  %v4476_v23 = vmul.bf16 %v8732_v59, %v10841_v26  ;;  %v8923_v59 = vld [vmem:[%s14024_s1 + $0x39c] sm:$0x1] }
 0x205   : > { %v5949_v4 = vpop.permute.xlu0 %5948  ;;  %v6191_v52 = vmul.bf16 %v6155_v12, %v11104_v15  ;;  %v4156_v39 = vrot.slane %v14160_v45, %v10387_v34  ;;  %v12651_v6 = vpop.f32.mrb[94].mxu0  ;;  %v5383_v12 = vsel %vm1715_vm6, %v5378_v46, %v12615_v49  ;;  %v5388_v45 = vshll.u32 %v12618_v19, 16 }
 0x206   : > { %14159 = vst [vmem:[#allocation41_spill] sm:$0xff] %v12641_v14  ;;  %v5957_v27 = vrot.slane %v5949_v4, %v10387_v34  ;;  %v12653_v51 = vpop.permute.xlu1 %5960  ;;  %v9506_v18 = vpop.f32.mrb[95].mxu0  ;;  %v5252_v60 = vsel %vm627_vm5, %v12507_v25, %v5251_v62  ;;  %v12665_v4 = vcombine.low %v5012_v38, %v5024_v44  ;;  %v8983_v25 = vld [vmem:[%s14024_s1 + $0x3fc] sm:$0xf] }
 0x207   : > { %7737 = vperm.xlu1 %9994, %v8982_v28   ;;  %v12659_v35 = vrot.slane %v6191_v52, 7  ;;  %6841 = vperm.xlu0 %9993, %v8922_v21   ;;  %v8733_v62 = vcombine.low %v4144_v30, %v4156_v39  ;;  %v12693_v30 = vrot.slane %v5388_v45, 1  ;;  %v12696_v0 = vmul.bf16 %v5252_v60, %v11104_v15  ;;  %v14163_v60 = vld [vmem:[#allocation9_spill] sm:$0xff] }
 0x208   : > { %v12667_v14 = vcombine.low %v5945_v24, %v5957_v27  ;;  %9676 = vmatmul.mubr.msk.bf16.gmra.mrb[132].mxu1 %vm1846_vm4, %v4476_v23  ;;  %v5259_v27 = vor.u32 %v5257_v40, %v12663_v58  ;;  %v5262_v23 = vshrl.u32 %v12665_v4, 16  ;;  %v14162_v18 = vrot.slane %v12589_v22, 1  ;;  %v8984_v22 = vld [vmem:[%s14024_s1 + $0x400] sm:$0xf] }
 0x209   : > { %9748 = vmatmul.mubr.msk.bf16.gmra.mrb[200].mxu0 %vm1846_vm4, %v5383_v12  ;;  %v5040_v28 = vpop.permute.xlu0 %5039  ;;  %v12680_v38 = vsel %vm626_vm7, %v12581_v16, %v12659_v35  ;;  %v1982_v46 = vpop.f32.mrb[28].mxu1  ;;  %9679 = vmatprep.mubr.msk.bf16.mxu1 %vm10043_vm2, %v14068_v48  ;;  %v5384_v16 = vshrl.u32 %v12540_v57, 16  ;;  %v4168_v40 = vrot.slane %v14163_v60, %v10387_v34  ;;  %v5969_v60 = vrot.slane %v12653_v51, %v10387_v34 }
 0x20a   : > { %14161 = vst [vmem:[#allocation8_spill] sm:$0xff] %v12680_v38  ;;  %v14050_v44 = vrot.slane %v12667_v14, 1  ;;  %v12686_v21 = vpop.permute.xlu1 %5051  ;;  %9751 = vmatprep.mubr.msk.bf16.mxu0 %vm10043_vm2, %v14068_v48  ;;  %v9437_v52 = vpop.f32.mrb[29].mxu1  ;;  %v12699_v39 = vadd.f32 %v12534_v7, %v1982_v46  ;;  %v5048_v57 = vrot.slane %v5040_v28, %v10387_v34  ;;  %v8985_v7 = vld [vmem:[%s14024_s1 + $0x404] sm:$0xf] }
 0x20b   : > { %v12690_v24 = vpop.f32.mrb[96].mxu0  ;;  %6853 = vperm.xlu1 %9994, %v8923_v59   ;;  %v1985_v45 = vpop.f32.mrb[30].mxu1  ;;  %7749 = vperm.xlu0 %9993, %v8983_v25   ;;  %v5386_v38 = vor.u32 %v5384_v16, %v12615_v49 }
 0x20c   : > { %v6157_v12 = vsel %vm2783_vm8, %v14162_v18, %v14050_v44  ;;  %v9509_v59 = vpop.f32.mrb[97].mxu0  ;;  %v9438_v46 = vpop.f32.mrb[31].mxu1  ;;  %v12719_v28 = vadd.f32 %v12573_v31, %v1985_v45  ;;  %v4180_v18 = vrot.slane %v11564_v5, %v10387_v34  ;;  %v4477_v44 = vmul.bf16 %v8733_v62, %v10889_v47  ;;  %v8987_v62 = vld [vmem:[%s14024_s1 + $0x40c] sm:$0xf] }
 0x20d   : > { %v5973_v52 = vpop.permute.xlu0 %5972  ;;  %v6192_v25 = vmul.bf16 %v6157_v12, %v11156_v20  ;;  %v5036_v59 = vrot.slane %v12608_v9, %v10387_v34  ;;  %v12729_v16 = vpop.f32.mrb[98].mxu0  ;;  %v5391_v12 = vsel %vm1715_vm6, %v5386_v38, %v12693_v30  ;;  %v5396_v5 = vshll.u32 %v12696_v0, 16 }
 0x20e   : > { %14164 = vst [vmem:[#allocation9_spill] sm:$0xff] %v12719_v28  ;;  %v5981_v49 = vrot.slane %v5973_v52, %v10387_v34  ;;  %v5985_v46 = vpop.permute.xlu1 %5984  ;;  %v9510_v31 = vpop.f32.mrb[99].mxu0  ;;  %v5260_v9 = vsel %vm627_vm5, %v12585_v50, %v5259_v27  ;;  %v12737_v28 = vrot.slane %v5262_v23, 7  ;;  %v8986_v50 = vld [vmem:[%s14024_s1 + $0x408] sm:$0xf]  ;;  %v8734_v23 = vcombine.low %v4168_v40, %v4180_v18 }
 0x20f   : > { %7773 = vperm.xlu1 %9994, %v8985_v7   ;;  %v6235_v45 = vrot.slane %v6192_v25, 7  ;;  %v12739_v51 = vcombine.low %v5036_v59, %v5048_v57  ;;  %7761 = vperm.xlu0 %9993, %v8984_v22   ;;  %v5265_v57 = vshll.u32 %v12665_v4, 16  ;;  %v12766_v40 = vrot.slane %v5396_v5, 1  ;;  %v14168_v5 = vld [vmem:[#allocation10_spill] sm:$0xff] }
 0x210   : > { %v12741_v52 = vcombine.low %v5969_v60, %v5981_v49  ;;  %9680 = vmatmul.mubr.msk.bf16.gmra.mrb[136].mxu1 %vm1846_vm4, %v4477_v44  ;;  %v12769_v4 = vmul.bf16 %v5260_v9, %v11156_v20  ;;  %v14167_v31 = vrot.slane %v12667_v14, 1  ;;  %v4192_v9 = vrot.slane %v14168_v5, %v10387_v34 }
 0x211   : > { %9752 = vmatmul.mubr.msk.bf16.gmra.mrb[204].mxu0 %vm1846_vm4, %v5391_v12  ;;  %v5064_v38 = vpop.permute.xlu0 %5063  ;;  %v12753_v27 = vsel %vm626_vm7, %v12659_v35, %v6235_v45  ;;  %v1990_v22 = vpop.f32.mrb[32].mxu1  ;;  %9683 = vmatprep.mubr.msk.bf16.mxu1 %vm10043_vm2, %v14068_v48  ;;  %v5392_v35 = vshrl.u32 %v12618_v19, 16  ;;  %v5267_v60 = vor.u32 %v5265_v57, %v12737_v28  ;;  %v5270_v49 = vshrl.u32 %v12739_v51, 16  ;;  %v8988_v57 = vld [vmem:[%s14024_s1 + $0x410] sm:$0x1] }
 0x212   : > { %14165 = vst [vmem:[#allocation42_spill] sm:$0xff] %v12753_v27  ;;  %v6158_v7 = vrot.slane %v12741_v52, 1  ;;  %v12759_v44 = vpop.permute.xlu1 %5075  ;;  %9755 = vmatprep.mubr.msk.bf16.mxu0 %vm10043_vm2, %v14068_v48  ;;  %v9441_v25 = vpop.f32.mrb[33].mxu1  ;;  %v12772_v18 = vadd.f32 %v12612_v63, %v1990_v22  ;;  %v5072_v52 = vrot.slane %v5064_v38, %v10387_v34  ;;  %v4204_v38 = vrot.slane %v11624_v29, %v10387_v34 }
 0x213   : > { %v12763_v59 = vpop.f32.mrb[100].mxu0  ;;  %7797 = vperm.xlu1 %9994, %v8987_v62   ;;  %v1993_v62 = vpop.f32.mrb[34].mxu1  ;;  %7785 = vperm.xlu0 %9993, %v8986_v50   ;;  %v5394_v63 = vor.u32 %v5392_v35, %v12693_v30  ;;  %v5060_v50 = vrot.slane %v12686_v21, %v10387_v34  ;;  %v4478_v5 = vmul.bf16 %v8734_v23, %v10942_v53  ;;  %v12804_v21 = vrot.slane %v5270_v49, 7 }
 0x214   : > { %14166 = vst [vmem:[#allocation43_spill] sm:$0xff] %v12772_v18  ;;  %v6159_v12 = vsel %vm2783_vm8, %v14167_v31, %v6158_v7  ;;  %v9513_v19 = vpop.f32.mrb[101].mxu0  ;;  %v9442_v25 = vpop.f32.mrb[35].mxu1  ;;  %v12787_v14 = vadd.f32 %v12651_v6, %v1993_v62  ;;  %v5993_v31 = vrot.slane %v5985_v46, %v10387_v34  ;;  %v5268_v29 = vsel %vm627_vm5, %v12663_v58, %v5267_v60 }
 0x215   : > { %v5997_v27 = vpop.permute.xlu0 %5996  ;;  %v6193_v22 = vmul.bf16 %v6159_v12, %v11209_v13  ;;  %v12796_v30 = vpop.f32.mrb[102].mxu0  ;;  %v5399_v6 = vsel %vm1715_vm6, %v5394_v63, %v12766_v40  ;;  %v5404_v12 = vshll.u32 %v12769_v4, 16  ;;  %v12806_v46 = vcombine.low %v5060_v50, %v5072_v52 }
 0x216   : > { %14169 = vst [vmem:[#allocation10_spill] sm:$0xff] %v12787_v14  ;;  %v6005_v19 = vrot.slane %v5997_v27, %v10387_v34  ;;  %v6009_v35 = vpop.permute.xlu1 %6008  ;;  %v9514_v25 = vpop.f32.mrb[103].mxu0  ;;  %v5400_v50 = vshrl.u32 %v12696_v0, 16  ;;  %v14172_v0 = vld [vmem:[#allocation7_spill] sm:$0xff] }
 0x217   : > { %v6237_v62 = vrot.slane %v6193_v22, 7  ;;  %7809 = vperm.xlu0 %9993, %v8988_v57   ;;  %v8735_v25 = vcombine.low %v4192_v9, %v4204_v38  ;;  %v5273_v22 = vshll.u32 %v12739_v51, 16  ;;  %v5278_v38 = vshrl.u32 %v12806_v46, 16 }
 0x218   : > { %v12808_v27 = vcombine.low %v5993_v31, %v6005_v19  ;;  %9684 = vmatmul.mubr.msk.bf16.gmra.mrb[140].mxu1 %vm1846_vm4, %v4478_v5  ;;  %v5402_v14 = vor.u32 %v5400_v50, %v12766_v40 }
 0x219   : > { %9756 = vmatmul.mubr.msk.bf16.gmra.mrb[208].mxu0 %vm1846_vm4, %v5399_v6  ;;  %v5088_v23 = vpop.permute.xlu0 %5087  ;;  %v12813_v63 = vsel %vm626_vm7, %v6235_v45, %v6237_v62  ;;  %v1998_v60 = vpop.f32.mrb[36].mxu1  ;;  %9687 = vmatprep.mubr.msk.bf16.mxu1 %vm10043_vm2, %v14068_v48  ;;  %v12825_v45 = vmul.bf16 %v5268_v29, %v11209_v13  ;;  %v5275_v9 = vor.u32 %v5273_v22, %v12804_v21  ;;  %v5406_v6 = vrot.slane %v5404_v12, 1 }
 0x21a   : > { %14170 = vst [vmem:[#allocation44_spill] sm:$0xff] %v12813_v63  ;;  %v6160_v58 = vrot.slane %v12808_v27, 1  ;;  %v6033_v49 = vpop.permute.xlu1 %6032  ;;  %9759 = vmatprep.mubr.msk.bf16.mxu0 %vm10043_vm2, %v14068_v48  ;;  %v9445_v52 = vpop.f32.mrb[37].mxu1  ;;  %v12828_v51 = vadd.f32 %v12690_v24, %v1998_v60  ;;  %v10031_v27 = vld [vmem:[%s14026_s3] ss:$0 sm:$0xff]  ;;  %v5096_v29 = vrot.slane %v5088_v23, %v10387_v34  ;;  %v4228_v23 = vrot.slane %v11683_v3, %v10387_v34 }
 0x21b   : > { %v12821_v57 = vpop.f32.mrb[104].mxu0  ;;  %v2001_v19 = vpop.f32.mrb[38].mxu1  ;;  %v577_v52 = vadd.f32 %v10031_v27, %v14172_v0  ;;  %v5407_v40 = vsel %vm1715_vm6, %v5402_v14, %v5406_v6 }
 0x21c   : > { %14171 = vst [vmem:[#allocation45_spill] sm:$0xff] %v12828_v51  ;;  %v6161_v31 = vsel %vm2783_vm8, %v6158_v7, %v6160_v58  ;;  %v9517_v5 = vpop.f32.mrb[105].mxu0  ;;  %v9446_v63 = vpop.f32.mrb[39].mxu1  ;;  %v12839_v60 = vadd.f32 %v12729_v16, %v2001_v19  ;;  %v4479_v7 = vmul.bf16 %v8735_v25, %v10996_v43  ;;  %v5084_v16 = vrot.slane %v12759_v44, %v10387_v34 }
 0x21d   : > { %v6021_v24 = vpop.permute.xlu0 %6020  ;;  %v6194_v22 = vmul.bf16 %v6161_v31, %v14128_v55  ;;  %v6017_v5 = vrot.slane %v6009_v35, %v10387_v34  ;;  %v12845_v51 = vpop.f32.mrb[106].mxu0  ;;  %v5412_v31 = vshll.u32 %v12825_v45, 16  ;;  %v5276_v35 = vsel %vm627_vm5, %v12737_v28, %v5275_v9 }
 0x21e   : > { %14173 = vst [vmem:[#allocation7_spill] sm:$0xff] %v12839_v60  ;;  %v6029_v12 = vrot.slane %v6021_v24, %v10387_v34  ;;  %v12848_v27 = vpop.permute.xlu1 %5099  ;;  %v9518_v63 = vpop.f32.mrb[107].mxu0  ;;  %v12857_v19 = vrot.slane %v5278_v38, 7  ;;  %v610_v50 = vmax.f32 %v577_v52, 0.0  ;;  %v4216_v24 = vrot.slane %v11646_v17, %v10387_v34 }
 0x21f   : > { %v6239_v25 = vrot.slane %v6194_v22, 7  ;;  %v12862_v3 = vcombine.low %v5084_v16, %v5096_v29  ;;  %v5281_v28 = vshll.u32 %v12806_v46, 16  ;;  %v6041_v9 = vrot.slane %v6033_v49, %v10387_v34 }
 0x220   : > { %v8871_v0 = vcombine.low %v6017_v5, %v6029_v12  ;;  %9688 = vmatmul.mubr.msk.bf16.gmra.mrb[144].mxu1 %vm1846_vm4, %v4479_v7  ;;  %v8736_v29 = vcombine.low %v4216_v24, %v4228_v23  ;;  %v5414_v5 = vrot.slane %v5412_v31, 1  ;;  %v12880_v46 = vmul.bf16 %v5276_v35, %v14128_v55 }
 0x221   : > { %9760 = vmatmul.mubr.msk.bf16.gmra.mrb[212].mxu0 %vm1846_vm4, %v5407_v40  ;;  %v6045_v44 = vpop.permute.xlu0 %6044  ;;  %v12867_v22 = vsel %vm626_vm7, %v6237_v62, %v6239_v25  ;;  %v2006_v14 = vpop.f32.mrb[40].mxu1  ;;  %9691 = vmatprep.mubr.msk.bf16.mxu1 %vm10043_vm2, %v14068_v48  ;;  %v5408_v62 = vshrl.u32 %v12769_v4, 16  ;;  %v5283_v49 = vor.u32 %v5281_v28, %v12857_v19  ;;  %v5286_v23 = vshrl.u32 %v12862_v3, 16  ;;  %v14177_v28 = vld [vmem:[#allocation11_spill] sm:$0xff] }
 0x222   : > { %14174 = vst [vmem:[#allocation46_spill] sm:$0xff] %v12867_v22  ;;  %v6162_v38 = vrot.slane %v8871_v0, 1  ;;  %v6053_v52 = vrot.slane %v6045_v44, %v10387_v34  ;;  %v12874_v17 = vpop.permute.xlu1 %6517  ;;  %9763 = vmatprep.mubr.msk.bf16.mxu0 %vm10043_vm2, %v14068_v48  ;;  %v9449_v7 = vpop.f32.mrb[41].mxu1  ;;  %v12887_v40 = vadd.f32 %v12763_v59, %v2006_v14  ;;  %v625_v35 = vpack.c.bf16 %v610_v50, %v610_v50 }
 0x223   : > { %v2009_v63 = vpop.f32.mrb[42].mxu1  ;;  %v12884_v0 = vpop.f32.mrb[108].mxu0  ;;  %v5410_v22 = vor.u32 %v5408_v62, %v5406_v6  ;;  %v4480_v59 = vmul.bf16 %v8736_v29, %v11050_v1  ;;  %v4252_v14 = vrot.slane %v11735_v8, %v10387_v34  ;;  %v5284_v50 = vsel %vm627_vm5, %v12804_v21, %v5283_v49 }
 0x224   : > { %v6163_v12 = vsel %vm2783_vm8, %v6160_v58, %v6162_v38  ;;  %v8872_v16 = vcombine.low %v6041_v9, %v6053_v52  ;;  %14175 = vst [vmem:[#allocation47_spill] sm:$0xff] %v12887_v40  ;;  %v9450_v24 = vpop.f32.mrb[43].mxu1  ;;  %v9521_v44 = vpop.f32.mrb[109].mxu0  ;;  %v12891_v4 = vadd.f32 %v12796_v30, %v2009_v63  ;;  %v4240_v58 = vrot.slane %v14177_v28, %v10387_v34 }
 0x225   : > { %v6195_v31 = vmul.bf16 %v6163_v12, %v11341_v33  ;;  %v6057_v52 = vpop.permute.xlu0 %6056  ;;  %v12896_v7 = vpop.f32.mrb[110].mxu0  ;;  %v5415_v44 = vsel %vm1715_vm6, %v5410_v22, %v5414_v5  ;;  %v5420_v6 = vshll.u32 %v12880_v46, 16  ;;  %v12909_v62 = vrot.slane %v5286_v23, 7 }
 0x226   : > { %14176 = vst [vmem:[#allocation48_spill] sm:$0xff] %v12891_v4  ;;  %v6164_v9 = vrot.slane %v8872_v16, 1  ;;  %v6065_v24 = vrot.slane %v6057_v52, %v10387_v34  ;;  %v9522_v30 = vpop.f32.mrb[111].mxu0  ;;  %v12902_v63 = vpop.permute.xlu1 %6541  ;;  %v14180_v21 = vmov 0  ;;  %v5416_v52 = vshrl.u32 %v12825_v45, 16  ;;  %v14184_v4 = vld [vmem:[#allocation27_spill] sm:$0xff] }
 0x227   : > { %v6241_v12 = vrot.slane %v6195_v31, 7  ;;  %v14179_v31 = vld [vmem:[#allocation6_spill] sm:$0xff]  ;;  %v14181_v21 = vsel %vm12919_vm9, 4294967295, %v14180_v21 }
 0x228   : > { %v6165_v16 = vsel %vm2783_vm8, %v6162_v38, %v6164_v9  ;;  %v8873_v29 = vcombine.low %v6065_v24, %v6065_v24  ;;  %9692 = vmatmul.mubr.msk.bf16.gmra.mrb[148].mxu1 %vm1846_vm4, %v4480_v59  ;;  %14182 = vst [vmem:[#allocation6_spill] sm:$0xff] %v14181_v21  ;;  %v8737_v38 = vcombine.low %v4240_v58, %v4252_v14  ;;  %v12942_v58 = vsel %vm12919_vm9, %v625_v35, 0 }
 0x229   : > { %9764 = vmatmul.mubr.msk.bf16.gmra.mrb[216].mxu0 %vm1846_vm4, %v5415_v44  ;;  %v12914_v8 = vsel %vm626_vm7, %v6239_v25, %v6241_v12  ;;  %v6196_v28 = vmul.bf16 %v6165_v16, %v14179_v31  ;;  %v12923_v22 = vpop.permute.xlu0 %6529  ;;  %9695 = vmatprep.mubr.msk.bf16.mxu1 %vm10043_vm2, %v14068_v48  ;;  %v5289_v25 = vshll.u32 %v12862_v3, 16  ;;  %v5108_v59 = vrot.slane %v12848_v27, %v10387_v34  ;;  %v2014_v24 = vpop.f32.mrb[44].mxu1 }
 0x22a   : > { %14178 = vst [vmem:[#allocation11_spill] sm:$0xff] %v12914_v8  ;;  %9767 = vmatprep.mubr.msk.bf16.mxu0 %vm10043_vm2, %v14068_v48  ;;  %v6166_v49 = vrot.slane %v8873_v29, 1  ;;  %v12930_v23 = vpop.permute.xlu1 %6565  ;;  %v5422_v16 = vrot.slane %v5420_v6, 1  ;;  %v12938_v44 = vmul.bf16 %v5284_v50, %v11341_v33  ;;  %v12947_v45 = vadd.f32 %v12821_v57, %v2014_v24  ;;  %v9453_v27 = vpop.f32.mrb[45].mxu1 }
 0x22b   : > { %v6243_v8 = vrot.slane %v6196_v28, 7  ;;  %v5291_v3 = vor.u32 %v5289_v25, %v12909_v62  ;;  %v4276_v6 = vrot.slane %v14184_v4, %v10387_v34  ;;  %v2017_v40 = vpop.f32.mrb[46].mxu1  ;;  %v5418_v60 = vor.u32 %v5416_v52, %v5414_v5 }
 0x22c   : > { %v12935_v30 = vpop.f32.mrb[112].mxu0  ;;  %v6167_v14 = vsel %vm2783_vm8, %v6164_v9, %v6166_v49  ;;  %14183 = vst [vmem:[#allocation49_spill] sm:$0xff] %v12947_v45  ;;  %v4481_v25 = vmul.bf16 %v8737_v38, %v11104_v15  ;;  %v14186_v9 = vld [vmem:[#allocation12_spill] sm:$0xff]  ;;  %v12959_v57 = vadd.f32 %v12845_v51, %v2017_v40  ;;  %v9454_v24 = vpop.f32.mrb[47].mxu1  ;;  %v8808_v4 = vcombine.low %v5108_v59, %v5108_v59 }
 0x22d   : > { %v9525_v29 = vpop.f32.mrb[113].mxu0  ;;  %v6197_v50 = vmul.bf16 %v6167_v14, %v12942_v58  ;;  %v6554_v28 = vpop.permute.xlu0 %6553  ;;  %v12953_v35 = vsel %vm626_vm7, %v6241_v12, %v6243_v8  ;;  %v4264_v49 = vrot.slane %v14186_v9, %v10387_v34  ;;  %v5423_v5 = vsel %vm1715_vm6, %v5418_v60, %v5422_v16 }
 0x22e   : > { %14185 = vst [vmem:[#allocation27_spill] sm:$0xff] %v12953_v35  ;;  %14187 = vst [vmem:[#allocation12_spill] sm:$0xff] %v12959_v57  ;;  %v12961_v27 = vpop.f32.mrb[114].mxu0  ;;  %v7474_v52 = vpop.permute.xlu1 %7473  ;;  %v5428_v12 = vshll.u32 %v12938_v44, 16  ;;  %v5292_v38 = vsel %vm627_vm5, %v12857_v19, %v5291_v3  ;;  %v6538_v19 = vrot.slane %v12923_v22, %v10387_v34  ;;  %v5294_v59 = vshll.u32 %v8808_v4, 16 }
 0x22f   : > { %v12963_v29 = vrot.slane %v6197_v50, 7  ;;  %v9526_v14 = vpop.f32.mrb[115].mxu0  ;;  %v8738_v51 = vcombine.low %v4264_v49, %v4276_v6  ;;  %v5424_v6 = vshrl.u32 %v12880_v46, 16  ;;  %v12987_v9 = vmul.bf16 %v5292_v38, %v14179_v31 }
 0x230   : > { %9696 = vmatmul.mubr.msk.bf16.gmra.mrb[152].mxu1 %vm1846_vm4, %v4481_v25  ;;  %v5430_v25 = vrot.slane %v5428_v12, 1  ;;  %v6526_v49 = vrot.slane %v12874_v17, %v10387_v34  ;;  %v6562_v24 = vrot.slane %v6554_v28, %v10387_v34  ;;  %v14191_v12 = vld [vmem:[#allocation14_spill] sm:$0xff] }
 0x231   : > { %14188 = vst [vmem:[#allocation50_spill] sm:$0xff] %v12963_v29  ;;  %9768 = vmatmul.mubr.msk.bf16.gmra.mrb[220].mxu0 %vm1846_vm4, %v5423_v5  ;;  %v12971_v40 = vpop.permute.xlu0 %6577  ;;  %9699 = vmatprep.mubr.msk.bf16.mxu1 %vm10043_vm2, %v14068_v48  ;;  %v12979_v60 = vsel %vm626_vm7, %v6243_v8, %v12963_v29  ;;  %v2022_v3 = vpop.f32.mrb[48].mxu1  ;;  %v4482_v4 = vmul.bf16 %v8738_v51, %v11156_v20 }
 0x232   : > { %9771 = vmatprep.mubr.msk.bf16.mxu0 %vm10043_vm2, %v14068_v48  ;;  %14189 = vst [vmem:[#allocation51_spill] sm:$0xff] %v12979_v60  ;;  %v12993_v8 = vadd.f32 %v12884_v0, %v2022_v3  ;;  %v9457_v14 = vpop.f32.mrb[49].mxu1  ;;  %v12996_v21 = vpop.permute.xlu1 %6589  ;;  %v5426_v46 = vor.u32 %v5424_v6, %v5422_v16  ;;  %v4300_v38 = vrot.slane %v14191_v12, %v10387_v34  ;;  %v5436_v6 = vshll.u32 %v12987_v9, 16 }
 0x233   : > { %v2025_v5 = vpop.f32.mrb[50].mxu1  ;;  %v6550_v29 = vrot.slane %v12902_v63, %v10387_v34  ;;  %v8924_v17 = vcombine.low %v6526_v49, %v6538_v19  ;;  %v14193_v14 = vld [vmem:[#allocation28_spill] sm:$0xff]  ;;  %v5296_v51 = vsel %vm627_vm5, %v12909_v62, %v5294_v59  ;;  %v7482_v63 = vrot.slane %v7474_v52, %v10387_v34 }
 0x234   : > { %v12983_v50 = vpop.f32.mrb[116].mxu0  ;;  %14190 = vst [vmem:[#allocation52_spill] sm:$0xff] %v12993_v8  ;;  %v13003_v28 = vadd.f32 %v12896_v7, %v2025_v5  ;;  %v9458_v0 = vpop.f32.mrb[51].mxu1  ;;  %v5431_v16 = vsel %vm1715_vm6, %v5426_v46, %v5430_v25  ;;  %v5432_v46 = vshrl.u32 %v12938_v44, 16 }
 0x235   : > { %v9529_v22 = vpop.f32.mrb[117].mxu0  ;;  %v7486_v3 = vpop.permute.xlu0 %7485  ;;  %v13011_v12 = vcombine.low %v6550_v29, %v6562_v24  ;;  %v6586_v29 = vrot.slane %v12971_v40, %v10387_v34  ;;  %v13026_v24 = vmul.bf16 %v5296_v51, %v12942_v58  ;;  %v5438_v0 = vrot.slane %v5436_v6, 1 }
 0x236   : > { %14192 = vst [vmem:[#allocation14_spill] sm:$0xff] %v13003_v28  ;;  %v4288_v22 = vrot.slane %v14193_v14, %v10387_v34  ;;  %v2250_v60 = vpop.f32.mrb[118].mxu0  ;;  %v7494_v7 = vrot.slane %v7486_v3, %v10387_v34  ;;  %v7498_v49 = vpop.permute.xlu1 %7497  ;;  %v14195_v3 = vld [vmem:[#allocation30_spill] sm:$0xff]  ;;  %v5434_v44 = vor.u32 %v5432_v46, %v5430_v25 }
 0x237   : > { %v9530_v19 = vpop.f32.mrb[119].mxu0  ;;  %v6937_v60 = vshll.u32 %v8924_v17, 16  ;;  %v4324_v14 = vrot.slane %v14195_v3, %v10387_v34  ;;  %v6944_v40 = vshll.u32 %v13011_v12, 16  ;;  %v5444_v25 = vshll.u32 %v13026_v24, 16 }
 0x238   : > { %9700 = vmatmul.mubr.msk.bf16.gmra.mrb[156].mxu1 %vm1846_vm4, %v4482_v4  ;;  %v8739_v62 = vcombine.low %v4288_v22, %v4300_v38  ;;  %v13023_v52 = vcombine.low %v7482_v63, %v7494_v7  ;;  %v6574_v38 = vrot.slane %v12930_v23, %v10387_v34  ;;  %v14197_v63 = vld [vmem:[#allocation29_spill] sm:$0xff] }
 0x239   : > { %9772 = vmatmul.mubr.msk.bf16.gmra.mrb[224].mxu0 %vm1846_vm4, %v5431_v16  ;;  %9703 = vmatprep.mubr.msk.bf16.mxu1 %vm10043_vm2, %v14068_v48  ;;  %v6602_v59 = vpop.permute.xlu0 %6601  ;;  %v2030_v4 = vpop.f32.mrb[52].mxu1  ;;  %v4312_v7 = vrot.slane %v14197_v63, %v10387_v34  ;;  %v13044_v3 = vrot.slane %v6937_v60, 1  ;;  %v6940_v60 = vshrl.u32 %v8924_v17, 16  ;;  %v6946_v46 = vrot.slane %v6944_v40, 1 }
 0x23a   : > { %9775 = vmatprep.mubr.msk.bf16.mxu0 %vm10043_vm2, %v14068_v48  ;;  %14194 = vst [vmem:[#allocation28_spill] sm:$0xff] %v13023_v52  ;;  %v13037_v22 = vadd.f32 %v12935_v30, %v2030_v4  ;;  %v9461_v16 = vpop.f32.mrb[53].mxu1  ;;  %v13041_v52 = vpop.permute.xlu1 %6613  ;;  %v4483_v6 = vmul.bf16 %v8739_v62, %v11209_v13  ;;  %v13046_v35 = vcombine.low %v6574_v38, %v6586_v29 }
 0x23b   : > { %v2033_v19 = vpop.f32.mrb[54].mxu1  ;;  %v7506_v16 = vrot.slane %v7498_v49, %v10387_v34  ;;  %v8740_v62 = vcombine.low %v4312_v7, %v4324_v14  ;;  %v14200_v49 = vld [vmem:[#allocation32_spill] sm:$0xff]  ;;  %v6942_v17 = vor.u32 %v6940_v60, %v13044_v3  ;;  %v6610_v40 = vrot.slane %v6602_v59, %v10387_v34 }
 0x23c   : > { %v13028_v5 = vpop.f32.mrb[120].mxu0  ;;  %14196 = vst [vmem:[#allocation30_spill] sm:$0xff] %v13037_v22  ;;  %v13049_v23 = vadd.f32 %v12961_v27, %v2033_v19  ;;  %v9462_v30 = vpop.f32.mrb[55].mxu1  ;;  %v5439_v22 = vsel %vm1715_vm6, %v5434_v44, %v5438_v0  ;;  %v14199_v27 = vld [vmem:[#allocation31_spill] sm:$0xff]  ;;  %v4336_v19 = vrot.slane %v14200_v49, %v10387_v34  ;;  %v6952_v14 = vshll.u32 %v13046_v35, 16 }
 0x23d   : > { %v9601_v51 = vpop.f32.mrb[121].mxu0  ;;  %v7510_v4 = vpop.permute.xlu0 %7509  ;;  %v4348_v38 = vrot.slane %v14199_v27, %v10387_v34 }
 0x23e   : > { %14198 = vst [vmem:[#allocation29_spill] sm:$0xff] %v13049_v23  ;;  %v7518_v51 = vrot.slane %v7510_v4, %v10387_v34  ;;  %v13053_v63 = vpop.f32.mrb[122].mxu0  ;;  %v7522_v4 = vpop.permute.xlu1 %7521  ;;  %v14203_v23 = vld [vmem:[#allocation33_spill] sm:$0xff]  ;;  %v6954_v45 = vrot.slane %v6952_v14, 1  ;;  %v14205_v14 = vld [vmem:[#allocation19_spill] sm:$0xff] }
 0x23f   : > { %v9602_v29 = vpop.f32.mrb[123].mxu0  ;;  %v8741_v59 = vcombine.low %v4336_v19, %v4348_v38  ;;  %v4372_v28 = vrot.slane %v14203_v23, %v10387_v34  ;;  %v7530_v38 = vrot.slane %v7522_v4, %v10387_v34 }
 0x240   : > { %9704 = vmatmul.mubr.msk.bf16.gmra.mrb[160].mxu1 %vm1846_vm4, %v4483_v6  ;;  %v13063_v30 = vcombine.low %v7506_v16, %v7518_v51  ;;  %v5440_v6 = vshrl.u32 %v12987_v9, 16  ;;  %v5446_v16 = vrot.slane %v5444_v25, 1  ;;  %v6947_v51 = vsel %vm1715_vm6, %v6942_v17, %v6946_v46  ;;  %v14204_v25 = vld [vmem:[#allocation15_spill] sm:$0xff] }
 0x241   : > { %9776 = vmatmul.mubr.msk.bf16.gmra.mrb[228].mxu0 %vm1846_vm4, %v5439_v22  ;;  %9707 = vmatprep.mubr.msk.bf16.mxu1 %vm10043_vm2, %v14068_v48  ;;  %v6626_v22 = vpop.permute.xlu0 %6625  ;;  %v2038_v7 = vpop.f32.mrb[56].mxu1  ;;  %v6598_v29 = vrot.slane %v12996_v21, %v10387_v34  ;;  %v4360_v17 = vrot.slane %v14204_v25, %v10387_v34  ;;  %v6948_v21 = vshrl.u32 %v13011_v12, 16  ;;  %v4485_v4 = vmul.bf16 %v8741_v59, %v11341_v33 }
 0x242   : > { %14201 = vst [vmem:[#allocation31_spill] sm:$0xff] %v13063_v30  ;;  %9779 = vmatprep.mubr.msk.bf16.mxu0 %vm10043_vm2, %v14068_v48  ;;  %v13079_v27 = vadd.f32 %v12983_v50, %v2038_v7  ;;  %v9465_v60 = vpop.f32.mrb[57].mxu1  ;;  %v4484_v30 = vmul.bf16 %v8740_v62, %v14128_v55  ;;  %v13084_v57 = vpop.permute.xlu1 %6637  ;;  %v5442_v9 = vor.u32 %v5440_v6, %v5438_v0  ;;  %v6956_v55 = vshrl.u32 %v13046_v35, 16 }
 0x243   : > { %v2041_v8 = vpop.f32.mrb[58].mxu1  ;;  %v13089_v50 = vcombine.low %v6598_v29, %v6610_v40  ;;  %v13092_v62 = vmul.bf16 %v6947_v51, %v14098_v11  ;;  %v6950_v19 = vor.u32 %v6948_v21, %v6946_v46  ;;  %v5741_v40 = vrot.slane %v14205_v14, %v10387_v34  ;;  %v14208_v21 = vld [vmem:[#allocation17_spill] sm:$0xff] }
 0x244   : > { %v13072_v44 = vpop.f32.mrb[124].mxu0  ;;  %14202 = vst [vmem:[#allocation32_spill] sm:$0xff] %v13079_v27  ;;  %v9466_v7 = vpop.f32.mrb[59].mxu1  ;;  %v5447_v0 = vsel %vm1715_vm6, %v5442_v9, %v5446_v16  ;;  %v6634_v16 = vrot.slane %v6626_v22, %v10387_v34  ;;  %v14207_v9 = vld [vmem:[#allocation16_spill] sm:$0xff]  ;;  %v6958_v35 = vor.u32 %v6956_v55, %v6954_v45 }
 0x245   : > { %v9605_v49 = vpop.f32.mrb[125].mxu0  ;;  %v7534_v60 = vpop.permute.xlu0 %7533  ;;  %v6955_v46 = vsel %vm1715_vm6, %v6950_v19, %v6954_v45  ;;  %v13119_v25 = vrot.slane %v14207_v9, %v10387_v34  ;;  %v5729_v7 = vrot.slane %v14208_v21, %v10387_v34  ;;  %v14210_v22 = vld [vmem:[#allocation20_spill] sm:$0xff]  ;;  %v7067_v21 = vmul.bf16 %v13044_v3, %v14094_v41 }
 0x246   : > { %v7542_v8 = vrot.slane %v7534_v60, %v10387_v34  ;;  %v13096_v23 = vpop.f32.mrb[126].mxu0  ;;  %v7546_v51 = vpop.permute.xlu1 %7545  ;;  %v13115_v49 = vcombine.low %v4360_v17, %v4372_v28  ;;  %v7092_v60 = vshrl.u32 %v13092_v62, 16  ;;  %v5765_v19 = vrot.slane %v14210_v22, %v10387_v34  ;;  %v14211_v17 = vld [vmem:[#allocation23_spill] sm:$0xff] }
 0x247   : > { %v9606_v12 = vpop.f32.mrb[127].mxu0  ;;  %v6622_v28 = vrot.slane %v13041_v52, %v10387_v34  ;;  %v13138_v27 = vmul.bf16 %v6955_v46, %v14100_v37  ;;  %v5448_v22 = vshrl.u32 %v13026_v24, 16  ;;  %v7554_v3 = vrot.slane %v7546_v51, %v10387_v34 }
 0x248   : > { %9708 = vmatmul.mubr.msk.bf16.gmra.mrb[164].mxu1 %vm1846_vm4, %v4484_v30  ;;  %v13103_v6 = vcombine.low %v7530_v38, %v7542_v8  ;;  %v6960_v30 = vshll.u32 %v13089_v50, 16  ;;  %v14209_v8 = vld [vmem:[#allocation18_spill] sm:$0xff]  ;;  %v7095_v51 = vshll.u32 %v13092_v62, 16  ;;  %v4486_v45 = vmul.bf16 %v13115_v49, %v14179_v31 }
 0x249   : > { %9780 = vmatmul.mubr.msk.bf16.gmra.mrb[232].mxu0 %vm1846_vm4, %v5447_v0  ;;  %9711 = vmatprep.mubr.msk.bf16.mxu1 %vm10043_vm2, %v14068_v48  ;;  %v13113_v29 = vpop.permute.xlu0 %6649  ;;  %v2904_v59 = vpop.f32.mrb[60].mxu1  ;;  %v5753_v0 = vrot.slane %v14209_v8, %v10387_v34  ;;  %v13144_v13 = vcombine.low %v6622_v28, %v6634_v16  ;;  %v7088_v16 = vshrl.u32 %v7067_v21, 16  ;;  %v7100_v55 = vshrl.u32 %v13138_v27, 16 }
 0x24a   : > { %14206 = vst [vmem:[#allocation33_spill] sm:$0xff] %v13103_v6  ;;  %9783 = vmatprep.mubr.msk.bf16.mxu0 %vm10043_vm2, %v14068_v48  ;;  %v3022_v12 = vadd.f32 %v2904_v59, %v14211_v17  ;;  %v9537_v14 = vpop.f32.mrb[61].mxu1  ;;  %v13133_v6 = vcombine.low %v5729_v7, %v5741_v40  ;;  %v13140_v8 = vpop.permute.xlu1 %6661  ;;  %v6962_v52 = vrot.slane %v6960_v30, 1  ;;  %v14212_v59 = vld [vmem:[#allocation34_spill] sm:$0xff]  ;;  %v6658_v62 = vrot.slane %v13113_v29, %v10387_v34 }
 0x24b   : > { %v2907_v33 = vpop.f32.mrb[62].mxu1  ;;  %v13147_v14 = vrot.slane %v7092_v60, 7  ;;  %v13156_v24 = vcombine.low %v5753_v0, %v5765_v19  ;;  %v8743_v0 = vcombine.low %v13119_v25, %v13119_v25 }
 0x24c   : > { %v13124_v38 = vpop.f32.mrb[128].mxu0  ;;  %v3023_v17 = vadd.f32 %v2907_v33, %v14212_v59  ;;  %v9538_v40 = vpop.f32.mrb[63].mxu1  ;;  %v13154_v18 = vadd.f32 %v13028_v5, %v3022_v12  ;;  %v6963_v5 = vsel %vm1715_vm6, %v6958_v35, %v6962_v52  ;;  %v6139_v19 = vrot.slane %v13133_v6, 1  ;;  %v14215_v12 = vld [vmem:[#allocation21_spill] sm:$0xff] }
 0x24d   : > { %v9609_v9 = vpop.f32.mrb[129].mxu0  ;;  %v7558_v7 = vpop.permute.xlu0 %7557  ;;  %v5777_v21 = vrot.slane %v14215_v12, %v10387_v34  ;;  %v7097_v49 = vor.u32 %v7095_v51, %v13147_v14  ;;  %v14216_v40 = vld [vmem:[#allocation22_spill] sm:$0xff]  ;;  %v13194_v35 = vmul.bf16 %v6963_v5, %v10841_v26  ;;  %v13198_v51 = vrot.slane %v7100_v55, 7 }
 0x24e   : > { %v7566_v46 = vrot.slane %v7558_v7, %v10387_v34  ;;  %v13151_v9 = vpop.f32.mrb[130].mxu0  ;;  %v13161_v33 = vadd.f32 %v13053_v63, %v3023_v17  ;;  %v7570_v28 = vpop.permute.xlu1 %7569  ;;  %v6968_v63 = vshll.u32 %v13144_v13, 16  ;;  %v5789_v29 = vrot.slane %v14216_v40, %v10387_v34 }
 0x24f   : > { %v9610_v30 = vpop.f32.mrb[131].mxu0  ;;  %v6646_v7 = vrot.slane %v13084_v57, %v10387_v34  ;;  %v7103_v17 = vshll.u32 %v13138_v27, 16  ;;  %v6964_v40 = vshrl.u32 %v13089_v50, 16  ;;  %v14217_v27 = vrot.slane %v13156_v24, 1 }
 0x250   : > { %9712 = vmatmul.mubr.msk.bf16.gmra.mrb[168].mxu1 %vm1846_vm4, %v4485_v4  ;;  %14213 = vst [vmem:[#allocation15_spill] sm:$0xff] %v13161_v33  ;;  %v13164_v60 = vcombine.low %v7554_v3, %v7566_v46  ;;  %v7090_v46 = vrot.slane %v7088_v16, 7  ;;  %v7578_v16 = vrot.slane %v7570_v28, %v10387_v34 }
 0x251   : > { %9784 = vmatmul.mubr.msk.bf16.gmra.mrb[236].mxu0 %vm1846_vm4, %v5448_v22  ;;  %9715 = vmatprep.mubr.msk.bf16.mxu1 %vm10043_vm2, %v14068_v48  ;;  %v13177_v4 = vpop.permute.xlu0 %6673  ;;  %v2912_v22 = vpop.f32.mrb[64].mxu1  ;;  %v13202_v33 = vcombine.low %v6646_v7, %v6658_v62  ;;  %v6141_v50 = vsel %vm2783_vm8, %v6139_v19, %v14217_v27  ;;  %v13221_v62 = vcombine.low %v5777_v21, %v5789_v29  ;;  %v6972_v27 = vshrl.u32 %v13144_v13, 16 }
 0x252   : > { %14214 = vst [vmem:[#allocation19_spill] sm:$0xff] %v13164_v60  ;;  %9855 = vmatprep.mubr.msk.bf16.mxu0 %vm10043_vm2, %v14068_v48  ;;  %v3024_v25 = vadd.f32 %v2912_v22, %v12243_v56  ;;  %v9541_v3 = vpop.f32.mrb[65].mxu1  ;;  %v13196_v12 = vpop.permute.xlu1 %6685  ;;  %v6970_v60 = vrot.slane %v6968_v63, 1  ;;  %v7098_v55 = vsel %vm627_vm5, %v7090_v46, %v7097_v49  ;;  %v6966_v63 = vor.u32 %v6964_v40, %v6962_v52 }
 0x253   : > { %v2915_v30 = vpop.f32.mrb[66].mxu1  ;;  %v7108_v52 = vshrl.u32 %v13194_v35, 16  ;;  %v6682_v21 = vrot.slane %v13177_v4, %v10387_v34  ;;  %v6183_v40 = vmul.bf16 %v6139_v19, %v14094_v41 }
 0x254   : > { %v13184_v59 = vpop.f32.mrb[132].mxu0  ;;  %v3025_v56 = vadd.f32 %v2915_v30, %v12259_v36  ;;  %v9542_v57 = vpop.f32.mrb[67].mxu1  ;;  %v6974_v13 = vor.u32 %v6972_v27, %v6970_v60 }
 0x255   : > { %v9613_v6 = vpop.f32.mrb[133].mxu0  ;;  %v7582_v22 = vpop.permute.xlu0 %7581  ;;  %v13251_v19 = vrot.slane %v7108_v52, 7 }
 0x256   : > { %v7590_v5 = vrot.slane %v7582_v22, %v10387_v34  ;;  %v13207_v3 = vpop.f32.mrb[134].mxu0  ;;  %v13211_v6 = vadd.f32 %v13072_v44, %v3024_v25  ;;  %v13219_v28 = vadd.f32 %v13096_v23, %v3025_v56  ;;  %v7594_v49 = vpop.permute.xlu1 %7593  ;;  %v7105_v44 = vor.u32 %v7103_v17, %v13198_v51 }
 0x257   : > { %v9614_v36 = vpop.f32.mrb[135].mxu0  ;;  %v6976_v23 = vshll.u32 %v13202_v33, 16  ;;  %v4487_v25 = vmul.bf16 %v8743_v0, %v12942_v58  ;;  %v6184_v56 = vmul.bf16 %v6141_v50, %v14098_v11  ;;  %v6670_v17 = vrot.slane %v13140_v8, %v10387_v34 }
 0x258   : > { %9716 = vmatmul.mubr.msk.bf16.gmra.mrb[172].mxu1 %vm1846_vm4, %v4486_v45  ;;  %v13223_v7 = vcombine.low %v7578_v16, %v7590_v5  ;;  %v6971_v45 = vsel %vm1715_vm6, %v6966_v63, %v6970_v60  ;;  %v7106_v41 = vsel %vm627_vm5, %v13147_v14, %v7105_v44  ;;  %v7111_v5 = vshll.u32 %v13194_v35, 16 }
 0x259   : > { %9856 = vmatmul.mubr.msk.bf16.vlgmr.msra.gmra.mrb[240].mxu0 %vm1846_vm4, %v7098_v55  ;;  %9719 = vmatprep.mubr.msk.bf16.mxu1 %vm10043_vm2, %v14068_v48  ;;  %v6698_v29 = vpop.permute.xlu0 %6697  ;;  %v2920_v46 = vpop.f32.mrb[68].mxu1  ;;  %v13245_v4 = vmul.bf16 %v6971_v45, %v10889_v47  ;;  %v6978_v8 = vrot.slane %v6976_v23, 1  ;;  %v13254_v50 = vcombine.low %v6670_v17, %v6682_v21  ;;  %v7602_v45 = vrot.slane %v7594_v49, %v10387_v34 }
 0x25a   : > { %14218 = vst [vmem:[#allocation16_spill] sm:$0xff] %v13223_v7  ;;  %9859 = vmatprep.mubr.msk.bf16.mxu0 %vm10043_vm2, %v14068_v48  ;;  %v3026_v57 = vadd.f32 %v2920_v46, %v12307_v32  ;;  %v9545_v22 = vpop.f32.mrb[69].mxu1  ;;  %v13247_v55 = vpop.permute.xlu1 %6709  ;;  %v14219_v32 = vld [vmem:[#allocation5_spill] sm:$0xff]  ;;  %v13265_v44 = vrot.slane %v6184_v56, 7  ;;  %v14220_v49 = vrot.slane %v13221_v62, 1  ;;  %v14221_v21 = vrot.slane %v13156_v24, 1 }
 0x25b   : > { %v2923_v0 = vpop.f32.mrb[70].mxu1  ;;  %v7113_v60 = vor.u32 %v7111_v5, %v13251_v19  ;;  %v6984_v56 = vshll.u32 %v13254_v50, 16  ;;  %v6706_v24 = vrot.slane %v6698_v29, %v10387_v34 }
 0x25c   : > { %v13236_v30 = vpop.f32.mrb[136].mxu0  ;;  %v3027_v63 = vadd.f32 %v2923_v0, %v14219_v32  ;;  %v9546_v36 = vpop.f32.mrb[71].mxu1  ;;  %v13263_v14 = vadd.f32 %v13124_v38, %v3026_v57  ;;  %v6143_v35 = vsel %vm2783_vm8, %v14221_v21, %v14220_v49  ;;  %v6218_v0 = vrot.slane %v6183_v40, 7 }
 0x25d   : > { %v9617_v16 = vpop.f32.mrb[137].mxu0  ;;  %v7606_v46 = vpop.permute.xlu0 %7605  ;;  %v6694_v32 = vrot.slane %v13196_v12, %v10387_v34  ;;  %v7114_v12 = vsel %vm627_vm5, %v13198_v51, %v7113_v60  ;;  %v6980_v21 = vshrl.u32 %v13202_v33, 16 }
 0x25e   : > { %v7614_v22 = vrot.slane %v7606_v46, %v10387_v34  ;;  %v13259_v16 = vpop.f32.mrb[138].mxu0  ;;  %v13270_v23 = vadd.f32 %v13151_v9, %v3027_v63  ;;  %v7618_v38 = vpop.permute.xlu1 %7617  ;;  %v7116_v9 = vshrl.u32 %v13245_v4, 16  ;;  %v14223_v63 = vld [vmem:[#allocation36_spill] sm:$0xff]  ;;  %v6220_v40 = vsel %vm626_vm7, %v6218_v0, %v13265_v44 }
 0x25f   : > { %v9618_v52 = vpop.f32.mrb[139].mxu0  ;;  %v7626_v0 = vrot.slane %v7618_v38, %v10387_v34  ;;  %v6982_v60 = vor.u32 %v6980_v21, %v6978_v8  ;;  %v14225_v38 = vld [vmem:[#allocation35_spill] sm:$0xff] }
 0x260   : > { %9720 = vmatmul.mubr.msk.bf16.gmra.mrb[176].mxu1 %vm1846_vm4, %v4487_v25  ;;  %v13277_v17 = vcombine.low %v7602_v45, %v7614_v22  ;;  %v6979_v25 = vsel %vm1715_vm6, %v6974_v13, %v6978_v8  ;;  %v6185_v45 = vmul.bf16 %v6143_v35, %v14100_v37  ;;  %v10028_v52 = vld [vmem:[%s14027_s4 + $0x80] sm:$0xff]   ;;  %v13308_v49 = vrot.slane %v7116_v9, 7 }
 0x261   : > { %9860 = vmatmul.mubr.msk.bf16.gmra.mrb[244].mxu0 %vm1846_vm4, %v7106_v41  ;;  %9791 = vmatprep.mubr.msk.bf16.mxu1 %vm10043_vm2, %v14068_v48  ;;  %v13288_v57 = vpop.permute.xlu0 %6721  ;;  %v2928_v41 = vpop.f32.mrb[72].mxu1  ;;  %v13297_v22 = vmul.bf16 %v6979_v25, %v10942_v53  ;;  %v6986_v35 = vrot.slane %v6984_v56, 1  ;;  %v13311_v25 = vcombine.low %v6694_v32, %v6706_v24  ;;  %v7119_v53 = vshll.u32 %v13245_v4, 16 }
 0x262   : > { %14222 = vst [vmem:[#allocation17_spill] sm:$0xff] %v13277_v17  ;;  %9863 = vmatprep.mubr.msk.bf16.mxu0 %vm10043_vm2, %v14068_v48  ;;  %v3028_v36 = vadd.f32 %v2928_v41, %v14223_v63  ;;  %v9549_v5 = vpop.f32.mrb[73].mxu1  ;;  %v13299_v29 = vpop.permute.xlu1 %6733  ;;  %v14224_v41 = vld [vmem:[#allocation37_spill] sm:$0xff]  ;;  %v13324_v9 = vrot.slane %v6185_v45, 7  ;;  %v14226_v24 = vrot.slane %v14225_v38, 1  ;;  %v14227_v32 = vrot.slane %v13221_v62, 1 }
 0x263   : > { %v2931_v13 = vpop.f32.mrb[74].mxu1  ;;  %v7121_v45 = vor.u32 %v7119_v53, %v13308_v49  ;;  %v6992_v62 = vshll.u32 %v13311_v25, 16  ;;  %v7127_v38 = vshll.u32 %v13297_v22, 16 }
 0x264   : > { %v13290_v27 = vpop.f32.mrb[140].mxu0  ;;  %v3029_v63 = vadd.f32 %v2931_v13, %v14224_v41  ;;  %v9550_v5 = vpop.f32.mrb[75].mxu1  ;;  %v13320_v51 = vadd.f32 %v13184_v59, %v3028_v36  ;;  %v6145_v4 = vsel %vm2783_vm8, %v14227_v32, %v14226_v24  ;;  %v7124_v59 = vshrl.u32 %v13297_v22, 16 }
 0x265   : > { %v9621_v46 = vpop.f32.mrb[141].mxu0  ;;  %v6987_v13 = vsel %vm1715_vm6, %v6982_v60, %v6986_v35  ;;  %v6186_v5 = vmul.bf16 %v6145_v4, %v10841_v26  ;;  %v6994_v24 = vrot.slane %v6992_v62, 1 }
 0x266   : > { %v7630_v46 = vpop.permute.xlu0 %7629  ;;  %v13316_v7 = vpop.f32.mrb[142].mxu0  ;;  %v13327_v56 = vadd.f32 %v13207_v3, %v3029_v63  ;;  %v10029_v3 = vld [vmem:[%s14027_s4 + $0x88] sm:$0xff]   ;;  %v6222_v63 = vsel %vm626_vm7, %v13265_v44, %v13324_v9  ;;  %v6988_v44 = vshrl.u32 %v13254_v50, 16 }
 0x267   : > { %v7638_v17 = vrot.slane %v7630_v46, %v10387_v34  ;;  %v9622_v33 = vpop.f32.mrb[143].mxu0  ;;  %v7642_v8 = vpop.permute.xlu1 %7641  ;;  %v13359_v46 = vrot.slane %v7124_v59, 7  ;;  %v6223_v50 = vrot.slane %v6186_v5, 7 }
 0x268   : > { %9792 = vmatmul.mubr.msk.bf16.vlgmr.msra.gmra.mrb[180].mxu1 %vm1846_vm4, %v6220_v40 }
 0x269   : > { %9864 = vmatmul.mubr.msk.bf16.gmra.mrb[248].mxu0 %vm1846_vm4, %v7114_v12  ;;  %v13335_v36 = vcombine.low %v7626_v0, %v7638_v17  ;;  %9916 = vmatpush3.bf16.msra.mxu1 %v10028_v52  ;;  %v6730_v17 = vrot.slane %v13288_v57, %v10387_v34  ;;  %v2936_v52 = vpop.f32.mrb[76].mxu1  ;;  %v7073_v0 = vmul.bf16 %v6987_v13, %v10996_v43 }
 0x26a   : > { %9795 = vmatprep.mubr.msk.bf16.mxu1 %vm10043_vm2, %v14068_v48  ;;  %v13345_v40 = vpop.permute.xlu0 %6745  ;;  %9867 = vmatprep.mubr.msk.bf16.mxu0 %vm10043_vm2, %v14068_v48  ;;  %v3030_v12 = vadd.f32 %v2936_v52, %v12463_v54  ;;  %v9553_v21 = vpop.f32.mrb[77].mxu1  ;;  %v6718_v57 = vrot.slane %v13247_v55, %v10387_v34  ;;  %v7122_v54 = vsel %vm627_vm5, %v13251_v19, %v7121_v45 }
 0x26b   : > { %9917 = vmatprep.subr.bf16.mxu1 %v14068_v48  ;;  %v2939_v60 = vpop.f32.mrb[78].mxu1  ;;  %v13364_v33 = vpop.permute.xlu1 %6757  ;;  %v7650_v55 = vrot.slane %v7642_v8, %v10387_v34  ;;  %v7129_v45 = vor.u32 %v7127_v38, %v13359_v46  ;;  %v7132_v8 = vshrl.u32 %v7073_v0, 16  ;;  %v7135_v38 = vshll.u32 %v7073_v0, 16 }
 0x26c   : > { %v13352_v53 = vpop.f32.mrb[144].mxu0  ;;  %v3031_v32 = vadd.f32 %v2939_v60, %v12484_v2  ;;  %v9554_v4 = vpop.f32.mrb[79].mxu1  ;;  %v13371_v13 = vcombine.low %v6718_v57, %v6730_v17  ;;  %v13378_v19 = vadd.f32 %v13236_v30, %v3030_v12 }
 0x26d   : > { %v9625_v41 = vpop.f32.mrb[145].mxu0  ;;  %9918 = vmatpush3.bf16.msra.mxu1 %v10029_v3  ;;  %v6990_v3 = vor.u32 %v6988_v44, %v6986_v35  ;;  %v6754_v35 = vrot.slane %v13345_v40, %v10387_v34  ;;  %v7130_v44 = vsel %vm627_vm5, %v13308_v49, %v7129_v45 }
 0x26e   : > { %v7654_v59 = vpop.permute.xlu0 %7653  ;;  %v13375_v21 = vpop.f32.mrb[146].mxu0  ;;  %v13383_v2 = vadd.f32 %v13259_v16, %v3031_v32  ;;  %v7000_v16 = vshll.u32 %v13371_v13, 16 }
 0x26f   : > { %v7662_v52 = vrot.slane %v7654_v59, %v10387_v34  ;;  %v9626_v22 = vpop.f32.mrb[147].mxu0  ;;  %v7666_v17 = vpop.permute.xlu1 %7665  ;;  %v6995_v12 = vsel %vm1715_vm6, %v6990_v3, %v6994_v24  ;;  %v6224_v59 = vsel %vm626_vm7, %v13324_v9, %v6223_v50 }
 0x270   : > { %9796 = vmatmul.mubr.msk.bf16.gmra.mrb[184].mxu1 %vm1846_vm4, %v6222_v63  ;;  %v7074_v40 = vmul.bf16 %v6995_v12, %v11050_v1  ;;  %v7002_v3 = vrot.slane %v7000_v16, 1  ;;  %v7674_v49 = vrot.slane %v7666_v17, %v10387_v34 }
 0x271   : > { %9868 = vmatmul.mubr.msk.bf16.gmra.mrb[252].mxu0 %vm1846_vm4, %v7122_v54  ;;  %v13386_v62 = vcombine.low %v7650_v55, %v7662_v52  ;;  %9799 = vmatprep.mubr.msk.bf16.mxu1 %vm10043_vm2, %v14068_v48  ;;  %v2944_v41 = vpop.f32.mrb[80].mxu1  ;;  %v13401_v54 = vrot.slane %v7132_v8, 7  ;;  %v6996_v55 = vshrl.u32 %v13311_v25, 16 }
 0x272   : > { %9871 = vmatprep.mubr.msk.bf16.mxu0 %vm10043_vm2, %v14068_v48  ;;  %v13392_v30 = vpop.permute.xlu0 %6769  ;;  %v3032_v5 = vadd.f32 %v2944_v41, %v12543_v61  ;;  %v9557_v57 = vpop.f32.mrb[81].mxu1  ;;  %v6742_v61 = vrot.slane %v13299_v29, %v10387_v34 }
 0x273   : > { %v2947_v32 = vpop.f32.mrb[82].mxu1  ;;  %v13405_v4 = vpop.permute.xlu1 %6781  ;;  %v7137_v29 = vor.u32 %v7135_v38, %v13401_v54  ;;  %v6998_v17 = vor.u32 %v6996_v55, %v6994_v24  ;;  %v6778_v24 = vrot.slane %v13392_v30, %v10387_v34  ;;  %v6766_v30 = vrot.slane %v13364_v33, %v10387_v34 }
 0x274   : > { %v13396_v63 = vpop.f32.mrb[148].mxu0  ;;  %v3033_v52 = vadd.f32 %v2947_v32, %v12563_v10  ;;  %v9558_v22 = vpop.f32.mrb[83].mxu1  ;;  %v13419_v9 = vadd.f32 %v13290_v27, %v3032_v5  ;;  %v13421_v25 = vcombine.low %v6742_v61, %v6754_v35  ;;  %v7140_v27 = vshrl.u32 %v7074_v40, 16  ;;  %v14229_v61 = vld [vmem:[#allocation38_spill] sm:$0xff] }
 0x275   : > { %v9629_v60 = vpop.f32.mrb[149].mxu0  ;;  %v7003_v5 = vsel %vm1715_vm6, %v6998_v17, %v7002_v3  ;;  %v7138_v22 = vsel %vm627_vm5, %v13359_v46, %v7137_v29  ;;  %v7004_v29 = vshrl.u32 %v13371_v13, 16 }
 0x276   : > { %v7678_v0 = vpop.permute.xlu0 %7677  ;;  %v13416_v8 = vpop.f32.mrb[150].mxu0  ;;  %v13426_v10 = vadd.f32 %v13316_v7, %v3033_v52  ;;  %v7008_v7 = vshll.u32 %v13421_v25, 16  ;;  %v6226_v52 = vsel %vm626_vm7, %v6223_v50, %v14229_v61 }
 0x277   : > { %v7686_v45 = vrot.slane %v7678_v0, %v10387_v34  ;;  %v9630_v12 = vpop.f32.mrb[151].mxu0  ;;  %v7690_v41 = vpop.permute.xlu1 %7689  ;;  %v13448_v0 = vrot.slane %v7140_v27, 7  ;;  %v7006_v13 = vor.u32 %v7004_v29, %v7002_v3  ;;  %v6790_v3 = vrot.slane %v13405_v4, %v10387_v34 }
 0x278   : > { %9800 = vmatmul.mubr.msk.bf16.gmra.mrb[188].mxu1 %vm1846_vm4, %v6224_v59  ;;  %v7010_v27 = vrot.slane %v7008_v7, 1  ;;  %v7012_v4 = vshrl.u32 %v13421_v25, 16 }
 0x279   : > { %9872 = vmatmul.mubr.msk.bf16.gmra.mrb[0].mxu0 %vm1846_vm4, %v7130_v44  ;;  %v13429_v16 = vcombine.low %v7674_v49, %v7686_v45  ;;  %9803 = vmatprep.mubr.msk.bf16.mxu1 %vm10043_vm2, %v14068_v48  ;;  %v2952_v57 = vpop.f32.mrb[84].mxu1  ;;  %v7075_v49 = vmul.bf16 %v7003_v5, %v11104_v15  ;;  %v14230_v45 = vld [vmem:[#allocation41_spill] sm:$0xff]  ;;  %v13462_v5 = vcombine.low %v6766_v30, %v6778_v24 }
 0x27a   : > { %9875 = vmatprep.mubr.msk.bf16.mxu0 %vm10043_vm2, %v14068_v48  ;;  %v6794_v35 = vpop.permute.xlu0 %6793  ;;  %v3034_v38 = vadd.f32 %v2952_v57, %v12621_v42  ;;  %v9561_v44 = vpop.f32.mrb[85].mxu1  ;;  %v7143_v57 = vshll.u32 %v7074_v40, 16 }
 0x27b   : > { %14228 = vst [vmem:[#allocation18_spill] sm:$0xff] %v13429_v16  ;;  %v2955_v59 = vpop.f32.mrb[86].mxu1  ;;  %v13442_v55 = vpop.permute.xlu1 %6805  ;;  %v7698_v44 = vrot.slane %v7690_v41, %v10387_v34  ;;  %v7148_v7 = vshrl.u32 %v7075_v49, 16 }
 0x27c   : > { %v13436_v60 = vpop.f32.mrb[152].mxu0  ;;  %v3035_v42 = vadd.f32 %v2955_v59, %v14230_v45  ;;  %v9562_v12 = vpop.f32.mrb[87].mxu1  ;;  %v13459_v46 = vadd.f32 %v13352_v53, %v3034_v38  ;;  %v7145_v53 = vor.u32 %v7143_v57, %v13448_v0  ;;  %v14232_v57 = vld [vmem:[#allocation9_spill] sm:$0xff] }
 0x27d   : > { %v9633_v32 = vpop.f32.mrb[153].mxu0 }
 0x27e   : > { %v7702_v17 = vpop.permute.xlu0 %7701  ;;  %v13456_v50 = vpop.f32.mrb[154].mxu0  ;;  %v13467_v40 = vadd.f32 %v13375_v21, %v3035_v42  ;;  %v7011_v21 = vsel %vm1715_vm6, %v7006_v13, %v7010_v27 }
 0x27f   : > { %v7710_v32 = vrot.slane %v7702_v17, %v10387_v34  ;;  %v9634_v33 = vpop.f32.mrb[155].mxu0  ;;  %v7714_v24 = vpop.permute.xlu1 %7713  ;;  %v13482_v17 = vrot.slane %v7148_v7, 7  ;;  %v7076_v13 = vmul.bf16 %v7011_v21, %v11156_v20 }
 0x280   : > { %9804 = vmatmul.mubr.msk.bf16.gmra.mrb[192].mxu1 %vm1846_vm4, %v6226_v52  ;;  %v7016_v52 = vshll.u32 %v13462_v5, 16  ;;  %v7146_v33 = vsel %vm627_vm5, %v13401_v54, %v7145_v53 }
 0x281   : > { %9876 = vmatmul.mubr.msk.bf16.gmra.mrb[4].mxu0 %vm1846_vm4, %v7138_v22  ;;  %v13469_v41 = vcombine.low %v7698_v44, %v7710_v32  ;;  %9807 = vmatprep.mubr.msk.bf16.mxu1 %vm10043_vm2, %v14068_v48  ;;  %v2960_v59 = vpop.f32.mrb[88].mxu1  ;;  %v6802_v22 = vrot.slane %v6794_v35, %v10387_v34  ;;  %v7722_v35 = vrot.slane %v7714_v24, %v10387_v34  ;;  %v7151_v24 = vshll.u32 %v7075_v49, 16 }
 0x282   : > { %9879 = vmatprep.mubr.msk.bf16.mxu0 %vm10043_vm2, %v14068_v48  ;;  %v6818_v38 = vpop.permute.xlu0 %6817  ;;  %v3036_v30 = vadd.f32 %v2960_v59, %v12699_v39  ;;  %v9565_v45 = vpop.f32.mrb[89].mxu1 }
 0x283   : > { %14231 = vst [vmem:[#allocation20_spill] sm:$0xff] %v13469_v41  ;;  %v2963_v12 = vpop.f32.mrb[90].mxu1  ;;  %v7018_v45 = vrot.slane %v7016_v52, 1  ;;  %v6830_v25 = vpop.permute.xlu1 %6829  ;;  %v7153_v52 = vor.u32 %v7151_v24, %v13482_v17  ;;  %v14237_v24 = vld [vmem:[#allocation25_spill] sm:$0xff] }
 0x284   : > { %v13476_v61 = vpop.f32.mrb[156].mxu0  ;;  %v3037_v44 = vadd.f32 %v2963_v12, %v14232_v57  ;;  %v9566_v32 = vpop.f32.mrb[91].mxu1  ;;  %v13495_v7 = vadd.f32 %v13396_v63, %v3036_v30  ;;  %v14233_v12 = vld [vmem:[#allocation39_spill] sm:$0xff]  ;;  %v7014_v63 = vor.u32 %v7012_v4, %v7010_v27  ;;  %v6826_v57 = vrot.slane %v6818_v38, %v10387_v34 }
 0x285   : > { %v9637_v42 = vpop.f32.mrb[157].mxu0  ;;  %v6814_v27 = vrot.slane %v13442_v55, %v10387_v34  ;;  %v7154_v38 = vsel %vm627_vm5, %v13448_v0, %v7153_v52  ;;  %v14238_v55 = vld [vmem:[#allocation26_spill] sm:$0xff] }
 0x286   : > { %v7726_v29 = vpop.permute.xlu0 %7725  ;;  %v13492_v59 = vpop.f32.mrb[158].mxu0  ;;  %v13498_v42 = vcombine.low %v6790_v3, %v6802_v22  ;;  %v13504_v53 = vadd.f32 %v13416_v8, %v3037_v44  ;;  %v7156_v22 = vshrl.u32 %v7076_v13, 16  ;;  %v7019_v8 = vsel %vm1715_vm6, %v7014_v63, %v7018_v45  ;;  %v14235_v44 = vld [vmem:[#allocation43_spill] sm:$0xff] }
 0x287   : > { %v7734_v39 = vrot.slane %v7726_v29, %v10387_v34  ;;  %v9638_v54 = vpop.f32.mrb[159].mxu0  ;;  %v13545_v0 = vpop.permute.xlu1 %7737 }
 0x288   : > { %9808 = vmatmul.mubr.msk.bf16.gmra.mrb[196].mxu1 %vm1846_vm4, %v14233_v12  ;;  %v7024_v49 = vshll.u32 %v13498_v42, 16  ;;  %v13522_v54 = vrot.slane %v7156_v22, 7  ;;  %14239 = vst [vmem:[#allocation34_spill] sm:$0xff] %v13545_v0  ;;  %v7028_v41 = vshrl.u32 %v13498_v42, 16 }
 0x289   : > { %9880 = vmatmul.mubr.msk.bf16.gmra.mrb[8].mxu0 %vm1846_vm4, %v7146_v33  ;;  %v13506_v21 = vcombine.low %v7722_v35, %v7734_v39  ;;  %9811 = vmatprep.mubr.msk.bf16.mxu1 %vm10043_vm2, %v14068_v48  ;;  %v2968_v30 = vpop.f32.mrb[92].mxu1  ;;  %v14236_v39 = vld [vmem:[#allocation10_spill] sm:$0xff] }
 0x28a   : > { %9883 = vmatprep.mubr.msk.bf16.mxu0 %vm10043_vm2, %v14068_v48  ;;  %v3038_v32 = vadd.f32 %v2968_v30, %v14235_v44  ;;  %v9569_v29 = vpop.f32.mrb[93].mxu1  ;;  %v7020_v44 = vshrl.u32 %v13462_v5, 16 }
 0x28b   : > { %14234 = vst [vmem:[#allocation23_spill] sm:$0xff] %v13506_v21  ;;  %v2971_v35 = vpop.f32.mrb[94].mxu1  ;;  %v7077_v21 = vmul.bf16 %v7019_v8, %v14237_v24  ;;  %v7026_v29 = vrot.slane %v7024_v49, 1  ;;  %v14242_v24 = vld [vmem:[#allocation3_spill] sm:$0xff] }
 0x28c   : > { %v13513_v3 = vpop.f32.mrb[160].mxu0  ;;  %v3039_v4 = vadd.f32 %v2971_v35, %v14236_v39  ;;  %v9570_v12 = vpop.f32.mrb[95].mxu1  ;;  %v13530_v30 = vadd.f32 %v13436_v60, %v3038_v32  ;;  %v7159_v35 = vshll.u32 %v7076_v13, 16  ;;  %v7022_v60 = vor.u32 %v7020_v44, %v7018_v45  ;;  %v14241_v44 = vld [vmem:[#allocation7_spill] sm:$0xff] }
 0x28d   : > { %v9641_v33 = vpop.f32.mrb[161].mxu0  ;;  %v6842_v39 = vpop.permute.xlu0 %6841  ;;  %v7164_v52 = vshrl.u32 %v7077_v21, 16  ;;  %v6838_v45 = vrot.slane %v6830_v25, %v10387_v34 }
 0x28e   : > { %v13525_v63 = vpop.f32.mrb[162].mxu0  ;;  %v13533_v33 = vcombine.low %v6814_v27, %v6826_v57  ;;  %v13539_v8 = vadd.f32 %v13456_v50, %v3039_v4  ;;  %v7161_v5 = vor.u32 %v7159_v35, %v13522_v54  ;;  %v7027_v50 = vsel %vm1715_vm6, %v7022_v60, %v7026_v29  ;;  %v14240_v27 = vld [vmem:[#allocation45_spill] sm:$0xff] }
 0x28f   : > { %v9642_v22 = vpop.f32.mrb[163].mxu0  ;;  %v6850_v32 = vrot.slane %v6842_v39, %v10387_v34  ;;  %v13556_v0 = vrot.slane %v7164_v52, 7  ;;  %v7078_v60 = vmul.bf16 %v7027_v50, %v14242_v24  ;;  %v7167_v50 = vshll.u32 %v7077_v21, 16 }
 0x290   : > { %9812 = vmatmul.mubr.msk.bf16.gmra.mrb[200].mxu1 %vm1846_vm4, %v14238_v55  ;;  %v7032_v13 = vshll.u32 %v13533_v33, 16  ;;  %v7162_v39 = vsel %vm627_vm5, %v13482_v17, %v7161_v5  ;;  %v7030_v17 = vor.u32 %v7028_v41, %v7026_v29  ;;  %v14245_v41 = vld [vmem:[#allocation48_spill] sm:$0xff] }
 0x291   : > { %9884 = vmatmul.mubr.msk.bf16.gmra.mrb[12].mxu0 %vm1846_vm4, %v7154_v38  ;;  %9815 = vmatprep.mubr.msk.bf16.mxu1 %vm10043_vm2, %v14068_v48  ;;  %v2976_v49 = vpop.f32.mrb[96].mxu1  ;;  %v7169_v5 = vor.u32 %v7167_v50, %v13556_v0 }
 0x292   : > { %9887 = vmatprep.mubr.msk.bf16.mxu0 %vm10043_vm2, %v14068_v48  ;;  %v3040_v4 = vadd.f32 %v2976_v49, %v14240_v27  ;;  %v9573_v12 = vpop.f32.mrb[97].mxu1  ;;  %v7034_v49 = vrot.slane %v7032_v13, 1  ;;  %v13564_v27 = vcombine.low %v6838_v45, %v6850_v32  ;;  %v7172_v13 = vshrl.u32 %v7078_v60, 16 }
 0x293   : > { %v2979_v55 = vpop.f32.mrb[98].mxu1  ;;  %v14243_v12 = vld [vmem:[#allocation40_spill] sm:$0xff] }
 0x294   : > { %v13548_v57 = vpop.f32.mrb[164].mxu0  ;;  %v3041_v22 = vadd.f32 %v2979_v55, %v14241_v44  ;;  %v9574_v35 = vpop.f32.mrb[99].mxu1  ;;  %v13570_v52 = vadd.f32 %v13476_v61, %v3040_v4  ;;  %v7035_v61 = vsel %vm1715_vm6, %v7030_v17, %v7034_v49  ;;  %v14244_v4 = vld [vmem:[#allocation47_spill] sm:$0xff]  ;;  %v7174_v24 = vrot.slane %v7172_v13, 7  ;;  %v14246_v17 = vld [vmem:[#allocation4_spill] sm:$0xff] }
 0x295   : > { %v9645_v38 = vpop.f32.mrb[165].mxu0  ;;  %v7079_v20 = vmul.bf16 %v7035_v61, %v14246_v17 }
 0x296   : > { %v13560_v16 = vpop.f32.mrb[166].mxu0  ;;  %v13573_v42 = vadd.f32 %v13492_v59, %v3041_v22  ;;  %v6854_v38 = vpop.permute.xlu1 %6853  ;;  %v7040_v59 = vshll.u32 %v13564_v27, 16 }
 0x297   : > { %v9646_v25 = vpop.f32.mrb[167].mxu0  ;;  %v6862_v21 = vrot.slane %v6854_v38, %v10387_v34  ;;  %v7170_v38 = vsel %vm627_vm5, %v13522_v54, %v7169_v5 }
 0x298   : > { %9816 = vmatmul.mubr.msk.bf16.gmra.mrb[204].mxu1 %vm1846_vm4, %v14243_v12 }
 0x299   : > { %9888 = vmatmul.mubr.msk.bf16.gmra.mrb[16].mxu0 %vm1846_vm4, %v7162_v39  ;;  %9819 = vmatprep.mubr.msk.bf16.mxu1 %vm10043_vm2, %v14068_v48  ;;  %v2984_v32 = vpop.f32.mrb[100].mxu1 }
 0x29a   : > { %9891 = vmatprep.mubr.msk.bf16.mxu0 %vm10043_vm2, %v14068_v48  ;;  %v3042_v45 = vadd.f32 %v2984_v32, %v14244_v4  ;;  %v9577_v44 = vpop.f32.mrb[101].mxu1  ;;  %v7036_v32 = vshrl.u32 %v13533_v33, 16  ;;  %v7042_v4 = vrot.slane %v7040_v59, 1  ;;  %v7180_v33 = vshrl.u32 %v7079_v20, 16 }
 0x29b   : > { %v2987_v35 = vpop.f32.mrb[102].mxu1  ;;  %v8938_v44 = vcombine.low %v6862_v21, %v6862_v21 }
 0x29c   : > { %v13580_v55 = vpop.f32.mrb[168].mxu0  ;;  %v3043_v29 = vadd.f32 %v2987_v35, %v14245_v41  ;;  %v9578_v12 = vpop.f32.mrb[103].mxu1  ;;  %v13590_v50 = vadd.f32 %v13513_v3, %v3042_v45  ;;  %v7175_v3 = vshll.u32 %v7078_v60, 16  ;;  %v7038_v54 = vor.u32 %v7036_v32, %v7034_v49  ;;  %v14248_v45 = vld [vmem:[#allocation49_spill] sm:$0xff] }
 0x29d   : > { %v9649_v22 = vpop.f32.mrb[169].mxu0  ;;  %v7048_v21 = vshll.u32 %v8938_v44, 16  ;;  %v7182_v49 = vrot.slane %v7180_v33, 7  ;;  %v7044_v44 = vshrl.u32 %v13564_v27, 16 }
 0x29e   : > { %v13586_v39 = vpop.f32.mrb[170].mxu0  ;;  %v14247_v22 = vld [vmem:[#allocation8_spill] sm:$0xff]  ;;  %v13600_v35 = vadd.f32 %v13525_v63, %v3043_v29  ;;  %v7177_v5 = vor.u32 %v7175_v3, %v7174_v24  ;;  %v7043_v59 = vsel %vm1715_vm6, %v7038_v54, %v7042_v4 }
 0x29f   : > { %v9650_v25 = vpop.f32.mrb[171].mxu0  ;;  %v7080_v32 = vmul.bf16 %v7043_v59, %v14179_v31  ;;  %v7050_v54 = vrot.slane %v7048_v21, 1  ;;  %v14251_v21 = vld [vmem:[#allocation52_spill] sm:$0xff] }
 0x2a0   : > { %9820 = vmatmul.mubr.msk.bf16.gmra.mrb[208].mxu1 %vm1846_vm4, %v14247_v22  ;;  %v14249_v25 = vld [vmem:[#allocation12_spill] sm:$0xff]  ;;  %v7178_v3 = vsel %vm627_vm5, %v13556_v0, %v7177_v5 }
 0x2a1   : > { %9892 = vmatmul.mubr.msk.bf16.gmra.mrb[20].mxu0 %vm1846_vm4, %v7170_v38  ;;  %9823 = vmatprep.mubr.msk.bf16.mxu1 %vm10043_vm2, %v14068_v48  ;;  %v2992_v13 = vpop.f32.mrb[104].mxu1  ;;  %v7188_v5 = vshrl.u32 %v7080_v32, 16 }
 0x2a2   : > { %9895 = vmatprep.mubr.msk.bf16.mxu0 %vm10043_vm2, %v14068_v48  ;;  %v3044_v41 = vadd.f32 %v2992_v13, %v14248_v45  ;;  %v9581_v12 = vpop.f32.mrb[105].mxu1  ;;  %v14250_v13 = vld [vmem:[#allocation42_spill] sm:$0xff] }
 0x2a3   : > { %v2995_v29 = vpop.f32.mrb[106].mxu1 }
 0x2a4   : > { %v3964_v61 = vpop.f32.mrb[172].mxu0  ;;  %v3045_v38 = vadd.f32 %v2995_v29, %v14249_v25  ;;  %v9582_v22 = vpop.f32.mrb[107].mxu1  ;;  %v13610_v34 = vadd.f32 %v13548_v57, %v3044_v41  ;;  %v7046_v57 = vor.u32 %v7044_v44, %v7042_v4  ;;  %v7190_v4 = vrot.slane %v7188_v5, 7 }
 0x2a5   : > { %v9653_v63 = vpop.f32.mrb[173].mxu0 }
 0x2a6   : > { %v3967_v60 = vpop.f32.mrb[174].mxu0  ;;  %v13620_v45 = vadd.f32 %v13560_v16, %v3045_v38  ;;  %v7051_v59 = vsel %vm1715_vm6, %v7046_v57, %v7050_v54  ;;  %v7191_v57 = vshll.u32 %v7080_v32, 16 }
 0x2a7   : > { %v9654_v17 = vpop.f32.mrb[175].mxu0  ;;  %v7081_v44 = vmul.bf16 %v7051_v59, %v12942_v58 }
 0x2a8   : > { %9824 = vmatmul.mubr.msk.bf16.gmra.mrb[212].mxu1 %vm1846_vm4, %v14250_v13  ;;  %v7183_v17 = vshll.u32 %v7079_v20, 16  ;;  %v14252_v20 = vld [vmem:[#allocation14_spill] sm:$0xff] }
 0x2a9   : > { %9896 = vmatmul.mubr.msk.bf16.gmra.mrb[24].mxu0 %vm1846_vm4, %v7178_v3  ;;  %9827 = vmatprep.mubr.msk.bf16.mxu1 %vm10043_vm2, %v14068_v48  ;;  %v3000_v27 = vpop.f32.mrb[108].mxu1  ;;  %v7196_v5 = vshrl.u32 %v7081_v44, 16 }
 0x2aa   : > { %9899 = vmatprep.mubr.msk.bf16.mxu0 %vm10043_vm2, %v14068_v48  ;;  %v7185_v0 = vor.u32 %v7183_v17, %v7182_v49  ;;  %v3046_v41 = vadd.f32 %v3000_v27, %v14251_v21  ;;  %v9585_v12 = vpop.f32.mrb[109].mxu1  ;;  %v14253_v17 = vld [vmem:[#allocation44_spill] sm:$0xff] }
 0x2ab   : > { %v3003_v16 = vpop.f32.mrb[110].mxu1 }
 0x2ac   : > { %v3972_v33 = vpop.f32.mrb[176].mxu0  ;;  %v3047_v25 = vadd.f32 %v3003_v16, %v14252_v20  ;;  %v9586_v38 = vpop.f32.mrb[111].mxu1  ;;  %v13630_v3 = vadd.f32 %v13580_v55, %v3046_v41  ;;  %v7186_v13 = vsel %vm627_vm5, %v7174_v24, %v7185_v0  ;;  %v7193_v55 = vor.u32 %v7191_v57, %v7190_v4  ;;  %v14254_v24 = vld [vmem:[#allocation30_spill] sm:$0xff]  ;;  %v14255_v16 = vld [vmem:[#allocation29_spill] sm:$0xff] }
 0x2ad   : > { %v9657_v63 = vpop.f32.mrb[177].mxu0 }
 0x2ae   : > { %v3975_v29 = vpop.f32.mrb[178].mxu0  ;;  %v13638_v54 = vadd.f32 %v13586_v39, %v3047_v25  ;;  %v7198_v25 = vrot.slane %v7196_v5, 7  ;;  %v7194_v38 = vsel %vm627_vm5, %v7182_v49, %v7193_v55  ;;  %v14257_v5 = vld [vmem:[#allocation32_spill] sm:$0xff] }
 0x2af   : > { %v9658_v22 = vpop.f32.mrb[179].mxu0 }
 0x2b0   : > { %9828 = vmatmul.mubr.msk.bf16.gmra.mrb[216].mxu1 %vm1846_vm4, %v14253_v17  ;;  %v14256_v22 = vld [vmem:[#allocation46_spill] sm:$0xff]  ;;  %v7199_v17 = vshll.u32 %v7081_v44, 16 }
 0x2b1   : > { %9900 = vmatmul.mubr.msk.bf16.gmra.mrb[28].mxu0 %vm1846_vm4, %v7186_v13  ;;  %9831 = vmatprep.mubr.msk.bf16.mxu1 %vm10043_vm2, %v14068_v48 }
 0x2b2   : > { %9903 = vmatprep.mubr.msk.bf16.mxu0 %vm10043_vm2, %v14068_v48  ;;  %v7201_v57 = vor.u32 %v7199_v17, %v7198_v25 }
 0x2b3   : > { %v3008_v27 = vpop.f32.mrb[112].mxu1 }
 0x2b4   : > { %v5541_v59 = vpop.f32.mrb[180].mxu0  ;;  %v3048_v0 = vadd.f32 %v3008_v27, %v14254_v24  ;;  %v9589_v21 = vpop.f32.mrb[113].mxu1  ;;  %v7202_v44 = vsel %vm627_vm5, %v7190_v4, %v7201_v57  ;;  %v14259_v4 = vld [vmem:[#allocation15_spill] sm:$0xff] }
 0x2b5   : > { %v9729_v41 = vpop.f32.mrb[181].mxu0  ;;  %v3011_v12 = vpop.f32.mrb[114].mxu1 }
 0x2b6   : > { %v5544_v63 = vpop.f32.mrb[182].mxu0  ;;  %v3049_v39 = vadd.f32 %v3011_v12, %v14255_v16  ;;  %v9590_v29 = vpop.f32.mrb[115].mxu1  ;;  %v13646_v20 = vadd.f32 %v3964_v61, %v3048_v0  ;;  %v14258_v16 = vld [vmem:[#allocation11_spill] sm:$0xff] }
 0x2b7   : > { %v9730_v32 = vpop.f32.mrb[183].mxu0 }
 0x2b8   : > { %9832 = vmatmul.mubr.msk.bf16.gmra.mrb[220].mxu1 %vm1846_vm4, %v14256_v22  ;;  %v13652_v13 = vadd.f32 %v3967_v60, %v3049_v39 }
 0x2b9   : > { %9904 = vmatmul.mubr.msk.bf16.gmra.mrb[32].mxu0 %vm1846_vm4, %v7194_v38  ;;  %9835 = vmatprep.mubr.msk.bf16.mxu1 %vm10043_vm2, %v14068_v48 }
 0x2ba   : > { %9907 = vmatprep.mubr.msk.bf16.mxu0 %vm10043_vm2, %v14068_v48 }
 0x2bb   : > { %v3016_v61 = vpop.f32.mrb[116].mxu1 }
 0x2bc   : > { %v5549_v27 = vpop.f32.mrb[184].mxu0  ;;  %v3050_v24 = vadd.f32 %v3016_v61, %v14257_v5  ;;  %v9593_v49 = vpop.f32.mrb[117].mxu1 }
 0x2bd   : > { %v9733_v55 = vpop.f32.mrb[185].mxu0  ;;  %v3019_v0 = vpop.f32.mrb[118].mxu1  ;;  %v14260_v49 = vld [vmem:[#allocation27_spill] sm:$0xff] }
 0x2be   : > { %v5552_v21 = vpop.f32.mrb[186].mxu0  ;;  %v9594_v41 = vpop.f32.mrb[119].mxu1  ;;  %v13659_v60 = vadd.f32 %v3972_v33, %v3050_v24 }
 0x2bf   : > { %v9734_v12 = vpop.f32.mrb[187].mxu0 }
 0x2c0   : > { %9836 = vmatmul.mubr.msk.bf16.gmra.mrb[224].mxu1 %vm1846_vm4, %v14258_v16 }
 0x2c1   : > { %9908 = vmatmul.mubr.msk.bf16.gmra.mrb[36].mxu0 %vm1846_vm4, %v7202_v44  ;;  %9839 = vmatprep.mubr.msk.bf16.mxu1 %vm10043_vm2, %v14068_v48 }
 0x2c2   : > { %9911 = vmatprep.mubr.msk.bf16.mxu0 %vm10043_vm2, %v14068_v48 }
 0x2c3   : > { %v4584_v39 = vpop.f32.mrb[120].mxu1 }
 0x2c4   : > { %v5557_v29 = vpop.f32.mrb[188].mxu0  ;;  %v4702_v32 = vadd.f32 %v4584_v39, %v13154_v18  ;;  %v9665_v38 = vpop.f32.mrb[121].mxu1 }
 0x2c5   : > { %v9737_v33 = vpop.f32.mrb[189].mxu0  ;;  %v4587_v22 = vpop.f32.mrb[122].mxu1 }
 0x2c6   : > { %v5560_v17 = vpop.f32.mrb[190].mxu0  ;;  %v4703_v57 = vadd.f32 %v4587_v22, %v14259_v4  ;;  %v9666_v61 = vpop.f32.mrb[123].mxu1  ;;  %v13671_v24 = vadd.f32 %v5541_v59, %v4702_v32 }
 0x2c7   : > { %v9738_v5 = vpop.f32.mrb[191].mxu0 }
 0x2c8   : > { %9840 = vmatmul.mubr.msk.bf16.gmra.mrb[228].mxu1 %vm1846_vm4, %v14260_v49  ;;  %v13676_v55 = vadd.f32 %v5544_v63, %v4703_v57 }
 0x2c9   : > { %9912 = vmatmul.mubr.msk.bf16.gmra.mrb[40].mxu0 %vm1846_vm4, %v7198_v25  ;;  %9843 = vmatprep.mubr.msk.bf16.mxu1 %vm10043_vm2, %v14068_v48  ;;  %v14261_v25 = vld [vmem:[#allocation51_spill] sm:$0xff] }
 0x2cb   : > { %v4592_v18 = vpop.f32.mrb[124].mxu1 }
 0x2cc   : > { %v5565_v0 = vpop.f32.mrb[192].mxu0  ;;  %v4704_v41 = vadd.f32 %v4592_v18, %v13211_v6  ;;  %v9669_v12 = vpop.f32.mrb[125].mxu1 }
 0x2cd   : > { %v9741_v44 = vpop.f32.mrb[193].mxu0  ;;  %v4595_v16 = vpop.f32.mrb[126].mxu1  ;;  %v14262_v12 = vld [vmem:[#allocation50_spill] sm:$0xff] }
 0x2ce   : > { %v5568_v39 = vpop.f32.mrb[194].mxu0  ;;  %v4705_v59 = vadd.f32 %v4595_v16, %v13219_v28  ;;  %v9670_v32 = vpop.f32.mrb[127].mxu1  ;;  %v13682_v33 = vadd.f32 %v5549_v27, %v4704_v41 }
 0x2cf   : > { %v9742_v38 = vpop.f32.mrb[195].mxu0 }
 0x2d0   : > { %9844 = vmatmul.mubr.msk.bf16.gmra.mrb[232].mxu1 %vm1846_vm4, %v14261_v25  ;;  %v13686_v63 = vadd.f32 %v5552_v21, %v4705_v59  ;;  %v14263_v25 = vld [vmem:[#allocation28_spill] sm:$0xff] }
 0x2d1   : > { %9847 = vmatprep.mubr.msk.bf16.mxu1 %vm10043_vm2, %v14068_v48 }
 0x2d3   : > { %v4600_v22 = vpop.f32.mrb[128].mxu1 }
 0x2d4   : > { %v5573_v6 = vpop.f32.mrb[196].mxu0  ;;  %v4706_v4 = vadd.f32 %v4600_v22, %v13263_v14  ;;  %v9673_v57 = vpop.f32.mrb[129].mxu1 }
 0x2d5   : > { %v9745_v61 = vpop.f32.mrb[197].mxu0  ;;  %v4603_v5 = vpop.f32.mrb[130].mxu1 }
 0x2d6   : > { %v5576_v28 = vpop.f32.mrb[198].mxu0  ;;  %v4707_v49 = vadd.f32 %v4603_v5, %v13270_v23  ;;  %v9674_v27 = vpop.f32.mrb[131].mxu1  ;;  %v13692_v41 = vadd.f32 %v5557_v29, %v4706_v4  ;;  %v7907_v29 = vmul.bf16 %v14263_v25, %v14098_v11 }
 0x2d7   : > { %v9746_v18 = vpop.f32.mrb[199].mxu0 }
 0x2d8   : > { %9848 = vmatmul.mubr.msk.bf16.gmra.mrb[236].mxu1 %vm1846_vm4, %v14262_v12  ;;  %v13696_v21 = vadd.f32 %v5560_v17, %v4707_v49 }
 0x2d9   : > { %9919 = vmatprep.mubr.msk.bf16.mxu1 %vm10043_vm2, %v14068_v48 }
 0x2db   : > { %v4608_v44 = vpop.f32.mrb[132].mxu1 }
 0x2dc   : > { %v5581_v14 = vpop.f32.mrb[200].mxu0  ;;  %v4708_v16 = vadd.f32 %v4608_v44, %v13320_v51  ;;  %v9677_v59 = vpop.f32.mrb[133].mxu1 }
 0x2dd   : > { %v9749_v32 = vpop.f32.mrb[201].mxu0  ;;  %v4611_v38 = vpop.f32.mrb[134].mxu1 }
 0x2de   : > { %v5584_v23 = vpop.f32.mrb[202].mxu0  ;;  %v4709_v22 = vadd.f32 %v4611_v38, %v13327_v56  ;;  %v9678_v4 = vpop.f32.mrb[135].mxu1  ;;  %v13704_v17 = vadd.f32 %v5565_v0, %v4708_v16  ;;  %v14264_v56 = vld [vmem:[#allocation31_spill] sm:$0xff] }
 0x2df   : > { %v9750_v57 = vpop.f32.mrb[203].mxu0  ;;  %v7908_v44 = vmul.bf16 %v14264_v56, %v14100_v37 }
 0x2e0   : > { %9920 = vmatmul.mubr.msk.bf16.vlgmr.msra.gmra.mrb[240].mxu1 %vm1846_vm4, %v7907_v29  ;;  %v13707_v61 = vadd.f32 %v5568_v39, %v4709_v22 }
 0x2e1   : > { %9923 = vmatprep.mubr.msk.bf16.mxu1 %vm10043_vm2, %v14068_v48 }
 0x2e3   : > { %v4616_v51 = vpop.f32.mrb[136].mxu1 }
 0x2e4   : > { %v5589_v5 = vpop.f32.mrb[204].mxu0  ;;  %v4710_v49 = vadd.f32 %v4616_v51, %v13378_v19  ;;  %v9681_v27 = vpop.f32.mrb[137].mxu1 }
 0x2e5   : > { %v9753_v18 = vpop.f32.mrb[205].mxu0  ;;  %v4619_v11 = vpop.f32.mrb[138].mxu1 }
 0x2e6   : > { %v5592_v12 = vpop.f32.mrb[206].mxu0  ;;  %v4711_v0 = vadd.f32 %v4619_v11, %v13383_v2  ;;  %v9682_v16 = vpop.f32.mrb[139].mxu1  ;;  %v13715_v39 = vadd.f32 %v5573_v6, %v4710_v49  ;;  %v14265_v2 = vld [vmem:[#allocation33_spill] sm:$0xff] }
 0x2e7   : > { %v9754_v59 = vpop.f32.mrb[207].mxu0  ;;  %v7909_v57 = vmul.bf16 %v14265_v2, %v10841_v26 }
 0x2e8   : > { %9924 = vmatmul.mubr.msk.bf16.gmra.mrb[244].mxu1 %vm1846_vm4, %v7908_v44  ;;  %v13718_v32 = vadd.f32 %v5576_v28, %v4711_v0 }
 0x2e9   : > { %9927 = vmatprep.mubr.msk.bf16.mxu1 %vm10043_vm2, %v14068_v48 }
 0x2eb   : > { %v4624_v19 = vpop.f32.mrb[140].mxu1 }
 0x2ec   : > { %v5597_v38 = vpop.f32.mrb[208].mxu0  ;;  %v4712_v25 = vadd.f32 %v4624_v19, %v13419_v9  ;;  %v9685_v29 = vpop.f32.mrb[141].mxu1 }
 0x2ed   : > { %v9757_v22 = vpop.f32.mrb[209].mxu0  ;;  %v4627_v37 = vpop.f32.mrb[142].mxu1 }
 0x2ee   : > { %v5600_v4 = vpop.f32.mrb[210].mxu0  ;;  %v4713_v6 = vadd.f32 %v4627_v37, %v13426_v10  ;;  %v9686_v51 = vpop.f32.mrb[143].mxu1  ;;  %v13726_v28 = vadd.f32 %v5581_v14, %v4712_v25  ;;  %v14266_v10 = vld [vmem:[#allocation19_spill] sm:$0xff] }
 0x2ef   : > { %v9758_v49 = vpop.f32.mrb[211].mxu0  ;;  %v7910_v16 = vmul.bf16 %v14266_v10, %v10889_v47 }
 0x2f0   : > { %9928 = vmatmul.mubr.msk.bf16.gmra.mrb[248].mxu1 %vm1846_vm4, %v7909_v57  ;;  %v13729_v27 = vadd.f32 %v5584_v23, %v4713_v6  ;;  %v14268_v6 = vld [vmem:[#allocation16_spill] sm:$0xff] }
 0x2f1   : > { %9931 = vmatprep.mubr.msk.bf16.mxu1 %vm10043_vm2, %v14068_v48 }
 0x2f3   : > { %v4632_v9 = vpop.f32.mrb[144].mxu1 }
 0x2f4   : > { %v5605_v18 = vpop.f32.mrb[212].mxu0  ;;  %v4714_v11 = vadd.f32 %v4632_v9, %v13459_v46  ;;  %v9689_v56 = vpop.f32.mrb[145].mxu1 }
 0x2f5   : > { %v9761_v44 = vpop.f32.mrb[213].mxu0  ;;  %v4635_v26 = vpop.f32.mrb[146].mxu1 }
 0x2f6   : > { %v5608_v0 = vpop.f32.mrb[214].mxu0  ;;  %v4715_v14 = vadd.f32 %v4635_v26, %v13467_v40  ;;  %v9690_v59 = vpop.f32.mrb[147].mxu1  ;;  %v13737_v23 = vadd.f32 %v5589_v5, %v4714_v11  ;;  %v14267_v40 = vld [vmem:[#allocation13_spill] sm:$0xff] }
 0x2f7   : > { %v9762_v19 = vpop.f32.mrb[215].mxu0  ;;  %v7911_v51 = vmul.bf16 %v14268_v6, %v14267_v40 }
 0x2f8   : > { %9932 = vmatmul.mubr.msk.bf16.gmra.mrb[252].mxu1 %vm1846_vm4, %v7910_v16  ;;  %v13740_v25 = vadd.f32 %v5592_v12, %v4715_v14 }
 0x2f9   : > { %9935 = vmatprep.mubr.msk.bf16.mxu1 %vm10043_vm2, %v14068_v48 }
 0x2fb   : > { %v4640_v46 = vpop.f32.mrb[148].mxu1 }
 0x2fc   : > { %v5613_v29 = vpop.f32.mrb[216].mxu0  ;;  %v4716_v22 = vadd.f32 %v4640_v46, %v13495_v7  ;;  %v9693_v37 = vpop.f32.mrb[149].mxu1 }
 0x2fd   : > { %v9765_v2 = vpop.f32.mrb[217].mxu0  ;;  %v4643_v47 = vpop.f32.mrb[150].mxu1 }
 0x2fe   : > { %v5616_v57 = vpop.f32.mrb[218].mxu0  ;;  %v4717_v5 = vadd.f32 %v4643_v47, %v13504_v53  ;;  %v9694_v49 = vpop.f32.mrb[151].mxu1  ;;  %v13748_v12 = vadd.f32 %v5597_v38, %v4716_v22  ;;  %v14269_v53 = vld [vmem:[#allocation17_spill] sm:$0xff] }
 0x2ff   : > { %v9766_v9 = vpop.f32.mrb[219].mxu0  ;;  %v7912_v59 = vmul.bf16 %v14269_v53, %v10996_v43 }
 0x300   : > { %9936 = vmatmul.mubr.msk.bf16.gmra.mrb[0].mxu1 %vm1846_vm4, %v7911_v51  ;;  %v13751_v11 = vadd.f32 %v5600_v4, %v4717_v5 }
 0x301   : > { %9939 = vmatprep.mubr.msk.bf16.mxu1 %vm10043_vm2, %v14068_v48 }
 0x303   : > { %v4648_v7 = vpop.f32.mrb[152].mxu1 }
 0x304   : > { %v5621_v56 = vpop.f32.mrb[220].mxu0  ;;  %v4718_v44 = vadd.f32 %v4648_v7, %v13530_v30  ;;  %v9697_v26 = vpop.f32.mrb[153].mxu1 }
 0x305   : > { %v9769_v10 = vpop.f32.mrb[221].mxu0  ;;  %v4651_v16 = vpop.f32.mrb[154].mxu1 }
 0x306   : > { %v5624_v14 = vpop.f32.mrb[222].mxu0  ;;  %v4719_v38 = vadd.f32 %v4651_v16, %v13539_v8  ;;  %v9698_v19 = vpop.f32.mrb[155].mxu1  ;;  %v13759_v4 = vadd.f32 %v5605_v18, %v4718_v44  ;;  %v7913_v8 = vmul.bf16 %v13335_v36, %v11050_v1 }
 0x307   : > { %v9770_v46 = vpop.f32.mrb[223].mxu0 }
 0x308   : > { %9940 = vmatmul.mubr.msk.bf16.gmra.mrb[4].mxu1 %vm1846_vm4, %v7912_v59  ;;  %v13762_v22 = vadd.f32 %v5608_v0, %v4719_v38 }
 0x309   : > { %9943 = vmatprep.mubr.msk.bf16.mxu1 %vm10043_vm2, %v14068_v48 }
 0x30b   : > { %v4656_v30 = vpop.f32.mrb[156].mxu1 }
 0x30c   : > { %v5629_v37 = vpop.f32.mrb[224].mxu0  ;;  %v4720_v2 = vadd.f32 %v4656_v30, %v13570_v52  ;;  %v9701_v47 = vpop.f32.mrb[157].mxu1  ;;  %v14271_v30 = vld [vmem:[#allocation18_spill] sm:$0xff] }
 0x30d   : > { %v9773_v40 = vpop.f32.mrb[225].mxu0  ;;  %v4659_v43 = vpop.f32.mrb[158].mxu1 }
 0x30e   : > { %v5632_v6 = vpop.f32.mrb[226].mxu0  ;;  %v4721_v18 = vadd.f32 %v4659_v43, %v13573_v42  ;;  %v9702_v51 = vpop.f32.mrb[159].mxu1  ;;  %v13770_v0 = vadd.f32 %v5613_v29, %v4720_v2  ;;  %v7914_v42 = vmul.bf16 %v13386_v62, %v11104_v15 }
 0x30f   : > { %v9774_v5 = vpop.f32.mrb[227].mxu0 }
 0x310   : > { %9944 = vmatmul.mubr.msk.bf16.gmra.mrb[8].mxu1 %vm1846_vm4, %v7913_v8  ;;  %v13773_v49 = vadd.f32 %v5616_v57, %v4721_v18 }
 0x311   : > { %9947 = vmatprep.mubr.msk.bf16.mxu1 %vm10043_vm2, %v14068_v48 }
 0x313   : > { %v4664_v52 = vpop.f32.mrb[160].mxu1 }
 0x314   : > { %v5637_v9 = vpop.f32.mrb[228].mxu0  ;;  %v4722_v7 = vadd.f32 %v4664_v52, %v13590_v50  ;;  %v9705_v44 = vpop.f32.mrb[161].mxu1 }
 0x315   : > { %v9777_v26 = vpop.f32.mrb[229].mxu0  ;;  %v4667_v1 = vpop.f32.mrb[162].mxu1  ;;  %v14273_v44 = vld [vmem:[#allocation20_spill] sm:$0xff] }
 0x316   : > { %v5640_v36 = vpop.f32.mrb[230].mxu0  ;;  %v4723_v29 = vadd.f32 %v4667_v1, %v13600_v35  ;;  %v9706_v10 = vpop.f32.mrb[163].mxu1  ;;  %v13781_v57 = vadd.f32 %v5621_v56, %v4722_v7  ;;  %v14270_v35 = vld [vmem:[#allocation24_spill] sm:$0xff] }
 0x317   : > { %v9778_v16 = vpop.f32.mrb[231].mxu0  ;;  %v7915_v2 = vmul.bf16 %v14271_v30, %v14270_v35  ;;  %v14275_v35 = vld [vmem:[#allocation23_spill] sm:$0xff]  ;;  %v14276_v30 = vld [vmem:[#allocation2_spill] sm:$0xff] }
 0x318   : > { %9948 = vmatmul.mubr.msk.bf16.gmra.mrb[12].mxu1 %vm1846_vm4, %v7914_v42  ;;  %v13784_v53 = vadd.f32 %v5624_v14, %v4723_v29 }
 0x319   : > { %9951 = vmatprep.mubr.msk.bf16.mxu1 %vm10043_vm2, %v14068_v48 }
 0x31b   : > { %v4672_v50 = vpop.f32.mrb[164].mxu1 }
 0x31c   : > { %v5645_v59 = vpop.f32.mrb[232].mxu0  ;;  %v4724_v38 = vadd.f32 %v4672_v50, %v13610_v34  ;;  %v9709_v19 = vpop.f32.mrb[165].mxu1 }
 0x31d   : > { %v9781_v46 = vpop.f32.mrb[233].mxu0  ;;  %v4675_v15 = vpop.f32.mrb[166].mxu1 }
 0x31e   : > { %v5648_v62 = vpop.f32.mrb[234].mxu0  ;;  %v4725_v56 = vadd.f32 %v4675_v15, %v13620_v45  ;;  %v9710_v47 = vpop.f32.mrb[167].mxu1  ;;  %v13792_v14 = vadd.f32 %v5629_v37, %v4724_v38  ;;  %v14272_v45 = vld [vmem:[#allocation25_spill] sm:$0xff]  ;;  %v14274_v15 = vld [vmem:[#allocation3_spill] sm:$0xff] }
 0x31f   : > { %v9782_v40 = vpop.f32.mrb[235].mxu0  ;;  %v7916_v26 = vmul.bf16 %v14273_v44, %v14272_v45 }
 0x320   : > { %9952 = vmatmul.mubr.msk.bf16.gmra.mrb[16].mxu1 %vm1846_vm4, %v7915_v2  ;;  %v13795_v43 = vadd.f32 %v5632_v6, %v4725_v56 }
 0x321   : > { %9955 = vmatprep.mubr.msk.bf16.mxu1 %vm10043_vm2, %v14068_v48 }
 0x323   : > { %v4680_v34 = vpop.f32.mrb[168].mxu1 }
 0x324   : > { %v5653_v8 = vpop.f32.mrb[236].mxu0  ;;  %v4726_v18 = vadd.f32 %v4680_v34, %v13630_v3  ;;  %v9713_v51 = vpop.f32.mrb[169].mxu1  ;;  %v14277_v34 = vld [vmem:[#allocation34_spill] sm:$0xff] }
 0x325   : > { %v9785_v5 = vpop.f32.mrb[237].mxu0  ;;  %v4683_v52 = vpop.f32.mrb[170].mxu1 }
 0x326   : > { %v5656_v7 = vpop.f32.mrb[238].mxu0  ;;  %v4727_v37 = vadd.f32 %v4683_v52, %v13638_v54  ;;  %v9714_v1 = vpop.f32.mrb[171].mxu1  ;;  %v13803_v6 = vadd.f32 %v5637_v9, %v4726_v18  ;;  %v7917_v9 = vmul.bf16 %v14275_v35, %v14274_v15  ;;  %v7746_v18 = vrot.slane %v14277_v34, %v14276_v30 }
 0x327   : > { %v9786_v42 = vpop.f32.mrb[239].mxu0  ;;  %v7750_v3 = vpop.permute.xlu0 %7749 }
 0x328   : > { %9956 = vmatmul.mubr.msk.bf16.gmra.mrb[20].mxu1 %vm1846_vm4, %v7916_v26  ;;  %v13806_v29 = vadd.f32 %v5640_v36, %v4727_v37  ;;  %v7758_v2 = vrot.slane %v7750_v3, %v14276_v30  ;;  %v7774_v5 = vpop.permute.xlu1 %7773 }
 0x329   : > { %9959 = vmatprep.mubr.msk.bf16.mxu1 %vm10043_vm2, %v14068_v48  ;;  %v7782_v26 = vrot.slane %v7774_v5, %v14276_v30 }
 0x32a   : > { %v9000_v51 = vcombine.low %v7746_v18, %v7758_v2 }
 0x32b   : > { %v4688_v10 = vpop.f32.mrb[172].mxu1  ;;  %v7762_v52 = vpop.permute.xlu0 %7761 }
 0x32c   : > { %v7294_v16 = vpop.f32.mrb[240].mxu0  ;;  %v4728_v50 = vadd.f32 %v4688_v10, %v13646_v20  ;;  %v9717_v38 = vpop.f32.mrb[173].mxu1  ;;  %v7770_v37 = vrot.slane %v7762_v52, %v14276_v30 }
 0x32d   : > { %v9857_v19 = vpop.f32.mrb[241].mxu0  ;;  %v4691_v46 = vpop.f32.mrb[174].mxu1 }
 0x32e   : > { %v7297_v54 = vpop.f32.mrb[242].mxu0  ;;  %v4729_v36 = vadd.f32 %v4691_v46, %v13652_v13  ;;  %v9718_v56 = vpop.f32.mrb[175].mxu1  ;;  %v13815_v40 = vadd.f32 %v5645_v59, %v4728_v50  ;;  %v9001_v19 = vcombine.low %v7770_v37, %v7782_v26 }
 0x32f   : > { %v9858_v47 = vpop.f32.mrb[243].mxu0  ;;  %v7786_v46 = vpop.permute.xlu0 %7785 }
 0x330   : > { %9960 = vmatmul.mubr.msk.bf16.gmra.mrb[24].mxu1 %vm1846_vm4, %v7917_v9  ;;  %v13820_v20 = vadd.f32 %v5648_v62, %v4729_v36  ;;  %v14278_v62 = vld [vmem:[#allocation4_spill] sm:$0xff]  ;;  %v7919_v56 = vmul.bf16 %v9001_v19, %v14179_v31  ;;  %v7794_v18 = vrot.slane %v7786_v46, %v14276_v30 }
 0x331   : > { %9963 = vmatprep.mubr.msk.bf16.mxu1 %vm10043_vm2, %v14068_v48  ;;  %v7918_v3 = vmul.bf16 %v9000_v51, %v14278_v62 }
 0x333   : > { %v4696_v7 = vpop.f32.mrb[176].mxu1 }
 0x334   : > { %v7302_v45 = vpop.f32.mrb[244].mxu0  ;;  %v4730_v13 = vadd.f32 %v4696_v7, %v13659_v60  ;;  %v9721_v44 = vpop.f32.mrb[177].mxu1 }
 0x335   : > { %v9861_v59 = vpop.f32.mrb[245].mxu0  ;;  %v4699_v1 = vpop.f32.mrb[178].mxu1 }
 0x336   : > { %v7305_v42 = vpop.f32.mrb[246].mxu0  ;;  %v9722_v10 = vpop.f32.mrb[179].mxu1  ;;  %v13828_v38 = vadd.f32 %v5653_v8, %v4730_v13 }
 0x337   : > { %v9862_v50 = vpop.f32.mrb[247].mxu0  ;;  %v7798_v60 = vpop.permute.xlu1 %7797 }
 0x338   : > { %9964 = vmatmul.mubr.msk.bf16.gmra.mrb[28].mxu1 %vm1846_vm4, %v7918_v3  ;;  %v7806_v8 = vrot.slane %v7798_v60, %v14276_v30 }
 0x339   : > { %9967 = vmatprep.mubr.msk.bf16.mxu1 %vm10043_vm2, %v14068_v48 }
 0x33a   : > { %v9002_v31 = vcombine.low %v7794_v18, %v7806_v8 }
 0x33b   : > { %v6338_v15 = vpop.f32.mrb[180].mxu1 }
 0x33c   : > { %v7310_v35 = vpop.f32.mrb[248].mxu0  ;;  %v6456_v9 = vadd.f32 %v6338_v15, %v13671_v24  ;;  %v9793_v2 = vpop.f32.mrb[181].mxu1 }
 0x33d   : > { %v9865_v36 = vpop.f32.mrb[249].mxu0  ;;  %v6341_v47 = vpop.f32.mrb[182].mxu1 }
 0x33e   : > { %v7313_v34 = vpop.f32.mrb[250].mxu0  ;;  %v6457_v51 = vadd.f32 %v6341_v47, %v13676_v55  ;;  %v9794_v5 = vpop.f32.mrb[183].mxu1  ;;  %v13838_v7 = vadd.f32 %v7294_v16, %v6456_v9  ;;  %v7920_v16 = vmul.bf16 %v9002_v31, %v12942_v58 }
 0x33f   : > { %v9866_v52 = vpop.f32.mrb[251].mxu0  ;;  %v7810_v24 = vpop.permute.xlu0 %7809 }
 0x340   : > { %9968 = vmatmul.mubr.msk.bf16.gmra.mrb[32].mxu1 %vm1846_vm4, %v7919_v56  ;;  %v13841_v13 = vadd.f32 %v7297_v54, %v6457_v51  ;;  %v7818_v3 = vrot.slane %v7810_v24, %v14276_v30 }
 0x341   : > { %9971 = vmatprep.mubr.msk.bf16.mxu1 %vm10043_vm2, %v14068_v48 }
 0x343   : > { %v6346_v44 = vpop.f32.mrb[184].mxu1 }
 0x344   : > { %v7318_v59 = vpop.f32.mrb[252].mxu0  ;;  %v6458_v26 = vadd.f32 %v6346_v44, %v13682_v33  ;;  %v9797_v37 = vpop.f32.mrb[185].mxu1  ;;  %v9003_v33 = vcombine.low %v7818_v3, %v7818_v3 }
 0x345   : > { %v9869_v1 = vpop.f32.mrb[253].mxu0  ;;  %v6349_v55 = vpop.f32.mrb[186].mxu1 }
 0x346   : > { %v7321_v62 = vpop.f32.mrb[254].mxu0  ;;  %v6459_v54 = vadd.f32 %v6349_v55, %v13686_v63  ;;  %v9798_v10 = vpop.f32.mrb[187].mxu1  ;;  %v13849_v19 = vadd.f32 %v7302_v45, %v6458_v26  ;;  %v7921_v36 = vmul.bf16 0, %v9003_v33 }
 0x347   : > { %v9870_v50 = vpop.f32.mrb[255].mxu0 }
 0x348   : > { %9972 = vmatmul.mubr.msk.bf16.gmra.mrb[36].mxu1 %vm1846_vm4, %v7920_v16  ;;  %v13852_v60 = vadd.f32 %v7305_v42, %v6459_v54 }
 0x349   : > { %9975 = vmatprep.mubr.msk.bf16.mxu1 %vm10043_vm2, %v14068_v48 }
 0x34b   : > { %v6354_v46 = vpop.f32.mrb[188].mxu1 }
 0x34c   : > { %v7326_v15 = vpop.f32.mrb[0].mxu0  ;;  %v6460_v58 = vadd.f32 %v6354_v46, %v13692_v41  ;;  %v9801_v9 = vpop.f32.mrb[189].mxu1 }
 0x34d   : > { %v9873_v30 = vpop.f32.mrb[1].mxu0  ;;  %v6357_v2 = vpop.f32.mrb[190].mxu1 }
 0x34e   : > { %v7329_v63 = vpop.f32.mrb[2].mxu0  ;;  %v6461_v45 = vadd.f32 %v6357_v2, %v13696_v21  ;;  %v9802_v56 = vpop.f32.mrb[191].mxu1  ;;  %v13858_v8 = vadd.f32 %v7310_v35, %v6460_v58 }
 0x34f   : > { %v9874_v47 = vpop.f32.mrb[3].mxu0 }
 0x350   : > { %9976 = vmatmul.mubr.msk.bf16.gmra.mrb[40].mxu1 %vm1846_vm4, %v7921_v36  ;;  %v13861_v42 = vadd.f32 %v7313_v34, %v6461_v45 }
 0x353   : > { %v6362_v48 = vpop.f32.mrb[192].mxu1 }
 0x354   : > { %v7334_v18 = vpop.f32.mrb[4].mxu0  ;;  %v6462_v51 = vadd.f32 %v6362_v48, %v13704_v17  ;;  %v9805_v41 = vpop.f32.mrb[193].mxu1 }
 0x355   : > { %v9877_v5 = vpop.f32.mrb[5].mxu0  ;;  %v6365_v52 = vpop.f32.mrb[194].mxu1 }
 0x356   : > { %v7337_v31 = vpop.f32.mrb[6].mxu0  ;;  %v6463_v24 = vadd.f32 %v6365_v52, %v13707_v61  ;;  %v9806_v44 = vpop.f32.mrb[195].mxu1  ;;  %v13865_v26 = vadd.f32 %v7318_v59, %v6462_v51 }
 0x357   : > { %v9878_v21 = vpop.f32.mrb[7].mxu0 }
 0x358   : > { %v13867_v35 = vadd.f32 %v7321_v62, %v6463_v24 }
 0x35b   : > { %v6370_v37 = vpop.f32.mrb[196].mxu1 }
 0x35c   : > { %v7342_v1 = vpop.f32.mrb[8].mxu0  ;;  %v6464_v34 = vadd.f32 %v6370_v37, %v13715_v39  ;;  %v9809_v55 = vpop.f32.mrb[197].mxu1 }
 0x35d   : > { %v9881_v16 = vpop.f32.mrb[9].mxu0  ;;  %v6373_v3 = vpop.f32.mrb[198].mxu1 }
 0x35e   : > { %v7345_v17 = vpop.f32.mrb[10].mxu0  ;;  %v6465_v54 = vadd.f32 %v6373_v3, %v13718_v32  ;;  %v9810_v10 = vpop.f32.mrb[199].mxu1  ;;  %v13871_v33 = vadd.f32 %v7326_v15, %v6464_v34 }
 0x35f   : > { %v9882_v50 = vpop.f32.mrb[11].mxu0 }
 0x360   : > { %v13873_v61 = vadd.f32 %v7329_v63, %v6465_v54 }
 0x363   : > { %v6378_v59 = vpop.f32.mrb[200].mxu1 }
 0x364   : > { %v7350_v46 = vpop.f32.mrb[12].mxu0  ;;  %v6466_v62 = vadd.f32 %v6378_v59, %v13726_v28  ;;  %v9813_v58 = vpop.f32.mrb[201].mxu1 }
 0x365   : > { %v9885_v9 = vpop.f32.mrb[13].mxu0  ;;  %v6381_v30 = vpop.f32.mrb[202].mxu1 }
 0x366   : > { %v7353_v39 = vpop.f32.mrb[14].mxu0  ;;  %v6467_v2 = vadd.f32 %v6381_v30, %v13729_v27  ;;  %v9814_v36 = vpop.f32.mrb[203].mxu1  ;;  %v13877_v56 = vadd.f32 %v7334_v18, %v6466_v62 }
 0x367   : > { %v9886_v45 = vpop.f32.mrb[15].mxu0 }
 0x368   : > { %v13879_v32 = vadd.f32 %v7337_v31, %v6467_v2 }
 0x36b   : > { %v6386_v15 = vpop.f32.mrb[204].mxu1 }
 0x36c   : > { %v7358_v47 = vpop.f32.mrb[16].mxu0  ;;  %v6468_v63 = vadd.f32 %v6386_v15, %v13737_v23  ;;  %v9817_v48 = vpop.f32.mrb[205].mxu1 }
 0x36d   : > { %v9889_v51 = vpop.f32.mrb[17].mxu0  ;;  %v6389_v41 = vpop.f32.mrb[206].mxu1 }
 0x36e   : > { %v7361_v28 = vpop.f32.mrb[18].mxu0  ;;  %v6469_v5 = vadd.f32 %v6389_v41, %v13740_v25  ;;  %v9818_v52 = vpop.f32.mrb[207].mxu1  ;;  %v13883_v44 = vadd.f32 %v7342_v1, %v6468_v63 }
 0x36f   : > { %v9890_v24 = vpop.f32.mrb[19].mxu0 }
 0x370   : > { %v13885_v27 = vadd.f32 %v7345_v17, %v6469_v5 }
 0x373   : > { %v6394_v18 = vpop.f32.mrb[208].mxu1 }
 0x374   : > { %v7366_v21 = vpop.f32.mrb[20].mxu0  ;;  %v6470_v31 = vadd.f32 %v6394_v18, %v13748_v12  ;;  %v9821_v37 = vpop.f32.mrb[209].mxu1 }
 0x375   : > { %v9893_v34 = vpop.f32.mrb[21].mxu0  ;;  %v6397_v55 = vpop.f32.mrb[210].mxu1 }
 0x376   : > { %v7369_v23 = vpop.f32.mrb[22].mxu0  ;;  %v6471_v16 = vadd.f32 %v6397_v55, %v13751_v11  ;;  %v9822_v3 = vpop.f32.mrb[211].mxu1  ;;  %v13889_v10 = vadd.f32 %v7350_v46, %v6470_v31 }
 0x377   : > { %v9894_v54 = vpop.f32.mrb[23].mxu0 }
 0x378   : > { %v13891_v25 = vadd.f32 %v7353_v39, %v6471_v16 }
 0x37b   : > { %v6402_v1 = vpop.f32.mrb[212].mxu1 }
 0x37c   : > { %v7374_v50 = vpop.f32.mrb[24].mxu0  ;;  %v6472_v17 = vadd.f32 %v6402_v1, %v13759_v4  ;;  %v9825_v59 = vpop.f32.mrb[213].mxu1 }
 0x37d   : > { %v9897_v62 = vpop.f32.mrb[25].mxu0  ;;  %v6405_v58 = vpop.f32.mrb[214].mxu1 }
 0x37e   : > { %v7377_v12 = vpop.f32.mrb[26].mxu0  ;;  %v6473_v9 = vadd.f32 %v6405_v58, %v13762_v22  ;;  %v9826_v30 = vpop.f32.mrb[215].mxu1  ;;  %v13895_v36 = vadd.f32 %v7358_v47, %v6472_v17 }
 0x37f   : > { %v9898_v2 = vpop.f32.mrb[27].mxu0 }
 0x380   : > { %v13897_v11 = vadd.f32 %v7361_v28, %v6473_v9 }
 0x383   : > { %v6410_v46 = vpop.f32.mrb[216].mxu1 }
 0x384   : > { %v7382_v45 = vpop.f32.mrb[28].mxu0  ;;  %v6474_v39 = vadd.f32 %v6410_v46, %v13770_v0  ;;  %v9829_v15 = vpop.f32.mrb[217].mxu1 }
 0x385   : > { %v9901_v63 = vpop.f32.mrb[29].mxu0  ;;  %v6413_v48 = vpop.f32.mrb[218].mxu1 }
 0x386   : > { %v7385_v4 = vpop.f32.mrb[30].mxu0  ;;  %v6475_v51 = vadd.f32 %v6413_v48, %v13773_v49  ;;  %v9830_v41 = vpop.f32.mrb[219].mxu1  ;;  %v13901_v52 = vadd.f32 %v7366_v21, %v6474_v39 }
 0x387   : > { %v9902_v5 = vpop.f32.mrb[31].mxu0 }
 0x388   : > { %v13903_v22 = vadd.f32 %v7369_v23, %v6475_v51 }
 0x38b   : > { %v6418_v47 = vpop.f32.mrb[220].mxu1 }
 0x38c   : > { %v7390_v24 = vpop.f32.mrb[32].mxu0  ;;  %v6476_v28 = vadd.f32 %v6418_v47, %v13781_v57  ;;  %v9833_v18 = vpop.f32.mrb[221].mxu1 }
 0x38d   : > { %v9905_v31 = vpop.f32.mrb[33].mxu0  ;;  %v6421_v37 = vpop.f32.mrb[222].mxu1 }
 0x38e   : > { %v7393_v0 = vpop.f32.mrb[34].mxu0  ;;  %v6477_v34 = vadd.f32 %v6421_v37, %v13784_v53  ;;  %v9834_v55 = vpop.f32.mrb[223].mxu1  ;;  %v13907_v3 = vadd.f32 %v7374_v50, %v6476_v28 }
 0x38f   : > { %v9906_v16 = vpop.f32.mrb[35].mxu0 }
 0x390   : > { %v13909_v49 = vadd.f32 %v7377_v12, %v6477_v34 }
 0x393   : > { %v6426_v21 = vpop.f32.mrb[224].mxu1 }
 0x394   : > { %v7398_v54 = vpop.f32.mrb[36].mxu0  ;;  %v6478_v23 = vadd.f32 %v6426_v21, %v13792_v14  ;;  %v9837_v1 = vpop.f32.mrb[225].mxu1 }
 0x395   : > { %v9909_v17 = vpop.f32.mrb[37].mxu0  ;;  %v6429_v59 = vpop.f32.mrb[226].mxu1 }
 0x396   : > { %v7401_v57 = vpop.f32.mrb[38].mxu0  ;;  %v6479_v62 = vadd.f32 %v6429_v59, %v13795_v43  ;;  %v9838_v58 = vpop.f32.mrb[227].mxu1  ;;  %v13913_v30 = vadd.f32 %v7382_v45, %v6478_v23 }
 0x397   : > { %v9910_v9 = vpop.f32.mrb[39].mxu0 }
 0x398   : > { %v13915_v53 = vadd.f32 %v7385_v4, %v6479_v62 }
 0x39b   : > { %v6434_v50 = vpop.f32.mrb[228].mxu1 }
 0x39c   : > { %v7406_v2 = vpop.f32.mrb[40].mxu0  ;;  %v6480_v12 = vadd.f32 %v6434_v50, %v13803_v6  ;;  %v9841_v46 = vpop.f32.mrb[229].mxu1 }
 0x39d   : > { %v9913_v39 = vpop.f32.mrb[41].mxu0  ;;  %v6437_v15 = vpop.f32.mrb[230].mxu1 }
 0x39e   : > { %v7409_v14 = vpop.f32.mrb[42].mxu0  ;;  %v6481_v63 = vadd.f32 %v6437_v15, %v13806_v29  ;;  %v9842_v48 = vpop.f32.mrb[231].mxu1  ;;  %v13919_v41 = vadd.f32 %v7390_v24, %v6480_v12 }
 0x39f   : > { %v9914_v51 = vpop.f32.mrb[43].mxu0 }
 0x3a0   : > { %v13921_v43 = vadd.f32 %v7393_v0, %v6481_v63 }
 0x3a3   : > { %v6442_v45 = vpop.f32.mrb[232].mxu1 }
 0x3a4   : > { %v6482_v4 = vadd.f32 %v6442_v45, %v13815_v40  ;;  %v9845_v5 = vpop.f32.mrb[233].mxu1  ;;  %v13935_v40 = vld [vmem:[%s14028_s5] ss:$0 sm:$0xff] }
 0x3a5   : > { %v6445_v47 = vpop.f32.mrb[234].mxu1 }
 0x3a6   : > { %v6483_v28 = vadd.f32 %v6445_v47, %v13820_v20  ;;  %v9846_v6 = vpop.f32.mrb[235].mxu1  ;;  %v13925_v18 = vadd.f32 %v7398_v54, %v6482_v4 }
 0x3a8   : > { %v13927_v31 = vadd.f32 %v7401_v57, %v6483_v28 }
 0x3ab   : > { %v6450_v37 = vpop.f32.mrb[236].mxu1 }
 0x3ac   : > { %v6484_v29 = vadd.f32 %v6450_v37, %v13828_v38  ;;  %v9849_v24 = vpop.f32.mrb[237].mxu1 }
 0x3ad   : > { %v6453_v34 = vpop.f32.mrb[238].mxu1 }
 0x3ae   : > { %v9850_v0 = vpop.f32.mrb[239].mxu1  ;;  %v13930_v55 = vadd.f32 %v7406_v2, %v6484_v29 }
 0x3b3   : > { %v8018_v16 = vpop.f32.mrb[240].mxu1 }
 0x3b4   : > { %v8136_v20 = vadd.f32 %v8018_v16, %v13838_v7  ;;  %v9921_v21 = vpop.f32.mrb[241].mxu1 }
 0x3b5   : > { %v8021_v54 = vpop.f32.mrb[242].mxu1 }
 0x3b6   : > { %v8172_v23 = vadd.f32 %v13935_v40, %v8136_v20  ;;  %v8137_v38 = vadd.f32 %v8021_v54, %v13841_v13  ;;  %v9922_v1 = vpop.f32.mrb[243].mxu1 }
 0x3b8   : > { %v8173_v17 = vadd.f32 %v13935_v40, %v8137_v38  ;;  %v8201_v59 = vmax.f32 %v8172_v23, 0.0 }
 0x3ba   : > { %v8202_v57 = vmax.f32 %v8173_v17, 0.0 }
 0x3bb   : > { %v8026_v62 = vpop.f32.mrb[244].mxu1 }
 0x3bc   : > { %v9089_v7 = vpack.c.bf16 %v8202_v57, %v8201_v59  ;;  %v8138_v58 = vadd.f32 %v8026_v62, %v13849_v19  ;;  %v9925_v9 = vpop.f32.mrb[245].mxu1 }
 0x3bd   : > { %v8029_v50 = vpop.f32.mrb[246].mxu1 }
 0x3be   : > { %9090 = vst [vmem:[%s13946_s12] sm:$0xff] %v9089_v7   ;;  %v8174_v13 = vadd.f32 %v13935_v40, %v8138_v58  ;;  %v8139_v2 = vadd.f32 %v8029_v50, %v13852_v60  ;;  %v9926_v12 = vpop.f32.mrb[247].mxu1 }
 0x3c0   : > { %v8175_v46 = vadd.f32 %v13935_v40, %v8139_v2  ;;  %v8203_v39 = vmax.f32 %v8174_v13, 0.0 }
 0x3c2   : > { %v8204_v15 = vmax.f32 %v8175_v46, 0.0 }
 0x3c3   : > { %v8034_v14 = vpop.f32.mrb[248].mxu1 }
 0x3c4   : > { %v9094_v63 = vpack.c.bf16 %v8204_v15, %v8203_v39  ;;  %v8140_v48 = vadd.f32 %v8034_v14, %v13858_v8  ;;  %v9929_v51 = vpop.f32.mrb[249].mxu1 }
 0x3c5   : > { %v8037_v45 = vpop.f32.mrb[250].mxu1 }
 0x3c6   : > { %9156 = vst [vmem:[%s13946_s12 + $0x8] sm:$0xff] %v9094_v63   ;;  %v8176_v19 = vadd.f32 %v13935_v40, %v8140_v48  ;;  %v8141_v4 = vadd.f32 %v8037_v45, %v13861_v42  ;;  %v9930_v5 = vpop.f32.mrb[251].mxu1 }
 0x3c8   : > { %v8177_v60 = vadd.f32 %v13935_v40, %v8141_v4  ;;  %v8205_v47 = vmax.f32 %v8176_v19, 0.0 }
 0x3ca   : > { %v8206_v28 = vmax.f32 %v8177_v60, 0.0 }
 0x3cb   : > { %v8042_v6 = vpop.f32.mrb[252].mxu1 }
 0x3cc   : > { %v9099_v37 = vpack.c.bf16 %v8206_v28, %v8205_v47  ;;  %v8142_v29 = vadd.f32 %v8042_v6, %v13865_v26  ;;  %v9933_v24 = vpop.f32.mrb[253].mxu1 }
 0x3cd   : > { %v8045_v34 = vpop.f32.mrb[254].mxu1 }
 0x3ce   : > { %9157 = vst [vmem:[%s13946_s12 + $0x10] sm:$0xff] %v9099_v37   ;;  %v8178_v8 = vadd.f32 %v13935_v40, %v8142_v29  ;;  %v8143_v0 = vadd.f32 %v8045_v34, %v13867_v35  ;;  %v9934_v16 = vpop.f32.mrb[255].mxu1 }
 0x3d0   : > { %v8179_v42 = vadd.f32 %v13935_v40, %v8143_v0  ;;  %v8207_v20 = vmax.f32 %v8178_v8, 0.0 }
 0x3d2   : > { %v8208_v21 = vmax.f32 %v8179_v42, 0.0 }
 0x3d3   : > { %v8050_v54 = vpop.f32.mrb[0].mxu1 }
 0x3d4   : > { %v9104_v23 = vpack.c.bf16 %v8208_v21, %v8207_v20  ;;  %v8144_v38 = vadd.f32 %v8050_v54, %v13871_v33  ;;  %v9937_v1 = vpop.f32.mrb[1].mxu1 }
 0x3d5   : > { %v8053_v17 = vpop.f32.mrb[2].mxu1 }
 0x3d6   : > { %9158 = vst [vmem:[%s13946_s12 + $0x18] sm:$0xff] %v9104_v23   ;;  %v8180_v26 = vadd.f32 %v13935_v40, %v8144_v38  ;;  %v8145_v59 = vadd.f32 %v8053_v17, %v13873_v61  ;;  %v9938_v57 = vpop.f32.mrb[3].mxu1 }
 0x3d8   : > { %v8181_v35 = vadd.f32 %v13935_v40, %v8145_v59  ;;  %v8209_v62 = vmax.f32 %v8180_v26, 0.0 }
 0x3da   : > { %v8210_v7 = vmax.f32 %v8181_v35, 0.0 }
 0x3db   : > { %v8058_v58 = vpop.f32.mrb[4].mxu1 }
 0x3dc   : > { %v9109_v9 = vpack.c.bf16 %v8210_v7, %v8209_v62  ;;  %v8146_v50 = vadd.f32 %v8058_v58, %v13877_v56  ;;  %v9941_v13 = vpop.f32.mrb[5].mxu1 }
 0x3dd   : > { %v8061_v2 = vpop.f32.mrb[6].mxu1 }
 0x3de   : > { %9159 = vst [vmem:[%s13946_s12 + $0x20] sm:$0xff] %v9109_v9   ;;  %v8182_v33 = vadd.f32 %v13935_v40, %v8146_v50  ;;  %v8147_v12 = vadd.f32 %v8061_v2, %v13879_v32  ;;  %v9942_v46 = vpop.f32.mrb[7].mxu1 }
 0x3e0   : > { %v8183_v61 = vadd.f32 %v13935_v40, %v8147_v12  ;;  %v8211_v39 = vmax.f32 %v8182_v33, 0.0 }
 0x3e2   : > { %v8212_v15 = vmax.f32 %v8183_v61, 0.0 }
 0x3e3   : > { %v8066_v14 = vpop.f32.mrb[8].mxu1 }
 0x3e4   : > { %v9114_v63 = vpack.c.bf16 %v8212_v15, %v8211_v39  ;;  %v8148_v48 = vadd.f32 %v8066_v14, %v13883_v44  ;;  %v9945_v51 = vpop.f32.mrb[9].mxu1 }
 0x3e5   : > { %v8069_v45 = vpop.f32.mrb[10].mxu1 }
 0x3e6   : > { %9160 = vst [vmem:[%s13946_s12 + $0x28] sm:$0xff] %v9114_v63   ;;  %v8184_v56 = vadd.f32 %v13935_v40, %v8148_v48  ;;  %v8149_v19 = vadd.f32 %v8069_v45, %v13885_v27  ;;  %v9946_v4 = vpop.f32.mrb[11].mxu1 }
 0x3e8   : > { %v8185_v32 = vadd.f32 %v13935_v40, %v8149_v19  ;;  %v8213_v5 = vmax.f32 %v8184_v56, 0.0 }
 0x3ea   : > { %v8214_v60 = vmax.f32 %v8185_v32, 0.0 }
 0x3eb   : > { %v8074_v47 = vpop.f32.mrb[12].mxu1 }
 0x3ec   : > { %v9119_v28 = vpack.c.bf16 %v8214_v60, %v8213_v5  ;;  %v8150_v6 = vadd.f32 %v8074_v47, %v13889_v10  ;;  %v9949_v37 = vpop.f32.mrb[13].mxu1 }
 0x3ed   : > { %v8077_v29 = vpop.f32.mrb[14].mxu1 }
 0x3ee   : > { %9161 = vst [vmem:[%s13946_s12 + $0x30] sm:$0xff] %v9119_v28   ;;  %v8186_v44 = vadd.f32 %v13935_v40, %v8150_v6  ;;  %v8151_v24 = vadd.f32 %v8077_v29, %v13891_v25  ;;  %v9950_v34 = vpop.f32.mrb[15].mxu1 }
 0x3f0   : > { %v8187_v27 = vadd.f32 %v13935_v40, %v8151_v24  ;;  %v8215_v8 = vmax.f32 %v8186_v44, 0.0 }
 0x3f2   : > { %v8216_v0 = vmax.f32 %v8187_v27, 0.0 }
 0x3f3   : > { %v8082_v16 = vpop.f32.mrb[16].mxu1 }
 0x3f4   : > { %v9124_v42 = vpack.c.bf16 %v8216_v0, %v8215_v8  ;;  %v8152_v20 = vadd.f32 %v8082_v16, %v13895_v36  ;;  %v9953_v21 = vpop.f32.mrb[17].mxu1 }
 0x3f5   : > { %v8085_v54 = vpop.f32.mrb[18].mxu1 }
 0x3f6   : > { %9162 = vst [vmem:[%s13946_s12 + $0x38] sm:$0xff] %v9124_v42   ;;  %v8188_v10 = vadd.f32 %v13935_v40, %v8152_v20  ;;  %v8153_v23 = vadd.f32 %v8085_v54, %v13897_v11  ;;  %v9954_v38 = vpop.f32.mrb[19].mxu1 }
 0x3f8   : > { %v8189_v25 = vadd.f32 %v13935_v40, %v8153_v23  ;;  %v8217_v1 = vmax.f32 %v8188_v10, 0.0 }
 0x3fa   : > { %v8218_v17 = vmax.f32 %v8189_v25, 0.0 }
 0x3fb   : > { %v8090_v26 = vpop.f32.mrb[20].mxu1 }
 0x3fc   : > { %v9129_v59 = vpack.c.bf16 %v8218_v17, %v8217_v1  ;;  %v8154_v57 = vadd.f32 %v8090_v26, %v13901_v52  ;;  %v9957_v35 = vpop.f32.mrb[21].mxu1 }
 0x3fd   : > { %v8093_v62 = vpop.f32.mrb[22].mxu1 }
 0x3fe   : > { %9163 = vst [vmem:[%s13946_s12 + $0x40] sm:$0xff] %v9129_v59   ;;  %v8190_v36 = vadd.f32 %v13935_v40, %v8154_v57  ;;  %v8155_v7 = vadd.f32 %v8093_v62, %v13903_v22  ;;  %v9958_v58 = vpop.f32.mrb[23].mxu1  ;;  %v8375_v57 = vld [vmem:[%s13946_s12 + $0x70] sm:$0x1] }
 0x400   : > { %v8191_v11 = vadd.f32 %v13935_v40, %v8155_v7  ;;  %v8219_v9 = vmax.f32 %v8190_v36, 0.0 }
 0x402   : > { %v8220_v50 = vmax.f32 %v8191_v11, 0.0 }
 0x403   : > { %v8098_v13 = vpop.f32.mrb[24].mxu1 }
 0x404   : > { %v9134_v2 = vpack.c.bf16 %v8220_v50, %v8219_v9  ;;  %v8156_v33 = vadd.f32 %v8098_v13, %v13907_v3  ;;  %v9961_v12 = vpop.f32.mrb[25].mxu1 }
 0x405   : > { %v8101_v46 = vpop.f32.mrb[26].mxu1 }
 0x406   : > { %9164 = vst [vmem:[%s13946_s12 + $0x48] sm:$0xff] %v9134_v2   ;;  %v8192_v52 = vadd.f32 %v13935_v40, %v8156_v33  ;;  %v8157_v61 = vadd.f32 %v8101_v46, %v13909_v49  ;;  %v9962_v39 = vpop.f32.mrb[27].mxu1 }
 0x408   : > { %v8193_v22 = vadd.f32 %v13935_v40, %v8157_v61  ;;  %v8221_v15 = vmax.f32 %v8192_v52, 0.0 }
 0x40a   : > { %v8222_v14 = vmax.f32 %v8193_v22, 0.0 }
 0x40b   : > { %v8106_v63 = vpop.f32.mrb[28].mxu1 }
 0x40c   : > { %v9139_v48 = vpack.c.bf16 %v8222_v14, %v8221_v15  ;;  %v8158_v51 = vadd.f32 %v8106_v63, %v13913_v30  ;;  %v9965_v45 = vpop.f32.mrb[29].mxu1 }
 0x40d   : > { %v8109_v56 = vpop.f32.mrb[30].mxu1 }
 0x40e   : > { %9165 = vst [vmem:[%s13946_s12 + $0x50] sm:$0xff] %v9139_v48   ;;  %v8194_v3 = vadd.f32 %v13935_v40, %v8158_v51  ;;  %v8159_v19 = vadd.f32 %v8109_v56, %v13915_v53  ;;  %v9966_v4 = vpop.f32.mrb[31].mxu1 }
 0x410   : > { %v8195_v49 = vadd.f32 %v13935_v40, %v8159_v19  ;;  %v8223_v32 = vmax.f32 %v8194_v3, 0.0 }
 0x412   : > { %v8224_v5 = vmax.f32 %v8195_v49, 0.0 }
 0x413   : > { %v8114_v60 = vpop.f32.mrb[32].mxu1 }
 0x414   : > { %v9144_v47 = vpack.c.bf16 %v8224_v5, %v8223_v32  ;;  %v8160_v28 = vadd.f32 %v8114_v60, %v13919_v41  ;;  %v9969_v6 = vpop.f32.mrb[33].mxu1 }
 0x415   : > { %v8117_v37 = vpop.f32.mrb[34].mxu1 }
 0x416   : > { %9166 = vst [vmem:[%s13946_s12 + $0x58] sm:$0xff] %v9144_v47   ;;  %v8196_v30 = vadd.f32 %v13935_v40, %v8160_v28  ;;  %v8161_v29 = vadd.f32 %v8117_v37, %v13921_v43  ;;  %v9970_v44 = vpop.f32.mrb[35].mxu1 }
 0x418   : > { %v8197_v53 = vadd.f32 %v13935_v40, %v8161_v29  ;;  %v8225_v24 = vmax.f32 %v8196_v30, 0.0 }
 0x41a   : > { %v8226_v34 = vmax.f32 %v8197_v53, 0.0 }
 0x41b   : > { %v8122_v27 = vpop.f32.mrb[36].mxu1 }
 0x41c   : > { %v9149_v8 = vpack.c.bf16 %v8226_v34, %v8225_v24  ;;  %v8162_v0 = vadd.f32 %v8122_v27, %v13925_v18  ;;  %v9973_v16 = vpop.f32.mrb[37].mxu1 }
 0x41d   : > { %v8125_v42 = vpop.f32.mrb[38].mxu1 }
 0x41e   : > { %9167 = vst [vmem:[%s13946_s12 + $0x60] sm:$0xff] %v9149_v8   ;;  %v8198_v41 = vadd.f32 %v13935_v40, %v8162_v0  ;;  %v8163_v20 = vadd.f32 %v8125_v42, %v13927_v31  ;;  %v9974_v21 = vpop.f32.mrb[39].mxu1 }
 0x420   : > { %v8199_v43 = vadd.f32 %v13935_v40, %v8163_v20  ;;  %v8227_v54 = vmax.f32 %v8198_v41, 0.0 }
 0x422   : > { %v8228_v10 = vmax.f32 %v8199_v43, 0.0 }
 0x423   : > { %v8130_v23 = vpop.f32.mrb[40].mxu1 }
 0x424   : > { %v9154_v38 = vpack.c.bf16 %v8228_v10, %v8227_v54  ;;  %v8164_v25 = vadd.f32 %v8130_v23, %v13930_v55  ;;  %v9977_v1 = vpop.f32.mrb[41].mxu1 }
 0x425   : > { %v8133_v18 = vpop.f32.mrb[42].mxu1 }
 0x426   : > { %9168 = vst [vmem:[%s13946_s12 + $0x68] sm:$0xff] %v9154_v38   ;;  %v8200_v17 = vadd.f32 %v13935_v40, %v8164_v25  ;;  %v9978_v26 = vpop.f32.mrb[43].mxu1 }
 0x428   : > { %v8229_v59 = vmax.f32 %v8200_v17, 0.0 }
 0x42a   : > { %v9085_v35 = vpack.c.bf16 %v8229_v59, %v8229_v59 }
 0x42c   : > { %v8376_v62 = vsel %vm12919_vm9, %v9085_v35, %v8375_v57 }
 0x42d   : > { %8377 = vst [vmem:[%s13946_s12 + $0x70] sm:$0x1] %v8376_v62 }
 0x42e PF: > { %s16_s21 = sadd.s32 1, %s10038_s21  }
 0x42f   : > { %p13_p4 = scmp.ge.s32.totalorder %s16_s21, 4  }
 0x431   :  { %15 = sbr.rel (!%p13_p4) target bundleno = 1 (0x1), region = 90 }

// kernel: forward.3
= control target key start
LH: loop header
LB: loop body
LE: loop exit
PB: predicated region body
PF: predicated region fallthrough
CT: control target
= control target key end

     0   :  { %s5116_s30 = smov 0   ;;  %s6471_s0 = inlined_call_operand.vmem [shape: bf16[2,9,64,128], index: 0, kind: input, shape index: {}]   ;;  %s6472_s1 = inlined_call_operand.vmem [shape: f32[9,1,128], index: 1, kind: input, shape index: {}]   ;;  %s6473_s2 = inlined_call_operand.vmem [shape: f32[1,128], index: 2, kind: input, shape index: {}]   ;;  %s6474_s3 = inlined_call_operand.vmem [shape: bf16[256,128], index: 3, kind: input, shape index: {}]   ;;  %s6475_s4 = inlined_call_operand.vmem [shape: f32[1,128], index: 4, kind: input, shape index: {}]   ;;  %s6476_s5 = inlined_call_operand.vmem [shape: bf16[128,2048], index: 5, kind: input, shape index: {}]   ;;  %s6477_s6 = inlined_call_operand.vmem [shape: f32[1,2048], index: 6, kind: input, shape index: {}]   ;;  %s6478_s7 = inlined_call_operand.vmem [shape: bf16[2048,128], index: 7, kind: input, shape index: {}]   ;;  %s6479_s8 = inlined_call_operand.vmem [shape: f32[1,128], index: 8, kind: input, shape index: {}]   ;;  %s6480_s9 = inlined_call_operand.vmem [shape: f32[2,1,128], index: 9, kind: output, shape index: {}]  }
   0x1 LB: > { %s4153_s10 = sadd.s32 4294967295, %s5063_s30   ;;  %p4157_p0 = scmp.ge.s32.totalorder %s5063_s30, 1  ;;  %s5063_s30 = sphi %s5116_s30, %s19_s30  }
   0x2   : > { %p287_p1 = scmp.lt.s32.totalorder %s5063_s30, 3 }
   0x4   : > { %p288_p2 = pnand %p4157_p0, %p287_p1 }
   0x5   : > { %v4905_v0 = vld [vmem:[%s6474_s3 + $0x40] sm:$0xff] (!%p288_p2)   ;;  %p321_p3 = scmp.lt.s32.totalorder (!%p288_p2), %s4153_s10, 1  ;;  %v4907_v2 = vld [vmem:[%s6474_s3 + $0x48] sm:$0xff] (!%p288_p2)   ;;  %v4909_v4 = vld [vmem:[%s6474_s3 + $0x50] sm:$0xff] (!%p288_p2)  }
   0x6   : > { %291 = sbr.rel (%p288_p2) target bundleno = 874 (0x36a), region = 56  ;;  %v4906_v1 = vld [vmem:[%s6474_s3] sm:$0xff] (!%p288_p2)   ;;  %4679 = vmatprep.subr.bf16.mxu0 (!%p288_p2), %v4905_v0  ;;  %v4908_v3 = vld [vmem:[%s6474_s3 + $0x8] sm:$0xff] (!%p288_p2)   ;;  %v4910_v5 = vld [vmem:[%s6474_s3 + $0x10] sm:$0xff] (!%p288_p2)  }
   0x7   : > { %4680 = vmatpush3.bf16.msra.mxu0 (!%p288_p2), %v4906_v1  ;;  %v4911_v6 = vld [vmem:[%s6474_s3 + $0x58] sm:$0xff] (!%p288_p2)   ;;  %v4913_v8 = vld [vmem:[%s6474_s3 + $0x60] sm:$0xff] (!%p288_p2)   ;;  %v4915_v10 = vld [vmem:[%s6474_s3 + $0x68] sm:$0xff] (!%p288_p2)  }
   0x8   : > { %4681 = vmatprep.subr.bf16.mxu0 (!%p288_p2), %v4907_v2  ;;  %v4912_v7 = vld [vmem:[%s6474_s3 + $0x18] sm:$0xff] (!%p288_p2)   ;;  %v4914_v9 = vld [vmem:[%s6474_s3 + $0x20] sm:$0xff] (!%p288_p2)   ;;  %v4916_v25 = vld [vmem:[%s6474_s3 + $0x28] sm:$0xff] (!%p288_p2)  }
   0x9   : > { %v5169_v12 = vld [vmem:[%s6472_s1] ss:$0 sm:$0xff] (!%p288_p2)  ;;  %v5175_v18 = vld [vmem:[%s6472_s1 + $0x1] ss:$0 sm:$0xff] (!%p288_p2)  ;;  %v5181_v20 = vld [vmem:[%s6472_s1 + $0x2] ss:$0 sm:$0xff] (!%p288_p2) }
   0xa   : > { %v5197_v30 = vld [vmem:[%s6472_s1 + $0x3] ss:$0 sm:$0xff] (!%p288_p2)  ;;  %v4917_v32 = vld [vmem:[%s6474_s3 + $0x70] sm:$0xff] (!%p288_p2)   ;;  %v5208_v37 = vld [vmem:[%s6472_s1 + $0x4] ss:$0 sm:$0xff] (!%p288_p2) }
   0xb   : > { %4682 = vmatpush3.bf16.msra.mxu0 (!%p288_p2), %v4908_v3  ;;  %v5215_v42 = vld [vmem:[%s6472_s1 + $0x5] ss:$0 sm:$0xff] (!%p288_p2)  ;;  %v4918_v49 = vld [vmem:[%s6474_s3 + $0x30] sm:$0xff] (!%p288_p2)   ;;  %v5229_v54 = vld [vmem:[%s6472_s1 + $0x6] ss:$0 sm:$0xff] (!%p288_p2) }
   0xc   : > { %4683 = vmatprep.subr.bf16.mxu0 (!%p288_p2), %v4909_v4  ;;  %v4919_v56 = vld [vmem:[%s6474_s3 + $0x78] sm:$0xff] (!%p288_p2)   ;;  %v5240_v61 = vld [vmem:[%s6472_s1 + $0x7] ss:$0 sm:$0xff] (!%p288_p2)  ;;  %v5245_v2 = vld [vmem:[%s6472_s1 + $0x8] ss:$0 sm:$0xff] (!%p288_p2) }
   0xd   : > { %s6482_s10 = smov (!%p321_p3, %s4153_s10), 1 }
   0xe   : > { %s4895_s25 = smul.u32 288, %s6482_s10  ;;  %s328_s24 = scalar_lea.vmem %s6480_s9, %s6482_s10 }
   0xf   : > { %4684 = vmatpush3.bf16.msra.mxu0 %v4910_v5 }
  0x10   : > { %4685 = vmatprep.subr.bf16.mxu0 %v4911_v6  ;;  %s5157_s13 = scalar_lea.vmem %s6471_s0, %s4895_s25 }
  0x11   : > { %v4521_v11 = vld [vmem:[%s5157_s13] sm:$0xff]   ;;  %v4648_v3 = vld [vmem:[%s5157_s13 + $0x8] sm:$0xff]  }
  0x12   : > { %v4651_v13 = vld [vmem:[%s5157_s13 + $0x20] sm:$0xff]   ;;  %v4522_v14 = vunpack.c.l.bf16 %v4521_v11  ;;  %v4523_v15 = vunpack.c.h.bf16 %v4521_v11 }
  0x13   : > { %4686 = vmatpush3.bf16.msra.mxu0 %v4912_v7  ;;  %v4538_v16 = vunpack.c.l.bf16 %v4651_v13  ;;  %v4539_v17 = vunpack.c.h.bf16 %v4651_v13  ;;  %v4655_v19 = vld [vmem:[%s5157_s13 + $0x40] sm:$0xff]  }
  0x14   : > { %4687 = vmatprep.subr.bf16.mxu0 %v4913_v8  ;;  %v4554_v21 = vunpack.c.l.bf16 %v4655_v19  ;;  %v4555_v22 = vunpack.c.h.bf16 %v4655_v19  ;;  %v4659_v23 = vld [vmem:[%s5157_s13 + $0x60] sm:$0xff]   ;;  %v353_v26 = vmul.f32 %v4522_v14, %v5169_v12  ;;  %v354_v27 = vmul.f32 %v4523_v15, %v5169_v12  ;;  %v4652_v8 = vld [vmem:[%s5157_s13 + $0x28] sm:$0xff]  }
  0x15   : > { %v5185_v24 = vld [vmem:[%s5157_s13 + $0x80] sm:$0xff]   ;;  %v386_v28 = vmul.f32 %v4538_v16, %v5175_v18  ;;  %v387_v29 = vmul.f32 %v4539_v17, %v5175_v18  ;;  %v4570_v35 = vunpack.c.l.bf16 %v4659_v23  ;;  %v4571_v36 = vunpack.c.h.bf16 %v4659_v23  ;;  %v4656_v15 = vld [vmem:[%s5157_s13 + $0x48] sm:$0xff]  }
  0x16   : > { %v4663_v31 = vld [vmem:[%s5157_s13 + $0xa0] sm:$0xff]   ;;  %v427_v33 = vmul.f32 %v4554_v21, %v5181_v20  ;;  %v428_v34 = vmul.f32 %v4555_v22, %v5181_v20  ;;  %v493_v40 = vunpack.c.l.bf16 %v5185_v24  ;;  %v494_v41 = vunpack.c.h.bf16 %v5185_v24 }
  0x17   : > { %4688 = vmatpush3.bf16.msra.mxu0 %v4914_v9  ;;  %v394_v38 = vadd.f32 %v386_v28, %v353_v26  ;;  %v395_v39 = vadd.f32 %v387_v29, %v354_v27  ;;  %v4667_v43 = vld [vmem:[%s5157_s13 + $0xc0] sm:$0xff]   ;;  %v468_v44 = vmul.f32 %v4570_v35, %v5197_v30  ;;  %v469_v45 = vmul.f32 %v4571_v36, %v5197_v30  ;;  %v4920_v9 = vld [vmem:[%s6474_s3 + $0x38] sm:$0xff]   ;;  %v4660_v26 = vld [vmem:[%s5157_s13 + $0x68] sm:$0xff]  }
  0x18   : > { %4689 = vmatprep.subr.bf16.mxu0 %v4915_v10  ;;  %v4586_v46 = vunpack.c.l.bf16 %v4663_v31  ;;  %v4587_v47 = vunpack.c.h.bf16 %v4663_v31  ;;  %v4671_v48 = vld [vmem:[%s5157_s13 + $0xe0] sm:$0xff]   ;;  %v509_v52 = vmul.f32 %v5208_v37, %v493_v40  ;;  %v510_v53 = vmul.f32 %v5208_v37, %v494_v41  ;;  %v5264_v36 = vld [vmem:[%s5157_s13 + $0x88] sm:$0xff]  }
  0x19   : > { %v435_v50 = vadd.f32 %v427_v33, %v394_v38  ;;  %v436_v51 = vadd.f32 %v428_v34, %v395_v39  ;;  %v4675_v55 = vld [vmem:[%s5157_s13 + $0x100] sm:$0xff]   ;;  %v4602_v59 = vunpack.c.l.bf16 %v4667_v43  ;;  %v4603_v60 = vunpack.c.h.bf16 %v4667_v43 }
  0x1a   : > { %v550_v57 = vmul.f32 %v4586_v46, %v5215_v42  ;;  %v551_v58 = vmul.f32 %v4587_v47, %v5215_v42  ;;  %v4618_v0 = vunpack.c.l.bf16 %v4671_v48  ;;  %v4619_v1 = vunpack.c.h.bf16 %v4671_v48  ;;  %v4664_v47 = vld [vmem:[%s5157_s13 + $0xa8] sm:$0xff]   ;;  %v5273_v48 = vld [vmem:[%s6473_s2] ss:$0 sm:$0xff] }
  0x1b   : > { %4690 = vmatpush3.bf16.msra.mxu0 %v4916_v25  ;;  %v476_v62 = vadd.f32 %v468_v44, %v435_v50  ;;  %v477_v63 = vadd.f32 %v469_v45, %v436_v51  ;;  %v591_v4 = vmul.f32 %v4602_v59, %v5229_v54  ;;  %v592_v5 = vmul.f32 %v4603_v60, %v5229_v54 }
  0x1c   : > { %4691 = vmatprep.subr.bf16.mxu0 %v4917_v32  ;;  %v4634_v6 = vunpack.c.l.bf16 %v4675_v55  ;;  %v4635_v7 = vunpack.c.h.bf16 %v4675_v55  ;;  %v632_v13 = vmul.f32 %v4618_v0, %v5240_v61  ;;  %v633_v14 = vmul.f32 %v4619_v1, %v5240_v61 }
  0x1d   : > { %v517_v10 = vadd.f32 %v509_v52, %v476_v62  ;;  %v518_v11 = vadd.f32 %v510_v53, %v477_v63  ;;  %v4526_v19 = vunpack.c.l.bf16 %v4648_v3  ;;  %v4527_v23 = vunpack.c.h.bf16 %v4648_v3 }
  0x1e   : > { %v673_v16 = vmul.f32 %v4634_v6, %v5245_v2  ;;  %v674_v17 = vmul.f32 %v4635_v7, %v5245_v2  ;;  %v4542_v25 = vunpack.c.l.bf16 %v4652_v8  ;;  %v4543_v28 = vunpack.c.h.bf16 %v4652_v8 }
  0x1f   : > { %4692 = vmatpush3.bf16.msra.mxu0 %v4918_v49  ;;  %v558_v21 = vadd.f32 %v550_v57, %v517_v10  ;;  %v559_v22 = vadd.f32 %v551_v58, %v518_v11  ;;  %v355_v27 = vmul.f32 %v4526_v19, %v5169_v12  ;;  %v4558_v29 = vunpack.c.l.bf16 %v4656_v15  ;;  %v4668_v58 = vld [vmem:[%s5157_s13 + $0xc8] sm:$0xff]   ;;  %v4649_v11 = vld [vmem:[%s5157_s13 + $0x10] sm:$0xff]  }
  0x20   : > { %4693 = vmatprep.subr.bf16.mxu0 %v4919_v56  ;;  %v4559_v31 = vunpack.c.h.bf16 %v4656_v15  ;;  %v356_v34 = vmul.f32 %v4527_v23, %v5169_v12  ;;  %v388_v35 = vmul.f32 %v4542_v25, %v5175_v18  ;;  %v389_v38 = vmul.f32 %v4543_v28, %v5175_v18  ;;  %v4676_v10 = vld [vmem:[%s5157_s13 + $0x108] sm:$0xff]   ;;  %v4657_v25 = vld [vmem:[%s5157_s13 + $0x50] sm:$0xff]  }
  0x21   : > { %v599_v32 = vadd.f32 %v591_v4, %v558_v21  ;;  %v600_v33 = vadd.f32 %v592_v5, %v559_v22  ;;  %v429_v39 = vmul.f32 %v4558_v29, %v5181_v20  ;;  %v4574_v41 = vunpack.c.l.bf16 %v4660_v26  ;;  %v4672_v5 = vld [vmem:[%s5157_s13 + $0xe8] sm:$0xff]  }
  0x22   : > { %v430_v40 = vmul.f32 %v4559_v31, %v5181_v20  ;;  %v396_v45 = vadd.f32 %v388_v35, %v355_v27  ;;  %v4575_v46 = vunpack.c.h.bf16 %v4660_v26  ;;  %v397_v49 = vadd.f32 %v389_v38, %v356_v34  ;;  %v4661_v34 = vld [vmem:[%s5157_s13 + $0x70] sm:$0xff]  }
  0x23   : > { %4694 = vmatpush3.bf16.msra.mxu0 %v4920_v9  ;;  %v640_v43 = vadd.f32 %v632_v13, %v599_v32  ;;  %v641_v44 = vadd.f32 %v633_v14, %v600_v33  ;;  %v470_v50 = vmul.f32 %v4574_v41, %v5197_v30  ;;  %v495_v51 = vunpack.c.l.bf16 %v5264_v36 }
  0x24   : > { %v496_v52 = vunpack.c.h.bf16 %v5264_v36  ;;  %v437_v56 = vadd.f32 %v429_v39, %v396_v45  ;;  %v471_v57 = vmul.f32 %v4575_v46, %v5197_v30  ;;  %v438_v59 = vadd.f32 %v430_v40, %v397_v49  ;;  %v5300_v46 = vld [vmem:[%s5157_s13 + $0x90] sm:$0xff]  }
  0x25   : > { %v681_v53 = vadd.f32 %v673_v16, %v640_v43  ;;  %v682_v55 = vadd.f32 %v674_v17, %v641_v44  ;;  %v511_v60 = vmul.f32 %v5208_v37, %v495_v51  ;;  %v4590_v63 = vunpack.c.l.bf16 %v4664_v47  ;;  %v4653_v17 = vld [vmem:[%s5157_s13 + $0x30] sm:$0xff]  }
  0x26   : > { %v512_v62 = vmul.f32 %v5208_v37, %v496_v52  ;;  %v478_v3 = vadd.f32 %v470_v50, %v437_v56  ;;  %v4591_v4 = vunpack.c.h.bf16 %v4664_v47  ;;  %v479_v6 = vadd.f32 %v471_v57, %v438_v59  ;;  %v4665_v56 = vld [vmem:[%s5157_s13 + $0xb0] sm:$0xff]  }
  0x27   : > { %v696_v0 = vadd.f32 %v5273_v48, %v681_v53  ;;  %v697_v1 = vadd.f32 %v5273_v48, %v682_v55  ;;  %v552_v7 = vmul.f32 %v4590_v63, %v5215_v42  ;;  %v4606_v8 = vunpack.c.l.bf16 %v4668_v58 }
  0x28   : > { %v4607_v9 = vunpack.c.h.bf16 %v4668_v58  ;;  %v519_v15 = vadd.f32 %v511_v60, %v478_v3  ;;  %v553_v16 = vmul.f32 %v4591_v4, %v5215_v42  ;;  %v520_v19 = vadd.f32 %v512_v62, %v479_v6  ;;  %v4669_v3 = vld [vmem:[%s5157_s13 + $0xd0] sm:$0xff]  }
  0x29   : > { %v704_v13 = vmax.f32 %v696_v0, 0.0  ;;  %v705_v14 = vmax.f32 %v697_v1, 0.0  ;;  %v593_v21 = vmul.f32 %v4606_v8, %v5229_v54  ;;  %v4622_v23 = vunpack.c.l.bf16 %v4672_v5  ;;  %v4673_v8 = vld [vmem:[%s5157_s13 + $0xf0] sm:$0xff]  }
  0x2a   : > { %v594_v22 = vmul.f32 %v4607_v9, %v5229_v54  ;;  %v560_v27 = vadd.f32 %v552_v7, %v519_v15  ;;  %v4623_v28 = vunpack.c.h.bf16 %v4672_v5  ;;  %v4638_v29 = vunpack.c.l.bf16 %v4676_v10 }
  0x2b   : > { %v712_v26 = vpack.c.bf16 %v705_v14, %v704_v13  ;;  %v561_v31 = vadd.f32 %v553_v16, %v520_v19  ;;  %v634_v32 = vmul.f32 %v4622_v23, %v5240_v61  ;;  %v4639_v33 = vunpack.c.h.bf16 %v4676_v10  ;;  %v4677_v19 = vld [vmem:[%s5157_s13 + $0x110] sm:$0xff]  }
  0x2c   : > { %v601_v35 = vadd.f32 %v593_v21, %v560_v27  ;;  %v635_v38 = vmul.f32 %v4623_v28, %v5240_v61  ;;  %v675_v39 = vmul.f32 %v4638_v29, %v5245_v2  ;;  %v4530_v40 = vunpack.c.l.bf16 %v4649_v11 }
  0x2d   : > { %907 = vmatprep.mubr.bf16.mxu0 %v712_v26  ;;  %v602_v41 = vadd.f32 %v594_v22, %v561_v31  ;;  %v676_v43 = vmul.f32 %v4639_v33, %v5245_v2  ;;  %v4531_v44 = vunpack.c.h.bf16 %v4649_v11  ;;  %v4546_v45 = vunpack.c.l.bf16 %v4653_v17  ;;  %v4650_v26 = vld [vmem:[%s5157_s13 + $0x18] sm:$0xff]  }
  0x2e   : > { %908 = vmatmul.mubr.bf16.vlgmr.msra.gmra.mrb[0].mxu0 %v5185_v24  ;;  %v642_v47 = vadd.f32 %v634_v32, %v601_v35  ;;  %v357_v49 = vmul.f32 %v4530_v40, %v5169_v12  ;;  %v4547_v50 = vunpack.c.h.bf16 %v4653_v17  ;;  %v4562_v51 = vunpack.c.l.bf16 %v4657_v25 }
  0x2f   : > { %v643_v52 = vadd.f32 %v635_v38, %v602_v41  ;;  %v358_v53 = vmul.f32 %v4531_v44, %v5169_v12  ;;  %v390_v55 = vmul.f32 %v4546_v45, %v5175_v18  ;;  %v4563_v24 = vunpack.c.h.bf16 %v4657_v25  ;;  %v4654_v38 = vld [vmem:[%s5157_s13 + $0x38] sm:$0xff]  }
  0x30   : > { %v683_v57 = vadd.f32 %v675_v39, %v642_v47  ;;  %v391_v58 = vmul.f32 %v4547_v50, %v5175_v18  ;;  %v431_v59 = vmul.f32 %v4562_v51, %v5181_v20  ;;  %v4578_v60 = vunpack.c.l.bf16 %v4661_v34  ;;  %v4658_v44 = vld [vmem:[%s5157_s13 + $0x58] sm:$0xff]  }
  0x31   : > { %v684_v62 = vadd.f32 %v676_v43, %v643_v52  ;;  %v398_v63 = vadd.f32 %v390_v55, %v357_v49  ;;  %v432_v0 = vmul.f32 %v4563_v24, %v5181_v20  ;;  %v4579_v1 = vunpack.c.h.bf16 %v4661_v34  ;;  %v4662_v51 = vld [vmem:[%s5157_s13 + $0x78] sm:$0xff]  }
  0x32   : > { %v698_v4 = vadd.f32 %v5273_v48, %v683_v57  ;;  %v399_v5 = vadd.f32 %v391_v58, %v358_v53  ;;  %v472_v6 = vmul.f32 %v4578_v60, %v5197_v30  ;;  %v497_v7 = vunpack.c.l.bf16 %v5300_v46 }
  0x33   : > { %v699_v9 = vadd.f32 %v5273_v48, %v684_v62  ;;  %v439_v10 = vadd.f32 %v431_v59, %v398_v63  ;;  %v473_v11 = vmul.f32 %v4579_v1, %v5197_v30  ;;  %v498_v13 = vunpack.c.h.bf16 %v5300_v46 }
  0x34   : > { %v706_v14 = vmax.f32 %v698_v4, 0.0  ;;  %v440_v15 = vadd.f32 %v432_v0, %v399_v5  ;;  %v513_v16 = vmul.f32 %v5208_v37, %v497_v7  ;;  %v4594_v17 = vunpack.c.l.bf16 %v4665_v56  ;;  %v5335_v0 = vld [vmem:[%s5157_s13 + $0x98] sm:$0xff]  }
  0x35   : > { %v707_v21 = vmax.f32 %v699_v9, 0.0  ;;  %v480_v22 = vadd.f32 %v472_v6, %v439_v10  ;;  %v514_v23 = vmul.f32 %v5208_v37, %v498_v13  ;;  %v4595_v25 = vunpack.c.h.bf16 %v4665_v56  ;;  %v4666_v5 = vld [vmem:[%s5157_s13 + $0xb8] sm:$0xff]  }
  0x36   : > { %v481_v27 = vadd.f32 %v473_v11, %v440_v15  ;;  %v554_v28 = vmul.f32 %v4594_v17, %v5215_v42  ;;  %v4610_v29 = vunpack.c.l.bf16 %v4669_v3  ;;  %v4611_v31 = vunpack.c.h.bf16 %v4669_v3 }
  0x37   : > { %v713_v32 = vpack.c.bf16 %v707_v21, %v706_v14  ;;  %v521_v33 = vadd.f32 %v513_v16, %v480_v22  ;;  %v555_v34 = vmul.f32 %v4595_v25, %v5215_v42  ;;  %v4626_v35 = vunpack.c.l.bf16 %v4673_v8  ;;  %v4674_v21 = vld [vmem:[%s5157_s13 + $0xf8] sm:$0xff]  }
  0x38   : > { %v522_v39 = vadd.f32 %v514_v23, %v481_v27  ;;  %v595_v40 = vmul.f32 %v4610_v29, %v5229_v54  ;;  %v596_v41 = vmul.f32 %v4611_v31, %v5229_v54  ;;  %v4627_v43 = vunpack.c.h.bf16 %v4673_v8 }
  0x39   : > { %915 = vmatprep.mubr.bf16.mxu0 %v713_v32  ;;  %v562_v45 = vadd.f32 %v554_v28, %v521_v33  ;;  %v636_v47 = vmul.f32 %v4626_v35, %v5240_v61  ;;  %v4642_v49 = vunpack.c.l.bf16 %v4677_v19  ;;  %v4643_v50 = vunpack.c.h.bf16 %v4677_v19  ;;  %v4670_v19 = vld [vmem:[%s5157_s13 + $0xd8] sm:$0xff]  }
  0x3a   : > { %916 = vmatmul.mubr.bf16.gmra.mrb[4].mxu0 %v5264_v36  ;;  %v563_v52 = vadd.f32 %v555_v34, %v522_v39  ;;  %v637_v53 = vmul.f32 %v4627_v43, %v5240_v61  ;;  %v4534_v55 = vunpack.c.l.bf16 %v4650_v26  ;;  %v4535_v58 = vunpack.c.h.bf16 %v4650_v26  ;;  %v4678_v34 = vld [vmem:[%s5157_s13 + $0x118] sm:$0xff]  }
  0x3b   : > { %v603_v24 = vadd.f32 %v595_v40, %v562_v45  ;;  %v677_v56 = vmul.f32 %v4642_v49, %v5245_v2  ;;  %v678_v57 = vmul.f32 %v4643_v50, %v5245_v2  ;;  %v4550_v62 = vunpack.c.l.bf16 %v4654_v38  ;;  %v952_v40 = vld [vmem:[%s6476_s5] sm:$0xff]  ;;  %v955_v49 = vld [vmem:[%s6476_s5 + $0x48] sm:$0xff] }
  0x3c   : > { %v604_v59 = vadd.f32 %v596_v41, %v563_v52  ;;  %v359_v60 = vmul.f32 %v4534_v55, %v5169_v12  ;;  %v4551_v63 = vunpack.c.h.bf16 %v4654_v38  ;;  %v360_v36 = vmul.f32 %v4535_v58, %v5169_v12  ;;  %v954_v41 = vld [vmem:[%s6476_s5 + $0x40] sm:$0xff] }
  0x3d   : > { %v644_v1 = vadd.f32 %v636_v47, %v603_v24  ;;  %v4566_v3 = vunpack.c.l.bf16 %v4658_v44  ;;  %v4567_v4 = vunpack.c.h.bf16 %v4658_v44  ;;  %v392_v7 = vmul.f32 %v4550_v62, %v5175_v18  ;;  %v953_v47 = vld [vmem:[%s6476_s5 + $0x8] sm:$0xff]  ;;  %v956_v55 = vld [vmem:[%s6476_s5 + $0x80] sm:$0xff] }
  0x3e   : > { %v645_v6 = vadd.f32 %v637_v53, %v604_v59  ;;  %v393_v8 = vmul.f32 %v4551_v63, %v5175_v18  ;;  %v4582_v9 = vunpack.c.l.bf16 %v4662_v51  ;;  %v4583_v14 = vunpack.c.h.bf16 %v4662_v51  ;;  %v957_v59 = vld [vmem:[%s6476_s5 + $0x88] sm:$0xff] }
  0x3f   : > { %v685_v10 = vadd.f32 %v677_v56, %v644_v1  ;;  %v433_v11 = vmul.f32 %v4566_v3, %v5181_v20  ;;  %v434_v13 = vmul.f32 %v4567_v4, %v5181_v20  ;;  %v400_v16 = vadd.f32 %v392_v7, %v359_v60  ;;  %v959_v60 = vld [vmem:[%s6476_s5 + $0xc8] sm:$0xff]  ;;  %v962_v3 = vld [vmem:[%s6476_s5 + $0x140] sm:$0xff] }
  0x40   : > { %v686_v15 = vadd.f32 %v678_v57, %v645_v6  ;;  %v401_v12 = vadd.f32 %v393_v8, %v360_v36  ;;  %v474_v17 = vmul.f32 %v4582_v9, %v5197_v30  ;;  %v475_v23 = vmul.f32 %v4583_v14, %v5197_v30 }
  0x41   : > { %v700_v22 = vadd.f32 %v5273_v48, %v685_v10  ;;  %v499_v18 = vunpack.c.l.bf16 %v5335_v0  ;;  %v500_v25 = vunpack.c.h.bf16 %v5335_v0  ;;  %v441_v20 = vadd.f32 %v433_v11, %v400_v16  ;;  %v961_v10 = vld [vmem:[%s6476_s5 + $0x108] sm:$0xff] }
  0x42   : > { %v701_v26 = vadd.f32 %v5273_v48, %v686_v15  ;;  %v442_v27 = vadd.f32 %v434_v13, %v401_v12  ;;  %v4598_v28 = vunpack.c.l.bf16 %v4666_v5  ;;  %v4599_v33 = vunpack.c.h.bf16 %v4666_v5  ;;  %v963_v11 = vld [vmem:[%s6476_s5 + $0x148] sm:$0xff] }
  0x43   : > { %v708_v29 = vmax.f32 %v700_v22, 0.0  ;;  %v515_v31 = vmul.f32 %v5208_v37, %v499_v18  ;;  %v516_v32 = vmul.f32 %v5208_v37, %v500_v25  ;;  %v482_v38 = vadd.f32 %v474_v17, %v441_v20  ;;  %v966_v17 = vld [vmem:[%s6476_s5 + $0x1c0] sm:$0xff]  ;;  %v965_v18 = vld [vmem:[%s6476_s5 + $0x188] sm:$0xff] }
  0x44   : > { %v709_v35 = vmax.f32 %v701_v26, 0.0  ;;  %v483_v39 = vadd.f32 %v475_v23, %v442_v27  ;;  %v556_v30 = vmul.f32 %v4598_v28, %v5215_v42  ;;  %v557_v43 = vmul.f32 %v4599_v33, %v5215_v42  ;;  %v958_v42 = vld [vmem:[%s6476_s5 + $0xc0] sm:$0xff]  ;;  %v967_v25 = vld [vmem:[%s6476_s5 + $0x1c8] sm:$0xff] }
  0x45   : > { %v4614_v44 = vunpack.c.l.bf16 %v4670_v19  ;;  %v4615_v45 = vunpack.c.h.bf16 %v4670_v19  ;;  %v4630_v37 = vunpack.c.l.bf16 %v4674_v21  ;;  %v523_v51 = vadd.f32 %v515_v31, %v482_v38  ;;  %v970_v31 = vld [vmem:[%s6476_s5 + $0x240] sm:$0xff]  ;;  %v971_v38 = vld [vmem:[%s6476_s5 + $0x248] sm:$0xff] }
  0x46   : > { %v714_v50 = vpack.c.bf16 %v709_v35, %v708_v29  ;;  %v524_v52 = vadd.f32 %v516_v32, %v483_v39  ;;  %v4631_v53 = vunpack.c.h.bf16 %v4674_v21  ;;  %v4646_v58 = vunpack.c.l.bf16 %v4678_v34  ;;  %v968_v29 = vld [vmem:[%s6476_s5 + $0x200] sm:$0xff] }
  0x47   : > { %v597_v24 = vmul.f32 %v4614_v44, %v5229_v54  ;;  %v598_v56 = vmul.f32 %v4615_v45, %v5229_v54  ;;  %v638_v57 = vmul.f32 %v4630_v37, %v5240_v61  ;;  %v564_v62 = vadd.f32 %v556_v30, %v523_v51  ;;  %v960_v54 = vld [vmem:[%s6476_s5 + $0x100] sm:$0xff] }
  0x48   : > { %923 = vmatprep.mubr.bf16.mxu0 %v714_v50  ;;  %v565_v63 = vadd.f32 %v557_v43, %v524_v52  ;;  %v639_v1 = vmul.f32 %v4631_v53, %v5240_v61  ;;  %v4647_v36 = vunpack.c.h.bf16 %v4678_v34  ;;  %v679_v4 = vmul.f32 %v4646_v58, %v5245_v2  ;;  %v974_v43 = vld [vmem:[%s6476_s5 + $0x2c0] sm:$0xff]  ;;  %v973_v52 = vld [vmem:[%s6476_s5 + $0x288] sm:$0xff] }
  0x49   : > { %924 = vmatmul.mubr.bf16.gmra.mrb[8].mxu0 %v5300_v46  ;;  %v4263_v5 = vcombine.high %v952_v40, %v954_v41  ;;  %v4262_v6 = vcombine.low %v952_v40, %v954_v41  ;;  %v605_v7 = vadd.f32 %v597_v24, %v564_v62  ;;  %v4264_v61 = vcombine.low %v953_v47, %v955_v49  ;;  %v972_v41 = vld [vmem:[%s6476_s5 + $0x280] sm:$0xff] }
  0x4a   : > { %v606_v8 = vadd.f32 %v598_v56, %v565_v63  ;;  %v680_v9 = vmul.f32 %v4647_v36, %v5245_v2  ;;  %v4265_v13 = vcombine.high %v953_v47, %v955_v49  ;;  %v4267_v46 = vcombine.high %v956_v55, %v958_v42  ;;  %v964_v2 = vld [vmem:[%s6476_s5 + $0x180] sm:$0xff]  ;;  %v977_v56 = vld [vmem:[%s6476_s5 + $0x308] sm:$0xff] }
  0x4b   : > { %1166 = vmatprep.subr.bf16.mxu1 %v4263_v5  ;;  %v646_v14 = vadd.f32 %v638_v57, %v605_v7  ;;  %v4266_v16 = vcombine.low %v956_v55, %v958_v42  ;;  %v4269_v12 = vcombine.high %v957_v59, %v959_v60  ;;  %v4271_v19 = vcombine.high %v960_v54, %v962_v3  ;;  %v976_v42 = vld [vmem:[%s6476_s5 + $0x300] sm:$0xff]  ;;  %v1396_v7 = vld [vmem:[%s6476_s5 + $0x10] sm:$0xff] }
  0x4c   : > { %v647_v15 = vadd.f32 %v639_v1, %v606_v8  ;;  %1167 = vmatpush1.bf16.msra.mxu1 %v4262_v6  ;;  %1239 = vmatprep.subr.bf16.mxu0 %v4265_v13  ;;  %v4268_v23 = vcombine.low %v957_v59, %v959_v60  ;;  %v4273_v26 = vcombine.high %v961_v10, %v963_v11  ;;  %v978_v24 = vld [vmem:[%s6476_s5 + $0x340] sm:$0xff]  ;;  %v979_v59 = vld [vmem:[%s6476_s5 + $0x348] sm:$0xff]  ;;  %v1398_v8 = vld [vmem:[%s6476_s5 + $0x50] sm:$0xff] }
  0x4d   : > { %1168 = vmatprep.subr.bf16.mxu1 %v4267_v46  ;;  %v687_v21 = vadd.f32 %v679_v4, %v646_v14  ;;  %1240 = vmatpush1.bf16.msra.mxu0 %v4264_v61  ;;  %v4270_v28 = vcombine.low %v960_v54, %v962_v3  ;;  %v4275_v32 = vcombine.high %v964_v2, %v966_v17  ;;  %v980_v60 = vld [vmem:[%s6476_s5 + $0x380] sm:$0xff]  ;;  %v981_v54 = vld [vmem:[%s6476_s5 + $0x388] sm:$0xff]  ;;  %v5065_v61 = vmov 0   ;;  %v1399_v13 = vld [vmem:[%s6476_s5 + $0x58] sm:$0xff] }
  0x4e   : > { %v688_v22 = vadd.f32 %v680_v9, %v647_v15  ;;  %1241 = vmatprep.subr.bf16.mxu0 %v4269_v12  ;;  %v4272_v35 = vcombine.low %v961_v10, %v963_v11  ;;  %v4277_v39 = vcombine.high %v965_v18, %v967_v25  ;;  %v4274_v40 = vcombine.low %v964_v2, %v966_v17  ;;  %v982_v62 = vld [vmem:[%s6476_s5 + $0x3c0] sm:$0xff]  ;;  %v983_v3 = vld [vmem:[%s6476_s5 + $0x3c8] sm:$0xff]  ;;  %v1397_v9 = vld [vmem:[%s6476_s5 + $0x18] sm:$0xff] }
  0x4f   : > { %v702_v20 = vadd.f32 %v5273_v48, %v687_v21  ;;  %v4279_v44 = vcombine.high %v968_v29, %v970_v31  ;;  %v4276_v45 = vcombine.low %v965_v18, %v967_v25  ;;  %v4278_v47 = vcombine.low %v968_v29, %v970_v31  ;;  %1198 = vmatprep.mubr.bf16.mxu1 %v5065_v61  ;;  %v1400_v18 = vld [vmem:[%s6476_s5 + $0x90] sm:$0xff] }
  0x50   : > { %v703_v27 = vadd.f32 %v5273_v48, %v688_v22  ;;  %1169 = vmatpush1.bf16.msra.mxu1 %v4266_v16  ;;  %v969_v48 = vld [vmem:[%s6476_s5 + $0x208] sm:$0xff]  ;;  %v4283_v49 = vcombine.high %v972_v41, %v974_v43  ;;  %v4282_v51 = vcombine.low %v972_v41, %v974_v43  ;;  %v4287_v57 = vcombine.high %v976_v42, %v978_v24  ;;  %v5479_v16 = vld [vmem:[%s6475_s4] ss:$0 sm:$0xff]  ;;  %v1402_v25 = vld [vmem:[%s6476_s5 + $0xd0] sm:$0xff] }
  0x51   : > { %1170 = vmatprep.subr.bf16.mxu1 %v4271_v19  ;;  %v710_v33 = vmax.f32 %v702_v20, 0.0  ;;  %1242 = vmatpush1.bf16.msra.mxu0 %v4268_v23  ;;  %v4281_v37 = vcombine.high %v969_v48, %v971_v38  ;;  %v4280_v50 = vcombine.low %v969_v48, %v971_v38  ;;  %v4286_v58 = vcombine.low %v976_v42, %v978_v24  ;;  %v1403_v20 = vld [vmem:[%s6476_s5 + $0xd8] sm:$0xff] }
  0x52   : > { %v711_v34 = vmax.f32 %v703_v27, 0.0  ;;  %1243 = vmatprep.subr.bf16.mxu0 %v4273_v26  ;;  %v4288_v63 = vcombine.low %v977_v56, %v979_v59  ;;  %v4289_v1 = vcombine.high %v977_v56, %v979_v59  ;;  %v4291_v36 = vcombine.high %v980_v60, %v982_v62  ;;  %v1401_v26 = vld [vmem:[%s6476_s5 + $0x98] sm:$0xff] }
  0x53   : > { %v4290_v4 = vcombine.low %v980_v60, %v982_v62  ;;  %v4293_v5 = vcombine.high %v981_v54, %v983_v3  ;;  %v4292_v6 = vcombine.low %v981_v54, %v983_v3  ;;  %v4294_v10 = vcombine.low %v1396_v7, %v1398_v8  ;;  %v1407_v48 = vld [vmem:[%s6476_s5 + $0x158] sm:$0xff]  ;;  %v1414_v60 = vld [vmem:[%s6476_s5 + $0x250] sm:$0xff] }
  0x54   : > { %v715_v30 = vpack.c.bf16 %v711_v34, %v710_v33  ;;  %1171 = vmatpush1.bf16.msra.mxu1 %v4270_v28  ;;  %v4295_v11 = vcombine.high %v1396_v7, %v1398_v8  ;;  %v4296_v46 = vcombine.low %v1397_v9, %v1399_v13  ;;  %v4297_v14 = vcombine.high %v1397_v9, %v1399_v13  ;;  %v1404_v33 = vld [vmem:[%s6476_s5 + $0x110] sm:$0xff]  ;;  %v1413_v62 = vld [vmem:[%s6476_s5 + $0x218] sm:$0xff] }
  0x55   : > { %1172 = vmatprep.subr.bf16.mxu1 %v4275_v32  ;;  %1244 = vmatpush1.bf16.msra.mxu0 %v4272_v35  ;;  %v4299_v31 = vcombine.high %v1400_v18, %v1402_v25  ;;  %v4301_v32 = vcombine.high %v1401_v26, %v1403_v20  ;;  %v1406_v34 = vld [vmem:[%s6476_s5 + $0x150] sm:$0xff]  ;;  %v1405_v35 = vld [vmem:[%s6476_s5 + $0x118] sm:$0xff] }
  0x56   : > { %931 = vmatprep.mubr.bf16.mxu0 %v715_v30  ;;  %1245 = vmatprep.subr.bf16.mxu0 %v4277_v39  ;;  %v4298_v39 = vcombine.low %v1400_v18, %v1402_v25  ;;  %v4300_v30 = vcombine.low %v1401_v26, %v1403_v20  ;;  %v4303_v41 = vcombine.high %v1404_v33, %v1406_v34  ;;  %v1416_v3 = vld [vmem:[%s6476_s5 + $0x290] sm:$0xff]  ;;  %v1417_v7 = vld [vmem:[%s6476_s5 + $0x298] sm:$0xff] }
  0x57   : > { %932 = vmatmul.mubr.bf16.gmra.mrb[12].mxu0 %v5335_v0  ;;  %v975_v0 = vld [vmem:[%s6476_s5 + $0x2c8] sm:$0xff]  ;;  %v4305_v43 = vcombine.high %v1405_v35, %v1407_v48  ;;  %v1419_v8 = vld [vmem:[%s6476_s5 + $0x2d8] sm:$0xff]  ;;  %v1424_v20 = vld [vmem:[%s6476_s5 + $0x390] sm:$0xff] }
  0x58   : > { %1173 = vmatpush1.bf16.msra.mxu1 %v4274_v40  ;;  %v4284_v53 = vcombine.low %v973_v52, %v975_v0  ;;  %v4285_v55 = vcombine.high %v973_v52, %v975_v0  ;;  %1271 = vmatprep.mubr.bf16.mxu0 %v5065_v61  ;;  %v4302_v52 = vcombine.low %v1404_v33, %v1406_v34  ;;  %v1427_v33 = vld [vmem:[%s6476_s5 + $0x3d8] sm:$0xff] }
  0x59   : > { %1174 = vmatprep.subr.bf16.mxu1 %v4279_v44  ;;  %1246 = vmatpush1.bf16.msra.mxu0 %v4276_v45  ;;  %v1408_v44 = vld [vmem:[%s6476_s5 + $0x190] sm:$0xff]  ;;  %v4317_v13 = vcombine.high %v1417_v7, %v1419_v8 }
  0x5a   : > { %1247 = vmatprep.subr.bf16.mxu0 %v4281_v37 }
  0x5c   : > { %1175 = vmatpush1.bf16.msra.mxu1 %v4278_v47  ;;  %v1410_v47 = vld [vmem:[%s6476_s5 + $0x1d0] sm:$0xff] }
  0x5d   : > { %1176 = vmatprep.subr.bf16.mxu1 %v4283_v49  ;;  %1248 = vmatpush1.bf16.msra.mxu0 %v4280_v50  ;;  %v1409_v49 = vld [vmem:[%s6476_s5 + $0x198] sm:$0xff]  ;;  %v4307_v42 = vcombine.high %v1408_v44, %v1410_v47 }
  0x5e   : > { %1249 = vmatprep.subr.bf16.mxu0 %v4285_v55  ;;  %v1411_v50 = vld [vmem:[%s6476_s5 + $0x1d8] sm:$0xff]  ;;  %v4304_v55 = vcombine.low %v1405_v35, %v1407_v48 }
  0x5f   : > { %v4309_v24 = vcombine.high %v1409_v49, %v1411_v50 }
  0x60   : > { %1177 = vmatpush1.bf16.msra.mxu1 %v4282_v51 }
  0x61   : > { %1250 = vmatpush1.bf16.msra.mxu0 %v4284_v53  ;;  %1178 = vmatprep.subr.bf16.mxu1 %v4287_v57  ;;  %v1412_v57 = vld [vmem:[%s6476_s5 + $0x210] sm:$0xff] }
  0x62   : > { %1251 = vmatprep.subr.bf16.mxu0 %v4289_v1  ;;  %v4306_v1 = vcombine.low %v1408_v44, %v1410_v47  ;;  %v4310_v9 = vcombine.low %v1412_v57, %v1414_v60  ;;  %v1841_v44 = vld [vmem:[%s6476_s5 + $0x28] sm:$0xff] }
  0x64   : > { %1179 = vmatpush1.bf16.msra.mxu1 %v4286_v58 }
  0x65   : > { %1252 = vmatpush1.bf16.msra.mxu0 %v4288_v63  ;;  %1180 = vmatprep.subr.bf16.mxu1 %v4291_v36  ;;  %v1415_v63 = vld [vmem:[%s6476_s5 + $0x258] sm:$0xff]  ;;  %v4308_v36 = vcombine.low %v1409_v49, %v1411_v50 }
  0x66   : > { %1253 = vmatprep.subr.bf16.mxu0 %v4293_v5  ;;  %v4313_v5 = vcombine.high %v1413_v62, %v1415_v63 }
  0x68   : > { %1181 = vmatpush1.bf16.msra.mxu1 %v4290_v4  ;;  %v4311_v4 = vcombine.high %v1412_v57, %v1414_v60 }
  0x69   : > { %1254 = vmatpush1.bf16.msra.mxu0 %v4292_v6  ;;  %1610 = vmatprep.subr.bf16.mxu1 %v4295_v11  ;;  %v1418_v6 = vld [vmem:[%s6476_s5 + $0x2d0] sm:$0xff] }
  0x6a   : > { %1683 = vmatprep.subr.bf16.mxu0 %v4297_v14  ;;  %v4315_v11 = vcombine.high %v1416_v3, %v1418_v6 }
 0x101   : > { %v4695_v15 = vpop.f32.mrb[0].mxu0 }
 0x102   : > { %v4696_v12 = vpop.f32.mrb[1].mxu0 }
 0x103   : > { %v4697_v2 = vadd.f32 %v4696_v12, %v4695_v15  ;;  %v4698_v17 = vpop.f32.mrb[2].mxu0  ;;  %v1422_v15 = vld [vmem:[%s6476_s5 + $0x350] sm:$0xff]  ;;  %v1421_v12 = vld [vmem:[%s6476_s5 + $0x318] sm:$0xff] }
 0x104   : > { %v4699_v19 = vpop.f32.mrb[3].mxu0 }
 0x105   : > { %v910_v21 = vadd.f32 %v4697_v2, %v5479_v16  ;;  %v4700_v22 = vadd.f32 %v4699_v19, %v4698_v17  ;;  %v1423_v2 = vld [vmem:[%s6476_s5 + $0x358] sm:$0xff] }
 0x106   : > { %v4321_v26 = vcombine.high %v1421_v12, %v1423_v2  ;;  %v4320_v48 = vcombine.low %v1421_v12, %v1423_v2  ;;  %v1853_v12 = vld [vmem:[%s6476_s5 + $0x1a8] sm:$0xff] }
 0x107   : > { %v913_v23 = vadd.f32 %v4700_v22, %v5479_v16  ;;  %v940_v27 = vmax.f32 %v910_v21, 0.0  ;;  %v4314_v22 = vcombine.low %v1416_v3, %v1418_v6  ;;  %v1848_v6 = vld [vmem:[%s6476_s5 + $0x120] sm:$0xff]  ;;  %v1855_v2 = vld [vmem:[%s6476_s5 + $0x1e8] sm:$0xff] }
 0x109   : > { %v941_v28 = vmax.f32 %v913_v23, 0.0  ;;  %v4316_v23 = vcombine.low %v1417_v7, %v1419_v8  ;;  %v1850_v7 = vld [vmem:[%s6476_s5 + $0x160] sm:$0xff]  ;;  %v1849_v8 = vld [vmem:[%s6476_s5 + $0x128] sm:$0xff] }
 0x10b   : > { %v5495_v29 = vpack.c.bf16 %v941_v28, %v940_v27 }
 0x10d   : > { %1199 = vmatmul.mubr.bf16.vlgmr.msra.gmra.mrb[0].mxu1 %v5495_v29  ;;  %1272 = vmatmul.mubr.bf16.vlgmr.msra.gmra.mrb[16].mxu0 %v5495_v29  ;;  %v4701_v38 = vpop.f32.mrb[4].mxu0 }
 0x10e   : > { %1611 = vmatpush1.bf16.msra.mxu1 %v4294_v10  ;;  %1684 = vmatpush1.bf16.msra.mxu0 %v4296_v46  ;;  %v4702_v40 = vpop.f32.mrb[5].mxu0  ;;  %v4312_v10 = vcombine.low %v1413_v62, %v1415_v63  ;;  %v1420_v46 = vld [vmem:[%s6476_s5 + $0x310] sm:$0xff]  ;;  %v1844_v62 = vld [vmem:[%s6476_s5 + $0xa0] sm:$0xff]  ;;  %v1845_v63 = vld [vmem:[%s6476_s5 + $0xa8] sm:$0xff] }
 0x10f   : > { %1612 = vmatprep.subr.bf16.mxu1 %v4299_v31  ;;  %1685 = vmatprep.subr.bf16.mxu0 %v4301_v32  ;;  %v4703_v45 = vadd.f32 %v4702_v40, %v4701_v38  ;;  %v4704_v37 = vpop.f32.mrb[6].mxu0  ;;  %v4319_v25 = vcombine.high %v1420_v46, %v1422_v15  ;;  %v1426_v31 = vld [vmem:[%s6476_s5 + $0x3d0] sm:$0xff]  ;;  %v1425_v32 = vld [vmem:[%s6476_s5 + $0x398] sm:$0xff]  ;;  %v4318_v35 = vcombine.low %v1420_v46, %v1422_v15  ;;  %v1854_v15 = vld [vmem:[%s6476_s5 + $0x1e0] sm:$0xff] }
 0x110   : > { %1208 = vmatprep.mubr.bf16.mxu1 %v5065_v61  ;;  %1281 = vmatprep.mubr.bf16.mxu0 %v5065_v61  ;;  %v4705_v51 = vpop.f32.mrb[7].mxu0  ;;  %v4323_v38 = vcombine.high %v1424_v20, %v1426_v31  ;;  %v4322_v47 = vcombine.low %v1424_v20, %v1426_v31  ;;  %v4324_v49 = vcombine.low %v1425_v32, %v1427_v33 }
 0x111   : > { %v918_v0 = vadd.f32 %v4703_v45, %v5479_v16  ;;  %v4706_v53 = vadd.f32 %v4705_v51, %v4704_v37  ;;  %v1843_v45 = vld [vmem:[%s6476_s5 + $0x68] sm:$0xff] }
 0x112   : > { %1613 = vmatpush1.bf16.msra.mxu1 %v4298_v39  ;;  %1686 = vmatpush1.bf16.msra.mxu0 %v4300_v30  ;;  %v4325_v39 = vcombine.high %v1425_v32, %v1427_v33  ;;  %v1840_v30 = vld [vmem:[%s6476_s5 + $0x20] sm:$0xff]  ;;  %v4329_v51 = vcombine.high %v1841_v44, %v1843_v45  ;;  %v4328_v3 = vcombine.low %v1841_v44, %v1843_v45  ;;  %v1867_v44 = vld [vmem:[%s6476_s5 + $0x368] sm:$0xff] }
 0x113   : > { %1614 = vmatprep.subr.bf16.mxu1 %v4303_v41  ;;  %1687 = vmatprep.subr.bf16.mxu0 %v4305_v43  ;;  %v921_v56 = vadd.f32 %v4706_v53, %v5479_v16  ;;  %v942_v58 = vmax.f32 %v918_v0, 0.0  ;;  %v1842_v43 = vld [vmem:[%s6476_s5 + $0x60] sm:$0xff] }
 0x114   : > { %v4327_v50 = vcombine.high %v1840_v30, %v1842_v43  ;;  %v1860_v32 = vld [vmem:[%s6476_s5 + $0x2a0] sm:$0xff] }
 0x115   : > { %v943_v59 = vmax.f32 %v921_v56, 0.0  ;;  %v1862_v33 = vld [vmem:[%s6476_s5 + $0x2e0] sm:$0xff] }
 0x116   : > { %1615 = vmatpush1.bf16.msra.mxu1 %v4302_v52  ;;  %1688 = vmatpush1.bf16.msra.mxu0 %v4304_v55  ;;  %v4346_v45 = vcombine.low %v1860_v32, %v1862_v33 }
 0x117   : > { %1616 = vmatprep.subr.bf16.mxu1 %v4307_v42  ;;  %1689 = vmatprep.subr.bf16.mxu0 %v4309_v24  ;;  %v5539_v54 = vpack.c.bf16 %v943_v59, %v942_v58 }
 0x119   : > { %1209 = vmatmul.mubr.bf16.gmra.mrb[4].mxu1 %v5539_v54  ;;  %1282 = vmatmul.mubr.bf16.gmra.mrb[20].mxu0 %v5539_v54 }
 0x11a   : > { %1617 = vmatpush1.bf16.msra.mxu1 %v4306_v1  ;;  %1690 = vmatpush1.bf16.msra.mxu0 %v4308_v36  ;;  %v1847_v1 = vld [vmem:[%s6476_s5 + $0xe8] sm:$0xff]  ;;  %v4326_v36 = vcombine.low %v1840_v30, %v1842_v43 }
 0x11b   : > { %1218 = vmatprep.mubr.bf16.mxu1 %v5065_v61  ;;  %1291 = vmatprep.mubr.bf16.mxu0 %v5065_v61  ;;  %v1865_v43 = vld [vmem:[%s6476_s5 + $0x328] sm:$0xff] }
 0x11c   : > { %v4707_v14 = vpop.f32.mrb[8].mxu0  ;;  %1618 = vmatprep.subr.bf16.mxu1 %v4311_v4  ;;  %1691 = vmatprep.subr.bf16.mxu0 %v4313_v5  ;;  %v4333_v5 = vcombine.high %v1845_v63, %v1847_v1 }
 0x11d   : > { %v4708_v17 = vpop.f32.mrb[9].mxu0 }
 0x11e   : > { %v4709_v19 = vadd.f32 %v4708_v17, %v4707_v14  ;;  %v4710_v21 = vpop.f32.mrb[10].mxu0  ;;  %1619 = vmatpush1.bf16.msra.mxu1 %v4310_v9  ;;  %1692 = vmatpush1.bf16.msra.mxu0 %v4312_v10  ;;  %v1851_v9 = vld [vmem:[%s6476_s5 + $0x168] sm:$0xff]  ;;  %v1852_v14 = vld [vmem:[%s6476_s5 + $0x1a0] sm:$0xff]  ;;  %v4334_v17 = vcombine.low %v1848_v6, %v1850_v7 }
 0x11f   : > { %v4711_v18 = vpop.f32.mrb[11].mxu0  ;;  %1620 = vmatprep.subr.bf16.mxu1 %v4315_v11  ;;  %1693 = vmatprep.subr.bf16.mxu0 %v4317_v13  ;;  %v4332_v11 = vcombine.low %v1845_v63, %v1847_v1  ;;  %v4335_v13 = vcombine.high %v1848_v6, %v1850_v7  ;;  %v4337_v46 = vcombine.high %v1849_v8, %v1851_v9  ;;  %v2291_v6 = vld [vmem:[%s6476_s5 + $0xf8] sm:$0xff] }
 0x120   : > { %v926_v27 = vadd.f32 %v4709_v19, %v5479_v16  ;;  %v4712_v28 = vadd.f32 %v4711_v18, %v4710_v21  ;;  %v4336_v19 = vcombine.low %v1849_v8, %v1851_v9  ;;  %v4339_v21 = vcombine.high %v1852_v14, %v1854_v15  ;;  %v1858_v18 = vld [vmem:[%s6476_s5 + $0x260] sm:$0xff] }
 0x121   : > { %v4338_v20 = vcombine.low %v1852_v14, %v1854_v15  ;;  %v2295_v14 = vld [vmem:[%s6476_s5 + $0x178] sm:$0xff] }
 0x122   : > { %v929_v34 = vadd.f32 %v4712_v28, %v5479_v16  ;;  %1621 = vmatpush1.bf16.msra.mxu1 %v4314_v22  ;;  %1694 = vmatpush1.bf16.msra.mxu0 %v4316_v23  ;;  %v944_v40 = vmax.f32 %v926_v27, 0.0  ;;  %v4341_v22 = vcombine.high %v1853_v12, %v1855_v2  ;;  %v1856_v23 = vld [vmem:[%s6476_s5 + $0x220] sm:$0xff]  ;;  %v4340_v27 = vcombine.low %v1853_v12, %v1855_v2 }
 0x123   : > { %1622 = vmatprep.subr.bf16.mxu1 %v4319_v25  ;;  %1695 = vmatprep.subr.bf16.mxu0 %v4321_v26  ;;  %v1857_v25 = vld [vmem:[%s6476_s5 + $0x228] sm:$0xff]  ;;  %v4343_v28 = vcombine.high %v1856_v23, %v1858_v18 }
 0x124   : > { %v945_v41 = vmax.f32 %v929_v34, 0.0  ;;  %v1859_v26 = vld [vmem:[%s6476_s5 + $0x268] sm:$0xff] }
 0x125   : > { %v4345_v31 = vcombine.high %v1857_v25, %v1859_v26  ;;  %v1861_v34 = vld [vmem:[%s6476_s5 + $0x2a8] sm:$0xff] }
 0x126   : > { %v5595_v37 = vpack.c.bf16 %v945_v41, %v944_v40  ;;  %1623 = vmatpush1.bf16.msra.mxu1 %v4318_v35  ;;  %1696 = vmatpush1.bf16.msra.mxu0 %v4320_v48  ;;  %v1863_v35 = vld [vmem:[%s6476_s5 + $0x2e8] sm:$0xff]  ;;  %v4342_v48 = vcombine.low %v1856_v23, %v1858_v18  ;;  %v1864_v40 = vld [vmem:[%s6476_s5 + $0x320] sm:$0xff]  ;;  %v2299_v23 = vld [vmem:[%s6476_s5 + $0x1f8] sm:$0xff] }
 0x127   : > { %1624 = vmatprep.subr.bf16.mxu1 %v4323_v38  ;;  %1697 = vmatprep.subr.bf16.mxu0 %v4325_v39  ;;  %v4344_v38 = vcombine.low %v1857_v25, %v1859_v26  ;;  %v4347_v39 = vcombine.high %v1860_v32, %v1862_v33  ;;  %v4349_v30 = vcombine.high %v1861_v34, %v1863_v35  ;;  %v1866_v41 = vld [vmem:[%s6476_s5 + $0x360] sm:$0xff]  ;;  %v2303_v32 = vld [vmem:[%s6476_s5 + $0x278] sm:$0xff] }
 0x128   : > { %1219 = vmatmul.mubr.bf16.gmra.mrb[8].mxu1 %v5595_v37  ;;  %1292 = vmatmul.mubr.bf16.gmra.mrb[24].mxu0 %v5595_v37 }
 0x129   : > { %1228 = vmatprep.mubr.bf16.mxu1 %v5065_v61  ;;  %1301 = vmatprep.mubr.bf16.mxu0 %v5065_v61 }
 0x12a   : > { %v4713_v52 = vpop.f32.mrb[12].mxu0  ;;  %1625 = vmatpush1.bf16.msra.mxu1 %v4322_v47  ;;  %1698 = vmatpush1.bf16.msra.mxu0 %v4324_v49  ;;  %v4348_v47 = vcombine.low %v1861_v34, %v1863_v35  ;;  %v4351_v49 = vcombine.high %v1864_v40, %v1866_v41 }
 0x12b   : > { %v4714_v0 = vpop.f32.mrb[13].mxu0  ;;  %2054 = vmatprep.subr.bf16.mxu1 %v4327_v50  ;;  %2127 = vmatprep.subr.bf16.mxu0 %v4329_v51  ;;  %v4353_v50 = vcombine.high %v1865_v43, %v1867_v44  ;;  %v1868_v51 = vld [vmem:[%s6476_s5 + $0x3a0] sm:$0xff] }
 0x12c   : > { %v4715_v53 = vadd.f32 %v4714_v0, %v4713_v52  ;;  %v4716_v55 = vpop.f32.mrb[14].mxu0  ;;  %v1870_v52 = vld [vmem:[%s6476_s5 + $0x3e0] sm:$0xff]  ;;  %v1869_v0 = vld [vmem:[%s6476_s5 + $0x3a8] sm:$0xff] }
 0x12d   : > { %v4717_v42 = vpop.f32.mrb[15].mxu0 }
 0x12e   : > { %v934_v24 = vadd.f32 %v4715_v53, %v5479_v16  ;;  %v4718_v56 = vadd.f32 %v4717_v42, %v4716_v55  ;;  %v1871_v53 = vld [vmem:[%s6476_s5 + $0x3e8] sm:$0xff]  ;;  %v4350_v55 = vcombine.low %v1864_v40, %v1866_v41  ;;  %v4352_v42 = vcombine.low %v1865_v43, %v1867_v44  ;;  %v2307_v40 = vld [vmem:[%s6476_s5 + $0x2f8] sm:$0xff] }
 0x12f   : > { %v4356_v63 = vcombine.low %v1869_v0, %v1871_v53 }
 0x130   : > { %v937_v57 = vadd.f32 %v4718_v56, %v5479_v16  ;;  %v946_v58 = vmax.f32 %v934_v24, 0.0  ;;  %v1846_v16 = vld [vmem:[%s6476_s5 + $0xe0] sm:$0xff]  ;;  %v4355_v24 = vcombine.high %v1868_v51, %v1870_v52  ;;  %v4357_v56 = vcombine.high %v1869_v0, %v1871_v53 }
 0x131   : > { %v4331_v4 = vcombine.high %v1844_v62, %v1846_v16  ;;  %v4330_v10 = vcombine.low %v1844_v62, %v1846_v16  ;;  %v2287_v62 = vld [vmem:[%s6476_s5 + $0x78] sm:$0xff]  ;;  %v4354_v16 = vcombine.low %v1868_v51, %v1870_v52 }
 0x132   : > { %v947_v59 = vmax.f32 %v937_v57, 0.0  ;;  %v2284_v57 = vld [vmem:[%s6476_s5 + $0x30] sm:$0xff]  ;;  %v2311_v51 = vld [vmem:[%s6476_s5 + $0x378] sm:$0xff] }
 0x134   : > { %v5603_v60 = vpack.c.bf16 %v947_v59, %v946_v58  ;;  %v2286_v58 = vld [vmem:[%s6476_s5 + $0x70] sm:$0xff]  ;;  %v2285_v59 = vld [vmem:[%s6476_s5 + $0x38] sm:$0xff] }
 0x135   : > { %v4359_v1 = vcombine.high %v2284_v57, %v2286_v58  ;;  %v4358_v7 = vcombine.low %v2284_v57, %v2286_v58  ;;  %v4360_v8 = vcombine.low %v2285_v59, %v2287_v62  ;;  %v2315_v57 = vld [vmem:[%s6476_s5 + $0x3f8] sm:$0xff] }
 0x136   : > { %1229 = vmatmul.mubr.bf16.gmra.mrb[12].mxu1 %v5603_v60  ;;  %1302 = vmatmul.mubr.bf16.gmra.mrb[28].mxu0 %v5603_v60 }
 0x137   : > { %1642 = vmatprep.mubr.bf16.mxu1 %v5065_v61  ;;  %1715 = vmatprep.mubr.bf16.mxu0 %v5065_v61 }
 0x13e   : > { %1643 = vmatmul.mubr.bf16.vlgmr.msra.gmra.mrb[16].mxu1 %v5495_v29  ;;  %1716 = vmatmul.mubr.bf16.vlgmr.msra.gmra.mrb[32].mxu0 %v5495_v29 }
 0x13f   : > { %2055 = vmatpush1.bf16.msra.mxu1 %v4326_v36  ;;  %2128 = vmatpush1.bf16.msra.mxu0 %v4328_v3  ;;  %v4361_v36 = vcombine.high %v2285_v59, %v2287_v62  ;;  %v2288_v3 = vld [vmem:[%s6476_s5 + $0xb0] sm:$0xff] }
 0x140   : > { %2056 = vmatprep.subr.bf16.mxu1 %v4331_v4  ;;  %2129 = vmatprep.subr.bf16.mxu0 %v4333_v5  ;;  %v2290_v4 = vld [vmem:[%s6476_s5 + $0xf0] sm:$0xff]  ;;  %v2289_v5 = vld [vmem:[%s6476_s5 + $0xb8] sm:$0xff] }
 0x141   : > { %1652 = vmatprep.mubr.bf16.mxu1 %v5065_v61  ;;  %1725 = vmatprep.mubr.bf16.mxu0 %v5065_v61  ;;  %v4363_v9 = vcombine.high %v2288_v3, %v2290_v4  ;;  %v4362_v15 = vcombine.low %v2288_v3, %v2290_v4  ;;  %v4364_v12 = vcombine.low %v2289_v5, %v2291_v6  ;;  %v4926_v3 = vld [vmem:[%s6478_s7 + $0xc0] sm:$0xff]  }
 0x142   : > { %v4927_v4 = vld [vmem:[%s6478_s7] sm:$0xff]  }
 0x143   : > { %2057 = vmatpush1.bf16.msra.mxu1 %v4330_v10  ;;  %2130 = vmatpush1.bf16.msra.mxu0 %v4332_v11  ;;  %v4365_v10 = vcombine.high %v2289_v5, %v2291_v6  ;;  %v2292_v11 = vld [vmem:[%s6476_s5 + $0x130] sm:$0xff]  ;;  %v4929_v5 = vld [vmem:[%s6478_s7 + $0x48] sm:$0xff]  }
 0x144   : > { %2058 = vmatprep.subr.bf16.mxu1 %v4335_v13  ;;  %2131 = vmatprep.subr.bf16.mxu0 %v4337_v46  ;;  %v2294_v13 = vld [vmem:[%s6476_s5 + $0x170] sm:$0xff]  ;;  %v2293_v46 = vld [vmem:[%s6476_s5 + $0x138] sm:$0xff]  ;;  %v4930_v6 = vld [vmem:[%s6478_s7 + $0xc8] sm:$0xff]  }
 0x145   : > { %v4367_v2 = vcombine.high %v2292_v11, %v2294_v13  ;;  %v4366_v18 = vcombine.low %v2292_v11, %v2294_v13  ;;  %v4368_v25 = vcombine.low %v2293_v46, %v2295_v14  ;;  %v4936_v11 = vld [vmem:[%s6478_s7 + $0x90] sm:$0xff]   ;;  %v4937_v13 = vld [vmem:[%s6478_s7 + $0x58] sm:$0xff]  }
 0x146   : > { %1653 = vmatmul.mubr.bf16.gmra.mrb[20].mxu1 %v5539_v54  ;;  %1726 = vmatmul.mubr.bf16.gmra.mrb[36].mxu0 %v5539_v54 }
 0x147   : > { %2059 = vmatpush1.bf16.msra.mxu1 %v4334_v17  ;;  %2132 = vmatpush1.bf16.msra.mxu0 %v4336_v19  ;;  %v4369_v17 = vcombine.high %v2293_v46, %v2295_v14  ;;  %v2296_v19 = vld [vmem:[%s6476_s5 + $0x1b0] sm:$0xff]  ;;  %v4938_v46 = vld [vmem:[%s6478_s7 + $0xd8] sm:$0xff]  }
 0x148   : > { %2060 = vmatprep.subr.bf16.mxu1 %v4339_v21  ;;  %2133 = vmatprep.subr.bf16.mxu0 %v4341_v22  ;;  %v2298_v21 = vld [vmem:[%s6476_s5 + $0x1f0] sm:$0xff]  ;;  %v2297_v22 = vld [vmem:[%s6476_s5 + $0x1b8] sm:$0xff] }
 0x149   : > { %1662 = vmatprep.mubr.bf16.mxu1 %v5065_v61  ;;  %1735 = vmatprep.mubr.bf16.mxu0 %v5065_v61  ;;  %v4371_v26 = vcombine.high %v2296_v19, %v2298_v21  ;;  %v4370_v33 = vcombine.low %v2296_v19, %v2298_v21  ;;  %v4372_v34 = vcombine.low %v2297_v22, %v2299_v23  ;;  %v4939_v14 = vld [vmem:[%s6478_s7 + $0x18] sm:$0xff]   ;;  %v4946_v19 = vld [vmem:[%s6478_s7 + $0xe8] sm:$0xff]  }
 0x14a   : > { %v4947_v21 = vld [vmem:[%s6478_s7 + $0x28] sm:$0xff]  }
 0x14b   : > { %2061 = vmatpush1.bf16.msra.mxu1 %v4338_v20  ;;  %2134 = vmatpush1.bf16.msra.mxu0 %v4340_v27  ;;  %v4373_v20 = vcombine.high %v2297_v22, %v2299_v23  ;;  %v2300_v27 = vld [vmem:[%s6476_s5 + $0x230] sm:$0xff] }
 0x14c   : > { %2062 = vmatprep.subr.bf16.mxu1 %v4343_v28  ;;  %2135 = vmatprep.subr.bf16.mxu0 %v4345_v31  ;;  %v2302_v28 = vld [vmem:[%s6476_s5 + $0x270] sm:$0xff]  ;;  %v2301_v31 = vld [vmem:[%s6476_s5 + $0x238] sm:$0xff] }
 0x14d   : > { %v4375_v35 = vcombine.high %v2300_v27, %v2302_v28  ;;  %v4374_v41 = vcombine.low %v2300_v27, %v2302_v28  ;;  %v4376_v43 = vcombine.low %v2301_v31, %v2303_v32  ;;  %v4949_v22 = vld [vmem:[%s6478_s7 + $0x70] sm:$0xff]   ;;  %v4955_v27 = vld [vmem:[%s6478_s7 + $0x38] sm:$0xff]  }
 0x14e   : > { %1663 = vmatmul.mubr.bf16.gmra.mrb[24].mxu1 %v5595_v37  ;;  %1736 = vmatmul.mubr.bf16.gmra.mrb[40].mxu0 %v5595_v37  ;;  %v4950_v23 = vld [vmem:[%s6478_s7 + $0xf0] sm:$0xff]   ;;  %v4956_v28 = vld [vmem:[%s6478_s7 + $0xb8] sm:$0xff]  }
 0x14f   : > { %2063 = vmatpush1.bf16.msra.mxu1 %v4342_v48  ;;  %2136 = vmatpush1.bf16.msra.mxu0 %v4344_v38  ;;  %v4377_v48 = vcombine.high %v2301_v31, %v2303_v32  ;;  %v2304_v38 = vld [vmem:[%s6476_s5 + $0x2b0] sm:$0xff]  ;;  %v4957_v31 = vld [vmem:[%s6478_s7 + $0x140] sm:$0xff]  }
 0x150   : > { %2064 = vmatprep.subr.bf16.mxu1 %v4347_v39  ;;  %2137 = vmatprep.subr.bf16.mxu0 %v4349_v30  ;;  %v2306_v39 = vld [vmem:[%s6476_s5 + $0x2f0] sm:$0xff]  ;;  %v2305_v30 = vld [vmem:[%s6476_s5 + $0x2b8] sm:$0xff]  ;;  %v4958_v32 = vld [vmem:[%s6478_s7 + $0x1c0] sm:$0xff]  }
 0x151   : > { %1672 = vmatprep.mubr.bf16.mxu1 %v5065_v61  ;;  %1745 = vmatprep.mubr.bf16.mxu0 %v5065_v61  ;;  %v4379_v44 = vcombine.high %v2304_v38, %v2306_v39  ;;  %v4378_v52 = vcombine.low %v2304_v38, %v2306_v39  ;;  %v4380_v0 = vcombine.low %v2305_v30, %v2307_v40  ;;  %v984_v38 = vld [vmem:[%s6477_s6] sm:$0xf] }
 0x153   : > { %2065 = vmatpush1.bf16.msra.mxu1 %v4346_v45  ;;  %2138 = vmatpush1.bf16.msra.mxu0 %v4348_v47  ;;  %v4381_v45 = vcombine.high %v2305_v30, %v2307_v40  ;;  %v2308_v47 = vld [vmem:[%s6476_s5 + $0x330] sm:$0xff] }
 0x154   : > { %2066 = vmatprep.subr.bf16.mxu1 %v4351_v49  ;;  %2139 = vmatprep.subr.bf16.mxu0 %v4353_v50  ;;  %v2310_v49 = vld [vmem:[%s6476_s5 + $0x370] sm:$0xff]  ;;  %v2309_v50 = vld [vmem:[%s6476_s5 + $0x338] sm:$0xff] }
 0x155   : > { %v4383_v53 = vcombine.high %v2308_v47, %v2310_v49  ;;  %v4382_v58 = vcombine.low %v2308_v47, %v2310_v49  ;;  %v4384_v59 = vcombine.low %v2309_v50, %v2311_v51 }
 0x156   : > { %1673 = vmatmul.mubr.bf16.gmra.mrb[28].mxu1 %v5603_v60  ;;  %1746 = vmatmul.mubr.bf16.gmra.mrb[44].mxu0 %v5603_v60 }
 0x157   : > { %2067 = vmatpush1.bf16.msra.mxu1 %v4350_v55  ;;  %2140 = vmatpush1.bf16.msra.mxu0 %v4352_v42  ;;  %v4385_v55 = vcombine.high %v2309_v50, %v2311_v51  ;;  %v2312_v42 = vld [vmem:[%s6476_s5 + $0x3b0] sm:$0xff] }
 0x158   : > { %2068 = vmatprep.subr.bf16.mxu1 %v4355_v24  ;;  %2141 = vmatprep.subr.bf16.mxu0 %v4357_v56  ;;  %v2314_v24 = vld [vmem:[%s6476_s5 + $0x3f0] sm:$0xff]  ;;  %v2313_v56 = vld [vmem:[%s6476_s5 + $0x3b8] sm:$0xff] }
 0x159   : > { %2086 = vmatprep.mubr.bf16.mxu1 %v5065_v61  ;;  %2159 = vmatprep.mubr.bf16.mxu0 %v5065_v61  ;;  %v4387_v62 = vcombine.high %v2312_v42, %v2314_v24 }
 0x15b   : > { %2069 = vmatpush1.bf16.msra.mxu1 %v4354_v16  ;;  %2142 = vmatpush1.bf16.msra.mxu0 %v4356_v63  ;;  %v4389_v16 = vcombine.high %v2313_v56, %v2315_v57  ;;  %v4386_v63 = vcombine.low %v2312_v42, %v2314_v24 }
 0x15c   : > { %2498 = vmatprep.subr.bf16.mxu1 %v4359_v1  ;;  %2571 = vmatprep.subr.bf16.mxu0 %v4361_v36  ;;  %v4388_v1 = vcombine.low %v2313_v56, %v2315_v57  ;;  %v4925_v36 = vld [vmem:[%s6478_s7 + $0x40] sm:$0xff]  }
 0x15e   : > { %2087 = vmatmul.mubr.bf16.vlgmr.msra.gmra.mrb[32].mxu1 %v5495_v29  ;;  %2160 = vmatmul.mubr.bf16.vlgmr.msra.gmra.mrb[48].mxu0 %v5495_v29 }
 0x15f   : > { %2499 = vmatpush1.bf16.msra.mxu1 %v4358_v7  ;;  %2572 = vmatpush1.bf16.msra.mxu0 %v4360_v8  ;;  %v4931_v7 = vld [vmem:[%s6478_s7 + $0x8] sm:$0xff]  }
 0x160   : > { %2500 = vmatprep.subr.bf16.mxu1 %v4363_v9  ;;  %2573 = vmatprep.subr.bf16.mxu0 %v4365_v10  ;;  %v4932_v8 = vld [vmem:[%s6478_s7 + $0x88] sm:$0xff]   ;;  %v4934_v9 = vld [vmem:[%s6478_s7 + $0xd0] sm:$0xff]  }
 0x161   : > { %2096 = vmatprep.mubr.bf16.mxu1 %v5065_v61  ;;  %2169 = vmatprep.mubr.bf16.mxu0 %v5065_v61  ;;  %v4935_v10 = vld [vmem:[%s6478_s7 + $0x10] sm:$0xff]  }
 0x163   : > { %2501 = vmatpush1.bf16.msra.mxu1 %v4362_v15  ;;  %2574 = vmatpush1.bf16.msra.mxu0 %v4364_v12  ;;  %v4941_v15 = vld [vmem:[%s6478_s7 + $0x60] sm:$0xff]  }
 0x164   : > { %2502 = vmatprep.subr.bf16.mxu1 %v4367_v2  ;;  %2575 = vmatprep.subr.bf16.mxu0 %v4369_v17  ;;  %v4943_v12 = vld [vmem:[%s6478_s7 + $0x20] sm:$0xff]   ;;  %v4945_v17 = vld [vmem:[%s6478_s7 + $0x68] sm:$0xff]  }
 0x165   : > { %v4944_v2 = vld [vmem:[%s6478_s7 + $0xa0] sm:$0xff]  }
 0x166   : > { %2097 = vmatmul.mubr.bf16.gmra.mrb[36].mxu1 %v5539_v54  ;;  %2170 = vmatmul.mubr.bf16.gmra.mrb[52].mxu0 %v5539_v54 }
 0x167   : > { %2503 = vmatpush1.bf16.msra.mxu1 %v4366_v18  ;;  %2576 = vmatpush1.bf16.msra.mxu0 %v4368_v25  ;;  %v4951_v18 = vld [vmem:[%s6478_s7 + $0x30] sm:$0xff]  }
 0x168   : > { %2504 = vmatprep.subr.bf16.mxu1 %v4371_v26  ;;  %2577 = vmatprep.subr.bf16.mxu0 %v4373_v20  ;;  %v4952_v25 = vld [vmem:[%s6478_s7 + $0xb0] sm:$0xff]   ;;  %v4953_v26 = vld [vmem:[%s6478_s7 + $0x78] sm:$0xff]  }
 0x169   : > { %2106 = vmatprep.mubr.bf16.mxu1 %v5065_v61  ;;  %2179 = vmatprep.mubr.bf16.mxu0 %v5065_v61  ;;  %v4954_v20 = vld [vmem:[%s6478_s7 + $0xf8] sm:$0xff]  }
 0x16b   : > { %2505 = vmatpush1.bf16.msra.mxu1 %v4370_v33  ;;  %2578 = vmatpush1.bf16.msra.mxu0 %v4372_v34  ;;  %v986_v33 = vlaneseq }
 0x16c   : > { %2506 = vmatprep.subr.bf16.mxu1 %v4375_v35  ;;  %2579 = vmatprep.subr.bf16.mxu0 %v4377_v48 }
 0x16d   : > { %v987_v34 = vshrl.u32 %v986_v33, 7 }
 0x16e   : > { %2107 = vmatmul.mubr.bf16.gmra.mrb[40].mxu1 %v5595_v37  ;;  %2180 = vmatmul.mubr.bf16.gmra.mrb[56].mxu0 %v5595_v37 }
 0x16f   : > { %2507 = vmatpush1.bf16.msra.mxu1 %v4374_v41  ;;  %2580 = vmatpush1.bf16.msra.mxu0 %v4376_v43  ;;  %v5937_v35 = vsub.s32 0, %v987_v34  ;;  %v5939_v48 = vsub.s32 2, %v987_v34  ;;  %v5944_v39 = vsub.s32 1, %v987_v34  ;;  %v5946_v30 = vsub.s32 3, %v987_v34 }
 0x170   : > { %2508 = vmatprep.subr.bf16.mxu1 %v4379_v44  ;;  %2581 = vmatprep.subr.bf16.mxu0 %v4381_v45 }
 0x171   : > { %2116 = vmatprep.mubr.bf16.mxu1 %v5065_v61  ;;  %2189 = vmatprep.mubr.bf16.mxu0 %v5065_v61  ;;  %v5949_v40 = vrot.slane %v984_v38, %v5937_v35  ;;  %v5952_v41 = vrot.slane %v984_v38, %v5939_v48  ;;  %v5955_v43 = vrot.slane %v984_v38, %v5944_v39 }
 0x172   : > { %v5958_v44 = vrot.slane %v984_v38, %v5946_v30 }
 0x173   : > { %2509 = vmatpush1.bf16.msra.mxu1 %v4378_v52  ;;  %2582 = vmatpush1.bf16.msra.mxu0 %v4380_v0 }
 0x174   : > { %2510 = vmatprep.subr.bf16.mxu1 %v4383_v53  ;;  %2583 = vmatprep.subr.bf16.mxu0 %v4385_v55 }
 0x176   : > { %2117 = vmatmul.mubr.bf16.gmra.mrb[44].mxu1 %v5603_v60  ;;  %2190 = vmatmul.mubr.bf16.gmra.mrb[60].mxu0 %v5603_v60 }
 0x177   : > { %2511 = vmatpush1.bf16.msra.mxu1 %v4382_v58  ;;  %2584 = vmatpush1.bf16.msra.mxu0 %v4384_v59 }
 0x178   : > { %2512 = vmatprep.subr.bf16.mxu1 %v4387_v62  ;;  %2585 = vmatprep.subr.bf16.mxu0 %v4389_v16 }
 0x179   : > { %2530 = vmatprep.mubr.bf16.mxu1 %v5065_v61  ;;  %2603 = vmatprep.mubr.bf16.mxu0 %v5065_v61 }
 0x17b   : > { %2513 = vmatpush1.bf16.msra.mxu1 %v4386_v63  ;;  %2586 = vmatpush1.bf16.msra.mxu0 %v4388_v1 }
 0x17c   : > { %4719 = vmatprep.subr.bf16.mxu1 %v4925_v36  ;;  %4741 = vmatprep.subr.bf16.mxu0 %v4926_v3 }
 0x17e   : > { %2531 = vmatmul.mubr.bf16.vlgmr.msra.gmra.mrb[48].mxu1 %v5495_v29  ;;  %2604 = vmatmul.mubr.bf16.vlgmr.msra.gmra.mrb[64].mxu0 %v5495_v29  ;;  %v4928_v29 = vld [vmem:[%s6478_s7 + $0x80] sm:$0xff]  }
 0x17f   : > { %2540 = vmatprep.mubr.bf16.mxu1 %v5065_v61  ;;  %2613 = vmatprep.mubr.bf16.mxu0 %v5065_v61 }
 0x180   : > { %4720 = vmatpush3.bf16.msra.mxu1 %v4927_v4  ;;  %4742 = vmatpush3.bf16.msra.mxu0 %v4928_v29 }
 0x181   : > { %4721 = vmatprep.subr.bf16.mxu1 %v4929_v5  ;;  %4743 = vmatprep.subr.bf16.mxu0 %v4930_v6 }
 0x184   : > { %4722 = vmatpush3.bf16.msra.mxu1 %v4931_v7  ;;  %4744 = vmatpush3.bf16.msra.mxu0 %v4932_v8 }
 0x185   : > { %4745 = vmatprep.subr.bf16.mxu0 %v4934_v9 }
 0x186   : > { %2541 = vmatmul.mubr.bf16.gmra.mrb[52].mxu1 %v5539_v54  ;;  %2614 = vmatmul.mubr.bf16.gmra.mrb[68].mxu0 %v5539_v54  ;;  %v4933_v54 = vld [vmem:[%s6478_s7 + $0x50] sm:$0xff]  }
 0x187   : > { %2550 = vmatprep.mubr.bf16.mxu1 %v5065_v61  ;;  %2623 = vmatprep.mubr.bf16.mxu0 %v5065_v61 }
 0x188   : > { %4723 = vmatprep.subr.bf16.mxu1 %v4933_v54  ;;  %4746 = vmatpush3.bf16.msra.mxu0 %v4936_v11 }
 0x189   : > { %4724 = vmatpush3.bf16.msra.mxu1 %v4935_v10  ;;  %4747 = vmatprep.subr.bf16.mxu0 %v4938_v46 }
 0x18a   : > { %4725 = vmatprep.subr.bf16.mxu1 %v4937_v13 }
 0x18d   : > { %4726 = vmatpush3.bf16.msra.mxu1 %v4939_v14 }
 0x18e   : > { %2551 = vmatmul.mubr.bf16.gmra.mrb[56].mxu1 %v5595_v37  ;;  %2624 = vmatmul.mubr.bf16.gmra.mrb[72].mxu0 %v5595_v37  ;;  %v4940_v37 = vld [vmem:[%s6478_s7 + $0x98] sm:$0xff]  }
 0x18f   : > { %2560 = vmatprep.mubr.bf16.mxu1 %v5065_v61  ;;  %2633 = vmatprep.mubr.bf16.mxu0 %v5065_v61  ;;  %v4942_v61 = vld [vmem:[%s6478_s7 + $0xe0] sm:$0xff]  }
 0x190   : > { %4748 = vmatpush3.bf16.msra.mxu0 %v4940_v37  ;;  %4727 = vmatprep.subr.bf16.mxu1 %v4941_v15 }
 0x191   : > { %4749 = vmatprep.subr.bf16.mxu0 %v4942_v61  ;;  %4728 = vmatpush3.bf16.msra.mxu1 %v4943_v12 }
 0x192   : > { %4729 = vmatprep.subr.bf16.mxu1 %v4945_v17 }
 0x194   : > { %4750 = vmatpush3.bf16.msra.mxu0 %v4944_v2 }
 0x195   : > { %4751 = vmatprep.subr.bf16.mxu0 %v4946_v19  ;;  %4730 = vmatpush3.bf16.msra.mxu1 %v4947_v21 }
 0x196   : > { %2561 = vmatmul.mubr.bf16.gmra.mrb[60].mxu1 %v5603_v60  ;;  %2634 = vmatmul.mubr.bf16.gmra.mrb[76].mxu0 %v5603_v60  ;;  %v4948_v60 = vld [vmem:[%s6478_s7 + $0xa8] sm:$0xff]  }
 0x197   : > { %4731 = vmatprep.subr.bf16.mxu1 %v4949_v22 }
 0x198   : > { %4752 = vmatpush3.bf16.msra.mxu0 %v4948_v60 }
 0x199   : > { %4753 = vmatprep.subr.bf16.mxu0 %v4950_v23  ;;  %4732 = vmatpush3.bf16.msra.mxu1 %v4951_v18 }
 0x19a   : > { %4733 = vmatprep.subr.bf16.mxu1 %v4953_v26 }
 0x19c   : > { %4754 = vmatpush3.bf16.msra.mxu0 %v4952_v25 }
 0x19d   : > { %4755 = vmatprep.subr.bf16.mxu0 %v4954_v20  ;;  %4734 = vmatpush3.bf16.msra.mxu1 %v4955_v27 }
 0x19e   : > { %4763 = vmatprep.subr.bf16.mxu1 %v4957_v31 }
 0x1a0   : > { %4756 = vmatpush3.bf16.msra.mxu0 %v4956_v28 }
 0x1a1   : > { %4785 = vmatprep.subr.bf16.mxu0 %v4958_v32 }
 0x1e0   : > { %v1200_v45 = vpop.f32.mrb[0].mxu1  ;;  %v1273_v47 = vpop.f32.mrb[16].mxu0 }
 0x1e1   : > { %v1201_v49 = vadd.f32 %v1200_v45, %v5949_v40  ;;  %v1274_v50 = vadd.f32 %v1273_v47, %v5952_v41  ;;  %v1202_v51 = vpop.f32.mrb[1].mxu1  ;;  %v1275_v52 = vpop.f32.mrb[17].mxu0 }
 0x1e2   : > { %v1203_v0 = vadd.f32 %v1202_v51, %v5955_v43  ;;  %v1276_v53 = vadd.f32 %v1275_v52, %v5958_v44  ;;  %v1204_v55 = vpop.f32.mrb[2].mxu1  ;;  %v1277_v42 = vpop.f32.mrb[18].mxu0 }
 0x1e3   : > { %v1205_v24 = vadd.f32 %v1204_v55, %v5949_v40  ;;  %v1278_v56 = vadd.f32 %v1277_v42, %v5952_v41  ;;  %v1206_v57 = vpop.f32.mrb[3].mxu1  ;;  %v1279_v58 = vpop.f32.mrb[19].mxu0  ;;  %v1312_v16 = vmax.f32 %v1201_v49, 0.0  ;;  %v1314_v63 = vmax.f32 %v1274_v50, 0.0 }
 0x1e4   : > { %v1207_v59 = vadd.f32 %v1206_v57, %v5955_v43  ;;  %v1280_v62 = vadd.f32 %v1279_v58, %v5958_v44  ;;  %v1313_v3 = vmax.f32 %v1203_v0, 0.0  ;;  %v1315_v4 = vmax.f32 %v1276_v53, 0.0 }
 0x1e5   : > { %v1316_v1 = vmax.f32 %v1205_v24, 0.0  ;;  %v1318_v36 = vmax.f32 %v1278_v56, 0.0 }
 0x1e6   : > { %v1317_v29 = vmax.f32 %v1207_v59, 0.0  ;;  %v1319_v5 = vmax.f32 %v1280_v62, 0.0 }
 0x1e7   : > { %v1344_v6 = vadd.f32 %v1316_v1, %v1312_v16  ;;  %v1370_v7 = vadd.f32 %v1318_v36, %v1314_v63 }
 0x1e8   : > { %v1357_v8 = vadd.f32 %v1317_v29, %v1313_v3  ;;  %v1383_v54 = vadd.f32 %v1319_v5, %v1315_v4 }
 0x1ec   : > { %v1210_v9 = vpop.f32.mrb[4].mxu1  ;;  %v1283_v10 = vpop.f32.mrb[20].mxu0 }
 0x1ed   : > { %v1211_v11 = vadd.f32 %v1210_v9, %v5949_v40  ;;  %v1284_v13 = vadd.f32 %v1283_v10, %v5952_v41  ;;  %v1212_v46 = vpop.f32.mrb[5].mxu1  ;;  %v1285_v14 = vpop.f32.mrb[21].mxu0 }
 0x1ee   : > { %v1213_v37 = vadd.f32 %v1212_v46, %v5955_v43  ;;  %v1286_v15 = vadd.f32 %v1285_v14, %v5958_v44  ;;  %v1214_v61 = vpop.f32.mrb[6].mxu1  ;;  %v1287_v12 = vpop.f32.mrb[22].mxu0 }
 0x1ef   : > { %v1320_v2 = vmax.f32 %v1211_v11, 0.0  ;;  %v1322_v17 = vmax.f32 %v1284_v13, 0.0  ;;  %v1215_v19 = vadd.f32 %v1214_v61, %v5949_v40  ;;  %v1288_v21 = vadd.f32 %v1287_v12, %v5952_v41  ;;  %v1216_v60 = vpop.f32.mrb[7].mxu1  ;;  %v1289_v22 = vpop.f32.mrb[23].mxu0  ;;  %v1428_v61 = vld [vmem:[%s6477_s6 + $0x4] sm:$0xf] }
 0x1f0   : > { %v1321_v23 = vmax.f32 %v1213_v37, 0.0  ;;  %v1323_v18 = vmax.f32 %v1286_v15, 0.0  ;;  %v1217_v25 = vadd.f32 %v1216_v60, %v5955_v43  ;;  %v1290_v26 = vadd.f32 %v1289_v22, %v5958_v44 }
 0x1f1   : > { %v1345_v20 = vadd.f32 %v1344_v6, %v1320_v2  ;;  %v1371_v27 = vadd.f32 %v1370_v7, %v1322_v17  ;;  %v1324_v28 = vmax.f32 %v1215_v19, 0.0  ;;  %v1326_v31 = vmax.f32 %v1288_v21, 0.0 }
 0x1f2   : > { %v1358_v32 = vadd.f32 %v1357_v8, %v1321_v23  ;;  %v1384_v33 = vadd.f32 %v1383_v54, %v1323_v18  ;;  %v1325_v34 = vmax.f32 %v1217_v25, 0.0  ;;  %v1327_v38 = vmax.f32 %v1290_v26, 0.0 }
 0x1f3   : > { %v1346_v45 = vadd.f32 %v1345_v20, %v1324_v28  ;;  %v1372_v47 = vadd.f32 %v1371_v27, %v1326_v31  ;;  %v5990_v22 = vrot.slane %v1428_v61, %v5937_v35  ;;  %v5993_v23 = vrot.slane %v1428_v61, %v5939_v48 }
 0x1f4   : > { %v1359_v49 = vadd.f32 %v1358_v32, %v1325_v34  ;;  %v1385_v50 = vadd.f32 %v1384_v33, %v1327_v38  ;;  %v5998_v27 = vrot.slane %v1428_v61, %v5944_v39  ;;  %v6001_v28 = vrot.slane %v1428_v61, %v5946_v30 }
 0x1fb   : > { %v1220_v51 = vpop.f32.mrb[8].mxu1  ;;  %v1293_v52 = vpop.f32.mrb[24].mxu0 }
 0x1fc   : > { %v1221_v0 = vadd.f32 %v1220_v51, %v5949_v40  ;;  %v1294_v53 = vadd.f32 %v1293_v52, %v5952_v41  ;;  %v1222_v55 = vpop.f32.mrb[9].mxu1  ;;  %v1295_v42 = vpop.f32.mrb[25].mxu0 }
 0x1fd   : > { %v1223_v24 = vadd.f32 %v1222_v55, %v5955_v43  ;;  %v1296_v56 = vadd.f32 %v1295_v42, %v5958_v44  ;;  %v1224_v57 = vpop.f32.mrb[10].mxu1  ;;  %v1297_v58 = vpop.f32.mrb[26].mxu0  ;;  %v6010_v42 = vld [vmem:[%s6477_s6 + $0x8] sm:$0xf] }
 0x1fe   : > { %v1328_v59 = vmax.f32 %v1221_v0, 0.0  ;;  %v1330_v62 = vmax.f32 %v1294_v53, 0.0  ;;  %v1225_v16 = vadd.f32 %v1224_v57, %v5949_v40  ;;  %v1298_v63 = vadd.f32 %v1297_v58, %v5952_v41  ;;  %v1226_v1 = vpop.f32.mrb[11].mxu1  ;;  %v1299_v36 = vpop.f32.mrb[27].mxu0 }
 0x1ff   : > { %v1329_v3 = vmax.f32 %v1223_v24, 0.0  ;;  %v1331_v4 = vmax.f32 %v1296_v56, 0.0  ;;  %v1227_v29 = vadd.f32 %v1226_v1, %v5955_v43  ;;  %v1300_v5 = vadd.f32 %v1299_v36, %v5958_v44 }
 0x200   : > { %v1347_v6 = vadd.f32 %v1346_v45, %v1328_v59  ;;  %v1373_v7 = vadd.f32 %v1372_v47, %v1330_v62  ;;  %v1332_v8 = vmax.f32 %v1225_v16, 0.0  ;;  %v1334_v54 = vmax.f32 %v1298_v63, 0.0 }
 0x201   : > { %v1360_v9 = vadd.f32 %v1359_v49, %v1329_v3  ;;  %v1386_v10 = vadd.f32 %v1385_v50, %v1331_v4  ;;  %v1333_v11 = vmax.f32 %v1227_v29, 0.0  ;;  %v1335_v13 = vmax.f32 %v1300_v5, 0.0 }
 0x202   : > { %v1348_v46 = vadd.f32 %v1347_v6, %v1332_v8  ;;  %v1374_v14 = vadd.f32 %v1373_v7, %v1334_v54 }
 0x203   : > { %v1361_v37 = vadd.f32 %v1360_v9, %v1333_v11  ;;  %v1387_v15 = vadd.f32 %v1386_v10, %v1335_v13 }
 0x209   : > { %v1230_v12 = vpop.f32.mrb[12].mxu1  ;;  %v1303_v2 = vpop.f32.mrb[28].mxu0 }
 0x20a   : > { %v1231_v17 = vadd.f32 %v1230_v12, %v5949_v40  ;;  %v1304_v19 = vadd.f32 %v1303_v2, %v5952_v41  ;;  %v1232_v21 = vpop.f32.mrb[13].mxu1  ;;  %v1305_v60 = vpop.f32.mrb[29].mxu0 }
 0x20b   : > { %v1233_v18 = vadd.f32 %v1232_v21, %v5955_v43  ;;  %v1306_v25 = vadd.f32 %v1305_v60, %v5958_v44  ;;  %v1234_v26 = vpop.f32.mrb[14].mxu1  ;;  %v1307_v20 = vpop.f32.mrb[30].mxu0 }
 0x20c   : > { %v1336_v31 = vmax.f32 %v1231_v17, 0.0  ;;  %v1338_v32 = vmax.f32 %v1304_v19, 0.0  ;;  %v1235_v33 = vadd.f32 %v1234_v26, %v5949_v40  ;;  %v1308_v34 = vadd.f32 %v1307_v20, %v5952_v41  ;;  %v1236_v38 = vpop.f32.mrb[15].mxu1  ;;  %v1309_v45 = vpop.f32.mrb[31].mxu0 }
 0x20d   : > { %v1337_v47 = vmax.f32 %v1233_v18, 0.0  ;;  %v1339_v49 = vmax.f32 %v1306_v25, 0.0  ;;  %v1237_v50 = vadd.f32 %v1236_v38, %v5955_v43  ;;  %v1310_v51 = vadd.f32 %v1309_v45, %v5958_v44 }
 0x20e   : > { %v1349_v52 = vadd.f32 %v1348_v46, %v1336_v31  ;;  %v1375_v0 = vadd.f32 %v1374_v14, %v1338_v32  ;;  %v1340_v53 = vmax.f32 %v1235_v33, 0.0  ;;  %v1342_v55 = vmax.f32 %v1308_v34, 0.0 }
 0x20f   : > { %v1362_v40 = vadd.f32 %v1361_v37, %v1337_v47  ;;  %v1388_v24 = vadd.f32 %v1387_v15, %v1339_v49  ;;  %v1341_v41 = vmax.f32 %v1237_v50, 0.0  ;;  %v1343_v56 = vmax.f32 %v1310_v51, 0.0 }
 0x210   : > { %v1350_v57 = vadd.f32 %v1349_v52, %v1340_v53  ;;  %v1376_v58 = vadd.f32 %v1375_v0, %v1342_v55  ;;  %v6014_v44 = vrot.slane %v6010_v42, %v5937_v35  ;;  %v6022_v14 = vrot.slane %v6010_v42, %v5939_v48 }
 0x211   : > { %v1363_v59 = vadd.f32 %v1362_v40, %v1341_v41  ;;  %v1389_v62 = vadd.f32 %v1388_v24, %v1343_v56  ;;  %v1644_v43 = vpop.f32.mrb[16].mxu1  ;;  %v1717_v16 = vpop.f32.mrb[32].mxu0  ;;  %v6026_v37 = vrot.slane %v6010_v42, %v5944_v39 }
 0x212   : > { %v1351_v63 = vrot.slane %v1350_v57, 4  ;;  %v1377_v1 = vrot.slane %v1376_v58, 4  ;;  %v1645_v36 = vadd.f32 %v1644_v43, %v5990_v22  ;;  %v1718_v3 = vadd.f32 %v1717_v16, %v5993_v23  ;;  %v1646_v4 = vpop.f32.mrb[17].mxu1  ;;  %v1719_v29 = vpop.f32.mrb[33].mxu0 }
 0x213   : > { %v1364_v5 = vrot.slane %v1363_v59, 4  ;;  %v1390_v6 = vrot.slane %v1389_v62, 4  ;;  %v1647_v7 = vadd.f32 %v1646_v4, %v5998_v27  ;;  %v1720_v8 = vadd.f32 %v1719_v29, %v6001_v28  ;;  %v1648_v54 = vpop.f32.mrb[18].mxu1  ;;  %v1721_v9 = vpop.f32.mrb[34].mxu0 }
 0x214   : > { %v1352_v10 = vadd.f32 %v1351_v63, %v1350_v57  ;;  %v1378_v11 = vadd.f32 %v1377_v1, %v1376_v58  ;;  %v1650_v13 = vpop.f32.mrb[19].mxu1  ;;  %v1723_v46 = vpop.f32.mrb[35].mxu0  ;;  %v1756_v12 = vmax.f32 %v1645_v36, 0.0  ;;  %v1758_v2 = vmax.f32 %v1718_v3, 0.0 }
 0x215   : > { %v1365_v15 = vadd.f32 %v1364_v5, %v1363_v59  ;;  %v1391_v61 = vadd.f32 %v1390_v6, %v1389_v62  ;;  %v1649_v21 = vadd.f32 %v1648_v54, %v5990_v22  ;;  %v1722_v60 = vadd.f32 %v1721_v9, %v5993_v23 }
 0x216   : > { %v1353_v17 = vrot.slane %v1352_v10, 2  ;;  %v1379_v19 = vrot.slane %v1378_v11, 2  ;;  %v1757_v18 = vmax.f32 %v1647_v7, 0.0  ;;  %v1759_v25 = vmax.f32 %v1720_v8, 0.0 }
 0x217   : > { %v1651_v26 = vadd.f32 %v1650_v13, %v5998_v27  ;;  %v1724_v20 = vadd.f32 %v1723_v46, %v6001_v28  ;;  %v1760_v33 = vmax.f32 %v1649_v21, 0.0  ;;  %v1762_v34 = vmax.f32 %v1722_v60, 0.0 }
 0x218   : > { %v1354_v31 = vadd.f32 %v1353_v17, %v1352_v10  ;;  %v1380_v32 = vadd.f32 %v1379_v19, %v1378_v11  ;;  %v1366_v38 = vrot.slane %v1365_v15, 2  ;;  %v1392_v45 = vrot.slane %v1391_v61, 2 }
 0x219   : > { %v1761_v47 = vmax.f32 %v1651_v26, 0.0  ;;  %v1763_v49 = vmax.f32 %v1724_v20, 0.0  ;;  %v1654_v50 = vpop.f32.mrb[20].mxu1  ;;  %v1727_v51 = vpop.f32.mrb[36].mxu0  ;;  %v1788_v53 = vadd.f32 %v1760_v33, %v1756_v12  ;;  %v1814_v55 = vadd.f32 %v1762_v34, %v1758_v2 }
 0x21a   : > { %v1355_v52 = vrot.slane %v1354_v31, 1  ;;  %v1381_v0 = vrot.slane %v1380_v32, 1  ;;  %v1656_v40 = vpop.f32.mrb[21].mxu1  ;;  %v1729_v24 = vpop.f32.mrb[37].mxu0  ;;  %v1655_v57 = vadd.f32 %v1654_v50, %v5990_v22  ;;  %v1728_v58 = vadd.f32 %v1727_v51, %v5993_v23 }
 0x21b   : > { %v1801_v41 = vadd.f32 %v1761_v47, %v1757_v18  ;;  %v1827_v56 = vadd.f32 %v1763_v49, %v1759_v25  ;;  %v1658_v59 = vpop.f32.mrb[22].mxu1  ;;  %v1731_v62 = vpop.f32.mrb[38].mxu0  ;;  %v1657_v63 = vadd.f32 %v1656_v40, %v5998_v27  ;;  %v1730_v1 = vadd.f32 %v1729_v24, %v6001_v28 }
 0x21c   : > { %v1356_v43 = vadd.f32 %v1355_v52, %v1354_v31  ;;  %v1382_v16 = vadd.f32 %v1381_v0, %v1380_v32  ;;  %v1660_v36 = vpop.f32.mrb[23].mxu1  ;;  %v1733_v3 = vpop.f32.mrb[39].mxu0  ;;  %v1764_v4 = vmax.f32 %v1655_v57, 0.0  ;;  %v1766_v29 = vmax.f32 %v1728_v58, 0.0 }
 0x21d   : > { %v1659_v5 = vadd.f32 %v1658_v59, %v5990_v22  ;;  %v1732_v6 = vadd.f32 %v1731_v62, %v5993_v23  ;;  %v1765_v7 = vmax.f32 %v1657_v63, 0.0  ;;  %v1767_v8 = vmax.f32 %v1730_v1, 0.0 }
 0x21e   : > { %v1367_v54 = vadd.f32 %v1366_v38, %v1365_v15  ;;  %v1393_v9 = vadd.f32 %v1392_v45, %v1391_v61  ;;  %v1789_v10 = vadd.f32 %v1788_v53, %v1764_v4  ;;  %v1815_v11 = vadd.f32 %v1814_v55, %v1766_v29 }
 0x21f   : > { %v1768_v13 = vmax.f32 %v1659_v5, 0.0  ;;  %v1770_v46 = vmax.f32 %v1732_v6, 0.0  ;;  %v6038_v12 = vmul.f32 0.015625, %v1356_v43  ;;  %v6040_v2 = vmul.f32 0.015625, %v1382_v16 }
 0x220   : > { %v1802_v17 = vadd.f32 %v1801_v41, %v1765_v7  ;;  %v1828_v19 = vadd.f32 %v1827_v56, %v1767_v8  ;;  %v1661_v18 = vadd.f32 %v1660_v36, %v5998_v27  ;;  %v1734_v25 = vadd.f32 %v1733_v3, %v6001_v28 }
 0x221   : > { %v1790_v21 = vadd.f32 %v1789_v10, %v1768_v13  ;;  %v1816_v60 = vadd.f32 %v1815_v11, %v1770_v46  ;;  %v1664_v26 = vpop.f32.mrb[24].mxu1  ;;  %v1737_v20 = vpop.f32.mrb[40].mxu0  ;;  %v1368_v33 = vrot.slane %v1367_v54, 1  ;;  %v1394_v34 = vrot.slane %v1393_v9, 1 }
 0x222   : > { %v1665_v15 = vadd.f32 %v1664_v26, %v5990_v22  ;;  %v1738_v61 = vadd.f32 %v1737_v20, %v5993_v23  ;;  %v1666_v31 = vpop.f32.mrb[25].mxu1  ;;  %v1739_v32 = vpop.f32.mrb[41].mxu0  ;;  %v1769_v38 = vmax.f32 %v1661_v18, 0.0  ;;  %v1771_v45 = vmax.f32 %v1734_v25, 0.0 }
 0x223   : > { %v1667_v47 = vadd.f32 %v1666_v31, %v5998_v27  ;;  %v1740_v49 = vadd.f32 %v1739_v32, %v6001_v28  ;;  %v1668_v50 = vpop.f32.mrb[26].mxu1  ;;  %v1741_v51 = vpop.f32.mrb[42].mxu0  ;;  %v1369_v36 = vadd.f32 %v1368_v33, %v1367_v54  ;;  %v1395_v3 = vadd.f32 %v1394_v34, %v1393_v9  ;;  %v4961_v33 = vld [vmem:[%s6478_s7 + $0x148] sm:$0xff]  }
 0x224   : > { %v1772_v52 = vmax.f32 %v1665_v15, 0.0  ;;  %v1774_v0 = vmax.f32 %v1738_v61, 0.0  ;;  %v1669_v53 = vadd.f32 %v1668_v50, %v5990_v22  ;;  %v1742_v55 = vadd.f32 %v1741_v51, %v5993_v23  ;;  %v1670_v40 = vpop.f32.mrb[27].mxu1  ;;  %v1743_v24 = vpop.f32.mrb[43].mxu0  ;;  %v4962_v34 = vld [vmem:[%s6478_s7 + $0x1c8] sm:$0xff]  }
 0x225   : > { %v1803_v41 = vadd.f32 %v1802_v17, %v1769_v38  ;;  %v1829_v56 = vadd.f32 %v1828_v19, %v1771_v45  ;;  %v1773_v57 = vmax.f32 %v1667_v47, 0.0  ;;  %v1775_v58 = vmax.f32 %v1740_v49, 0.0 }
 0x226   : > { %v1791_v59 = vadd.f32 %v1790_v21, %v1772_v52  ;;  %v1817_v62 = vadd.f32 %v1816_v60, %v1774_v0  ;;  %v1776_v43 = vmax.f32 %v1669_v53, 0.0  ;;  %v1778_v16 = vmax.f32 %v1742_v55, 0.0  ;;  %v2316_v53 = vld [vmem:[%s6477_s6 + $0xc] sm:$0xf] }
 0x227   : > { %v1804_v63 = vadd.f32 %v1803_v41, %v1773_v57  ;;  %v1830_v1 = vadd.f32 %v1829_v56, %v1775_v58  ;;  %v1671_v5 = vadd.f32 %v1670_v40, %v5998_v27  ;;  %v1744_v6 = vadd.f32 %v1743_v24, %v6001_v28  ;;  %v4963_v41 = vld [vmem:[%s6478_s7 + $0x108] sm:$0xff]  }
 0x228   : > { %v1792_v4 = vadd.f32 %v1791_v59, %v1776_v43  ;;  %v1818_v29 = vadd.f32 %v1817_v62, %v1778_v16  ;;  %v2744_v7 = vpack.c.bf16 %v6038_v12, %v6038_v12  ;;  %v2746_v8 = vpack.c.bf16 %v6040_v2, %v6040_v2  ;;  %v4959_v12 = vld [vmem:[%s6478_s7 + $0x100] sm:$0xff]   ;;  %v4966_v43 = vld [vmem:[%s6478_s7 + $0x1d0] sm:$0xff]  }
 0x229   : > { %v2729_v10 = vmul.f32 0.015625, %v1369_v36  ;;  %v2731_v11 = vmul.f32 0.015625, %v1395_v3  ;;  %v1674_v13 = vpop.f32.mrb[28].mxu1  ;;  %v1747_v46 = vpop.f32.mrb[44].mxu0  ;;  %v1777_v17 = vmax.f32 %v1671_v5, 0.0  ;;  %v1779_v19 = vmax.f32 %v1744_v6, 0.0 }
 0x22a   : > { %v1675_v54 = vadd.f32 %v1674_v13, %v5990_v22  ;;  %v1748_v9 = vadd.f32 %v1747_v46, %v5993_v23  ;;  %v1676_v21 = vpop.f32.mrb[29].mxu1  ;;  %v1749_v60 = vpop.f32.mrb[45].mxu0  ;;  %v4960_v2 = vld [vmem:[%s6478_s7 + $0x180] sm:$0xff]   ;;  %v6093_v16 = vrot.slane %v6010_v42, %v5946_v30 }
 0x22b   : > { %v2745_v18 = vpack.c.bf16 %v2729_v10, %v2729_v10  ;;  %v2747_v25 = vpack.c.bf16 %v2731_v11, %v2731_v11  ;;  %v1677_v26 = vadd.f32 %v1676_v21, %v5998_v27  ;;  %v1750_v20 = vadd.f32 %v1749_v60, %v6001_v28  ;;  %v1678_v15 = vpop.f32.mrb[30].mxu1  ;;  %v1751_v61 = vpop.f32.mrb[46].mxu0  ;;  %v4969_v21 = vld [vmem:[%s6478_s7 + $0x158] sm:$0xff]  }
 0x22c   : > { %v1805_v31 = vadd.f32 %v1804_v63, %v1777_v17  ;;  %v1831_v32 = vadd.f32 %v1830_v1, %v1779_v19  ;;  %v1780_v38 = vmax.f32 %v1675_v54, 0.0  ;;  %v1782_v45 = vmax.f32 %v1748_v9, 0.0  ;;  %v1680_v47 = vpop.f32.mrb[31].mxu1  ;;  %v1753_v49 = vpop.f32.mrb[47].mxu0  ;;  %v4970_v60 = vld [vmem:[%s6478_s7 + $0x1d8] sm:$0xff]  }
 0x22d   : > { %3817 = vmatprep.mubr.bf16.mxu1 %v2745_v18  ;;  %3857 = vmatprep.mubr.bf16.mxu0 %v2747_v25  ;;  %v1781_v50 = vmax.f32 %v1677_v26, 0.0  ;;  %v1783_v51 = vmax.f32 %v1750_v20, 0.0  ;;  %v1679_v52 = vadd.f32 %v1678_v15, %v5990_v22  ;;  %v1752_v0 = vadd.f32 %v1751_v61, %v5993_v23  ;;  %v4964_v22 = vld [vmem:[%s6478_s7 + $0x188] sm:$0xff]  }
 0x22e   : > { %3818 = vmatmul.mubr.bf16.vlgmr.msra.gmra.mrb[64].mxu1 %v2744_v7  ;;  %3858 = vmatmul.mubr.bf16.vlgmr.msra.gmra.mrb[80].mxu0 %v2746_v8  ;;  %v1793_v55 = vadd.f32 %v1792_v4, %v1780_v38  ;;  %v1819_v40 = vadd.f32 %v1818_v29, %v1782_v45  ;;  %v1681_v24 = vadd.f32 %v1680_v47, %v5998_v27  ;;  %v4965_v27 = vld [vmem:[%s6478_s7 + $0x150] sm:$0xff]   ;;  %v4971_v45 = vld [vmem:[%s6478_s7 + $0x118] sm:$0xff]  }
 0x22f   : > { %4764 = vmatpush3.bf16.msra.mxu1 %v4959_v12  ;;  %4786 = vmatpush3.bf16.msra.mxu0 %v4960_v2  ;;  %v1806_v23 = vadd.f32 %v1805_v31, %v1781_v50  ;;  %v1832_v56 = vadd.f32 %v1831_v32, %v1783_v51  ;;  %v1784_v57 = vmax.f32 %v1679_v52, 0.0  ;;  %v1786_v58 = vmax.f32 %v1752_v0, 0.0  ;;  %v4972_v47 = vld [vmem:[%s6478_s7 + $0x198] sm:$0xff]  }
 0x230   : > { %4765 = vmatprep.subr.bf16.mxu1 %v4961_v33  ;;  %4787 = vmatprep.subr.bf16.mxu0 %v4962_v34  ;;  %v1785_v59 = vmax.f32 %v1681_v24, 0.0  ;;  %v1754_v62 = vadd.f32 %v1753_v49, %v6001_v28  ;;  %v6096_v63 = vrot.slane %v2316_v53, %v5937_v35  ;;  %v6099_v28 = vrot.slane %v2316_v53, %v5939_v48  ;;  %v4967_v48 = vld [vmem:[%s6478_s7 + $0x110] sm:$0xff]  }
 0x231   : > { %v1794_v1 = vadd.f32 %v1793_v55, %v1784_v57  ;;  %v1820_v36 = vadd.f32 %v1819_v40, %v1786_v58  ;;  %v2088_v3 = vpop.f32.mrb[32].mxu1  ;;  %v2161_v4 = vpop.f32.mrb[48].mxu0  ;;  %v6102_v29 = vrot.slane %v2316_v53, %v5944_v39  ;;  %v4968_v39 = vld [vmem:[%s6478_s7 + $0x190] sm:$0xff]   ;;  %v6114_v19 = vrot.slane %v2316_v53, %v5946_v30  ;;  %v4973_v55 = vld [vmem:[%s6478_s7 + $0x160] sm:$0xff]  }
 0x232   : > { %v1807_v5 = vadd.f32 %v1806_v23, %v1785_v59  ;;  %v1787_v6 = vmax.f32 %v1754_v62, 0.0  ;;  %v2089_v7 = vadd.f32 %v2088_v3, %v6014_v44  ;;  %v2162_v42 = vadd.f32 %v2161_v4, %v6022_v14  ;;  %v2090_v8 = vpop.f32.mrb[33].mxu1  ;;  %v2163_v10 = vpop.f32.mrb[49].mxu0  ;;  %v4974_v40 = vld [vmem:[%s6478_s7 + $0x1e0] sm:$0xff]  }
 0x233   : > { %4766 = vmatpush3.bf16.msra.mxu1 %v4963_v41  ;;  %4788 = vmatpush3.bf16.msra.mxu0 %v4964_v22  ;;  %v1795_v35 = vrot.slane %v1794_v1, 4  ;;  %v1821_v11 = vrot.slane %v1820_v36, 4  ;;  %v2091_v13 = vadd.f32 %v2090_v8, %v6026_v37  ;;  %v2092_v46 = vpop.f32.mrb[34].mxu1  ;;  %v2165_v17 = vpop.f32.mrb[50].mxu0  ;;  %v2164_v25 = vadd.f32 %v2163_v10, %v6093_v16  ;;  %v4977_v10 = vld [vmem:[%s6478_s7 + $0x168] sm:$0xff]  }
 0x234   : > { %v1808_v54 = vrot.slane %v1807_v5, 4  ;;  %v1833_v9 = vadd.f32 %v1832_v56, %v1787_v6  ;;  %4767 = vmatprep.subr.bf16.mxu1 %v4965_v27  ;;  %4789 = vmatprep.subr.bf16.mxu0 %v4966_v43  ;;  %v2200_v18 = vmax.f32 %v2089_v7, 0.0  ;;  %v2094_v12 = vpop.f32.mrb[35].mxu1  ;;  %v2167_v2 = vpop.f32.mrb[51].mxu0  ;;  %v2202_v20 = vmax.f32 %v2162_v42, 0.0  ;;  %v4975_v6 = vld [vmem:[%s6478_s7 + $0x120] sm:$0xff]  }
 0x235   : > { %v1796_v26 = vadd.f32 %v1795_v35, %v1794_v1  ;;  %v1822_v30 = vadd.f32 %v1821_v11, %v1820_v36  ;;  %v2201_v15 = vmax.f32 %v2091_v13, 0.0  ;;  %v2093_v32 = vadd.f32 %v2092_v46, %v6014_v44  ;;  %v4976_v7 = vld [vmem:[%s6478_s7 + $0x1a0] sm:$0xff]   ;;  %v4978_v35 = vld [vmem:[%s6478_s7 + $0x1e8] sm:$0xff]  }
 0x236   : > { %v6123_v61 = vadd.f32 %v1808_v54, %v1807_v5  ;;  %v1834_v31 = vrot.slane %v1833_v9, 4  ;;  %v2166_v33 = vadd.f32 %v2165_v17, %v6022_v14  ;;  %v2095_v49 = vadd.f32 %v2094_v12, %v6026_v37 }
 0x237   : > { %v1797_v34 = vrot.slane %v1796_v26, 2  ;;  %v1823_v38 = vrot.slane %v1822_v30, 2  ;;  %4768 = vmatpush3.bf16.msra.mxu1 %v4967_v48  ;;  %4790 = vmatpush3.bf16.msra.mxu0 %v4968_v39  ;;  %v2168_v50 = vadd.f32 %v2167_v2, %v6093_v16  ;;  %v2203_v52 = vmax.f32 %v2164_v25, 0.0 }
 0x238   : > { %v6135_v51 = vadd.f32 %v1834_v31, %v1833_v9  ;;  %4769 = vmatprep.subr.bf16.mxu1 %v4969_v21  ;;  %4791 = vmatprep.subr.bf16.mxu0 %v4970_v60  ;;  %v2204_v0 = vmax.f32 %v2093_v32, 0.0  ;;  %v2206_v53 = vmax.f32 %v2166_v33, 0.0  ;;  %v1810_v41 = vrot.slane %v6123_v61, 2 }
 0x239   : > { %v1798_v24 = vadd.f32 %v1797_v34, %v1796_v26  ;;  %v2205_v22 = vmax.f32 %v2095_v49, 0.0  ;;  %v2207_v23 = vmax.f32 %v2168_v50, 0.0  ;;  %v2098_v56 = vpop.f32.mrb[36].mxu1  ;;  %v2171_v57 = vpop.f32.mrb[52].mxu0  ;;  %v6144_v58 = vadd.f32 %v1823_v38, %v1822_v30  ;;  %v4979_v26 = vld [vmem:[%s6478_s7 + $0x128] sm:$0xff]   ;;  %v4982_v49 = vld [vmem:[%s6478_s7 + $0x1f0] sm:$0xff]  }
 0x23a   : > { %v2232_v59 = vadd.f32 %v2204_v0, %v2200_v18  ;;  %v2258_v62 = vadd.f32 %v2206_v53, %v2202_v20  ;;  %v2099_v27 = vadd.f32 %v2098_v56, %v6014_v44  ;;  %v2100_v43 = vpop.f32.mrb[37].mxu1  ;;  %v2173_v1 = vpop.f32.mrb[53].mxu0  ;;  %v1836_v3 = vrot.slane %v6135_v51, 2  ;;  %v4980_v30 = vld [vmem:[%s6478_s7 + $0x1a8] sm:$0xff]  }
 0x23b   : > { %v1799_v36 = vrot.slane %v1798_v24, 1  ;;  %4770 = vmatpush3.bf16.msra.mxu1 %v4971_v45  ;;  %4792 = vmatpush3.bf16.msra.mxu0 %v4972_v47  ;;  %v2245_v4 = vadd.f32 %v2205_v22, %v2201_v15  ;;  %v2271_v5 = vadd.f32 %v2207_v23, %v2203_v52  ;;  %v2102_v42 = vpop.f32.mrb[38].mxu1  ;;  %v2175_v8 = vpop.f32.mrb[54].mxu0  ;;  %v2172_v48 = vadd.f32 %v2171_v57, %v6022_v14  ;;  %v4981_v47 = vld [vmem:[%s6478_s7 + $0x170] sm:$0xff]  }
 0x23c   : > { %4771 = vmatprep.subr.bf16.mxu1 %v4973_v55  ;;  %4793 = vmatprep.subr.bf16.mxu0 %v4974_v40  ;;  %v2208_v11 = vmax.f32 %v2099_v27, 0.0  ;;  %v2101_v39 = vadd.f32 %v2100_v43, %v6026_v37  ;;  %v2174_v13 = vadd.f32 %v2173_v1, %v6093_v16  ;;  %v2104_v46 = vpop.f32.mrb[39].mxu1  ;;  %v2177_v17 = vpop.f32.mrb[55].mxu0  ;;  %v2103_v54 = vadd.f32 %v2102_v42, %v6014_v44  ;;  %v4983_v27 = vld [vmem:[%s6478_s7 + $0x130] sm:$0xff]  }
 0x23d   : > { %v2176_v9 = vadd.f32 %v2175_v8, %v6022_v14  ;;  %v2105_v21 = vadd.f32 %v2104_v46, %v6026_v37  ;;  %v2178_v60 = vadd.f32 %v2177_v17, %v6093_v16  ;;  %v2210_v25 = vmax.f32 %v2172_v48, 0.0 }
 0x23e   : > { %v2233_v18 = vadd.f32 %v2232_v59, %v2208_v11  ;;  %v2209_v12 = vmax.f32 %v2101_v39, 0.0  ;;  %v2211_v2 = vmax.f32 %v2174_v13, 0.0  ;;  %v2212_v20 = vmax.f32 %v2103_v54, 0.0 }
 0x23f   : > { %4772 = vmatpush3.bf16.msra.mxu1 %v4975_v6  ;;  %4794 = vmatpush3.bf16.msra.mxu0 %v4976_v7  ;;  %v2214_v15 = vmax.f32 %v2176_v9, 0.0  ;;  %v2213_v31 = vmax.f32 %v2105_v21, 0.0  ;;  %v2215_v32 = vmax.f32 %v2178_v60, 0.0  ;;  %v1825_v33 = vrot.slane %v6144_v58, 1  ;;  %v4987_v21 = vld [vmem:[%s6478_s7 + $0x138] sm:$0xff]  }
 0x240   : > { %4773 = vmatprep.subr.bf16.mxu1 %v4977_v10  ;;  %4795 = vmatprep.subr.bf16.mxu0 %v4978_v35  ;;  %v2259_v34 = vadd.f32 %v2258_v62, %v2210_v25  ;;  %v2246_v38 = vadd.f32 %v2245_v4, %v2209_v12  ;;  %v2272_v45 = vadd.f32 %v2271_v5, %v2211_v2  ;;  %v4986_v4 = vld [vmem:[%s6478_s7 + $0x1f8] sm:$0xff]  }
 0x241   : > { %v2234_v50 = vadd.f32 %v2233_v18, %v2212_v20  ;;  %v2108_v52 = vpop.f32.mrb[40].mxu1  ;;  %v2181_v0 = vpop.f32.mrb[56].mxu0  ;;  %v1811_v53 = vadd.f32 %v1810_v41, %v6123_v61  ;;  %v1837_v55 = vadd.f32 %v1836_v3, %v6135_v51  ;;  %v1800_v40 = vadd.f32 %v1799_v36, %v1798_v24  ;;  %v4984_v61 = vld [vmem:[%s6478_s7 + $0x1b0] sm:$0xff]   ;;  %v4985_v3 = vld [vmem:[%s6478_s7 + $0x178] sm:$0xff]  }
 0x242   : > { %v2260_v22 = vadd.f32 %v2259_v34, %v2214_v15  ;;  %v2247_v23 = vadd.f32 %v2246_v38, %v2213_v31  ;;  %v2273_v56 = vadd.f32 %v2272_v45, %v2215_v32  ;;  %v2109_v57 = vadd.f32 %v2108_v52, %v6014_v44  ;;  %v2110_v59 = vpop.f32.mrb[41].mxu1  ;;  %v2183_v62 = vpop.f32.mrb[57].mxu0  ;;  %v4988_v60 = vld [vmem:[%s6478_s7 + $0x1b8] sm:$0xff]   ;;  %v4989_v38 = vld [vmem:[%s6478_s7 + $0x240] sm:$0xff]  }
 0x243   : > { %4774 = vmatpush3.bf16.msra.mxu1 %v4979_v26  ;;  %4796 = vmatpush3.bf16.msra.mxu0 %v4980_v30  ;;  %v2182_v51 = vadd.f32 %v2181_v0, %v6022_v14  ;;  %v2111_v24 = vadd.f32 %v2110_v59, %v6026_v37  ;;  %v2184_v41 = vadd.f32 %v2183_v62, %v6093_v16  ;;  %v2112_v43 = vpop.f32.mrb[42].mxu1  ;;  %v2185_v1 = vpop.f32.mrb[58].mxu0  ;;  %v1812_v36 = vrot.slane %v1811_v53, 1  ;;  %v4990_v45 = vld [vmem:[%s6478_s7 + $0x2c0] sm:$0xff]  }
 0x244   : > { %4775 = vmatprep.subr.bf16.mxu1 %v4981_v47  ;;  %4797 = vmatprep.subr.bf16.mxu0 %v4982_v49  ;;  %v2216_v5 = vmax.f32 %v2109_v57, 0.0  ;;  %v2113_v6 = vadd.f32 %v2112_v43, %v6014_v44  ;;  %v2186_v7 = vadd.f32 %v2185_v1, %v6022_v14  ;;  %v1838_v42 = vrot.slane %v1837_v55, 1  ;;  %v2114_v8 = vpop.f32.mrb[43].mxu1  ;;  %v2187_v10 = vpop.f32.mrb[59].mxu0 }
 0x245   : > { %v2218_v35 = vmax.f32 %v2182_v51, 0.0  ;;  %v2217_v11 = vmax.f32 %v2111_v24, 0.0  ;;  %v2219_v48 = vmax.f32 %v2184_v41, 0.0  ;;  %v1813_v39 = vadd.f32 %v1812_v36, %v1811_v53  ;;  %v4993_v51 = vld [vmem:[%s6478_s7 + $0x248] sm:$0xff]  }
 0x246   : > { %v2235_v13 = vadd.f32 %v2234_v50, %v2216_v5  ;;  %v2220_v46 = vmax.f32 %v2113_v6, 0.0  ;;  %v2222_v17 = vmax.f32 %v2186_v7, 0.0  ;;  %v1839_v54 = vadd.f32 %v1838_v42, %v1837_v55 }
 0x247   : > { %4776 = vmatpush3.bf16.msra.mxu1 %v4983_v27  ;;  %4798 = vmatpush3.bf16.msra.mxu0 %v4984_v61  ;;  %v2261_v9 = vadd.f32 %v2260_v22, %v2218_v35  ;;  %v2248_v18 = vadd.f32 %v2247_v23, %v2217_v11  ;;  %v2274_v25 = vadd.f32 %v2273_v56, %v2219_v48  ;;  %v2733_v12 = vmul.f32 0.015625, %v1813_v39  ;;  %v4991_v22 = vld [vmem:[%s6478_s7 + $0x200] sm:$0xff]   ;;  %v4995_v11 = vld [vmem:[%s6478_s7 + $0x208] sm:$0xff]  }
 0x248   : > { %4777 = vmatprep.subr.bf16.mxu1 %v4985_v3  ;;  %4799 = vmatprep.subr.bf16.mxu0 %v4986_v4  ;;  %v2236_v2 = vadd.f32 %v2235_v13, %v2220_v46  ;;  %v2735_v26 = vmul.f32 0.015625, %v1839_v54  ;;  %v2115_v30 = vadd.f32 %v2114_v8, %v6026_v37  ;;  %v2188_v20 = vadd.f32 %v2187_v10, %v6093_v16  ;;  %v4992_v61 = vld [vmem:[%s6478_s7 + $0x280] sm:$0xff]   ;;  %v4994_v3 = vld [vmem:[%s6478_s7 + $0x2c8] sm:$0xff]  }
 0x249   : > { %v2262_v15 = vadd.f32 %v2261_v9, %v2222_v17  ;;  %v2749_v31 = vpack.c.bf16 %v2733_v12, %v2733_v12  ;;  %v2732_v32 = vmul.f32 0.015625, %v1800_v40  ;;  %v1826_v34 = vadd.f32 %v1825_v33, %v6144_v58  ;;  %v2118_v47 = vpop.f32.mrb[44].mxu1  ;;  %v2191_v49 = vpop.f32.mrb[60].mxu0  ;;  %v4997_v17 = vld [vmem:[%s6478_s7 + $0x250] sm:$0xff]  }
 0x24a   : > { %v2751_v50 = vpack.c.bf16 %v2735_v26, %v2735_v26  ;;  %v2221_v52 = vmax.f32 %v2115_v30, 0.0  ;;  %v2223_v0 = vmax.f32 %v2188_v20, 0.0  ;;  %v2119_v53 = vadd.f32 %v2118_v47, %v6014_v44  ;;  %v2120_v55 = vpop.f32.mrb[45].mxu1  ;;  %v2193_v40 = vpop.f32.mrb[61].mxu0 }
 0x24b   : > { %4778 = vmatpush3.bf16.msra.mxu1 %v4987_v21  ;;  %4800 = vmatpush3.bf16.msra.mxu0 %v4988_v60  ;;  %v2748_v58 = vpack.c.bf16 %v2732_v32, %v2732_v32  ;;  %v2734_v33 = vmul.f32 0.015625, %v1826_v34  ;;  %v2192_v23 = vadd.f32 %v2191_v49, %v6022_v14  ;;  %v2121_v56 = vadd.f32 %v2120_v55, %v6026_v37  ;;  %v2122_v57 = vpop.f32.mrb[46].mxu1  ;;  %v2195_v59 = vpop.f32.mrb[62].mxu0  ;;  %v5000_v32 = vld [vmem:[%s6478_s7 + $0x290] sm:$0xff]   ;;  %v5001_v34 = vld [vmem:[%s6478_s7 + $0x258] sm:$0xff]  }
 0x24c   : > { %3897 = vmatprep.mubr.bf16.mxu1 %v2749_v31  ;;  %3937 = vmatprep.mubr.bf16.mxu0 %v2751_v50  ;;  %v2249_v62 = vadd.f32 %v2248_v18, %v2221_v52  ;;  %v2275_v27 = vadd.f32 %v2274_v25, %v2223_v0  ;;  %v2224_v24 = vmax.f32 %v2119_v53, 0.0  ;;  %v2194_v41 = vadd.f32 %v2193_v40, %v6093_v16  ;;  %v2124_v43 = vpop.f32.mrb[47].mxu1  ;;  %v2197_v1 = vpop.f32.mrb[63].mxu0  ;;  %v4999_v31 = vld [vmem:[%s6478_s7 + $0x210] sm:$0xff]  }
 0x24d   : > { %v2750_v36 = vpack.c.bf16 %v2734_v33, %v2734_v33  ;;  %4807 = vmatprep.subr.bf16.mxu1 %v4989_v38  ;;  %4829 = vmatprep.subr.bf16.mxu0 %v4990_v45  ;;  %v2226_v4 = vmax.f32 %v2192_v23, 0.0  ;;  %v2225_v5 = vmax.f32 %v2121_v56, 0.0  ;;  %v2123_v6 = vadd.f32 %v2122_v57, %v6014_v44  ;;  %v4996_v44 = vld [vmem:[%s6478_s7 + $0x288] sm:$0xff]  }
 0x24e   : > { %3898 = vmatmul.mubr.bf16.vlgmr.msra.gmra.mrb[68].mxu1 %v2748_v58  ;;  %v2237_v7 = vadd.f32 %v2236_v2, %v2224_v24  ;;  %v2227_v42 = vmax.f32 %v2194_v41, 0.0  ;;  %v2196_v8 = vadd.f32 %v2195_v59, %v6022_v14  ;;  %v2125_v10 = vadd.f32 %v2124_v43, %v6026_v37  ;;  %v5003_v24 = vld [vmem:[%s6478_s7 + $0x218] sm:$0xff]  }
 0x24f   : > { %3938 = vmatmul.mubr.bf16.vlgmr.msra.gmra.mrb[84].mxu0 %v2750_v36  ;;  %4808 = vmatpush3.bf16.msra.mxu1 %v4991_v22  ;;  %v2263_v35 = vadd.f32 %v2262_v15, %v2226_v4  ;;  %v2250_v48 = vadd.f32 %v2249_v62, %v2225_v5  ;;  %v2228_v39 = vmax.f32 %v2123_v6, 0.0  ;;  %v2198_v13 = vadd.f32 %v2197_v1, %v6093_v16  ;;  %v4998_v16 = vld [vmem:[%s6478_s7 + $0x2d0] sm:$0xff]   ;;  %v5002_v22 = vld [vmem:[%s6478_s7 + $0x2d8] sm:$0xff]   ;;  %v5005_v6 = vld [vmem:[%s6478_s7 + $0x260] sm:$0xff]  }
 0x250   : > { %4830 = vmatpush3.bf16.msra.mxu0 %v4992_v61  ;;  %4809 = vmatprep.subr.bf16.mxu1 %v4993_v51  ;;  %v2276_v14 = vadd.f32 %v2275_v27, %v2227_v42  ;;  %v2230_v46 = vmax.f32 %v2196_v8, 0.0  ;;  %v2229_v37 = vmax.f32 %v2125_v10, 0.0 }
 0x251   : > { %4831 = vmatprep.subr.bf16.mxu0 %v4994_v3  ;;  %v2238_v54 = vadd.f32 %v2237_v7, %v2228_v39  ;;  %v2231_v9 = vmax.f32 %v2198_v13, 0.0  ;;  %v2532_v21 = vpop.f32.mrb[48].mxu1  ;;  %v2605_v60 = vpop.f32.mrb[64].mxu0  ;;  %v5004_v3 = vld [vmem:[%s6478_s7 + $0x298] sm:$0xff]  }
 0x252   : > { %v2264_v18 = vadd.f32 %v2263_v35, %v2230_v46  ;;  %v2251_v25 = vadd.f32 %v2250_v48, %v2229_v37  ;;  %v2533_v12 = vadd.f32 %v2532_v21, %v6096_v63  ;;  %v2606_v2 = vadd.f32 %v2605_v60, %v6099_v28  ;;  %v2534_v26 = vpop.f32.mrb[49].mxu1  ;;  %v2607_v30 = vpop.f32.mrb[65].mxu0  ;;  %v5006_v35 = vld [vmem:[%s6478_s7 + $0x2e0] sm:$0xff]  }
 0x253   : > { %4810 = vmatpush3.bf16.msra.mxu1 %v4995_v11  ;;  %v2239_v20 = vrot.slane %v2238_v54, 4  ;;  %v2277_v15 = vadd.f32 %v2276_v14, %v2231_v9  ;;  %v2535_v38 = vadd.f32 %v2534_v26, %v6102_v29  ;;  %v2608_v45 = vadd.f32 %v2607_v30, %v6114_v19  ;;  %v2536_v47 = vpop.f32.mrb[50].mxu1  ;;  %v2609_v49 = vpop.f32.mrb[66].mxu0 }
 0x254   : > { %4832 = vmatpush3.bf16.msra.mxu0 %v4996_v44  ;;  %v2265_v50 = vrot.slane %v2264_v18, 4  ;;  %v2252_v52 = vrot.slane %v2251_v25, 4  ;;  %4811 = vmatprep.subr.bf16.mxu1 %v4997_v17  ;;  %v2644_v0 = vmax.f32 %v2533_v12, 0.0  ;;  %v2646_v53 = vmax.f32 %v2606_v2, 0.0  ;;  %v2538_v55 = vpop.f32.mrb[51].mxu1  ;;  %v2611_v40 = vpop.f32.mrb[67].mxu0 }
 0x255   : > { %v2240_v58 = vadd.f32 %v2239_v20, %v2238_v54  ;;  %v2278_v33 = vrot.slane %v2277_v15, 4  ;;  %4833 = vmatprep.subr.bf16.mxu0 %v4998_v16  ;;  %v2645_v23 = vmax.f32 %v2535_v38, 0.0  ;;  %v2647_v56 = vmax.f32 %v2608_v45, 0.0  ;;  %v5007_v16 = vld [vmem:[%s6478_s7 + $0x220] sm:$0xff]   ;;  %v5009_v2 = vld [vmem:[%s6478_s7 + $0x268] sm:$0xff]  }
 0x256   : > { %v2266_v57 = vadd.f32 %v2265_v50, %v2264_v18  ;;  %v6265_v59 = vadd.f32 %v2252_v52, %v2251_v25  ;;  %v2537_v62 = vadd.f32 %v2536_v47, %v6096_v63  ;;  %v2610_v27 = vadd.f32 %v2609_v49, %v6099_v28  ;;  %v5008_v12 = vld [vmem:[%s6478_s7 + $0x2a0] sm:$0xff]  }
 0x257   : > { %v2241_v61 = vrot.slane %v2240_v58, 2  ;;  %v6269_v51 = vadd.f32 %v2278_v33, %v2277_v15  ;;  %4812 = vmatpush3.bf16.msra.mxu1 %v4999_v31  ;;  %v2539_v41 = vadd.f32 %v2538_v55, %v6102_v29  ;;  %v2612_v43 = vadd.f32 %v2611_v40, %v6114_v19  ;;  %v5011_v55 = vld [vmem:[%s6478_s7 + $0x228] sm:$0xff]  }
 0x258   : > { %v2267_v1 = vrot.slane %v2266_v57, 2  ;;  %v2254_v36 = vrot.slane %v6265_v59, 2  ;;  %4834 = vmatpush3.bf16.msra.mxu0 %v5000_v32  ;;  %4813 = vmatprep.subr.bf16.mxu1 %v5001_v34  ;;  %v2648_v4 = vmax.f32 %v2537_v62, 0.0  ;;  %v2650_v5 = vmax.f32 %v2610_v27, 0.0  ;;  %v5010_v32 = vld [vmem:[%s6478_s7 + $0x2e8] sm:$0xff]   ;;  %v5013_v62 = vld [vmem:[%s6478_s7 + $0x270] sm:$0xff]  }
 0x259   : > { %v6283_v7 = vadd.f32 %v2241_v61, %v2240_v58  ;;  %v2280_v42 = vrot.slane %v6269_v51, 2  ;;  %4835 = vmatprep.subr.bf16.mxu0 %v5002_v22  ;;  %v2649_v8 = vmax.f32 %v2539_v41, 0.0  ;;  %v2651_v10 = vmax.f32 %v2612_v43, 0.0  ;;  %v2542_v11 = vpop.f32.mrb[52].mxu1  ;;  %v2615_v48 = vpop.f32.mrb[68].mxu0  ;;  %v5012_v22 = vld [vmem:[%s6478_s7 + $0x2a8] sm:$0xff]  }
 0x25a   : > { %v6289_v39 = vadd.f32 %v2267_v1, %v2266_v57  ;;  %v2676_v13 = vadd.f32 %v2648_v4, %v2644_v0  ;;  %v2702_v44 = vadd.f32 %v2650_v5, %v2646_v53  ;;  %v2543_v14 = vadd.f32 %v2542_v11, %v6096_v63  ;;  %v2544_v46 = vpop.f32.mrb[53].mxu1  ;;  %v2617_v37 = vpop.f32.mrb[69].mxu0  ;;  %v5014_v41 = vld [vmem:[%s6478_s7 + $0x2f0] sm:$0xff]  }
 0x25b   : > { %v2243_v17 = vrot.slane %v6283_v7, 1  ;;  %4814 = vmatpush3.bf16.msra.mxu1 %v5003_v24  ;;  %v2689_v54 = vadd.f32 %v2649_v8, %v2645_v23  ;;  %v2715_v9 = vadd.f32 %v2651_v10, %v2647_v56  ;;  %v2616_v21 = vadd.f32 %v2615_v48, %v6099_v28  ;;  %v2546_v60 = vpop.f32.mrb[54].mxu1  ;;  %v2619_v18 = vpop.f32.mrb[70].mxu0 }
 0x25c   : > { %v2269_v25 = vrot.slane %v6289_v39, 1  ;;  %4836 = vmatpush3.bf16.msra.mxu0 %v5004_v3  ;;  %4815 = vmatprep.subr.bf16.mxu1 %v5005_v6  ;;  %v2652_v26 = vmax.f32 %v2543_v14, 0.0  ;;  %v2545_v30 = vadd.f32 %v2544_v46, %v6102_v29  ;;  %v2618_v20 = vadd.f32 %v2617_v37, %v6114_v19  ;;  %v2548_v15 = vpop.f32.mrb[55].mxu1  ;;  %v2621_v31 = vpop.f32.mrb[71].mxu0  ;;  %v5017_v14 = vld [vmem:[%s6478_s7 + $0x278] sm:$0xff]  }
 0x25d   : > { %4837 = vmatprep.subr.bf16.mxu0 %v5006_v35  ;;  %v2654_v34 = vmax.f32 %v2616_v21, 0.0  ;;  %v2547_v38 = vadd.f32 %v2546_v60, %v6096_v63  ;;  %v2620_v45 = vadd.f32 %v2619_v18, %v6099_v28  ;;  %v2549_v47 = vadd.f32 %v2548_v15, %v6102_v29  ;;  %v5015_v35 = vld [vmem:[%s6478_s7 + $0x230] sm:$0xff]   ;;  %v5018_v21 = vld [vmem:[%s6478_s7 + $0x2f8] sm:$0xff]  }
 0x25e   : > { %v2677_v49 = vadd.f32 %v2676_v13, %v2652_v26  ;;  %v2653_v50 = vmax.f32 %v2545_v30, 0.0  ;;  %v2655_v52 = vmax.f32 %v2618_v20, 0.0  ;;  %v2622_v0 = vadd.f32 %v2621_v31, %v6114_v19  ;;  %v5019_v31 = vld [vmem:[%s6478_s7 + $0x238] sm:$0xff]  }
 0x25f   : > { %4816 = vmatpush3.bf16.msra.mxu1 %v5007_v16  ;;  %v2703_v53 = vadd.f32 %v2702_v44, %v2654_v34  ;;  %v2656_v40 = vmax.f32 %v2547_v38, 0.0  ;;  %v2658_v58 = vmax.f32 %v2620_v45, 0.0  ;;  %v2657_v33 = vmax.f32 %v2549_v47, 0.0  ;;  %v5016_v44 = vld [vmem:[%s6478_s7 + $0x2b0] sm:$0xff]   ;;  %v5020_v47 = vld [vmem:[%s6478_s7 + $0x2b8] sm:$0xff]  }
 0x260   : > { %4838 = vmatpush3.bf16.msra.mxu0 %v5008_v12  ;;  %4817 = vmatprep.subr.bf16.mxu1 %v5009_v2  ;;  %v2690_v23 = vadd.f32 %v2689_v54, %v2653_v50  ;;  %v2716_v56 = vadd.f32 %v2715_v9, %v2655_v52  ;;  %v2659_v57 = vmax.f32 %v2622_v0, 0.0  ;;  %v2255_v27 = vadd.f32 %v2254_v36, %v6265_v59 }
 0x261   : > { %4839 = vmatprep.subr.bf16.mxu0 %v5010_v32  ;;  %v2678_v61 = vadd.f32 %v2677_v49, %v2656_v40  ;;  %v2704_v24 = vadd.f32 %v2703_v53, %v2658_v58  ;;  %v2552_v43 = vpop.f32.mrb[56].mxu1  ;;  %v2625_v1 = vpop.f32.mrb[72].mxu0  ;;  %v2281_v3 = vadd.f32 %v2280_v42, %v6269_v51  ;;  %v2244_v4 = vadd.f32 %v2243_v17, %v6283_v7 }
 0x262   : > { %v2691_v5 = vadd.f32 %v2690_v23, %v2657_v33  ;;  %v2717_v6 = vadd.f32 %v2716_v56, %v2659_v57  ;;  %v2553_v8 = vadd.f32 %v2552_v43, %v6096_v63  ;;  %v2626_v10 = vadd.f32 %v2625_v1, %v6099_v28  ;;  %v2554_v59 = vpop.f32.mrb[57].mxu1  ;;  %v2627_v36 = vpop.f32.mrb[73].mxu0  ;;  %v5021_v33 = vld [vmem:[%s6478_s7 + $0x340] sm:$0xff]  }
 0x263   : > { %4818 = vmatpush3.bf16.msra.mxu1 %v5011_v55  ;;  %v2555_v11 = vadd.f32 %v2554_v59, %v6102_v29  ;;  %v2628_v48 = vadd.f32 %v2627_v36, %v6114_v19  ;;  %v2556_v51 = vpop.f32.mrb[58].mxu1  ;;  %v2629_v42 = vpop.f32.mrb[74].mxu0  ;;  %v2256_v7 = vrot.slane %v2255_v27, 1  ;;  %v2282_v13 = vrot.slane %v2281_v3, 1  ;;  %v5023_v43 = vld [vmem:[%s6478_s7 + $0x300] sm:$0xff]  }
 0x264   : > { %4840 = vmatpush3.bf16.msra.mxu0 %v5012_v22  ;;  %4819 = vmatprep.subr.bf16.mxu1 %v5013_v62  ;;  %v2660_v46 = vmax.f32 %v2553_v8, 0.0  ;;  %v2662_v37 = vmax.f32 %v2626_v10, 0.0  ;;  %v2557_v17 = vadd.f32 %v2556_v51, %v6096_v63  ;;  %v2630_v54 = vadd.f32 %v2629_v42, %v6099_v28  ;;  %v2558_v9 = vpop.f32.mrb[59].mxu1  ;;  %v2631_v16 = vpop.f32.mrb[75].mxu0  ;;  %v5022_v22 = vld [vmem:[%s6478_s7 + $0x3c0] sm:$0xff]   ;;  %v5025_v10 = vld [vmem:[%s6478_s7 + $0x348] sm:$0xff]  }
 0x265   : > { %4841 = vmatprep.subr.bf16.mxu0 %v5014_v41  ;;  %v2661_v60 = vmax.f32 %v2555_v11, 0.0  ;;  %v2663_v18 = vmax.f32 %v2628_v48, 0.0  ;;  %v2257_v12 = vadd.f32 %v2256_v7, %v2255_v27  ;;  %v2283_v2 = vadd.f32 %v2282_v13, %v2281_v3  ;;  %v5024_v8 = vld [vmem:[%s6478_s7 + $0x380] sm:$0xff]   ;;  %v5026_v7 = vld [vmem:[%s6478_s7 + $0x3c8] sm:$0xff]  }
 0x266   : > { %v2679_v26 = vadd.f32 %v2678_v61, %v2660_v46  ;;  %v2705_v30 = vadd.f32 %v2704_v24, %v2662_v37  ;;  %v2664_v20 = vmax.f32 %v2557_v17, 0.0  ;;  %v2666_v15 = vmax.f32 %v2630_v54, 0.0 }
 0x267   : > { %4820 = vmatpush3.bf16.msra.mxu1 %v5015_v35  ;;  %v2692_v32 = vadd.f32 %v2691_v5, %v2661_v60  ;;  %v2718_v34 = vadd.f32 %v2717_v6, %v2663_v18  ;;  %v2737_v38 = vmul.f32 0.015625, %v2257_v12  ;;  %v2739_v45 = vmul.f32 0.015625, %v2283_v2  ;;  %v5029_v12 = vld [vmem:[%s6478_s7 + $0x350] sm:$0xff]  }
 0x268   : > { %4842 = vmatpush3.bf16.msra.mxu0 %v5016_v44  ;;  %4821 = vmatprep.subr.bf16.mxu1 %v5017_v14  ;;  %v2680_v49 = vadd.f32 %v2679_v26, %v2664_v20  ;;  %v2706_v50 = vadd.f32 %v2705_v30, %v2666_v15  ;;  %v2559_v52 = vadd.f32 %v2558_v9, %v6102_v29  ;;  %v2736_v0 = vmul.f32 0.015625, %v2244_v4 }
 0x269   : > { %4843 = vmatprep.subr.bf16.mxu0 %v5018_v21  ;;  %v2753_v53 = vpack.c.bf16 %v2737_v38, %v2737_v38  ;;  %v2755_v55 = vpack.c.bf16 %v2739_v45, %v2739_v45  ;;  %v2632_v40 = vadd.f32 %v2631_v16, %v6114_v19  ;;  %v2270_v58 = vadd.f32 %v2269_v25, %v6289_v39  ;;  %v2562_v23 = vpop.f32.mrb[60].mxu1  ;;  %v2635_v56 = vpop.f32.mrb[76].mxu0  ;;  %v5028_v21 = vld [vmem:[%s6478_s7 + $0x388] sm:$0xff]   ;;  %v5032_v38 = vld [vmem:[%s6478_s7 + $0x390] sm:$0xff]   ;;  %v5033_v45 = vld [vmem:[%s6478_s7 + $0x358] sm:$0xff]  }
 0x26a   : > { %v2665_v57 = vmax.f32 %v2559_v52, 0.0  ;;  %v2752_v62 = vpack.c.bf16 %v2736_v0, %v2736_v0  ;;  %v2563_v27 = vadd.f32 %v2562_v23, %v6096_v63  ;;  %v2636_v61 = vadd.f32 %v2635_v56, %v6099_v28  ;;  %v2564_v24 = vpop.f32.mrb[61].mxu1  ;;  %v2637_v41 = vpop.f32.mrb[77].mxu0  ;;  %v5038_v56 = vld [vmem:[%s6478_s7 + $0x3e0] sm:$0xff]  }
 0x26b   : > { %4822 = vmatpush3.bf16.msra.mxu1 %v5019_v31  ;;  %3977 = vmatprep.mubr.bf16.mxu1 %v2753_v53  ;;  %v2667_v39 = vmax.f32 %v2632_v40, 0.0  ;;  %v2738_v25 = vmul.f32 0.015625, %v2270_v58  ;;  %v2565_v1 = vadd.f32 %v2564_v24, %v6102_v29  ;;  %v2638_v3 = vadd.f32 %v2637_v41, %v6114_v19  ;;  %v2566_v4 = vpop.f32.mrb[62].mxu1  ;;  %v2639_v5 = vpop.f32.mrb[78].mxu0  ;;  %v5031_v31 = vld [vmem:[%s6478_s7 + $0x310] sm:$0xff]   ;;  %v5035_v53 = vld [vmem:[%s6478_s7 + $0x318] sm:$0xff]  }
 0x26c   : > { %4844 = vmatpush3.bf16.msra.mxu0 %v5020_v47  ;;  %4017 = vmatprep.mubr.bf16.mxu0 %v2755_v55  ;;  %v2693_v6 = vadd.f32 %v2692_v32, %v2665_v57  ;;  %v2668_v59 = vmax.f32 %v2563_v27, 0.0  ;;  %v2670_v36 = vmax.f32 %v2636_v61, 0.0  ;;  %v2567_v35 = vadd.f32 %v2566_v4, %v6096_v63  ;;  %v2568_v11 = vpop.f32.mrb[63].mxu1  ;;  %v2641_v48 = vpop.f32.mrb[79].mxu0  ;;  %v5027_v63 = vld [vmem:[%s6478_s7 + $0x308] sm:$0xff]   ;;  %v5036_v58 = vld [vmem:[%s6478_s7 + $0x398] sm:$0xff]  }
 0x26d   : > { %v2719_v51 = vadd.f32 %v2718_v34, %v2667_v39  ;;  %v2754_v42 = vpack.c.bf16 %v2738_v25, %v2738_v25  ;;  %4851 = vmatprep.subr.bf16.mxu1 %v5021_v33  ;;  %4873 = vmatprep.subr.bf16.mxu0 %v5022_v22  ;;  %v2669_v13 = vmax.f32 %v2565_v1, 0.0  ;;  %v2671_v44 = vmax.f32 %v2638_v3, 0.0  ;;  %v5037_v33 = vld [vmem:[%s6478_s7 + $0x360] sm:$0xff]   ;;  %v5041_v41 = vld [vmem:[%s6478_s7 + $0x368] sm:$0xff]  }
 0x26e   : > { %3978 = vmatmul.mubr.bf16.vlgmr.msra.gmra.mrb[72].mxu1 %v2752_v62  ;;  %v2681_v14 = vadd.f32 %v2680_v49, %v2668_v59  ;;  %v2707_v46 = vadd.f32 %v2706_v50, %v2670_v36  ;;  %v2672_v37 = vmax.f32 %v2567_v35, 0.0  ;;  %v2640_v17 = vadd.f32 %v2639_v5, %v6099_v28  ;;  %v5034_v49 = vld [vmem:[%s6478_s7 + $0x3d8] sm:$0xff]   ;;  %v5039_v62 = vld [vmem:[%s6478_s7 + $0x320] sm:$0xff]   ;;  %v5043_v4 = vld [vmem:[%s6478_s7 + $0x328] sm:$0xff]  }
 0x26f   : > { %4018 = vmatmul.mubr.bf16.vlgmr.msra.gmra.mrb[88].mxu0 %v2754_v42  ;;  %4852 = vmatpush3.bf16.msra.mxu1 %v5023_v43  ;;  %v2694_v54 = vadd.f32 %v2693_v6, %v2669_v13  ;;  %v2720_v9 = vadd.f32 %v2719_v51, %v2671_v44  ;;  %v2569_v16 = vadd.f32 %v2568_v11, %v6102_v29  ;;  %v5030_v29 = vld [vmem:[%s6478_s7 + $0x3d0] sm:$0xff]   ;;  %v5040_v24 = vld [vmem:[%s6478_s7 + $0x3a0] sm:$0xff]   ;;  %v5042_v43 = vld [vmem:[%s6478_s7 + $0x3e8] sm:$0xff]  }
 0x270   : > { %4874 = vmatpush3.bf16.msra.mxu0 %v5024_v8  ;;  %4853 = vmatprep.subr.bf16.mxu1 %v5025_v10  ;;  %v2682_v60 = vadd.f32 %v2681_v14, %v2672_v37  ;;  %v2674_v18 = vmax.f32 %v2640_v17, 0.0  ;;  %v2642_v28 = vadd.f32 %v2641_v48, %v6114_v19  ;;  %v5044_v8 = vld [vmem:[%s6478_s7 + $0x3a8] sm:$0xff]   ;;  %v5045_v10 = vld [vmem:[%s6478_s7 + $0x370] sm:$0xff]   ;;  %v5049_v13 = vld [vmem:[%s6478_s7 + $0x378] sm:$0xff]  }
 0x271   : > { %4875 = vmatprep.subr.bf16.mxu0 %v5026_v7  ;;  %v2673_v2 = vmax.f32 %v2569_v16, 0.0  ;;  %v5046_v35 = vld [vmem:[%s6478_s7 + $0x3f0] sm:$0xff]   ;;  %v5051_v17 = vld [vmem:[%s6478_s7 + $0x338] sm:$0xff]  }
 0x272   : > { %v2683_v26 = vrot.slane %v2682_v60, 4  ;;  %v2708_v30 = vadd.f32 %v2707_v46, %v2674_v18  ;;  %v2675_v20 = vmax.f32 %v2642_v28, 0.0  ;;  %v5047_v51 = vld [vmem:[%s6478_s7 + $0x330] sm:$0xff]   ;;  %v5050_v46 = vld [vmem:[%s6478_s7 + $0x3f8] sm:$0xff]   ;;  %v3016_v28 = vld [vmem:[%s6479_s8] sm:$0x1] }
 0x273   : > { %4854 = vmatpush3.bf16.msra.mxu1 %v5027_v63  ;;  %v2695_v15 = vadd.f32 %v2694_v54, %v2673_v2  ;;  %v5048_v7 = vld [vmem:[%s6478_s7 + $0x3b0] sm:$0xff]   ;;  %v5052_v63 = vld [vmem:[%s6478_s7 + $0x3b8] sm:$0xff]  }
 0x274   : > { %4876 = vmatpush3.bf16.msra.mxu0 %v5028_v21  ;;  %v2684_v19 = vadd.f32 %v2683_v26, %v2682_v60  ;;  %v2709_v32 = vrot.slane %v2708_v30, 4  ;;  %v2721_v34 = vadd.f32 %v2720_v9, %v2675_v20  ;;  %4855 = vmatprep.subr.bf16.mxu1 %v5029_v12 }
 0x275   : > { %v2696_v47 = vrot.slane %v2695_v15, 4  ;;  %4877 = vmatprep.subr.bf16.mxu0 %v5030_v29 }
 0x276   : > { %v2710_v50 = vadd.f32 %v2709_v32, %v2708_v30  ;;  %v2722_v52 = vrot.slane %v2721_v34, 4  ;;  %v2685_v55 = vrot.slane %v2684_v19, 2 }
 0x277   : > { %v2697_v0 = vadd.f32 %v2696_v47, %v2695_v15  ;;  %4856 = vmatpush3.bf16.msra.mxu1 %v5031_v31 }
 0x278   : > { %v2723_v40 = vadd.f32 %v2722_v52, %v2721_v34  ;;  %4878 = vmatpush3.bf16.msra.mxu0 %v5032_v38  ;;  %4857 = vmatprep.subr.bf16.mxu1 %v5033_v45  ;;  %v2711_v22 = vrot.slane %v2710_v50, 2  ;;  %v2686_v61 = vadd.f32 %v2685_v55, %v2684_v19 }
 0x279   : > { %v2698_v23 = vrot.slane %v2697_v0, 2  ;;  %4879 = vmatprep.subr.bf16.mxu0 %v5034_v49 }
 0x27a   : > { %v2724_v57 = vrot.slane %v2723_v40, 2  ;;  %v2712_v25 = vadd.f32 %v2711_v22, %v2710_v50  ;;  %v2687_v6 = vrot.slane %v2686_v61, 1 }
 0x27b   : > { %4858 = vmatpush3.bf16.msra.mxu1 %v5035_v53  ;;  %v2699_v27 = vadd.f32 %v2698_v23, %v2697_v0 }
 0x27c   : > { %4880 = vmatpush3.bf16.msra.mxu0 %v5036_v58  ;;  %4859 = vmatprep.subr.bf16.mxu1 %v5037_v33  ;;  %v2725_v39 = vadd.f32 %v2724_v57, %v2723_v40  ;;  %v2713_v36 = vrot.slane %v2712_v25, 1  ;;  %v2688_v14 = vadd.f32 %v2687_v6, %v2686_v61 }
 0x27d   : > { %4881 = vmatprep.subr.bf16.mxu0 %v5038_v56  ;;  %v2700_v1 = vrot.slane %v2699_v27, 1 }
 0x27e   : > { %v2726_v3 = vrot.slane %v2725_v39, 1  ;;  %v2714_v37 = vadd.f32 %v2713_v36, %v2712_v25  ;;  %v2740_v54 = vmul.f32 0.015625, %v2688_v14 }
 0x27f   : > { %4860 = vmatpush3.bf16.msra.mxu1 %v5039_v62  ;;  %v2701_v5 = vadd.f32 %v2700_v1, %v2699_v27 }
 0x280   : > { %4882 = vmatpush3.bf16.msra.mxu0 %v5040_v24  ;;  %4861 = vmatprep.subr.bf16.mxu1 %v5041_v41  ;;  %v2727_v59 = vadd.f32 %v2726_v3, %v2725_v39  ;;  %v2742_v9 = vmul.f32 0.015625, %v2714_v37  ;;  %v2756_v16 = vpack.c.bf16 %v2740_v54, %v2740_v54 }
 0x281   : > { %4883 = vmatprep.subr.bf16.mxu0 %v5042_v43  ;;  %v2741_v11 = vmul.f32 0.015625, %v2701_v5 }
 0x282   : > { %v2743_v48 = vmul.f32 0.015625, %v2727_v59  ;;  %v2758_v21 = vpack.c.bf16 %v2742_v9, %v2742_v9 }
 0x283   : > { %4862 = vmatpush3.bf16.msra.mxu1 %v5043_v4  ;;  %v2757_v42 = vpack.c.bf16 %v2741_v11, %v2741_v11 }
 0x284   : > { %4884 = vmatpush3.bf16.msra.mxu0 %v5044_v8  ;;  %4863 = vmatprep.subr.bf16.mxu1 %v5045_v10  ;;  %v2759_v44 = vpack.c.bf16 %v2743_v48, %v2743_v48 }
 0x285   : > { %4885 = vmatprep.subr.bf16.mxu0 %v5046_v35  ;;  %4057 = vmatprep.mubr.bf16.mxu1 %v2757_v42 }
 0x286   : > { %4097 = vmatprep.mubr.bf16.mxu0 %v2759_v44 }
 0x287   : > { %4864 = vmatpush3.bf16.msra.mxu1 %v5047_v51 }
 0x288   : > { %4886 = vmatpush3.bf16.msra.mxu0 %v5048_v7  ;;  %4865 = vmatprep.subr.bf16.mxu1 %v5049_v13 }
 0x289   : > { %4887 = vmatprep.subr.bf16.mxu0 %v5050_v46 }
 0x28b   : > { %4866 = vmatpush3.bf16.msra.mxu1 %v5051_v17 }
 0x28c   : > { %4888 = vmatpush3.bf16.msra.mxu0 %v5052_v63 }
 0x28e   : > { %4058 = vmatmul.mubr.bf16.vlgmr.msra.gmra.mrb[76].mxu1 %v2756_v16 }
 0x28f   : > { %4098 = vmatmul.mubr.bf16.vlgmr.msra.gmra.mrb[92].mxu0 %v2758_v21 }
 0x301   : > { %v4735_v60 = vpop.f32.mrb[64].mxu1  ;;  %v4757_v18 = vpop.f32.mrb[80].mxu0 }
 0x302   : > { %v4736_v12 = vpop.f32.mrb[65].mxu1  ;;  %v4758_v2 = vpop.f32.mrb[81].mxu0 }
 0x303   : > { %v4737_v29 = vadd.f32 %v4736_v12, %v4735_v60  ;;  %v4759_v26 = vadd.f32 %v4758_v2, %v4757_v18  ;;  %v4738_v30 = vpop.f32.mrb[66].mxu1  ;;  %v4760_v20 = vpop.f32.mrb[82].mxu0 }
 0x304   : > { %v4739_v15 = vpop.f32.mrb[67].mxu1  ;;  %v4761_v31 = vpop.f32.mrb[83].mxu0 }
 0x305   : > { %v3820_v19 = vadd.f32 %v4737_v29, %v3016_v28 }
 0x307   : > { %v3860_v32 = vadd.f32 %v4759_v26, %v3820_v19 }
 0x321   : > { %v4779_v34 = vpop.f32.mrb[68].mxu1 }
 0x322   : > { %v4801_v38 = vpop.f32.mrb[84].mxu0  ;;  %v4780_v45 = vpop.f32.mrb[69].mxu1 }
 0x323   : > { %v4781_v47 = vadd.f32 %v4780_v45, %v4779_v34  ;;  %v4802_v49 = vpop.f32.mrb[85].mxu0  ;;  %v4782_v50 = vpop.f32.mrb[70].mxu1 }
 0x324   : > { %v4803_v52 = vadd.f32 %v4802_v49, %v4801_v38  ;;  %v4804_v0 = vpop.f32.mrb[86].mxu0  ;;  %v4783_v53 = vpop.f32.mrb[71].mxu1 }
 0x325   : > { %v3900_v55 = vadd.f32 %v4781_v47, %v3860_v32  ;;  %v4805_v40 = vpop.f32.mrb[87].mxu0 }
 0x327   : > { %v3940_v58 = vadd.f32 %v4803_v52, %v3900_v55 }
 0x341   : > { %v4823_v33 = vpop.f32.mrb[72].mxu1 }
 0x342   : > { %v4845_v22 = vpop.f32.mrb[88].mxu0  ;;  %v4824_v23 = vpop.f32.mrb[73].mxu1 }
 0x343   : > { %v4825_v56 = vadd.f32 %v4824_v23, %v4823_v33  ;;  %v4846_v57 = vpop.f32.mrb[89].mxu0  ;;  %v4826_v62 = vpop.f32.mrb[74].mxu1 }
 0x344   : > { %v4847_v27 = vadd.f32 %v4846_v57, %v4845_v22  ;;  %v4848_v61 = vpop.f32.mrb[90].mxu0  ;;  %v4827_v24 = vpop.f32.mrb[75].mxu1 }
 0x345   : > { %v3980_v41 = vadd.f32 %v4825_v56, %v3940_v58  ;;  %v4849_v39 = vpop.f32.mrb[91].mxu0 }
 0x347   : > { %v4020_v25 = vadd.f32 %v4847_v27, %v3980_v41 }
 0x361   : > { %v4867_v43 = vpop.f32.mrb[76].mxu1 }
 0x362   : > { %v4889_v1 = vpop.f32.mrb[92].mxu0  ;;  %v4868_v3 = vpop.f32.mrb[77].mxu1 }
 0x363   : > { %v4869_v4 = vadd.f32 %v4868_v3, %v4867_v43  ;;  %v4890_v5 = vpop.f32.mrb[93].mxu0  ;;  %v4870_v6 = vpop.f32.mrb[78].mxu1 }
 0x364   : > { %v4891_v8 = vadd.f32 %v4890_v5, %v4889_v1  ;;  %v4892_v10 = vpop.f32.mrb[94].mxu0  ;;  %v4871_v59 = vpop.f32.mrb[79].mxu1 }
 0x365   : > { %v4060_v36 = vadd.f32 %v4869_v4, %v4020_v25  ;;  %v4893_v35 = vpop.f32.mrb[95].mxu0 }
 0x367   : > { %v4100_v11 = vadd.f32 %v4891_v8, %v4060_v36 }
 0x369   : > { %4105 = vst [vmem:[%s328_s24] sm:$0x1] %v4100_v11 }
 0x36a PF: > { %s19_s30 = sadd.s32 1, %s5063_s30  }
 0x36b   : > { %p16_p4 = scmp.ge.s32.totalorder %s19_s30, 4  }
 0x36d   :  { %18 = sbr.rel (!%p16_p4) target bundleno = 1 (0x1), region = 102 }

</bundles_post_ra>
